<compile_context>
chip_gen: v5e
topology: v5e:2x2
jax: 0.10.0
libtpu: 0.0.40
codegen_flags: <defaults>
</compile_context>

<pallas_src>
import functools
import math

import jax
import jax.numpy as jnp
from jax.experimental import pallas as pl
from jax.experimental.pallas import tpu as pltpu

TOPK = 32  # memory_querying_responding hard-codes scores.topk(32)


def mtm_kernel(q_ref, k_ref, v_ref,
               wq_ref, bq_ref, wk_ref, bk_ref, wv_ref, bv_ref,
               wo_ref, bo_ref, o_ref, *, head):
    bt, tq, dm = q_ref.shape
    _, tk, _ = k_ref.shape
    h = head
    dk = dm // h
    scale = 1.0 / math.sqrt(dk)
    f32 = jnp.float32

    # ---- Dense QKV projections: batch folded into M, full-width N = d_model.
    q2 = q_ref[...].reshape(bt * tq, dm).astype(f32)
    k2 = k_ref[...].reshape(bt * tk, dm).astype(f32)
    v2 = v_ref[...].reshape(bt * tk, dm).astype(f32)

    qp = jnp.dot(q2, wq_ref[...].astype(f32), preferred_element_type=f32) \
        + bq_ref[...].astype(f32)                                  # (bt*Tq, DM)
    kp = jnp.dot(k2, wk_ref[...].astype(f32), preferred_element_type=f32) \
        + bk_ref[...].astype(f32)                                  # (bt*Tk, DM)
    vp = jnp.dot(v2, wv_ref[...].astype(f32), preferred_element_type=f32) \
        + bv_ref[...].astype(f32)                                  # (bt*Tk, DM)

    # ---- Per-(batch, head) attention scores, assembled block-wide. ----------
    dn_qkT = (((1,), (1,)), ((), ()))          # contract last dims: q @ k^T
    parts = []
    for ib in range(bt):                       # bt, h are small static counts
        for ih in range(h):
            qs = qp[ib * tq:(ib + 1) * tq, ih * dk:(ih + 1) * dk]   # (Tq, dk)
            ks = kp[ib * tk:(ib + 1) * tk, ih * dk:(ih + 1) * dk]   # (Tk, dk)
            parts.append(jax.lax.dot_general(qs, ks, dn_qkT,
                                             preferred_element_type=f32))
    scores = jnp.concatenate(parts, axis=0) * scale                 # (bt*h*Tq, Tk)

    # ---- 32nd-largest score per row: single unrolled block-wide peel loop. --
    neg = jnp.float32(-jnp.inf)
    m0 = jnp.max(scores, axis=-1, keepdims=True)   # global row max (reused below)

    def peel(_, carry):
        work, _ = carry
        cur = jnp.max(work, axis=-1, keepdims=True)
        return jnp.where(work == cur, neg, work), cur

    _, thresh = jax.lax.fori_loop(
        0, TOPK - 1, peel,
        (jnp.where(scores == m0, neg, scores), m0),
        unroll=True)
    # thresh == 32nd-largest per row (ties peel together, as documented).

    # ---- Softmax restricted to the top-TOPK scores (reuse m0 as the max). ---
    keep = scores >= thresh
    ex = jnp.where(keep, jnp.exp(scores - m0), 0.0)
    p = ex * pl.reciprocal(jnp.sum(ex, axis=-1, keepdims=True), approx=True)

    # ---- PV, head concat folded into ONE K=d_model output projection. -------
    ctx_rows = []
    for ib in range(bt):
        cols = []
        for ih in range(h):
            r0 = (ib * h + ih) * tq
            ps = p[r0:r0 + tq, :]                                   # (Tq, Tk)
            vs = vp[ib * tk:(ib + 1) * tk, ih * dk:(ih + 1) * dk]   # (Tk, dk)
            cols.append(jnp.dot(ps, vs, preferred_element_type=f32))
        ctx_rows.append(jnp.concatenate(cols, axis=-1))             # (Tq, DM)
    ctx = jnp.concatenate(ctx_rows, axis=0)                         # (bt*Tq, DM)

    out = jnp.dot(ctx, wo_ref[...].astype(f32),
                  preferred_element_type=f32) + bo_ref[...].astype(f32)
    o_ref[...] = out.reshape(bt, tq, dm).astype(o_ref.dtype)


@functools.partial(jax.jit, static_argnames=("head", "batch_block"))
def multi_thread_memory(query, key, value,
                        wq, bq, wk, bk, wv, bv, wo, bo,
                        *, head=8, batch_block=1):
    B, Tq, DM = query.shape
    _, Tk, _ = key.shape
    assert DM % head == 0
    assert Tk >= TOPK, "memory length must be >= 32 (torch .topk(32))"
    assert B % batch_block == 0

    # torch nn.Linear stores W as (out, in): y = x @ W.T + b.  Pass (in, out)
    # layouts so the kernel does plain dense matmuls.
    wq_t, wk_t, wv_t, wo_t = wq.T, wk.T, wv.T, wo.T
    bq_2d = bq.reshape(1, DM)
    bk_2d = bk.reshape(1, DM)
    bv_2d = bv.reshape(1, DM)
    bo_2d = bo.reshape(1, DM)

    def data_spec(t):
        return pl.BlockSpec((batch_block, t, DM), lambda b: (b, 0, 0))

    w_spec = pl.BlockSpec((DM, DM), lambda b: (0, 0))   # constant index: no re-DMA
    b_spec = pl.BlockSpec((1, DM), lambda b: (0, 0))

    grid_spec = pltpu.PrefetchScalarGridSpec(
        num_scalar_prefetch=0,
        grid=(B // batch_block,),
        in_specs=[
            data_spec(Tq),            # query
            data_spec(Tk),            # key
            data_spec(Tk),            # value
            w_spec, b_spec,           # Wq^T, bq
            w_spec, b_spec,           # Wk^T, bk
            w_spec, b_spec,           # Wv^T, bv
            w_spec, b_spec,           # Wo^T, bo
        ],
        out_specs=pl.BlockSpec((batch_block, Tq, DM), lambda b: (b, 0, 0)),
    )

    return pl.pallas_call(
        functools.partial(mtm_kernel, head=head),
        out_shape=jax.ShapeDtypeStruct((B, Tq, DM), query.dtype),
        grid_spec=grid_spec,
        compiler_params=pltpu.CompilerParams(
            dimension_semantics=("parallel",),
            # actual footprint ~9 MiB (weights double-buffered); well under the
            # v7x 64 MiB physical ceiling.
            vmem_limit_bytes=32 << 20,
        ),
    )(query, key, value, wq_t, bq_2d, wk_t, bk_2d, wv_t, bv_2d, wo_t, bo_2d)


def reference(query, key, value, wq, bq, wk, bk, wv, bv, wo, bo,
              *, head=8, topk=TOPK):
    """Pure-JAX reference mirroring the PyTorch forward (eval, no mask/past)."""
    B, Tq, DM = query.shape
    _, Tk, _ = key.shape
    dk = DM // head
    qp = query @ wq.T + bq
    kp = key @ wk.T + bk
    vp = value @ wv.T + bv
    split = lambda x: x.reshape(B, -1, head, dk).transpose(0, 2, 1, 3)
    qh, kh, vh = split(qp), split(kp), split(vp)
    scores = jnp.einsum('bhqd,bhkd->bhqk', qh, kh) / math.sqrt(dk)
    sel_scores, idx = jax.lax.top_k(scores, topk)                    # (B,H,Tq,topk)
    v_exp = jnp.broadcast_to(vh[:, :, None, :, :], (B, head, Tq, Tk, dk))
    idx_exp = jnp.broadcast_to(idx[..., None], (B, head, Tq, topk, dk))
    sel_v = jnp.take_along_axis(v_exp, idx_exp, axis=3)              # (B,H,Tq,topk,dk)
    p = jax.nn.softmax(sel_scores, axis=-1)
    ctx = jnp.einsum('bhqk,bhqkd->bhqd', p, sel_v)
    x = ctx.transpose(0, 2, 1, 3).reshape(B, Tq, DM)
    return x @ wo.T + bo


if __name__ == "__main__":
    # Small shapes consistent with the module: d_model=512, 8 heads, memory>=32.
    B, Tq, Tk = 2, 16, 64
    d_model, head = 512, 8

    key0 = jax.random.PRNGKey(0)
    ks = jax.random.split(key0, 11)
    query = jax.random.normal(ks[0], (B, Tq, d_model), jnp.float32)
    key_in = jax.random.normal(ks[1], (B, Tk, d_model), jnp.float32)
    value_in = jax.random.normal(ks[2], (B, Tk, d_model), jnp.float32)

    def mkw(k):
        return 0.02 * jax.random.normal(k, (d_model, d_model), jnp.float32)

    def mkb(k):
        return 0.02 * jax.random.normal(k, (d_model,), jnp.float32)

    wq, bq = mkw(ks[3]), mkb(ks[4])
    wk, bk = mkw(ks[5]), mkb(ks[6])
    wv, bv = mkw(ks[7]), mkb(ks[8])
    wo, bo = mkw(ks[9]), mkb(ks[10])

    # TODO(synk): dropout on p_attn and the mask / layer_past (KV-cache) branches
    # are the training / incremental-decoding paths; only the eval forward is
    # implemented here.
    out = multi_thread_memory(query, key_in, value_in,
                              wq, bq, wk, bk, wv, bv, wo, bo,
                              head=head, batch_block=1)
    out = jax.block_until_ready(out)

    ref = jax.block_until_ready(
        reference(query, key_in, value_in, wq, bq, wk, bk, wv, bv, wo, bo,
                  head=head))

    assert out.shape == (B, Tq, d_model), out.shape
    max_err = float(jnp.max(jnp.abs(out - ref)))
    assert jnp.allclose(out, ref, rtol=2e-3, atol=2e-3), max_err

    print("KERNEL_OK")
</pallas_src>

<mosaic_0001>
module attributes {stable_mosaic.version = 11 : i64} {
  func.func @mtm_kernel(%arg0: i32, %arg1: memref<1x16x512xf32, #tpu.memory_space<vmem>>, %arg2: memref<1x64x512xf32, #tpu.memory_space<vmem>>, %arg3: memref<1x64x512xf32, #tpu.memory_space<vmem>>, %arg4: memref<512x512xf32, #tpu.memory_space<vmem>>, %arg5: memref<1x512xf32, #tpu.memory_space<vmem>>, %arg6: memref<512x512xf32, #tpu.memory_space<vmem>>, %arg7: memref<1x512xf32, #tpu.memory_space<vmem>>, %arg8: memref<512x512xf32, #tpu.memory_space<vmem>>, %arg9: memref<1x512xf32, #tpu.memory_space<vmem>>, %arg10: memref<512x512xf32, #tpu.memory_space<vmem>>, %arg11: memref<1x512xf32, #tpu.memory_space<vmem>>, %arg12: memref<1x16x512xf32, #tpu.memory_space<vmem>>) attributes {dimension_semantics = [#tpu.dimension_semantics<parallel>], iteration_bounds = array<i64: 2>, scalar_prefetch = 0 : i64, scratch_operands = 0 : i64, tpu.core_type = #tpu.core_type<tc>, window_params = [{transform_indices = @transform_0, window_bounds = array<i64: 1, 16, 512>}, {transform_indices = @transform_1, window_bounds = array<i64: 1, 64, 512>}, {transform_indices = @transform_2, window_bounds = array<i64: 1, 64, 512>}, {pipeline_mode = #tpu.pipeline_mode<synchronous>, transform_indices = @transform_3, window_bounds = array<i64: 512, 512>}, {pipeline_mode = #tpu.pipeline_mode<synchronous>, transform_indices = @transform_4, window_bounds = array<i64: 1, 512>}, {pipeline_mode = #tpu.pipeline_mode<synchronous>, transform_indices = @transform_5, window_bounds = array<i64: 512, 512>}, {pipeline_mode = #tpu.pipeline_mode<synchronous>, transform_indices = @transform_6, window_bounds = array<i64: 1, 512>}, {pipeline_mode = #tpu.pipeline_mode<synchronous>, transform_indices = @transform_7, window_bounds = array<i64: 512, 512>}, {pipeline_mode = #tpu.pipeline_mode<synchronous>, transform_indices = @transform_8, window_bounds = array<i64: 1, 512>}, {pipeline_mode = #tpu.pipeline_mode<synchronous>, transform_indices = @transform_9, window_bounds = array<i64: 512, 512>}, {pipeline_mode = #tpu.pipeline_mode<synchronous>, transform_indices = @transform_10, window_bounds = array<i64: 1, 512>}, {transform_indices = @transform_11, window_bounds = array<i64: 1, 16, 512>}]} {
    %c0 = arith.constant 0 : index
    %c0_0 = arith.constant 0 : index
    %c0_1 = arith.constant 0 : index
    %0 = vector.load %arg1[%c0, %c0_0, %c0_1] : memref<1x16x512xf32, #tpu.memory_space<vmem>>, vector<1x16x512xf32>
    %1 = vector.shape_cast %0 : vector<1x16x512xf32> to vector<16x512xf32>
    %c0_2 = arith.constant 0 : index
    %c0_3 = arith.constant 0 : index
    %c0_4 = arith.constant 0 : index
    %2 = vector.load %arg2[%c0_2, %c0_3, %c0_4] : memref<1x64x512xf32, #tpu.memory_space<vmem>>, vector<1x64x512xf32>
    %3 = vector.shape_cast %2 : vector<1x64x512xf32> to vector<64x512xf32>
    %c0_5 = arith.constant 0 : index
    %c0_6 = arith.constant 0 : index
    %c0_7 = arith.constant 0 : index
    %4 = vector.load %arg3[%c0_5, %c0_6, %c0_7] : memref<1x64x512xf32, #tpu.memory_space<vmem>>, vector<1x64x512xf32>
    %5 = vector.shape_cast %4 : vector<1x64x512xf32> to vector<64x512xf32>
    %c0_8 = arith.constant 0 : index
    %c0_9 = arith.constant 0 : index
    %6 = vector.load %arg4[%c0_8, %c0_9] : memref<512x512xf32, #tpu.memory_space<vmem>>, vector<512x512xf32>
    %cst = arith.constant dense<0.000000e+00> : vector<16x512xf32>
    %7 = tpu.matmul %1, %6, %cst {dimension_numbers = #tpu.dot_dimension_numbers<[1], [0], [0], [1], [0, 0, 1, 1], [], []>} : vector<16x512xf32>, vector<512x512xf32>, vector<16x512xf32> -> vector<16x512xf32>
    %c0_10 = arith.constant 0 : index
    %c0_11 = arith.constant 0 : index
    %8 = vector.load %arg5[%c0_10, %c0_11] : memref<1x512xf32, #tpu.memory_space<vmem>>, vector<1x512xf32>
    %9 = vector.broadcast %8 : vector<1x512xf32> to vector<16x512xf32>
    %10 = arith.addf %7, %9 : vector<16x512xf32>
    %c0_12 = arith.constant 0 : index
    %c0_13 = arith.constant 0 : index
    %11 = vector.load %arg6[%c0_12, %c0_13] : memref<512x512xf32, #tpu.memory_space<vmem>>, vector<512x512xf32>
    %cst_14 = arith.constant dense<0.000000e+00> : vector<64x512xf32>
    %12 = tpu.matmul %3, %11, %cst_14 {dimension_numbers = #tpu.dot_dimension_numbers<[1], [0], [0], [1], [0, 0, 1, 1], [], []>} : vector<64x512xf32>, vector<512x512xf32>, vector<64x512xf32> -> vector<64x512xf32>
    %c0_15 = arith.constant 0 : index
    %c0_16 = arith.constant 0 : index
    %13 = vector.load %arg7[%c0_15, %c0_16] : memref<1x512xf32, #tpu.memory_space<vmem>>, vector<1x512xf32>
    %14 = vector.broadcast %13 : vector<1x512xf32> to vector<64x512xf32>
    %15 = arith.addf %12, %14 : vector<64x512xf32>
    %c0_17 = arith.constant 0 : index
    %c0_18 = arith.constant 0 : index
    %16 = vector.load %arg8[%c0_17, %c0_18] : memref<512x512xf32, #tpu.memory_space<vmem>>, vector<512x512xf32>
    %cst_19 = arith.constant dense<0.000000e+00> : vector<64x512xf32>
    %17 = tpu.matmul %5, %16, %cst_19 {dimension_numbers = #tpu.dot_dimension_numbers<[1], [0], [0], [1], [0, 0, 1, 1], [], []>} : vector<64x512xf32>, vector<512x512xf32>, vector<64x512xf32> -> vector<64x512xf32>
    %c0_20 = arith.constant 0 : index
    %c0_21 = arith.constant 0 : index
    %18 = vector.load %arg9[%c0_20, %c0_21] : memref<1x512xf32, #tpu.memory_space<vmem>>, vector<1x512xf32>
    %19 = vector.broadcast %18 : vector<1x512xf32> to vector<64x512xf32>
    %20 = arith.addf %17, %19 : vector<64x512xf32>
    %21 = vector.extract_strided_slice %10 {offsets = [0, 0], sizes = [16, 64], strides = [1, 1]} : vector<16x512xf32> to vector<16x64xf32>
    %22 = vector.extract_strided_slice %15 {offsets = [0, 0], sizes = [64, 64], strides = [1, 1]} : vector<64x512xf32> to vector<64x64xf32>
    %cst_22 = arith.constant dense<0.000000e+00> : vector<16x64xf32>
    %23 = tpu.matmul %21, %22, %cst_22 {dimension_numbers = #tpu.dot_dimension_numbers<[1], [1], [0], [0], [0, 0, 1, 0], [], []>} : vector<16x64xf32>, vector<64x64xf32>, vector<16x64xf32> -> vector<16x64xf32>
    %24 = vector.extract_strided_slice %10 {offsets = [0, 64], sizes = [16, 64], strides = [1, 1]} : vector<16x512xf32> to vector<16x64xf32>
    %25 = vector.extract_strided_slice %15 {offsets = [0, 64], sizes = [64, 64], strides = [1, 1]} : vector<64x512xf32> to vector<64x64xf32>
    %cst_23 = arith.constant dense<0.000000e+00> : vector<16x64xf32>
    %26 = tpu.matmul %24, %25, %cst_23 {dimension_numbers = #tpu.dot_dimension_numbers<[1], [1], [0], [0], [0, 0, 1, 0], [], []>} : vector<16x64xf32>, vector<64x64xf32>, vector<16x64xf32> -> vector<16x64xf32>
    %27 = vector.extract_strided_slice %10 {offsets = [0, 128], sizes = [16, 64], strides = [1, 1]} : vector<16x512xf32> to vector<16x64xf32>
    %28 = vector.extract_strided_slice %15 {offsets = [0, 128], sizes = [64, 64], strides = [1, 1]} : vector<64x512xf32> to vector<64x64xf32>
    %cst_24 = arith.constant dense<0.000000e+00> : vector<16x64xf32>
    %29 = tpu.matmul %27, %28, %cst_24 {dimension_numbers = #tpu.dot_dimension_numbers<[1], [1], [0], [0], [0, 0, 1, 0], [], []>} : vector<16x64xf32>, vector<64x64xf32>, vector<16x64xf32> -> vector<16x64xf32>
    %30 = vector.extract_strided_slice %10 {offsets = [0, 192], sizes = [16, 64], strides = [1, 1]} : vector<16x512xf32> to vector<16x64xf32>
    %31 = vector.extract_strided_slice %15 {offsets = [0, 192], sizes = [64, 64], strides = [1, 1]} : vector<64x512xf32> to vector<64x64xf32>
    %cst_25 = arith.constant dense<0.000000e+00> : vector<16x64xf32>
    %32 = tpu.matmul %30, %31, %cst_25 {dimension_numbers = #tpu.dot_dimension_numbers<[1], [1], [0], [0], [0, 0, 1, 0], [], []>} : vector<16x64xf32>, vector<64x64xf32>, vector<16x64xf32> -> vector<16x64xf32>
    %33 = vector.extract_strided_slice %10 {offsets = [0, 256], sizes = [16, 64], strides = [1, 1]} : vector<16x512xf32> to vector<16x64xf32>
    %34 = vector.extract_strided_slice %15 {offsets = [0, 256], sizes = [64, 64], strides = [1, 1]} : vector<64x512xf32> to vector<64x64xf32>
    %cst_26 = arith.constant dense<0.000000e+00> : vector<16x64xf32>
    %35 = tpu.matmul %33, %34, %cst_26 {dimension_numbers = #tpu.dot_dimension_numbers<[1], [1], [0], [0], [0, 0, 1, 0], [], []>} : vector<16x64xf32>, vector<64x64xf32>, vector<16x64xf32> -> vector<16x64xf32>
    %36 = vector.extract_strided_slice %10 {offsets = [0, 320], sizes = [16, 64], strides = [1, 1]} : vector<16x512xf32> to vector<16x64xf32>
    %37 = vector.extract_strided_slice %15 {offsets = [0, 320], sizes = [64, 64], strides = [1, 1]} : vector<64x512xf32> to vector<64x64xf32>
    %cst_27 = arith.constant dense<0.000000e+00> : vector<16x64xf32>
    %38 = tpu.matmul %36, %37, %cst_27 {dimension_numbers = #tpu.dot_dimension_numbers<[1], [1], [0], [0], [0, 0, 1, 0], [], []>} : vector<16x64xf32>, vector<64x64xf32>, vector<16x64xf32> -> vector<16x64xf32>
    %39 = vector.extract_strided_slice %10 {offsets = [0, 384], sizes = [16, 64], strides = [1, 1]} : vector<16x512xf32> to vector<16x64xf32>
    %40 = vector.extract_strided_slice %15 {offsets = [0, 384], sizes = [64, 64], strides = [1, 1]} : vector<64x512xf32> to vector<64x64xf32>
    %cst_28 = arith.constant dense<0.000000e+00> : vector<16x64xf32>
    %41 = tpu.matmul %39, %40, %cst_28 {dimension_numbers = #tpu.dot_dimension_numbers<[1], [1], [0], [0], [0, 0, 1, 0], [], []>} : vector<16x64xf32>, vector<64x64xf32>, vector<16x64xf32> -> vector<16x64xf32>
    %42 = vector.extract_strided_slice %10 {offsets = [0, 448], sizes = [16, 64], strides = [1, 1]} : vector<16x512xf32> to vector<16x64xf32>
    %43 = vector.extract_strided_slice %15 {offsets = [0, 448], sizes = [64, 64], strides = [1, 1]} : vector<64x512xf32> to vector<64x64xf32>
    %cst_29 = arith.constant dense<0.000000e+00> : vector<16x64xf32>
    %44 = tpu.matmul %42, %43, %cst_29 {dimension_numbers = #tpu.dot_dimension_numbers<[1], [1], [0], [0], [0, 0, 1, 0], [], []>} : vector<16x64xf32>, vector<64x64xf32>, vector<16x64xf32> -> vector<16x64xf32>
    %45 = tpu.concatenate %23, %26, %29, %32, %35, %38, %41, %44 in 0 : vector<16x64xf32>, vector<16x64xf32>, vector<16x64xf32>, vector<16x64xf32>, vector<16x64xf32>, vector<16x64xf32>, vector<16x64xf32>, vector<16x64xf32> -> vector<128x64xf32>
    %cst_30 = arith.constant 1.250000e-01 : f32
    %46 = vector.broadcast %cst_30 : f32 to vector<128x64xf32>
    %47 = arith.mulf %45, %46 : vector<128x64xf32>
    %cst_31 = arith.constant dense<0xFF800000> : vector<128xf32>
    %48 = vector.multi_reduction <maximumf>, %47, %cst_31 [1] : vector<128x64xf32> to vector<128xf32>
    %49 = vector.shape_cast %48 : vector<128xf32> to vector<128x1xf32>
    %50 = vector.broadcast %49 : vector<128x1xf32> to vector<128x64xf32>
    %51 = arith.cmpf oeq, %47, %50 : vector<128x64xf32>
    %cst_32 = arith.constant 0xFF800000 : f32
    %52 = vector.broadcast %cst_32 : f32 to vector<128x64xf32>
    %53 = arith.select %51, %52, %47 : vector<128x64xi1>, vector<128x64xf32>
    %cst_33 = arith.constant 0xFF800000 : f32
    %c0_i32 = arith.constant 0 : i32
    %cst_34 = arith.constant dense<0xFF800000> : vector<128xf32>
    %54 = vector.multi_reduction <maximumf>, %53, %cst_34 [1] : vector<128x64xf32> to vector<128xf32>
    %55 = vector.shape_cast %54 : vector<128xf32> to vector<128x1xf32>
    %56 = vector.broadcast %55 : vector<128x1xf32> to vector<128x64xf32>
    %57 = arith.cmpf oeq, %53, %56 : vector<128x64xf32>
    %58 = vector.broadcast %cst_33 : f32 to vector<128x64xf32>
    %59 = arith.select %57, %58, %53 : vector<128x64xi1>, vector<128x64xf32>
    %c1_i32 = arith.constant 1 : i32
    %cst_35 = arith.constant dense<0xFF800000> : vector<128xf32>
    %60 = vector.multi_reduction <maximumf>, %59, %cst_35 [1] : vector<128x64xf32> to vector<128xf32>
    %61 = vector.shape_cast %60 : vector<128xf32> to vector<128x1xf32>
    %62 = vector.broadcast %61 : vector<128x1xf32> to vector<128x64xf32>
    %63 = arith.cmpf oeq, %59, %62 : vector<128x64xf32>
    %64 = vector.broadcast %cst_33 : f32 to vector<128x64xf32>
    %65 = arith.select %63, %64, %59 : vector<128x64xi1>, vector<128x64xf32>
    %c2_i32 = arith.constant 2 : i32
    %cst_36 = arith.constant dense<0xFF800000> : vector<128xf32>
    %66 = vector.multi_reduction <maximumf>, %65, %cst_36 [1] : vector<128x64xf32> to vector<128xf32>
    %67 = vector.shape_cast %66 : vector<128xf32> to vector<128x1xf32>
    %68 = vector.broadcast %67 : vector<128x1xf32> to vector<128x64xf32>
    %69 = arith.cmpf oeq, %65, %68 : vector<128x64xf32>
    %70 = vector.broadcast %cst_33 : f32 to vector<128x64xf32>
    %71 = arith.select %69, %70, %65 : vector<128x64xi1>, vector<128x64xf32>
    %c3_i32 = arith.constant 3 : i32
    %cst_37 = arith.constant dense<0xFF800000> : vector<128xf32>
    %72 = vector.multi_reduction <maximumf>, %71, %cst_37 [1] : vector<128x64xf32> to vector<128xf32>
    %73 = vector.shape_cast %72 : vector<128xf32> to vector<128x1xf32>
    %74 = vector.broadcast %73 : vector<128x1xf32> to vector<128x64xf32>
    %75 = arith.cmpf oeq, %71, %74 : vector<128x64xf32>
    %76 = vector.broadcast %cst_33 : f32 to vector<128x64xf32>
    %77 = arith.select %75, %76, %71 : vector<128x64xi1>, vector<128x64xf32>
    %c4_i32 = arith.constant 4 : i32
    %cst_38 = arith.constant dense<0xFF800000> : vector<128xf32>
    %78 = vector.multi_reduction <maximumf>, %77, %cst_38 [1] : vector<128x64xf32> to vector<128xf32>
    %79 = vector.shape_cast %78 : vector<128xf32> to vector<128x1xf32>
    %80 = vector.broadcast %79 : vector<128x1xf32> to vector<128x64xf32>
    %81 = arith.cmpf oeq, %77, %80 : vector<128x64xf32>
    %82 = vector.broadcast %cst_33 : f32 to vector<128x64xf32>
    %83 = arith.select %81, %82, %77 : vector<128x64xi1>, vector<128x64xf32>
    %c5_i32 = arith.constant 5 : i32
    %cst_39 = arith.constant dense<0xFF800000> : vector<128xf32>
    %84 = vector.multi_reduction <maximumf>, %83, %cst_39 [1] : vector<128x64xf32> to vector<128xf32>
    %85 = vector.shape_cast %84 : vector<128xf32> to vector<128x1xf32>
    %86 = vector.broadcast %85 : vector<128x1xf32> to vector<128x64xf32>
    %87 = arith.cmpf oeq, %83, %86 : vector<128x64xf32>
    %88 = vector.broadcast %cst_33 : f32 to vector<128x64xf32>
    %89 = arith.select %87, %88, %83 : vector<128x64xi1>, vector<128x64xf32>
    %c6_i32 = arith.constant 6 : i32
    %cst_40 = arith.constant dense<0xFF800000> : vector<128xf32>
    %90 = vector.multi_reduction <maximumf>, %89, %cst_40 [1] : vector<128x64xf32> to vector<128xf32>
    %91 = vector.shape_cast %90 : vector<128xf32> to vector<128x1xf32>
    %92 = vector.broadcast %91 : vector<128x1xf32> to vector<128x64xf32>
    %93 = arith.cmpf oeq, %89, %92 : vector<128x64xf32>
    %94 = vector.broadcast %cst_33 : f32 to vector<128x64xf32>
    %95 = arith.select %93, %94, %89 : vector<128x64xi1>, vector<128x64xf32>
    %c7_i32 = arith.constant 7 : i32
    %cst_41 = arith.constant dense<0xFF800000> : vector<128xf32>
    %96 = vector.multi_reduction <maximumf>, %95, %cst_41 [1] : vector<128x64xf32> to vector<128xf32>
    %97 = vector.shape_cast %96 : vector<128xf32> to vector<128x1xf32>
    %98 = vector.broadcast %97 : vector<128x1xf32> to vector<128x64xf32>
    %99 = arith.cmpf oeq, %95, %98 : vector<128x64xf32>
    %100 = vector.broadcast %cst_33 : f32 to vector<128x64xf32>
    %101 = arith.select %99, %100, %95 : vector<128x64xi1>, vector<128x64xf32>
    %c8_i32 = arith.constant 8 : i32
    %cst_42 = arith.constant dense<0xFF800000> : vector<128xf32>
    %102 = vector.multi_reduction <maximumf>, %101, %cst_42 [1] : vector<128x64xf32> to vector<128xf32>
    %103 = vector.shape_cast %102 : vector<128xf32> to vector<128x1xf32>
    %104 = vector.broadcast %103 : vector<128x1xf32> to vector<128x64xf32>
    %105 = arith.cmpf oeq, %101, %104 : vector<128x64xf32>
    %106 = vector.broadcast %cst_33 : f32 to vector<128x64xf32>
    %107 = arith.select %105, %106, %101 : vector<128x64xi1>, vector<128x64xf32>
    %c9_i32 = arith.constant 9 : i32
    %cst_43 = arith.constant dense<0xFF800000> : vector<128xf32>
    %108 = vector.multi_reduction <maximumf>, %107, %cst_43 [1] : vector<128x64xf32> to vector<128xf32>
    %109 = vector.shape_cast %108 : vector<128xf32> to vector<128x1xf32>
    %110 = vector.broadcast %109 : vector<128x1xf32> to vector<128x64xf32>
    %111 = arith.cmpf oeq, %107, %110 : vector<128x64xf32>
    %112 = vector.broadcast %cst_33 : f32 to vector<128x64xf32>
    %113 = arith.select %111, %112, %107 : vector<128x64xi1>, vector<128x64xf32>
    %c10_i32 = arith.constant 10 : i32
    %cst_44 = arith.constant dense<0xFF800000> : vector<128xf32>
    %114 = vector.multi_reduction <maximumf>, %113, %cst_44 [1] : vector<128x64xf32> to vector<128xf32>
    %115 = vector.shape_cast %114 : vector<128xf32> to vector<128x1xf32>
    %116 = vector.broadcast %115 : vector<128x1xf32> to vector<128x64xf32>
    %117 = arith.cmpf oeq, %113, %116 : vector<128x64xf32>
    %118 = vector.broadcast %cst_33 : f32 to vector<128x64xf32>
    %119 = arith.select %117, %118, %113 : vector<128x64xi1>, vector<128x64xf32>
    %c11_i32 = arith.constant 11 : i32
    %cst_45 = arith.constant dense<0xFF800000> : vector<128xf32>
    %120 = vector.multi_reduction <maximumf>, %119, %cst_45 [1] : vector<128x64xf32> to vector<128xf32>
    %121 = vector.shape_cast %120 : vector<128xf32> to vector<128x1xf32>
    %122 = vector.broadcast %121 : vector<128x1xf32> to vector<128x64xf32>
    %123 = arith.cmpf oeq, %119, %122 : vector<128x64xf32>
    %124 = vector.broadcast %cst_33 : f32 to vector<128x64xf32>
    %125 = arith.select %123, %124, %119 : vector<128x64xi1>, vector<128x64xf32>
    %c12_i32 = arith.constant 12 : i32
    %cst_46 = arith.constant dense<0xFF800000> : vector<128xf32>
    %126 = vector.multi_reduction <maximumf>, %125, %cst_46 [1] : vector<128x64xf32> to vector<128xf32>
    %127 = vector.shape_cast %126 : vector<128xf32> to vector<128x1xf32>
    %128 = vector.broadcast %127 : vector<128x1xf32> to vector<128x64xf32>
    %129 = arith.cmpf oeq, %125, %128 : vector<128x64xf32>
    %130 = vector.broadcast %cst_33 : f32 to vector<128x64xf32>
    %131 = arith.select %129, %130, %125 : vector<128x64xi1>, vector<128x64xf32>
    %c13_i32 = arith.constant 13 : i32
    %cst_47 = arith.constant dense<0xFF800000> : vector<128xf32>
    %132 = vector.multi_reduction <maximumf>, %131, %cst_47 [1] : vector<128x64xf32> to vector<128xf32>
    %133 = vector.shape_cast %132 : vector<128xf32> to vector<128x1xf32>
    %134 = vector.broadcast %133 : vector<128x1xf32> to vector<128x64xf32>
    %135 = arith.cmpf oeq, %131, %134 : vector<128x64xf32>
    %136 = vector.broadcast %cst_33 : f32 to vector<128x64xf32>
    %137 = arith.select %135, %136, %131 : vector<128x64xi1>, vector<128x64xf32>
    %c14_i32 = arith.constant 14 : i32
    %cst_48 = arith.constant dense<0xFF800000> : vector<128xf32>
    %138 = vector.multi_reduction <maximumf>, %137, %cst_48 [1] : vector<128x64xf32> to vector<128xf32>
    %139 = vector.shape_cast %138 : vector<128xf32> to vector<128x1xf32>
    %140 = vector.broadcast %139 : vector<128x1xf32> to vector<128x64xf32>
    %141 = arith.cmpf oeq, %137, %140 : vector<128x64xf32>
    %142 = vector.broadcast %cst_33 : f32 to vector<128x64xf32>
    %143 = arith.select %141, %142, %137 : vector<128x64xi1>, vector<128x64xf32>
    %c15_i32 = arith.constant 15 : i32
    %cst_49 = arith.constant dense<0xFF800000> : vector<128xf32>
    %144 = vector.multi_reduction <maximumf>, %143, %cst_49 [1] : vector<128x64xf32> to vector<128xf32>
    %145 = vector.shape_cast %144 : vector<128xf32> to vector<128x1xf32>
    %146 = vector.broadcast %145 : vector<128x1xf32> to vector<128x64xf32>
    %147 = arith.cmpf oeq, %143, %146 : vector<128x64xf32>
    %148 = vector.broadcast %cst_33 : f32 to vector<128x64xf32>
    %149 = arith.select %147, %148, %143 : vector<128x64xi1>, vector<128x64xf32>
    %c16_i32 = arith.constant 16 : i32
    %cst_50 = arith.constant dense<0xFF800000> : vector<128xf32>
    %150 = vector.multi_reduction <maximumf>, %149, %cst_50 [1] : vector<128x64xf32> to vector<128xf32>
    %151 = vector.shape_cast %150 : vector<128xf32> to vector<128x1xf32>
    %152 = vector.broadcast %151 : vector<128x1xf32> to vector<128x64xf32>
    %153 = arith.cmpf oeq, %149, %152 : vector<128x64xf32>
    %154 = vector.broadcast %cst_33 : f32 to vector<128x64xf32>
    %155 = arith.select %153, %154, %149 : vector<128x64xi1>, vector<128x64xf32>
    %c17_i32 = arith.constant 17 : i32
    %cst_51 = arith.constant dense<0xFF800000> : vector<128xf32>
    %156 = vector.multi_reduction <maximumf>, %155, %cst_51 [1] : vector<128x64xf32> to vector<128xf32>
    %157 = vector.shape_cast %156 : vector<128xf32> to vector<128x1xf32>
    %158 = vector.broadcast %157 : vector<128x1xf32> to vector<128x64xf32>
    %159 = arith.cmpf oeq, %155, %158 : vector<128x64xf32>
    %160 = vector.broadcast %cst_33 : f32 to vector<128x64xf32>
    %161 = arith.select %159, %160, %155 : vector<128x64xi1>, vector<128x64xf32>
    %c18_i32 = arith.constant 18 : i32
    %cst_52 = arith.constant dense<0xFF800000> : vector<128xf32>
    %162 = vector.multi_reduction <maximumf>, %161, %cst_52 [1] : vector<128x64xf32> to vector<128xf32>
    %163 = vector.shape_cast %162 : vector<128xf32> to vector<128x1xf32>
    %164 = vector.broadcast %163 : vector<128x1xf32> to vector<128x64xf32>
    %165 = arith.cmpf oeq, %161, %164 : vector<128x64xf32>
    %166 = vector.broadcast %cst_33 : f32 to vector<128x64xf32>
    %167 = arith.select %165, %166, %161 : vector<128x64xi1>, vector<128x64xf32>
    %c19_i32 = arith.constant 19 : i32
    %cst_53 = arith.constant dense<0xFF800000> : vector<128xf32>
    %168 = vector.multi_reduction <maximumf>, %167, %cst_53 [1] : vector<128x64xf32> to vector<128xf32>
    %169 = vector.shape_cast %168 : vector<128xf32> to vector<128x1xf32>
    %170 = vector.broadcast %169 : vector<128x1xf32> to vector<128x64xf32>
    %171 = arith.cmpf oeq, %167, %170 : vector<128x64xf32>
    %172 = vector.broadcast %cst_33 : f32 to vector<128x64xf32>
    %173 = arith.select %171, %172, %167 : vector<128x64xi1>, vector<128x64xf32>
    %c20_i32 = arith.constant 20 : i32
    %cst_54 = arith.constant dense<0xFF800000> : vector<128xf32>
    %174 = vector.multi_reduction <maximumf>, %173, %cst_54 [1] : vector<128x64xf32> to vector<128xf32>
    %175 = vector.shape_cast %174 : vector<128xf32> to vector<128x1xf32>
    %176 = vector.broadcast %175 : vector<128x1xf32> to vector<128x64xf32>
    %177 = arith.cmpf oeq, %173, %176 : vector<128x64xf32>
    %178 = vector.broadcast %cst_33 : f32 to vector<128x64xf32>
    %179 = arith.select %177, %178, %173 : vector<128x64xi1>, vector<128x64xf32>
    %c21_i32 = arith.constant 21 : i32
    %cst_55 = arith.constant dense<0xFF800000> : vector<128xf32>
    %180 = vector.multi_reduction <maximumf>, %179, %cst_55 [1] : vector<128x64xf32> to vector<128xf32>
    %181 = vector.shape_cast %180 : vector<128xf32> to vector<128x1xf32>
    %182 = vector.broadcast %181 : vector<128x1xf32> to vector<128x64xf32>
    %183 = arith.cmpf oeq, %179, %182 : vector<128x64xf32>
    %184 = vector.broadcast %cst_33 : f32 to vector<128x64xf32>
    %185 = arith.select %183, %184, %179 : vector<128x64xi1>, vector<128x64xf32>
    %c22_i32 = arith.constant 22 : i32
    %cst_56 = arith.constant dense<0xFF800000> : vector<128xf32>
    %186 = vector.multi_reduction <maximumf>, %185, %cst_56 [1] : vector<128x64xf32> to vector<128xf32>
    %187 = vector.shape_cast %186 : vector<128xf32> to vector<128x1xf32>
    %188 = vector.broadcast %187 : vector<128x1xf32> to vector<128x64xf32>
    %189 = arith.cmpf oeq, %185, %188 : vector<128x64xf32>
    %190 = vector.broadcast %cst_33 : f32 to vector<128x64xf32>
    %191 = arith.select %189, %190, %185 : vector<128x64xi1>, vector<128x64xf32>
    %c23_i32 = arith.constant 23 : i32
    %cst_57 = arith.constant dense<0xFF800000> : vector<128xf32>
    %192 = vector.multi_reduction <maximumf>, %191, %cst_57 [1] : vector<128x64xf32> to vector<128xf32>
    %193 = vector.shape_cast %192 : vector<128xf32> to vector<128x1xf32>
    %194 = vector.broadcast %193 : vector<128x1xf32> to vector<128x64xf32>
    %195 = arith.cmpf oeq, %191, %194 : vector<128x64xf32>
    %196 = vector.broadcast %cst_33 : f32 to vector<128x64xf32>
    %197 = arith.select %195, %196, %191 : vector<128x64xi1>, vector<128x64xf32>
    %c24_i32 = arith.constant 24 : i32
    %cst_58 = arith.constant dense<0xFF800000> : vector<128xf32>
    %198 = vector.multi_reduction <maximumf>, %197, %cst_58 [1] : vector<128x64xf32> to vector<128xf32>
    %199 = vector.shape_cast %198 : vector<128xf32> to vector<128x1xf32>
    %200 = vector.broadcast %199 : vector<128x1xf32> to vector<128x64xf32>
    %201 = arith.cmpf oeq, %197, %200 : vector<128x64xf32>
    %202 = vector.broadcast %cst_33 : f32 to vector<128x64xf32>
    %203 = arith.select %201, %202, %197 : vector<128x64xi1>, vector<128x64xf32>
    %c25_i32 = arith.constant 25 : i32
    %cst_59 = arith.constant dense<0xFF800000> : vector<128xf32>
    %204 = vector.multi_reduction <maximumf>, %203, %cst_59 [1] : vector<128x64xf32> to vector<128xf32>
    %205 = vector.shape_cast %204 : vector<128xf32> to vector<128x1xf32>
    %206 = vector.broadcast %205 : vector<128x1xf32> to vector<128x64xf32>
    %207 = arith.cmpf oeq, %203, %206 : vector<128x64xf32>
    %208 = vector.broadcast %cst_33 : f32 to vector<128x64xf32>
    %209 = arith.select %207, %208, %203 : vector<128x64xi1>, vector<128x64xf32>
    %c26_i32 = arith.constant 26 : i32
    %cst_60 = arith.constant dense<0xFF800000> : vector<128xf32>
    %210 = vector.multi_reduction <maximumf>, %209, %cst_60 [1] : vector<128x64xf32> to vector<128xf32>
    %211 = vector.shape_cast %210 : vector<128xf32> to vector<128x1xf32>
    %212 = vector.broadcast %211 : vector<128x1xf32> to vector<128x64xf32>
    %213 = arith.cmpf oeq, %209, %212 : vector<128x64xf32>
    %214 = vector.broadcast %cst_33 : f32 to vector<128x64xf32>
    %215 = arith.select %213, %214, %209 : vector<128x64xi1>, vector<128x64xf32>
    %c27_i32 = arith.constant 27 : i32
    %cst_61 = arith.constant dense<0xFF800000> : vector<128xf32>
    %216 = vector.multi_reduction <maximumf>, %215, %cst_61 [1] : vector<128x64xf32> to vector<128xf32>
    %217 = vector.shape_cast %216 : vector<128xf32> to vector<128x1xf32>
    %218 = vector.broadcast %217 : vector<128x1xf32> to vector<128x64xf32>
    %219 = arith.cmpf oeq, %215, %218 : vector<128x64xf32>
    %220 = vector.broadcast %cst_33 : f32 to vector<128x64xf32>
    %221 = arith.select %219, %220, %215 : vector<128x64xi1>, vector<128x64xf32>
    %c28_i32 = arith.constant 28 : i32
    %cst_62 = arith.constant dense<0xFF800000> : vector<128xf32>
    %222 = vector.multi_reduction <maximumf>, %221, %cst_62 [1] : vector<128x64xf32> to vector<128xf32>
    %223 = vector.shape_cast %222 : vector<128xf32> to vector<128x1xf32>
    %224 = vector.broadcast %223 : vector<128x1xf32> to vector<128x64xf32>
    %225 = arith.cmpf oeq, %221, %224 : vector<128x64xf32>
    %226 = vector.broadcast %cst_33 : f32 to vector<128x64xf32>
    %227 = arith.select %225, %226, %221 : vector<128x64xi1>, vector<128x64xf32>
    %c29_i32 = arith.constant 29 : i32
    %cst_63 = arith.constant dense<0xFF800000> : vector<128xf32>
    %228 = vector.multi_reduction <maximumf>, %227, %cst_63 [1] : vector<128x64xf32> to vector<128xf32>
    %229 = vector.shape_cast %228 : vector<128xf32> to vector<128x1xf32>
    %230 = vector.broadcast %229 : vector<128x1xf32> to vector<128x64xf32>
    %231 = arith.cmpf oeq, %227, %230 : vector<128x64xf32>
    %232 = vector.broadcast %cst_33 : f32 to vector<128x64xf32>
    %233 = arith.select %231, %232, %227 : vector<128x64xi1>, vector<128x64xf32>
    %c30_i32 = arith.constant 30 : i32
    %cst_64 = arith.constant dense<0xFF800000> : vector<128xf32>
    %234 = vector.multi_reduction <maximumf>, %233, %cst_64 [1] : vector<128x64xf32> to vector<128xf32>
    %235 = vector.shape_cast %234 : vector<128xf32> to vector<128x1xf32>
    %236 = vector.broadcast %235 : vector<128x1xf32> to vector<128x64xf32>
    %237 = arith.cmpf oeq, %233, %236 : vector<128x64xf32>
    %238 = vector.broadcast %cst_33 : f32 to vector<128x64xf32>
    %239 = arith.select %237, %238, %233 : vector<128x64xi1>, vector<128x64xf32>
    %240 = vector.broadcast %235 : vector<128x1xf32> to vector<128x64xf32>
    %241 = arith.cmpf oge, %47, %240 : vector<128x64xf32>
    %242 = vector.broadcast %49 : vector<128x1xf32> to vector<128x64xf32>
    %243 = arith.subf %47, %242 : vector<128x64xf32>
    %244 = math.exp %243 : vector<128x64xf32>
    %cst_65 = arith.constant 0.000000e+00 : f32
    %245 = vector.broadcast %cst_65 : f32 to vector<128x64xf32>
    %246 = arith.select %241, %244, %245 : vector<128x64xi1>, vector<128x64xf32>
    %cst_66 = arith.constant dense<0.000000e+00> : vector<128xf32>
    %247 = vector.multi_reduction <add>, %246, %cst_66 [1] : vector<128x64xf32> to vector<128xf32>
    %248 = vector.shape_cast %247 : vector<128xf32> to vector<128x1xf32>
    %249 = tpu.reciprocal %248 {approx = true} : vector<128x1xf32> -> vector<128x1xf32>
    %250 = vector.broadcast %249 : vector<128x1xf32> to vector<128x64xf32>
    %251 = arith.mulf %246, %250 : vector<128x64xf32>
    %252 = vector.extract_strided_slice %251 {offsets = [0, 0], sizes = [16, 64], strides = [1, 1]} : vector<128x64xf32> to vector<16x64xf32>
    %253 = vector.extract_strided_slice %20 {offsets = [0, 0], sizes = [64, 64], strides = [1, 1]} : vector<64x512xf32> to vector<64x64xf32>
    %cst_67 = arith.constant dense<0.000000e+00> : vector<16x64xf32>
    %254 = tpu.matmul %252, %253, %cst_67 {dimension_numbers = #tpu.dot_dimension_numbers<[1], [0], [0], [1], [0, 0, 1, 1], [], []>} : vector<16x64xf32>, vector<64x64xf32>, vector<16x64xf32> -> vector<16x64xf32>
    %255 = vector.extract_strided_slice %251 {offsets = [16, 0], sizes = [16, 64], strides = [1, 1]} : vector<128x64xf32> to vector<16x64xf32>
    %256 = vector.extract_strided_slice %20 {offsets = [0, 64], sizes = [64, 64], strides = [1, 1]} : vector<64x512xf32> to vector<64x64xf32>
    %cst_68 = arith.constant dense<0.000000e+00> : vector<16x64xf32>
    %257 = tpu.matmul %255, %256, %cst_68 {dimension_numbers = #tpu.dot_dimension_numbers<[1], [0], [0], [1], [0, 0, 1, 1], [], []>} : vector<16x64xf32>, vector<64x64xf32>, vector<16x64xf32> -> vector<16x64xf32>
    %258 = vector.extract_strided_slice %251 {offsets = [32, 0], sizes = [16, 64], strides = [1, 1]} : vector<128x64xf32> to vector<16x64xf32>
    %259 = vector.extract_strided_slice %20 {offsets = [0, 128], sizes = [64, 64], strides = [1, 1]} : vector<64x512xf32> to vector<64x64xf32>
    %cst_69 = arith.constant dense<0.000000e+00> : vector<16x64xf32>
    %260 = tpu.matmul %258, %259, %cst_69 {dimension_numbers = #tpu.dot_dimension_numbers<[1], [0], [0], [1], [0, 0, 1, 1], [], []>} : vector<16x64xf32>, vector<64x64xf32>, vector<16x64xf32> -> vector<16x64xf32>
    %261 = vector.extract_strided_slice %251 {offsets = [48, 0], sizes = [16, 64], strides = [1, 1]} : vector<128x64xf32> to vector<16x64xf32>
    %262 = vector.extract_strided_slice %20 {offsets = [0, 192], sizes = [64, 64], strides = [1, 1]} : vector<64x512xf32> to vector<64x64xf32>
    %cst_70 = arith.constant dense<0.000000e+00> : vector<16x64xf32>
    %263 = tpu.matmul %261, %262, %cst_70 {dimension_numbers = #tpu.dot_dimension_numbers<[1], [0], [0], [1], [0, 0, 1, 1], [], []>} : vector<16x64xf32>, vector<64x64xf32>, vector<16x64xf32> -> vector<16x64xf32>
    %264 = vector.extract_strided_slice %251 {offsets = [64, 0], sizes = [16, 64], strides = [1, 1]} : vector<128x64xf32> to vector<16x64xf32>
    %265 = vector.extract_strided_slice %20 {offsets = [0, 256], sizes = [64, 64], strides = [1, 1]} : vector<64x512xf32> to vector<64x64xf32>
    %cst_71 = arith.constant dense<0.000000e+00> : vector<16x64xf32>
    %266 = tpu.matmul %264, %265, %cst_71 {dimension_numbers = #tpu.dot_dimension_numbers<[1], [0], [0], [1], [0, 0, 1, 1], [], []>} : vector<16x64xf32>, vector<64x64xf32>, vector<16x64xf32> -> vector<16x64xf32>
    %267 = vector.extract_strided_slice %251 {offsets = [80, 0], sizes = [16, 64], strides = [1, 1]} : vector<128x64xf32> to vector<16x64xf32>
    %268 = vector.extract_strided_slice %20 {offsets = [0, 320], sizes = [64, 64], strides = [1, 1]} : vector<64x512xf32> to vector<64x64xf32>
    %cst_72 = arith.constant dense<0.000000e+00> : vector<16x64xf32>
    %269 = tpu.matmul %267, %268, %cst_72 {dimension_numbers = #tpu.dot_dimension_numbers<[1], [0], [0], [1], [0, 0, 1, 1], [], []>} : vector<16x64xf32>, vector<64x64xf32>, vector<16x64xf32> -> vector<16x64xf32>
    %270 = vector.extract_strided_slice %251 {offsets = [96, 0], sizes = [16, 64], strides = [1, 1]} : vector<128x64xf32> to vector<16x64xf32>
    %271 = vector.extract_strided_slice %20 {offsets = [0, 384], sizes = [64, 64], strides = [1, 1]} : vector<64x512xf32> to vector<64x64xf32>
    %cst_73 = arith.constant dense<0.000000e+00> : vector<16x64xf32>
    %272 = tpu.matmul %270, %271, %cst_73 {dimension_numbers = #tpu.dot_dimension_numbers<[1], [0], [0], [1], [0, 0, 1, 1], [], []>} : vector<16x64xf32>, vector<64x64xf32>, vector<16x64xf32> -> vector<16x64xf32>
    %273 = vector.extract_strided_slice %251 {offsets = [112, 0], sizes = [16, 64], strides = [1, 1]} : vector<128x64xf32> to vector<16x64xf32>
    %274 = vector.extract_strided_slice %20 {offsets = [0, 448], sizes = [64, 64], strides = [1, 1]} : vector<64x512xf32> to vector<64x64xf32>
    %cst_74 = arith.constant dense<0.000000e+00> : vector<16x64xf32>
    %275 = tpu.matmul %273, %274, %cst_74 {dimension_numbers = #tpu.dot_dimension_numbers<[1], [0], [0], [1], [0, 0, 1, 1], [], []>} : vector<16x64xf32>, vector<64x64xf32>, vector<16x64xf32> -> vector<16x64xf32>
    %276 = tpu.concatenate %254, %257, %260, %263, %266, %269, %272, %275 in 1 : vector<16x64xf32>, vector<16x64xf32>, vector<16x64xf32>, vector<16x64xf32>, vector<16x64xf32>, vector<16x64xf32>, vector<16x64xf32>, vector<16x64xf32> -> vector<16x512xf32>
    %c0_75 = arith.constant 0 : index
    %c0_76 = arith.constant 0 : index
    %277 = vector.load %arg10[%c0_75, %c0_76] : memref<512x512xf32, #tpu.memory_space<vmem>>, vector<512x512xf32>
    %cst_77 = arith.constant dense<0.000000e+00> : vector<16x512xf32>
    %278 = tpu.matmul %276, %277, %cst_77 {dimension_numbers = #tpu.dot_dimension_numbers<[1], [0], [0], [1], [0, 0, 1, 1], [], []>} : vector<16x512xf32>, vector<512x512xf32>, vector<16x512xf32> -> vector<16x512xf32>
    %c0_78 = arith.constant 0 : index
    %c0_79 = arith.constant 0 : index
    %279 = vector.load %arg11[%c0_78, %c0_79] : memref<1x512xf32, #tpu.memory_space<vmem>>, vector<1x512xf32>
    %280 = vector.broadcast %279 : vector<1x512xf32> to vector<16x512xf32>
    %281 = arith.addf %278, %280 : vector<16x512xf32>
    %282 = vector.shape_cast %281 : vector<16x512xf32> to vector<1x16x512xf32>
    %c0_80 = arith.constant 0 : index
    %c0_81 = arith.constant 0 : index
    %c0_82 = arith.constant 0 : index
    %283 = vector.load %arg12[%c0_80, %c0_81, %c0_82] : memref<1x16x512xf32, #tpu.memory_space<vmem>>, vector<1x16x512xf32>
    tpu.vector_store %arg12[%c0_80, %c0_81, %c0_82], %282 {strides = array<i32>} : memref<1x16x512xf32, #tpu.memory_space<vmem>>, vector<1x16x512xf32>,
    return
  }
  func.func @transform_0(%arg0: i32) -> (i32, i32, i32) {
    %c0_i32 = arith.constant 0 : i32
    %c0_i32_0 = arith.constant 0 : i32
    %c0_i32_1 = arith.constant 0 : i32
    return %arg0, %c0_i32, %c0_i32_0 : i32, i32, i32
  }
  func.func @transform_1(%arg0: i32) -> (i32, i32, i32) {
    %c0_i32 = arith.constant 0 : i32
    %c0_i32_0 = arith.constant 0 : i32
    %c0_i32_1 = arith.constant 0 : i32
    return %arg0, %c0_i32, %c0_i32_0 : i32, i32, i32
  }
  func.func @transform_2(%arg0: i32) -> (i32, i32, i32) {
    %c0_i32 = arith.constant 0 : i32
    %c0_i32_0 = arith.constant 0 : i32
    %c0_i32_1 = arith.constant 0 : i32
    return %arg0, %c0_i32, %c0_i32_0 : i32, i32, i32
  }
  func.func @transform_3(%arg0: i32) -> (i32, i32) {
    %c0_i32 = arith.constant 0 : i32
    %c0_i32_0 = arith.constant 0 : i32
    %c0_i32_1 = arith.constant 0 : i32
    return %c0_i32, %c0_i32_0 : i32, i32
  }
  func.func @transform_4(%arg0: i32) -> (i32, i32) {
    %c0_i32 = arith.constant 0 : i32
    %c0_i32_0 = arith.constant 0 : i32
    %c0_i32_1 = arith.constant 0 : i32
    return %c0_i32, %c0_i32_0 : i32, i32
  }
  func.func @transform_5(%arg0: i32) -> (i32, i32) {
    %c0_i32 = arith.constant 0 : i32
    %c0_i32_0 = arith.constant 0 : i32
    %c0_i32_1 = arith.constant 0 : i32
    return %c0_i32, %c0_i32_0 : i32, i32
  }
  func.func @transform_6(%arg0: i32) -> (i32, i32) {
    %c0_i32 = arith.constant 0 : i32
    %c0_i32_0 = arith.constant 0 : i32
    %c0_i32_1 = arith.constant 0 : i32
    return %c0_i32, %c0_i32_0 : i32, i32
  }
  func.func @transform_7(%arg0: i32) -> (i32, i32) {
    %c0_i32 = arith.constant 0 : i32
    %c0_i32_0 = arith.constant 0 : i32
    %c0_i32_1 = arith.constant 0 : i32
    return %c0_i32, %c0_i32_0 : i32, i32
  }
  func.func @transform_8(%arg0: i32) -> (i32, i32) {
    %c0_i32 = arith.constant 0 : i32
    %c0_i32_0 = arith.constant 0 : i32
    %c0_i32_1 = arith.constant 0 : i32
    return %c0_i32, %c0_i32_0 : i32, i32
  }
  func.func @transform_9(%arg0: i32) -> (i32, i32) {
    %c0_i32 = arith.constant 0 : i32
    %c0_i32_0 = arith.constant 0 : i32
    %c0_i32_1 = arith.constant 0 : i32
    return %c0_i32, %c0_i32_0 : i32, i32
  }
  func.func @transform_10(%arg0: i32) -> (i32, i32) {
    %c0_i32 = arith.constant 0 : i32
    %c0_i32_0 = arith.constant 0 : i32
    %c0_i32_1 = arith.constant 0 : i32
    return %c0_i32, %c0_i32_0 : i32, i32
  }
  func.func @transform_11(%arg0: i32) -> (i32, i32, i32) {
    %c0_i32 = arith.constant 0 : i32
    %c0_i32_0 = arith.constant 0 : i32
    %c0_i32_1 = arith.constant 0 : i32
    return %arg0, %c0_i32, %c0_i32_0 : i32, i32, i32
  }
}

</mosaic_0001>

<bundles_post_ra>
// kernel: multi_thread_memory.1
= control target key start
LH: loop header
LB: loop body
LE: loop exit
PB: predicated region body
PF: predicated region fallthrough
CT: control target
= control target key end

     0   :  { %16 = vsyncpa [#allocation3], 0  ;;  %s15597_s0 = inlined_call_operand.vmem [shape: f32[2,16,512], index: 0, kind: input, shape index: {}]   ;;  %s15598_s1 = inlined_call_operand.vmem [shape: f32[2,64,512], index: 1, kind: input, shape index: {}]   ;;  %s15599_s2 = inlined_call_operand.vmem [shape: f32[2,64,512], index: 2, kind: input, shape index: {}]   ;;  %s15600_s3 = inlined_call_operand.vmem [shape: f32[512,512], index: 3, kind: input, shape index: {}]   ;;  %s15601_s4 = inlined_call_operand.vmem [shape: f32[1,512], index: 4, kind: input, shape index: {}]   ;;  %s15602_s5 = inlined_call_operand.vmem [shape: f32[512,512], index: 5, kind: input, shape index: {}]   ;;  %s15603_s6 = inlined_call_operand.vmem [shape: f32[1,512], index: 6, kind: input, shape index: {}]   ;;  %s15604_s7 = inlined_call_operand.vmem [shape: f32[512,512], index: 7, kind: input, shape index: {}]   ;;  %s15605_s8 = inlined_call_operand.vmem [shape: f32[1,512], index: 8, kind: input, shape index: {}]   ;;  %s15606_s9 = inlined_call_operand.vmem [shape: f32[512,512], index: 9, kind: input, shape index: {}]   ;;  %s15607_s10 = inlined_call_operand.vmem [shape: f32[1,512], index: 10, kind: input, shape index: {}]   ;;  %s15608_s11 = inlined_call_operand.hbm [shape: f32[2,16,512], index: 11, kind: output, shape index: {}]  }
   0x1   :  { %18 = vsyncpa [#allocation3 + $0x1], 0  ;;  %s7803_s17 = smov 0   ;;  %s7805_s18 = smov 0  }
   0x2   :  { %s7807_s19 = smov 0   ;;  %s7809_s20 = smov 0  }
   0x3 LB: > { %15658 = sst [smem:[#allocation5_spill]] %s7734_s19  ;;  %s7824_s21 = sadd.s32 4294967295, %s7738_s20   ;;  %s7738_s20 = sphi %s7809_s20, %s15779_s20   ;;  %s7734_s19 = sphi %s7807_s19, %s15781_s19   ;;  %s7730_s18 = sphi %s7805_s18, %s15783_s18   ;;  %s7726_s17 = sphi %s7803_s17, %s15782_s17  }
   0x4   : > { %s7288_s22 = sadd.s32 4294967294, %s7738_s20   ;;  %s7828_s23 = sadd.s32 1, %s7738_s20  }
   0x5   : > { %15659 = sst [smem:[#allocation6_spill]] %s7828_s23  ;;  %s277_s24 = sadd.s32 1, %s7734_s19 }
   0x6   : > { %s274_s25 = ssub.s32 %s7738_s20, %s7828_s23  ;;  %p287_p0 = scmp.ne.s32.totalorder %s7734_s19, %s7730_s18 }
   0x7   : > { %p275_p1 = scmp.eq.s32.totalorder %s274_s25, 0  ;;  %p288_p2 = scmp.eq.s32.totalorder %s7824_s21, 1 }
   0x8   : > { %p293_p3 = scmp.ne.s32.totalorder %s7730_s18, %s7726_s17  ;;  %p294_p4 = scmp.eq.s32.totalorder %s7288_s22, 1 }
   0x9   : > { %s7839_s26 = scalar_select %p275_p1, %s7734_s19, %s277_s24  }
   0xa   : > { %p7841_p5 = por %p288_p2, %p287_p0  ;;  %p7845_p6 = por %p294_p4, %p293_p3 }
   0xb   : > { %15660 = sst [smem:[#allocation7_spill]] %s7839_s26  ;;  %p7291_p7 = scmp.ge.s32.totalorder %s7738_s20, 1 }
   0xc   : > { %p360_p8 = scmp.lt.s32.totalorder %s7738_s20, 3 }
   0xe   : > { %p361_p9 = pnand %p7291_p7, %p360_p8 }
  0x10   : > { %364 = sbr.rel (%p361_p9) target bundleno = 5372 (0x14fc), region = 64 }
  0x15   : > { %v557_v0 = vld [vmem:[%s15600_s3 + $0x1e0] sm:$0xff]  ;;  %p410_p10 = scmp.lt.s32.totalorder %s7824_s21, 1  ;;  %s7740_s19 = smov 64   ;;  %vm2975_vm0 = vcmask 523264  }
  0x16   : > { %v621_v1 = vld [vmem:[%s15600_s3 + $0x3e0] sm:$0xff]  ;;  %763 = vmatpush.msra.mxu0 %v557_v0  ;;  %v558_v0 = vld [vmem:[%s15600_s3 + $0x1e8] sm:$0xff]  ;;  %s407_s13 = sand.u32 1, %s7730_s18   ;;  %s7403_s15 = sshll.u32 %s7824_s21, 6 }
  0x17   : > { %v685_v2 = vld [vmem:[%s15600_s3 + $0x5e0] sm:$0xff]  ;;  %786 = vmatpush.msra.mxu1 %v621_v1  ;;  %v622_v1 = vld [vmem:[%s15600_s3 + $0x3e8] sm:$0xff]  ;;  %s8185_s29 = scalar_select %p410_p10, %s7824_s21, 1 }
  0x18   : > { %v749_v3 = vld [vmem:[%s15600_s3 + $0x7e0] sm:$0xff]  ;;  %809 = vmatpush.msra.mxu2 %v685_v2  ;;  %v686_v2 = vld [vmem:[%s15600_s3 + $0x5e8] sm:$0xff]  ;;  %s7187_s21 = scalar_lea.sflag [#allocation3], %s407_s13 }
  0x19   : > { %v553_v4 = vld [vmem:[%s15600_s3 + $0x1c0] sm:$0xff]  ;;  %832 = vmatpush.msra.mxu3 %v749_v3  ;;  %v750_v3 = vld [vmem:[%s15600_s3 + $0x7e8] sm:$0xff]  ;;  %s7400_s22 = sshll.u32 %s8185_s29, 6  ;;  %s15612_s16 = sshll.u32 %s8185_s29, 8 }
  0x1a   : > { %v617_v5 = vld [vmem:[%s15600_s3 + $0x3c0] sm:$0xff]  ;;  %764 = vmatpush.msra.mxu0 %v553_v4  ;;  %v554_v4 = vld [vmem:[%s15600_s3 + $0x1c8] sm:$0xff]  ;;  %s8233_s23 = scalar_lea.vmem %s15597_s0, %s7400_s22  ;;  %s8867_s25 = scalar_lea.vmem %s15598_s1, %s15612_s16 }
  0x1b   : > { %v681_v6 = vld [vmem:[%s15600_s3 + $0x5c0] sm:$0xff]  ;;  %787 = vmatpush.msra.mxu1 %v617_v5  ;;  %v618_v5 = vld [vmem:[%s15600_s3 + $0x3c8] sm:$0xff]  ;;  %s15690_s14 = sshll.u32 %s8185_s29, 8 }
  0x1c   : > { %v745_v7 = vld [vmem:[%s15600_s3 + $0x7c0] sm:$0xff]  ;;  %810 = vmatpush.msra.mxu2 %v681_v6  ;;  %v682_v6 = vld [vmem:[%s15600_s3 + $0x5c8] sm:$0xff]  ;;  %s10063_s24 = scalar_lea.vmem %s15599_s2, %s15690_s14  ;;  %s7292_s14 = sshll.u32 %s407_s13, 6 }
  0x1d   : > { %v549_v8 = vld [vmem:[%s15600_s3 + $0x1a0] sm:$0xff]  ;;  %833 = vmatpush.msra.mxu3 %v745_v7  ;;  %v746_v7 = vld [vmem:[%s15600_s3 + $0x7c8] sm:$0xff] }
  0x1e   : > { %v613_v9 = vld [vmem:[%s15600_s3 + $0x3a0] sm:$0xff]  ;;  %765 = vmatpush.msra.mxu0 %v549_v8  ;;  %v550_v8 = vld [vmem:[%s15600_s3 + $0x1a8] sm:$0xff] }
  0x1f   : > { %v677_v10 = vld [vmem:[%s15600_s3 + $0x5a0] sm:$0xff]  ;;  %788 = vmatpush.msra.mxu1 %v613_v9  ;;  %v614_v9 = vld [vmem:[%s15600_s3 + $0x3a8] sm:$0xff] }
  0x20   : > { %v741_v11 = vld [vmem:[%s15600_s3 + $0x7a0] sm:$0xff]  ;;  %811 = vmatpush.msra.mxu2 %v677_v10  ;;  %v678_v10 = vld [vmem:[%s15600_s3 + $0x5a8] sm:$0xff] }
  0x21   : > { %v545_v12 = vld [vmem:[%s15600_s3 + $0x180] sm:$0xff]  ;;  %834 = vmatpush.msra.mxu3 %v741_v11  ;;  %v742_v11 = vld [vmem:[%s15600_s3 + $0x7a8] sm:$0xff] }
  0x22   : > { %v609_v13 = vld [vmem:[%s15600_s3 + $0x380] sm:$0xff]  ;;  %766 = vmatpush.msra.mxu0 %v545_v12  ;;  %v546_v12 = vld [vmem:[%s15600_s3 + $0x188] sm:$0xff] }
  0x23   : > { %v673_v14 = vld [vmem:[%s15600_s3 + $0x580] sm:$0xff]  ;;  %789 = vmatpush.msra.mxu1 %v609_v13  ;;  %v610_v13 = vld [vmem:[%s15600_s3 + $0x388] sm:$0xff] }
  0x24   : > { %v737_v15 = vld [vmem:[%s15600_s3 + $0x780] sm:$0xff]  ;;  %812 = vmatpush.msra.mxu2 %v673_v14  ;;  %v674_v14 = vld [vmem:[%s15600_s3 + $0x588] sm:$0xff] }
  0x25   : > { %v541_v16 = vld [vmem:[%s15600_s3 + $0x160] sm:$0xff]  ;;  %835 = vmatpush.msra.mxu3 %v737_v15  ;;  %v738_v15 = vld [vmem:[%s15600_s3 + $0x788] sm:$0xff] }
  0x26   : > { %v605_v17 = vld [vmem:[%s15600_s3 + $0x360] sm:$0xff]  ;;  %767 = vmatpush.msra.mxu0 %v541_v16  ;;  %v542_v16 = vld [vmem:[%s15600_s3 + $0x168] sm:$0xff] }
  0x27   : > { %v669_v18 = vld [vmem:[%s15600_s3 + $0x560] sm:$0xff]  ;;  %790 = vmatpush.msra.mxu1 %v605_v17  ;;  %v606_v17 = vld [vmem:[%s15600_s3 + $0x368] sm:$0xff] }
  0x28   : > { %v733_v19 = vld [vmem:[%s15600_s3 + $0x760] sm:$0xff]  ;;  %813 = vmatpush.msra.mxu2 %v669_v18  ;;  %v670_v18 = vld [vmem:[%s15600_s3 + $0x568] sm:$0xff] }
  0x29   : > { %v537_v20 = vld [vmem:[%s15600_s3 + $0x140] sm:$0xff]  ;;  %836 = vmatpush.msra.mxu3 %v733_v19  ;;  %v734_v19 = vld [vmem:[%s15600_s3 + $0x768] sm:$0xff] }
  0x2a   : > { %v601_v21 = vld [vmem:[%s15600_s3 + $0x340] sm:$0xff]  ;;  %768 = vmatpush.msra.mxu0 %v537_v20  ;;  %v538_v20 = vld [vmem:[%s15600_s3 + $0x148] sm:$0xff] }
  0x2b   : > { %v665_v22 = vld [vmem:[%s15600_s3 + $0x540] sm:$0xff]  ;;  %791 = vmatpush.msra.mxu1 %v601_v21  ;;  %v602_v21 = vld [vmem:[%s15600_s3 + $0x348] sm:$0xff] }
  0x2c   : > { %v729_v23 = vld [vmem:[%s15600_s3 + $0x740] sm:$0xff]  ;;  %814 = vmatpush.msra.mxu2 %v665_v22  ;;  %v666_v22 = vld [vmem:[%s15600_s3 + $0x548] sm:$0xff] }
  0x2d   : > { %v533_v24 = vld [vmem:[%s15600_s3 + $0x120] sm:$0xff]  ;;  %837 = vmatpush.msra.mxu3 %v729_v23  ;;  %v730_v23 = vld [vmem:[%s15600_s3 + $0x748] sm:$0xff] }
  0x2e   : > { %v597_v25 = vld [vmem:[%s15600_s3 + $0x320] sm:$0xff]  ;;  %769 = vmatpush.msra.mxu0 %v533_v24  ;;  %v534_v24 = vld [vmem:[%s15600_s3 + $0x128] sm:$0xff] }
  0x2f   : > { %v661_v26 = vld [vmem:[%s15600_s3 + $0x520] sm:$0xff]  ;;  %792 = vmatpush.msra.mxu1 %v597_v25  ;;  %v598_v25 = vld [vmem:[%s15600_s3 + $0x328] sm:$0xff] }
  0x30   : > { %v725_v27 = vld [vmem:[%s15600_s3 + $0x720] sm:$0xff]  ;;  %815 = vmatpush.msra.mxu2 %v661_v26  ;;  %v662_v26 = vld [vmem:[%s15600_s3 + $0x528] sm:$0xff] }
  0x31   : > { %v529_v28 = vld [vmem:[%s15600_s3 + $0x100] sm:$0xff]  ;;  %838 = vmatpush.msra.mxu3 %v725_v27  ;;  %v726_v27 = vld [vmem:[%s15600_s3 + $0x728] sm:$0xff] }
  0x32   : > { %v593_v29 = vld [vmem:[%s15600_s3 + $0x300] sm:$0xff]  ;;  %770 = vmatpush.msra.mxu0 %v529_v28  ;;  %v530_v28 = vld [vmem:[%s15600_s3 + $0x108] sm:$0xff] }
  0x33   : > { %v657_v30 = vld [vmem:[%s15600_s3 + $0x500] sm:$0xff]  ;;  %793 = vmatpush.msra.mxu1 %v593_v29  ;;  %v594_v29 = vld [vmem:[%s15600_s3 + $0x308] sm:$0xff] }
  0x34   : > { %v721_v31 = vld [vmem:[%s15600_s3 + $0x700] sm:$0xff]  ;;  %816 = vmatpush.msra.mxu2 %v657_v30  ;;  %v658_v30 = vld [vmem:[%s15600_s3 + $0x508] sm:$0xff] }
  0x35   : > { %v525_v32 = vld [vmem:[%s15600_s3 + $0xe0] sm:$0xff]  ;;  %839 = vmatpush.msra.mxu3 %v721_v31  ;;  %v722_v31 = vld [vmem:[%s15600_s3 + $0x708] sm:$0xff] }
  0x36   : > { %v589_v33 = vld [vmem:[%s15600_s3 + $0x2e0] sm:$0xff]  ;;  %771 = vmatpush.msra.mxu0 %v525_v32  ;;  %v526_v32 = vld [vmem:[%s15600_s3 + $0xe8] sm:$0xff] }
  0x37   : > { %v653_v34 = vld [vmem:[%s15600_s3 + $0x4e0] sm:$0xff]  ;;  %794 = vmatpush.msra.mxu1 %v589_v33  ;;  %v590_v33 = vld [vmem:[%s15600_s3 + $0x2e8] sm:$0xff] }
  0x38   : > { %v717_v35 = vld [vmem:[%s15600_s3 + $0x6e0] sm:$0xff]  ;;  %817 = vmatpush.msra.mxu2 %v653_v34  ;;  %v654_v34 = vld [vmem:[%s15600_s3 + $0x4e8] sm:$0xff] }
  0x39   : > { %v521_v36 = vld [vmem:[%s15600_s3 + $0xc0] sm:$0xff]  ;;  %840 = vmatpush.msra.mxu3 %v717_v35  ;;  %v718_v35 = vld [vmem:[%s15600_s3 + $0x6e8] sm:$0xff] }
  0x3a   : > { %v585_v37 = vld [vmem:[%s15600_s3 + $0x2c0] sm:$0xff]  ;;  %772 = vmatpush.msra.mxu0 %v521_v36  ;;  %v522_v36 = vld [vmem:[%s15600_s3 + $0xc8] sm:$0xff] }
  0x3b   : > { %v649_v38 = vld [vmem:[%s15600_s3 + $0x4c0] sm:$0xff]  ;;  %795 = vmatpush.msra.mxu1 %v585_v37  ;;  %v586_v37 = vld [vmem:[%s15600_s3 + $0x2c8] sm:$0xff] }
  0x3c   : > { %v713_v39 = vld [vmem:[%s15600_s3 + $0x6c0] sm:$0xff]  ;;  %818 = vmatpush.msra.mxu2 %v649_v38  ;;  %v650_v38 = vld [vmem:[%s15600_s3 + $0x4c8] sm:$0xff] }
  0x3d   : > { %v517_v40 = vld [vmem:[%s15600_s3 + $0xa0] sm:$0xff]  ;;  %841 = vmatpush.msra.mxu3 %v713_v39  ;;  %v714_v39 = vld [vmem:[%s15600_s3 + $0x6c8] sm:$0xff] }
  0x3e   : > { %v581_v41 = vld [vmem:[%s15600_s3 + $0x2a0] sm:$0xff]  ;;  %773 = vmatpush.msra.mxu0 %v517_v40  ;;  %v518_v40 = vld [vmem:[%s15600_s3 + $0xa8] sm:$0xff] }
  0x3f   : > { %v645_v42 = vld [vmem:[%s15600_s3 + $0x4a0] sm:$0xff]  ;;  %796 = vmatpush.msra.mxu1 %v581_v41  ;;  %v582_v41 = vld [vmem:[%s15600_s3 + $0x2a8] sm:$0xff] }
  0x40   : > { %v709_v43 = vld [vmem:[%s15600_s3 + $0x6a0] sm:$0xff]  ;;  %819 = vmatpush.msra.mxu2 %v645_v42  ;;  %v646_v42 = vld [vmem:[%s15600_s3 + $0x4a8] sm:$0xff] }
  0x41   : > { %v513_v44 = vld [vmem:[%s15600_s3 + $0x80] sm:$0xff]  ;;  %842 = vmatpush.msra.mxu3 %v709_v43  ;;  %v710_v43 = vld [vmem:[%s15600_s3 + $0x6a8] sm:$0xff] }
  0x42   : > { %v577_v45 = vld [vmem:[%s15600_s3 + $0x280] sm:$0xff]  ;;  %774 = vmatpush.msra.mxu0 %v513_v44  ;;  %v514_v44 = vld [vmem:[%s15600_s3 + $0x88] sm:$0xff] }
  0x43   : > { %v641_v46 = vld [vmem:[%s15600_s3 + $0x480] sm:$0xff]  ;;  %797 = vmatpush.msra.mxu1 %v577_v45  ;;  %v578_v45 = vld [vmem:[%s15600_s3 + $0x288] sm:$0xff] }
  0x44   : > { %v705_v47 = vld [vmem:[%s15600_s3 + $0x680] sm:$0xff]  ;;  %820 = vmatpush.msra.mxu2 %v641_v46  ;;  %v642_v46 = vld [vmem:[%s15600_s3 + $0x488] sm:$0xff] }
  0x45   : > { %v509_v48 = vld [vmem:[%s15600_s3 + $0x60] sm:$0xff]  ;;  %843 = vmatpush.msra.mxu3 %v705_v47  ;;  %v706_v47 = vld [vmem:[%s15600_s3 + $0x688] sm:$0xff] }
  0x46   : > { %v573_v49 = vld [vmem:[%s15600_s3 + $0x260] sm:$0xff]  ;;  %775 = vmatpush.msra.mxu0 %v509_v48  ;;  %v510_v48 = vld [vmem:[%s15600_s3 + $0x68] sm:$0xff] }
  0x47   : > { %v637_v50 = vld [vmem:[%s15600_s3 + $0x460] sm:$0xff]  ;;  %798 = vmatpush.msra.mxu1 %v573_v49  ;;  %v574_v49 = vld [vmem:[%s15600_s3 + $0x268] sm:$0xff] }
  0x48   : > { %v701_v51 = vld [vmem:[%s15600_s3 + $0x660] sm:$0xff]  ;;  %821 = vmatpush.msra.mxu2 %v637_v50  ;;  %v638_v50 = vld [vmem:[%s15600_s3 + $0x468] sm:$0xff] }
  0x49   : > { %v505_v52 = vld [vmem:[%s15600_s3 + $0x40] sm:$0xff]  ;;  %844 = vmatpush.msra.mxu3 %v701_v51  ;;  %v702_v51 = vld [vmem:[%s15600_s3 + $0x668] sm:$0xff] }
  0x4a   : > { %v569_v53 = vld [vmem:[%s15600_s3 + $0x240] sm:$0xff]  ;;  %776 = vmatpush.msra.mxu0 %v505_v52  ;;  %v506_v52 = vld [vmem:[%s15600_s3 + $0x48] sm:$0xff] }
  0x4b   : > { %v633_v54 = vld [vmem:[%s15600_s3 + $0x440] sm:$0xff]  ;;  %799 = vmatpush.msra.mxu1 %v569_v53  ;;  %v570_v53 = vld [vmem:[%s15600_s3 + $0x248] sm:$0xff] }
  0x4c   : > { %v697_v55 = vld [vmem:[%s15600_s3 + $0x640] sm:$0xff]  ;;  %822 = vmatpush.msra.mxu2 %v633_v54  ;;  %v634_v54 = vld [vmem:[%s15600_s3 + $0x448] sm:$0xff] }
  0x4d   : > { %v501_v56 = vld [vmem:[%s15600_s3 + $0x20] sm:$0xff]  ;;  %845 = vmatpush.msra.mxu3 %v697_v55  ;;  %v698_v55 = vld [vmem:[%s15600_s3 + $0x648] sm:$0xff] }
  0x4e   : > { %v565_v57 = vld [vmem:[%s15600_s3 + $0x220] sm:$0xff]  ;;  %777 = vmatpush.msra.mxu0 %v501_v56  ;;  %v502_v56 = vld [vmem:[%s15600_s3 + $0x28] sm:$0xff] }
  0x4f   : > { %v629_v58 = vld [vmem:[%s15600_s3 + $0x420] sm:$0xff]  ;;  %800 = vmatpush.msra.mxu1 %v565_v57  ;;  %v566_v57 = vld [vmem:[%s15600_s3 + $0x228] sm:$0xff] }
  0x50   : > { %v693_v59 = vld [vmem:[%s15600_s3 + $0x620] sm:$0xff]  ;;  %823 = vmatpush.msra.mxu2 %v629_v58  ;;  %v630_v58 = vld [vmem:[%s15600_s3 + $0x428] sm:$0xff] }
  0x51   : > { %v497_v60 = vld [vmem:[%s15600_s3] sm:$0xff]  ;;  %846 = vmatpush.msra.mxu3 %v693_v59  ;;  %v694_v59 = vld [vmem:[%s15600_s3 + $0x628] sm:$0xff] }
  0x52   : > { %v561_v61 = vld [vmem:[%s15600_s3 + $0x200] sm:$0xff]  ;;  %778 = vmatpush.msra.mxu0 %v497_v60  ;;  %v498_v60 = vld [vmem:[%s15600_s3 + $0x8] sm:$0xff] }
  0x53   : > { %v625_v62 = vld [vmem:[%s15600_s3 + $0x400] sm:$0xff]  ;;  %801 = vmatpush.msra.mxu1 %v561_v61  ;;  %v562_v61 = vld [vmem:[%s15600_s3 + $0x208] sm:$0xff] }
  0x54   : > { %v689_v63 = vld [vmem:[%s15600_s3 + $0x600] sm:$0xff]  ;;  %824 = vmatpush.msra.mxu2 %v625_v62  ;;  %855 = vmatpush.msrb.mxu0 %v558_v0  ;;  %v626_v62 = vld [vmem:[%s15600_s3 + $0x408] sm:$0xff] }
  0x55   : > { %847 = vmatpush.msra.mxu3 %v689_v63  ;;  %878 = vmatpush.msrb.mxu1 %v622_v1  ;;  %v690_v63 = vld [vmem:[%s15600_s3 + $0x608] sm:$0xff]  ;;  %v8248_v0 = vld [vmem:[%s8233_s23] sm:$0xff] }
  0x56   : > { %901 = vmatpush.msrb.mxu2 %v686_v2  ;;  %856 = vmatpush.msrb.mxu0 %v554_v4  ;;  %v8251_v1 = vld [vmem:[%s8233_s23 + $0x8] sm:$0xff]  ;;  %v8254_v2 = vld [vmem:[%s8233_s23 + $0x10] sm:$0xff] }
  0x57   : > { %924 = vmatpush.msrb.mxu3 %v750_v3  ;;  %879 = vmatpush.msrb.mxu1 %v618_v5  ;;  %v8257_v3 = vld [vmem:[%s8233_s23 + $0x18] sm:$0xff]  ;;  %v559_v4 = vld [vmem:[%s15600_s3 + $0x1f0] sm:$0xff] }
  0x58   : > { %902 = vmatpush.msrb.mxu2 %v682_v6  ;;  %857 = vmatpush.msrb.mxu0 %v550_v8  ;;  %v623_v5 = vld [vmem:[%s15600_s3 + $0x3f0] sm:$0xff] }
  0x59   : > { %925 = vmatpush.msrb.mxu3 %v746_v7  ;;  %880 = vmatpush.msrb.mxu1 %v614_v9  ;;  %v687_v6 = vld [vmem:[%s15600_s3 + $0x5f0] sm:$0xff] }
  0x5a   : > { %903 = vmatpush.msrb.mxu2 %v678_v10  ;;  %858 = vmatpush.msrb.mxu0 %v546_v12  ;;  %v751_v7 = vld [vmem:[%s15600_s3 + $0x7f0] sm:$0xff] }
  0x5b   : > { %926 = vmatpush.msrb.mxu3 %v742_v11  ;;  %881 = vmatpush.msrb.mxu1 %v610_v13  ;;  %v555_v8 = vld [vmem:[%s15600_s3 + $0x1d0] sm:$0xff] }
  0x5c   : > { %904 = vmatpush.msrb.mxu2 %v674_v14  ;;  %859 = vmatpush.msrb.mxu0 %v542_v16  ;;  %v619_v9 = vld [vmem:[%s15600_s3 + $0x3d0] sm:$0xff] }
  0x5d   : > { %927 = vmatpush.msrb.mxu3 %v738_v15  ;;  %882 = vmatpush.msrb.mxu1 %v606_v17  ;;  %v683_v10 = vld [vmem:[%s15600_s3 + $0x5d0] sm:$0xff] }
  0x5e   : > { %905 = vmatpush.msrb.mxu2 %v670_v18  ;;  %860 = vmatpush.msrb.mxu0 %v538_v20  ;;  %v747_v11 = vld [vmem:[%s15600_s3 + $0x7d0] sm:$0xff] }
  0x5f   : > { %928 = vmatpush.msrb.mxu3 %v734_v19  ;;  %883 = vmatpush.msrb.mxu1 %v602_v21  ;;  %v551_v12 = vld [vmem:[%s15600_s3 + $0x1b0] sm:$0xff] }
  0x60   : > { %906 = vmatpush.msrb.mxu2 %v666_v22  ;;  %861 = vmatpush.msrb.mxu0 %v534_v24  ;;  %v615_v13 = vld [vmem:[%s15600_s3 + $0x3b0] sm:$0xff] }
  0x61   : > { %929 = vmatpush.msrb.mxu3 %v730_v23  ;;  %884 = vmatpush.msrb.mxu1 %v598_v25  ;;  %v679_v14 = vld [vmem:[%s15600_s3 + $0x5b0] sm:$0xff] }
  0x62   : > { %907 = vmatpush.msrb.mxu2 %v662_v26  ;;  %862 = vmatpush.msrb.mxu0 %v530_v28  ;;  %v743_v15 = vld [vmem:[%s15600_s3 + $0x7b0] sm:$0xff] }
  0x63   : > { %930 = vmatpush.msrb.mxu3 %v726_v27  ;;  %885 = vmatpush.msrb.mxu1 %v594_v29  ;;  %v547_v16 = vld [vmem:[%s15600_s3 + $0x190] sm:$0xff] }
  0x64   : > { %908 = vmatpush.msrb.mxu2 %v658_v30  ;;  %863 = vmatpush.msrb.mxu0 %v526_v32  ;;  %v611_v17 = vld [vmem:[%s15600_s3 + $0x390] sm:$0xff] }
  0x65   : > { %931 = vmatpush.msrb.mxu3 %v722_v31  ;;  %886 = vmatpush.msrb.mxu1 %v590_v33  ;;  %v675_v18 = vld [vmem:[%s15600_s3 + $0x590] sm:$0xff] }
  0x66   : > { %909 = vmatpush.msrb.mxu2 %v654_v34  ;;  %864 = vmatpush.msrb.mxu0 %v522_v36  ;;  %v739_v19 = vld [vmem:[%s15600_s3 + $0x790] sm:$0xff] }
  0x67   : > { %932 = vmatpush.msrb.mxu3 %v718_v35  ;;  %887 = vmatpush.msrb.mxu1 %v586_v37  ;;  %v543_v20 = vld [vmem:[%s15600_s3 + $0x170] sm:$0xff] }
  0x68   : > { %910 = vmatpush.msrb.mxu2 %v650_v38  ;;  %865 = vmatpush.msrb.mxu0 %v518_v40  ;;  %v607_v21 = vld [vmem:[%s15600_s3 + $0x370] sm:$0xff] }
  0x69   : > { %933 = vmatpush.msrb.mxu3 %v714_v39  ;;  %888 = vmatpush.msrb.mxu1 %v582_v41  ;;  %v671_v22 = vld [vmem:[%s15600_s3 + $0x570] sm:$0xff] }
  0x6a   : > { %911 = vmatpush.msrb.mxu2 %v646_v42  ;;  %866 = vmatpush.msrb.mxu0 %v514_v44  ;;  %v735_v23 = vld [vmem:[%s15600_s3 + $0x770] sm:$0xff] }
  0x6b   : > { %934 = vmatpush.msrb.mxu3 %v710_v43  ;;  %889 = vmatpush.msrb.mxu1 %v578_v45  ;;  %v539_v24 = vld [vmem:[%s15600_s3 + $0x150] sm:$0xff] }
  0x6c   : > { %912 = vmatpush.msrb.mxu2 %v642_v46  ;;  %867 = vmatpush.msrb.mxu0 %v510_v48  ;;  %v603_v25 = vld [vmem:[%s15600_s3 + $0x350] sm:$0xff] }
  0x6d   : > { %935 = vmatpush.msrb.mxu3 %v706_v47  ;;  %890 = vmatpush.msrb.mxu1 %v574_v49  ;;  %v667_v26 = vld [vmem:[%s15600_s3 + $0x550] sm:$0xff] }
  0x6e   : > { %913 = vmatpush.msrb.mxu2 %v638_v50  ;;  %868 = vmatpush.msrb.mxu0 %v506_v52  ;;  %v731_v27 = vld [vmem:[%s15600_s3 + $0x750] sm:$0xff]  ;;  %v8408_v52 = vld [vmem:[%s8233_s23 + $0x20] sm:$0xff] }
  0x6f   : > { %936 = vmatpush.msrb.mxu3 %v702_v51  ;;  %891 = vmatpush.msrb.mxu1 %v570_v53  ;;  %v535_v28 = vld [vmem:[%s15600_s3 + $0x130] sm:$0xff]  ;;  %v8411_v53 = vld [vmem:[%s8233_s23 + $0x28] sm:$0xff] }
  0x70   : > { %914 = vmatpush.msrb.mxu2 %v634_v54  ;;  %869 = vmatpush.msrb.mxu0 %v502_v56  ;;  %v599_v29 = vld [vmem:[%s15600_s3 + $0x330] sm:$0xff] }
  0x71   : > { %937 = vmatpush.msrb.mxu3 %v698_v55  ;;  %892 = vmatpush.msrb.mxu1 %v566_v57  ;;  %v663_v30 = vld [vmem:[%s15600_s3 + $0x530] sm:$0xff]  ;;  %v8417_v55 = vld [vmem:[%s8233_s23 + $0x38] sm:$0xff] }
  0x72   : > { %915 = vmatpush.msrb.mxu2 %v630_v58  ;;  %870 = vmatpush.msrb.mxu0 %v498_v60  ;;  %v727_v31 = vld [vmem:[%s15600_s3 + $0x730] sm:$0xff] }
  0x73   : > { %938 = vmatpush.msrb.mxu3 %v694_v59  ;;  %893 = vmatpush.msrb.mxu1 %v562_v61  ;;  %v531_v32 = vld [vmem:[%s15600_s3 + $0x110] sm:$0xff] }
  0x74   : > { %916 = vmatpush.msrb.mxu2 %v626_v62  ;;  %779 = vmatmul.f32.vlgmr.msra.gmra.mxu0 %v8248_v0  ;;  %v595_v33 = vld [vmem:[%s15600_s3 + $0x310] sm:$0xff] }
  0x75   : > { %939 = vmatpush.msrb.mxu3 %v690_v63  ;;  %802 = vmatmul.f32.vlgmr.msra.gmra.mxu1 %v8251_v1  ;;  %v659_v34 = vld [vmem:[%s15600_s3 + $0x510] sm:$0xff] }
  0x76   : > { %825 = vmatmul.f32.vlgmr.msra.gmra.mxu2 %v8254_v2  ;;  %848 = vmatmul.f32.vlgmr.msra.gmra.mxu3 %v8257_v3  ;;  %v723_v35 = vld [vmem:[%s15600_s3 + $0x710] sm:$0xff] }
  0x77   : > { %947 = vmatpush.msra.mxu0 %v559_v4  ;;  %970 = vmatpush.msra.mxu1 %v623_v5  ;;  %v527_v36 = vld [vmem:[%s15600_s3 + $0xf0] sm:$0xff] }
  0x78   : > { %993 = vmatpush.msra.mxu2 %v687_v6  ;;  %1016 = vmatpush.msra.mxu3 %v751_v7  ;;  %v591_v37 = vld [vmem:[%s15600_s3 + $0x2f0] sm:$0xff] }
  0x79   : > { %948 = vmatpush.msra.mxu0 %v555_v8  ;;  %971 = vmatpush.msra.mxu1 %v619_v9  ;;  %v655_v38 = vld [vmem:[%s15600_s3 + $0x4f0] sm:$0xff] }
  0x7a   : > { %994 = vmatpush.msra.mxu2 %v683_v10  ;;  %1017 = vmatpush.msra.mxu3 %v747_v11  ;;  %v719_v39 = vld [vmem:[%s15600_s3 + $0x6f0] sm:$0xff] }
  0x7b   : > { %949 = vmatpush.msra.mxu0 %v551_v12  ;;  %972 = vmatpush.msra.mxu1 %v615_v13  ;;  %v523_v40 = vld [vmem:[%s15600_s3 + $0xd0] sm:$0xff]  ;;  %v560_v12 = vld [vmem:[%s15600_s3 + $0x1f8] sm:$0xff] }
  0x7c   : > { %995 = vmatpush.msra.mxu2 %v679_v14  ;;  %1018 = vmatpush.msra.mxu3 %v743_v15  ;;  %v587_v41 = vld [vmem:[%s15600_s3 + $0x2d0] sm:$0xff]  ;;  %v624_v13 = vld [vmem:[%s15600_s3 + $0x3f8] sm:$0xff] }
  0x7d   : > { %950 = vmatpush.msra.mxu0 %v547_v16  ;;  %973 = vmatpush.msra.mxu1 %v611_v17  ;;  %v651_v42 = vld [vmem:[%s15600_s3 + $0x4d0] sm:$0xff]  ;;  %v688_v14 = vld [vmem:[%s15600_s3 + $0x5f8] sm:$0xff] }
  0x7e   : > { %996 = vmatpush.msra.mxu2 %v675_v18  ;;  %1019 = vmatpush.msra.mxu3 %v739_v19  ;;  %v715_v43 = vld [vmem:[%s15600_s3 + $0x6d0] sm:$0xff]  ;;  %v752_v15 = vld [vmem:[%s15600_s3 + $0x7f8] sm:$0xff] }
  0x7f   : > { %951 = vmatpush.msra.mxu0 %v543_v20  ;;  %974 = vmatpush.msra.mxu1 %v607_v21  ;;  %v519_v44 = vld [vmem:[%s15600_s3 + $0xb0] sm:$0xff]  ;;  %v556_v16 = vld [vmem:[%s15600_s3 + $0x1d8] sm:$0xff] }
  0x80   : > { %997 = vmatpush.msra.mxu2 %v671_v22  ;;  %1020 = vmatpush.msra.mxu3 %v735_v23  ;;  %v583_v45 = vld [vmem:[%s15600_s3 + $0x2b0] sm:$0xff]  ;;  %v620_v17 = vld [vmem:[%s15600_s3 + $0x3d8] sm:$0xff] }
  0x81   : > { %952 = vmatpush.msra.mxu0 %v539_v24  ;;  %975 = vmatpush.msra.mxu1 %v603_v25  ;;  %v647_v46 = vld [vmem:[%s15600_s3 + $0x4b0] sm:$0xff]  ;;  %v684_v18 = vld [vmem:[%s15600_s3 + $0x5d8] sm:$0xff] }
  0x82   : > { %998 = vmatpush.msra.mxu2 %v667_v26  ;;  %1021 = vmatpush.msra.mxu3 %v731_v27  ;;  %v711_v47 = vld [vmem:[%s15600_s3 + $0x6b0] sm:$0xff]  ;;  %v748_v19 = vld [vmem:[%s15600_s3 + $0x7d8] sm:$0xff] }
  0x83   : > { %953 = vmatpush.msra.mxu0 %v535_v28  ;;  %976 = vmatpush.msra.mxu1 %v599_v29  ;;  %v515_v48 = vld [vmem:[%s15600_s3 + $0x90] sm:$0xff]  ;;  %v552_v20 = vld [vmem:[%s15600_s3 + $0x1b8] sm:$0xff] }
  0x84   : > { %999 = vmatpush.msra.mxu2 %v663_v30  ;;  %1022 = vmatpush.msra.mxu3 %v727_v31  ;;  %v579_v49 = vld [vmem:[%s15600_s3 + $0x290] sm:$0xff]  ;;  %v616_v21 = vld [vmem:[%s15600_s3 + $0x3b8] sm:$0xff] }
  0x85   : > { %954 = vmatpush.msra.mxu0 %v531_v32  ;;  %977 = vmatpush.msra.mxu1 %v595_v33  ;;  %v643_v50 = vld [vmem:[%s15600_s3 + $0x490] sm:$0xff]  ;;  %v680_v22 = vld [vmem:[%s15600_s3 + $0x5b8] sm:$0xff] }
  0x86   : > { %1000 = vmatpush.msra.mxu2 %v659_v34  ;;  %1023 = vmatpush.msra.mxu3 %v723_v35  ;;  %v707_v51 = vld [vmem:[%s15600_s3 + $0x690] sm:$0xff]  ;;  %v744_v23 = vld [vmem:[%s15600_s3 + $0x7b8] sm:$0xff] }
  0x87   : > { %955 = vmatpush.msra.mxu0 %v527_v36  ;;  %978 = vmatpush.msra.mxu1 %v591_v37  ;;  %v8414_v54 = vld [vmem:[%s8233_s23 + $0x30] sm:$0xff]  ;;  %v548_v24 = vld [vmem:[%s15600_s3 + $0x198] sm:$0xff] }
  0x88   : > { %1001 = vmatpush.msra.mxu2 %v655_v38  ;;  %1024 = vmatpush.msra.mxu3 %v719_v39  ;;  %v511_v56 = vld [vmem:[%s15600_s3 + $0x70] sm:$0xff]  ;;  %v612_v25 = vld [vmem:[%s15600_s3 + $0x398] sm:$0xff] }
  0x89   : > { %956 = vmatpush.msra.mxu0 %v523_v40  ;;  %979 = vmatpush.msra.mxu1 %v587_v41  ;;  %v575_v57 = vld [vmem:[%s15600_s3 + $0x270] sm:$0xff]  ;;  %v676_v26 = vld [vmem:[%s15600_s3 + $0x598] sm:$0xff] }
  0x8a   : > { %1002 = vmatpush.msra.mxu2 %v651_v42  ;;  %1025 = vmatpush.msra.mxu3 %v715_v43  ;;  %v639_v58 = vld [vmem:[%s15600_s3 + $0x470] sm:$0xff]  ;;  %v740_v27 = vld [vmem:[%s15600_s3 + $0x798] sm:$0xff] }
  0x8b   : > { %957 = vmatpush.msra.mxu0 %v519_v44  ;;  %980 = vmatpush.msra.mxu1 %v583_v45  ;;  %v703_v59 = vld [vmem:[%s15600_s3 + $0x670] sm:$0xff]  ;;  %v544_v28 = vld [vmem:[%s15600_s3 + $0x178] sm:$0xff] }
  0x8c   : > { %1003 = vmatpush.msra.mxu2 %v647_v46  ;;  %1026 = vmatpush.msra.mxu3 %v711_v47  ;;  %v507_v60 = vld [vmem:[%s15600_s3 + $0x50] sm:$0xff]  ;;  %v608_v29 = vld [vmem:[%s15600_s3 + $0x378] sm:$0xff] }
  0x8d   : > { %958 = vmatpush.msra.mxu0 %v515_v48  ;;  %981 = vmatpush.msra.mxu1 %v579_v49  ;;  %v571_v61 = vld [vmem:[%s15600_s3 + $0x250] sm:$0xff]  ;;  %v672_v30 = vld [vmem:[%s15600_s3 + $0x578] sm:$0xff] }
  0x8e   : > { %1004 = vmatpush.msra.mxu2 %v643_v50  ;;  %1027 = vmatpush.msra.mxu3 %v707_v51  ;;  %v635_v62 = vld [vmem:[%s15600_s3 + $0x450] sm:$0xff]  ;;  %v736_v31 = vld [vmem:[%s15600_s3 + $0x778] sm:$0xff] }
  0x8f   : > { %782 = vmatmul.f32.gmra.mxu0 %v8408_v52  ;;  %805 = vmatmul.f32.gmra.mxu1 %v8411_v53  ;;  %v699_v63 = vld [vmem:[%s15600_s3 + $0x650] sm:$0xff]  ;;  %v540_v32 = vld [vmem:[%s15600_s3 + $0x158] sm:$0xff] }
  0x90   : > { %828 = vmatmul.f32.gmra.mxu2 %v8414_v54  ;;  %851 = vmatmul.f32.gmra.mxu3 %v8417_v55  ;;  %v503_v4 = vld [vmem:[%s15600_s3 + $0x30] sm:$0xff]  ;;  %v604_v33 = vld [vmem:[%s15600_s3 + $0x358] sm:$0xff] }
  0x91   : > { %959 = vmatpush.msra.mxu0 %v511_v56  ;;  %982 = vmatpush.msra.mxu1 %v575_v57  ;;  %v567_v5 = vld [vmem:[%s15600_s3 + $0x230] sm:$0xff]  ;;  %v668_v34 = vld [vmem:[%s15600_s3 + $0x558] sm:$0xff] }
  0x92   : > { %1005 = vmatpush.msra.mxu2 %v639_v58  ;;  %1028 = vmatpush.msra.mxu3 %v703_v59  ;;  %v631_v6 = vld [vmem:[%s15600_s3 + $0x430] sm:$0xff]  ;;  %v732_v35 = vld [vmem:[%s15600_s3 + $0x758] sm:$0xff] }
  0x93   : > { %960 = vmatpush.msra.mxu0 %v507_v60  ;;  %983 = vmatpush.msra.mxu1 %v571_v61  ;;  %v695_v7 = vld [vmem:[%s15600_s3 + $0x630] sm:$0xff]  ;;  %v536_v36 = vld [vmem:[%s15600_s3 + $0x138] sm:$0xff] }
  0x94   : > { %1006 = vmatpush.msra.mxu2 %v635_v62  ;;  %1029 = vmatpush.msra.mxu3 %v699_v63  ;;  %v499_v8 = vld [vmem:[%s15600_s3 + $0x10] sm:$0xff]  ;;  %v600_v37 = vld [vmem:[%s15600_s3 + $0x338] sm:$0xff] }
  0x95   : > { %v563_v9 = vld [vmem:[%s15600_s3 + $0x210] sm:$0xff]  ;;  %961 = vmatpush.msra.mxu0 %v503_v4  ;;  %984 = vmatpush.msra.mxu1 %v567_v5  ;;  %v664_v38 = vld [vmem:[%s15600_s3 + $0x538] sm:$0xff] }
  0x96   : > { %v627_v10 = vld [vmem:[%s15600_s3 + $0x410] sm:$0xff]  ;;  %1007 = vmatpush.msra.mxu2 %v631_v6  ;;  %1030 = vmatpush.msra.mxu3 %v695_v7  ;;  %v728_v39 = vld [vmem:[%s15600_s3 + $0x738] sm:$0xff] }
  0x97   : > { %v691_v11 = vld [vmem:[%s15600_s3 + $0x610] sm:$0xff]  ;;  %962 = vmatpush.msra.mxu0 %v499_v8  ;;  %985 = vmatpush.msra.mxu1 %v563_v9  ;;  %v532_v40 = vld [vmem:[%s15600_s3 + $0x118] sm:$0xff] }
  0x98   : > { %1008 = vmatpush.msra.mxu2 %v627_v10  ;;  %1031 = vmatpush.msra.mxu3 %v691_v11  ;;  %v596_v41 = vld [vmem:[%s15600_s3 + $0x318] sm:$0xff] }
  0x99   : > { %871 = vmatmul.f32.vlgmr.msrb.gmra.mxu0 %v8248_v0  ;;  %894 = vmatmul.f32.vlgmr.msrb.gmra.mxu1 %v8251_v1  ;;  %v660_v42 = vld [vmem:[%s15600_s3 + $0x518] sm:$0xff] }
  0x9a   : > { %917 = vmatmul.f32.vlgmr.msrb.gmra.mxu2 %v8254_v2  ;;  %940 = vmatmul.f32.vlgmr.msrb.gmra.mxu3 %v8257_v3  ;;  %v724_v43 = vld [vmem:[%s15600_s3 + $0x718] sm:$0xff] }
  0x9b   : > { %1039 = vmatpush.msrb.mxu0 %v560_v12  ;;  %1062 = vmatpush.msrb.mxu1 %v624_v13  ;;  %v528_v44 = vld [vmem:[%s15600_s3 + $0xf8] sm:$0xff] }
  0x9c   : > { %1085 = vmatpush.msrb.mxu2 %v688_v14  ;;  %1108 = vmatpush.msrb.mxu3 %v752_v15  ;;  %v592_v45 = vld [vmem:[%s15600_s3 + $0x2f8] sm:$0xff] }
  0x9d   : > { %1040 = vmatpush.msrb.mxu0 %v556_v16  ;;  %1063 = vmatpush.msrb.mxu1 %v620_v17  ;;  %v656_v46 = vld [vmem:[%s15600_s3 + $0x4f8] sm:$0xff] }
  0x9e   : > { %1086 = vmatpush.msrb.mxu2 %v684_v18  ;;  %1109 = vmatpush.msrb.mxu3 %v748_v19  ;;  %v720_v47 = vld [vmem:[%s15600_s3 + $0x6f8] sm:$0xff] }
  0x9f   : > { %1041 = vmatpush.msrb.mxu0 %v552_v20  ;;  %1064 = vmatpush.msrb.mxu1 %v616_v21  ;;  %v524_v48 = vld [vmem:[%s15600_s3 + $0xd8] sm:$0xff]  ;;  %v1191_v20 = vld [vmem:[%s15602_s5 + $0x1e0] sm:$0xff] }
  0xa0   : > { %1087 = vmatpush.msrb.mxu2 %v680_v22  ;;  %1110 = vmatpush.msrb.mxu3 %v744_v23  ;;  %v588_v49 = vld [vmem:[%s15600_s3 + $0x2d8] sm:$0xff]  ;;  %v1255_v21 = vld [vmem:[%s15602_s5 + $0x3e0] sm:$0xff] }
  0xa1   : > { %1042 = vmatpush.msrb.mxu0 %v548_v24  ;;  %1065 = vmatpush.msrb.mxu1 %v612_v25  ;;  %v652_v50 = vld [vmem:[%s15600_s3 + $0x4d8] sm:$0xff]  ;;  %v1319_v22 = vld [vmem:[%s15602_s5 + $0x5e0] sm:$0xff] }
  0xa2   : > { %1088 = vmatpush.msrb.mxu2 %v676_v26  ;;  %1111 = vmatpush.msrb.mxu3 %v740_v27  ;;  %v716_v51 = vld [vmem:[%s15600_s3 + $0x6d8] sm:$0xff]  ;;  %v1383_v23 = vld [vmem:[%s15602_s5 + $0x7e0] sm:$0xff] }
  0xa3   : > { %1043 = vmatpush.msrb.mxu0 %v544_v28  ;;  %1066 = vmatpush.msrb.mxu1 %v608_v29  ;;  %v520_v56 = vld [vmem:[%s15600_s3 + $0xb8] sm:$0xff]  ;;  %v1187_v24 = vld [vmem:[%s15602_s5 + $0x1c0] sm:$0xff] }
  0xa4   : > { %1089 = vmatpush.msrb.mxu2 %v672_v30  ;;  %1112 = vmatpush.msrb.mxu3 %v736_v31  ;;  %v584_v57 = vld [vmem:[%s15600_s3 + $0x2b8] sm:$0xff]  ;;  %v1251_v25 = vld [vmem:[%s15602_s5 + $0x3c0] sm:$0xff] }
  0xa5   : > { %1044 = vmatpush.msrb.mxu0 %v540_v32  ;;  %1067 = vmatpush.msrb.mxu1 %v604_v33  ;;  %v648_v58 = vld [vmem:[%s15600_s3 + $0x4b8] sm:$0xff]  ;;  %v1315_v26 = vld [vmem:[%s15602_s5 + $0x5c0] sm:$0xff] }
  0xa6   : > { %1090 = vmatpush.msrb.mxu2 %v668_v34  ;;  %1113 = vmatpush.msrb.mxu3 %v732_v35  ;;  %v712_v59 = vld [vmem:[%s15600_s3 + $0x6b8] sm:$0xff]  ;;  %v1379_v27 = vld [vmem:[%s15602_s5 + $0x7c0] sm:$0xff] }
  0xa7   : > { %1045 = vmatpush.msrb.mxu0 %v536_v36  ;;  %1068 = vmatpush.msrb.mxu1 %v600_v37  ;;  %v516_v60 = vld [vmem:[%s15600_s3 + $0x98] sm:$0xff]  ;;  %v1183_v28 = vld [vmem:[%s15602_s5 + $0x1a0] sm:$0xff] }
  0xa8   : > { %1091 = vmatpush.msrb.mxu2 %v664_v38  ;;  %1114 = vmatpush.msrb.mxu3 %v728_v39  ;;  %v580_v61 = vld [vmem:[%s15600_s3 + $0x298] sm:$0xff]  ;;  %v1247_v29 = vld [vmem:[%s15602_s5 + $0x3a0] sm:$0xff] }
  0xa9   : > { %1046 = vmatpush.msrb.mxu0 %v532_v40  ;;  %1069 = vmatpush.msrb.mxu1 %v596_v41  ;;  %v644_v62 = vld [vmem:[%s15600_s3 + $0x498] sm:$0xff]  ;;  %v1311_v30 = vld [vmem:[%s15602_s5 + $0x5a0] sm:$0xff] }
  0xaa   : > { %1092 = vmatpush.msrb.mxu2 %v660_v42  ;;  %1115 = vmatpush.msrb.mxu3 %v724_v43  ;;  %v708_v63 = vld [vmem:[%s15600_s3 + $0x698] sm:$0xff]  ;;  %v1375_v31 = vld [vmem:[%s15602_s5 + $0x7a0] sm:$0xff] }
  0xab   : > { %1047 = vmatpush.msrb.mxu0 %v528_v44  ;;  %1070 = vmatpush.msrb.mxu1 %v592_v45  ;;  %v512_v4 = vld [vmem:[%s15600_s3 + $0x78] sm:$0xff]  ;;  %v1179_v32 = vld [vmem:[%s15602_s5 + $0x180] sm:$0xff] }
  0xac   : > { %1093 = vmatpush.msrb.mxu2 %v656_v46  ;;  %1116 = vmatpush.msrb.mxu3 %v720_v47  ;;  %v576_v5 = vld [vmem:[%s15600_s3 + $0x278] sm:$0xff]  ;;  %v1243_v33 = vld [vmem:[%s15602_s5 + $0x380] sm:$0xff] }
  0xad   : > { %1048 = vmatpush.msrb.mxu0 %v524_v48  ;;  %1071 = vmatpush.msrb.mxu1 %v588_v49  ;;  %v640_v6 = vld [vmem:[%s15600_s3 + $0x478] sm:$0xff]  ;;  %v1307_v34 = vld [vmem:[%s15602_s5 + $0x580] sm:$0xff] }
  0xae   : > { %1094 = vmatpush.msrb.mxu2 %v652_v50  ;;  %1117 = vmatpush.msrb.mxu3 %v716_v51  ;;  %v704_v7 = vld [vmem:[%s15600_s3 + $0x678] sm:$0xff]  ;;  %v1371_v35 = vld [vmem:[%s15602_s5 + $0x780] sm:$0xff] }
  0xaf   : > { %1049 = vmatpush.msrb.mxu0 %v520_v56  ;;  %1072 = vmatpush.msrb.mxu1 %v584_v57  ;;  %v508_v8 = vld [vmem:[%s15600_s3 + $0x58] sm:$0xff]  ;;  %v1175_v36 = vld [vmem:[%s15602_s5 + $0x160] sm:$0xff] }
  0xb0   : > { %1095 = vmatpush.msrb.mxu2 %v648_v58  ;;  %1118 = vmatpush.msrb.mxu3 %v712_v59  ;;  %v572_v9 = vld [vmem:[%s15600_s3 + $0x258] sm:$0xff]  ;;  %v1239_v37 = vld [vmem:[%s15602_s5 + $0x360] sm:$0xff] }
  0xb1   : > { %874 = vmatmul.f32.gmra.mxu0 %v8408_v52  ;;  %897 = vmatmul.f32.gmra.mxu1 %v8411_v53  ;;  %v636_v10 = vld [vmem:[%s15600_s3 + $0x458] sm:$0xff]  ;;  %v1303_v38 = vld [vmem:[%s15602_s5 + $0x560] sm:$0xff] }
  0xb2   : > { %920 = vmatmul.f32.gmra.mxu2 %v8414_v54  ;;  %943 = vmatmul.f32.gmra.mxu3 %v8417_v55  ;;  %v700_v11 = vld [vmem:[%s15600_s3 + $0x658] sm:$0xff]  ;;  %v1367_v39 = vld [vmem:[%s15602_s5 + $0x760] sm:$0xff] }
  0xb3   : > { %1050 = vmatpush.msrb.mxu0 %v516_v60  ;;  %1073 = vmatpush.msrb.mxu1 %v580_v61  ;;  %v504_v12 = vld [vmem:[%s15600_s3 + $0x38] sm:$0xff]  ;;  %v1171_v40 = vld [vmem:[%s15602_s5 + $0x140] sm:$0xff] }
  0xb4   : > { %1096 = vmatpush.msrb.mxu2 %v644_v62  ;;  %1119 = vmatpush.msrb.mxu3 %v708_v63  ;;  %v568_v13 = vld [vmem:[%s15600_s3 + $0x238] sm:$0xff]  ;;  %v1235_v41 = vld [vmem:[%s15602_s5 + $0x340] sm:$0xff] }
  0xb5   : > { %1051 = vmatpush.msrb.mxu0 %v512_v4  ;;  %1074 = vmatpush.msrb.mxu1 %v576_v5  ;;  %v632_v14 = vld [vmem:[%s15600_s3 + $0x438] sm:$0xff]  ;;  %v1299_v42 = vld [vmem:[%s15602_s5 + $0x540] sm:$0xff] }
  0xb6   : > { %1097 = vmatpush.msrb.mxu2 %v640_v6  ;;  %1120 = vmatpush.msrb.mxu3 %v704_v7  ;;  %v696_v15 = vld [vmem:[%s15600_s3 + $0x638] sm:$0xff]  ;;  %v1363_v43 = vld [vmem:[%s15602_s5 + $0x740] sm:$0xff] }
  0xb7   : > { %1052 = vmatpush.msrb.mxu0 %v508_v8  ;;  %1075 = vmatpush.msrb.mxu1 %v572_v9  ;;  %v500_v16 = vld [vmem:[%s15600_s3 + $0x18] sm:$0xff]  ;;  %v1167_v44 = vld [vmem:[%s15602_s5 + $0x120] sm:$0xff] }
  0xb8   : > { %1098 = vmatpush.msrb.mxu2 %v636_v10  ;;  %1121 = vmatpush.msrb.mxu3 %v700_v11  ;;  %v564_v17 = vld [vmem:[%s15600_s3 + $0x218] sm:$0xff]  ;;  %v1231_v45 = vld [vmem:[%s15602_s5 + $0x320] sm:$0xff] }
  0xb9   : > { %1053 = vmatpush.msrb.mxu0 %v504_v12  ;;  %1076 = vmatpush.msrb.mxu1 %v568_v13  ;;  %v628_v18 = vld [vmem:[%s15600_s3 + $0x418] sm:$0xff]  ;;  %v1295_v46 = vld [vmem:[%s15602_s5 + $0x520] sm:$0xff] }
  0xba   : > { %1099 = vmatpush.msrb.mxu2 %v632_v14  ;;  %1122 = vmatpush.msrb.mxu3 %v696_v15  ;;  %v692_v19 = vld [vmem:[%s15600_s3 + $0x618] sm:$0xff]  ;;  %v1359_v47 = vld [vmem:[%s15602_s5 + $0x720] sm:$0xff] }
  0xbb   : > { %963 = vmatmul.f32.vlgmr.msra.gmra.mxu0 %v8248_v0  ;;  %986 = vmatmul.f32.vlgmr.msra.gmra.mxu1 %v8251_v1  ;;  %v1163_v48 = vld [vmem:[%s15602_s5 + $0x100] sm:$0xff] }
  0xbc   : > { %1009 = vmatmul.f32.vlgmr.msra.gmra.mxu2 %v8254_v2  ;;  %1032 = vmatmul.f32.vlgmr.msra.gmra.mxu3 %v8257_v3  ;;  %v1227_v49 = vld [vmem:[%s15602_s5 + $0x300] sm:$0xff] }
  0xbd   : > { %1054 = vmatpush.msrb.mxu0 %v500_v16  ;;  %1077 = vmatpush.msrb.mxu1 %v564_v17  ;;  %v1291_v50 = vld [vmem:[%s15602_s5 + $0x500] sm:$0xff] }
  0xbe   : > { %1100 = vmatpush.msrb.mxu2 %v628_v18  ;;  %1123 = vmatpush.msrb.mxu3 %v692_v19  ;;  %v1355_v51 = vld [vmem:[%s15602_s5 + $0x700] sm:$0xff] }
  0xbf   : > { %1397 = vmatpush.msra.mxu0 %v1191_v20  ;;  %1438 = vmatpush.msra.mxu1 %v1255_v21  ;;  %v1159_v56 = vld [vmem:[%s15602_s5 + $0xe0] sm:$0xff]  ;;  %v8891_v21 = vld [vmem:[%s8867_s25 + $0x8] sm:$0xff] }
  0xc0   : > { %1479 = vmatpush.msra.mxu2 %v1319_v22  ;;  %1520 = vmatpush.msra.mxu3 %v1383_v23  ;;  %v1223_v57 = vld [vmem:[%s15602_s5 + $0x2e0] sm:$0xff]  ;;  %v8894_v22 = vld [vmem:[%s8867_s25 + $0x10] sm:$0xff]  ;;  %v8897_v23 = vld [vmem:[%s8867_s25 + $0x18] sm:$0xff] }
  0xc1   : > { %1398 = vmatpush.msra.mxu0 %v1187_v24  ;;  %1439 = vmatpush.msra.mxu1 %v1251_v25  ;;  %v1287_v58 = vld [vmem:[%s15602_s5 + $0x4e0] sm:$0xff]  ;;  %v1320_v24 = vld [vmem:[%s15602_s5 + $0x5e8] sm:$0xff] }
  0xc2   : > { %1480 = vmatpush.msra.mxu2 %v1315_v26  ;;  %1521 = vmatpush.msra.mxu3 %v1379_v27  ;;  %v1351_v59 = vld [vmem:[%s15602_s5 + $0x6e0] sm:$0xff]  ;;  %v1192_v25 = vld [vmem:[%s15602_s5 + $0x1e8] sm:$0xff] }
  0xc3   : > { %1399 = vmatpush.msra.mxu0 %v1183_v28  ;;  %1440 = vmatpush.msra.mxu1 %v1247_v29  ;;  %v1155_v60 = vld [vmem:[%s15602_s5 + $0xc0] sm:$0xff]  ;;  %v1384_v26 = vld [vmem:[%s15602_s5 + $0x7e8] sm:$0xff] }
  0xc4   : > { %1481 = vmatpush.msra.mxu2 %v1311_v30  ;;  %1522 = vmatpush.msra.mxu3 %v1375_v31  ;;  %v1215_v61 = vld [vmem:[%s15602_s5 + $0x2a0] sm:$0xff]  ;;  %v1256_v27 = vld [vmem:[%s15602_s5 + $0x3e8] sm:$0xff] }
  0xc5   : > { %1400 = vmatpush.msra.mxu0 %v1179_v32  ;;  %1441 = vmatpush.msra.mxu1 %v1243_v33  ;;  %v1279_v62 = vld [vmem:[%s15602_s5 + $0x4a0] sm:$0xff]  ;;  %v1316_v28 = vld [vmem:[%s15602_s5 + $0x5c8] sm:$0xff] }
  0xc6   : > { %1482 = vmatpush.msra.mxu2 %v1307_v34  ;;  %1523 = vmatpush.msra.mxu3 %v1371_v35  ;;  %v1343_v63 = vld [vmem:[%s15602_s5 + $0x6a0] sm:$0xff]  ;;  %v1188_v29 = vld [vmem:[%s15602_s5 + $0x1c8] sm:$0xff] }
  0xc7   : > { %966 = vmatmul.f32.gmra.mxu0 %v8408_v52  ;;  %989 = vmatmul.f32.gmra.mxu1 %v8411_v53  ;;  %v1147_v4 = vld [vmem:[%s15602_s5 + $0x80] sm:$0xff]  ;;  %v1380_v30 = vld [vmem:[%s15602_s5 + $0x7c8] sm:$0xff] }
  0xc8   : > { %1012 = vmatmul.f32.gmra.mxu2 %v8414_v54  ;;  %1035 = vmatmul.f32.gmra.mxu3 %v8417_v55  ;;  %v1211_v5 = vld [vmem:[%s15602_s5 + $0x280] sm:$0xff]  ;;  %v1252_v31 = vld [vmem:[%s15602_s5 + $0x3c8] sm:$0xff] }
  0xc9   : > { %1401 = vmatpush.msra.mxu0 %v1175_v36  ;;  %1442 = vmatpush.msra.mxu1 %v1239_v37  ;;  %v1275_v6 = vld [vmem:[%s15602_s5 + $0x480] sm:$0xff]  ;;  %v1312_v32 = vld [vmem:[%s15602_s5 + $0x5a8] sm:$0xff] }
  0xca   : > { %1483 = vmatpush.msra.mxu2 %v1303_v38  ;;  %1524 = vmatpush.msra.mxu3 %v1367_v39  ;;  %v1339_v7 = vld [vmem:[%s15602_s5 + $0x680] sm:$0xff]  ;;  %v1184_v33 = vld [vmem:[%s15602_s5 + $0x1a8] sm:$0xff]  ;;  %v8946_v38 = vld [vmem:[%s8867_s25 + $0x30] sm:$0xff] }
  0xcb   : > { %1402 = vmatpush.msra.mxu0 %v1171_v40  ;;  %1443 = vmatpush.msra.mxu1 %v1235_v41  ;;  %v1143_v8 = vld [vmem:[%s15602_s5 + $0x60] sm:$0xff]  ;;  %v1376_v34 = vld [vmem:[%s15602_s5 + $0x7a8] sm:$0xff]  ;;  %v8949_v39 = vld [vmem:[%s8867_s25 + $0x38] sm:$0xff] }
  0xcc   : > { %1484 = vmatpush.msra.mxu2 %v1299_v42  ;;  %1525 = vmatpush.msra.mxu3 %v1363_v43  ;;  %v1207_v9 = vld [vmem:[%s15602_s5 + $0x260] sm:$0xff]  ;;  %v1248_v35 = vld [vmem:[%s15602_s5 + $0x3a8] sm:$0xff] }
  0xcd   : > { %1403 = vmatpush.msra.mxu0 %v1167_v44  ;;  %1444 = vmatpush.msra.mxu1 %v1231_v45  ;;  %v1271_v10 = vld [vmem:[%s15602_s5 + $0x460] sm:$0xff]  ;;  %v8943_v37 = vld [vmem:[%s8867_s25 + $0x28] sm:$0xff] }
  0xce   : > { %1485 = vmatpush.msra.mxu2 %v1295_v46  ;;  %1526 = vmatpush.msra.mxu3 %v1359_v47  ;;  %v1335_v11 = vld [vmem:[%s15602_s5 + $0x660] sm:$0xff]  ;;  %v1308_v40 = vld [vmem:[%s15602_s5 + $0x588] sm:$0xff] }
  0xcf   : > { %1404 = vmatpush.msra.mxu0 %v1163_v48  ;;  %1445 = vmatpush.msra.mxu1 %v1227_v49  ;;  %v1267_v12 = vld [vmem:[%s15602_s5 + $0x440] sm:$0xff]  ;;  %v1180_v41 = vld [vmem:[%s15602_s5 + $0x188] sm:$0xff] }
  0xd0   : > { %1486 = vmatpush.msra.mxu2 %v1291_v50  ;;  %1527 = vmatpush.msra.mxu3 %v1355_v51  ;;  %v1199_v13 = vld [vmem:[%s15602_s5 + $0x220] sm:$0xff]  ;;  %v1372_v42 = vld [vmem:[%s15602_s5 + $0x788] sm:$0xff] }
  0xd1   : > { %1055 = vmatmul.f32.vlgmr.msrb.gmra.mxu0 %v8248_v0  ;;  %1078 = vmatmul.f32.vlgmr.msrb.gmra.mxu1 %v8251_v1  ;;  %v1219_v0 = vld [vmem:[%s15602_s5 + $0x2c0] sm:$0xff]  ;;  %v1244_v43 = vld [vmem:[%s15602_s5 + $0x388] sm:$0xff] }
  0xd2   : > { %1101 = vmatmul.f32.vlgmr.msrb.gmra.mxu2 %v8254_v2  ;;  %1124 = vmatmul.f32.vlgmr.msrb.gmra.mxu3 %v8257_v3  ;;  %v1283_v1 = vld [vmem:[%s15602_s5 + $0x4c0] sm:$0xff]  ;;  %v1304_v44 = vld [vmem:[%s15602_s5 + $0x568] sm:$0xff] }
  0xd3   : > { %1405 = vmatpush.msra.mxu0 %v1159_v56  ;;  %1446 = vmatpush.msra.mxu1 %v1223_v57  ;;  %v1347_v2 = vld [vmem:[%s15602_s5 + $0x6c0] sm:$0xff]  ;;  %v1176_v45 = vld [vmem:[%s15602_s5 + $0x168] sm:$0xff] }
  0xd4   : > { %1487 = vmatpush.msra.mxu2 %v1287_v58  ;;  %1528 = vmatpush.msra.mxu3 %v1351_v59  ;;  %v1151_v3 = vld [vmem:[%s15602_s5 + $0xa0] sm:$0xff]  ;;  %v1368_v46 = vld [vmem:[%s15602_s5 + $0x768] sm:$0xff]  ;;  %v8998_v58 = vld [vmem:[%s8867_s25 + $0x50] sm:$0xff] }
  0xd5   : > { %1406 = vmatpush.msra.mxu0 %v1155_v60  ;;  %1447 = vmatpush.msra.mxu1 %v1219_v0  ;;  %v1263_v14 = vld [vmem:[%s15602_s5 + $0x420] sm:$0xff]  ;;  %v1240_v47 = vld [vmem:[%s15602_s5 + $0x368] sm:$0xff]  ;;  %v9001_v59 = vld [vmem:[%s8867_s25 + $0x58] sm:$0xff] }
  0xd6   : > { %1488 = vmatpush.msra.mxu2 %v1283_v1  ;;  %1529 = vmatpush.msra.mxu3 %v1347_v2  ;;  %v1327_v15 = vld [vmem:[%s15602_s5 + $0x620] sm:$0xff]  ;;  %v1300_v48 = vld [vmem:[%s15602_s5 + $0x548] sm:$0xff] }
  0xd7   : > { %1407 = vmatpush.msra.mxu0 %v1151_v3  ;;  %1448 = vmatpush.msra.mxu1 %v1215_v61  ;;  %v1131_v16 = vld [vmem:[%s15602_s5] sm:$0xff]  ;;  %v1172_v49 = vld [vmem:[%s15602_s5 + $0x148] sm:$0xff] }
  0xd8   : > { %1489 = vmatpush.msra.mxu2 %v1279_v62  ;;  %1530 = vmatpush.msra.mxu3 %v1343_v63  ;;  %v1195_v17 = vld [vmem:[%s15602_s5 + $0x200] sm:$0xff]  ;;  %v1364_v50 = vld [vmem:[%s15602_s5 + $0x748] sm:$0xff] }
  0xd9   : > { %1408 = vmatpush.msra.mxu0 %v1147_v4  ;;  %1449 = vmatpush.msra.mxu1 %v1211_v5  ;;  %v1259_v18 = vld [vmem:[%s15602_s5 + $0x400] sm:$0xff]  ;;  %v1236_v51 = vld [vmem:[%s15602_s5 + $0x348] sm:$0xff] }
  0xda   : > { %1490 = vmatpush.msra.mxu2 %v1275_v6  ;;  %1531 = vmatpush.msra.mxu3 %v1339_v7  ;;  %v1323_v19 = vld [vmem:[%s15602_s5 + $0x600] sm:$0xff]  ;;  %v8995_v57 = vld [vmem:[%s8867_s25 + $0x48] sm:$0xff] }
  0xdb   : > { %1058 = vmatmul.f32.gmra.mxu0 %v8408_v52  ;;  %1081 = vmatmul.f32.gmra.mxu1 %v8411_v53  ;;  %v1139_v52 = vld [vmem:[%s15602_s5 + $0x40] sm:$0xff]  ;;  %v1296_v60 = vld [vmem:[%s15602_s5 + $0x528] sm:$0xff] }
  0xdc   : > { %1104 = vmatmul.f32.gmra.mxu2 %v8414_v54  ;;  %1127 = vmatmul.f32.gmra.mxu3 %v8417_v55  ;;  %v1203_v53 = vld [vmem:[%s15602_s5 + $0x240] sm:$0xff]  ;;  %v1168_v0 = vld [vmem:[%s15602_s5 + $0x128] sm:$0xff] }
  0xdd   : > { %1409 = vmatpush.msra.mxu0 %v1143_v8  ;;  %1450 = vmatpush.msra.mxu1 %v1207_v9  ;;  %v1331_v54 = vld [vmem:[%s15602_s5 + $0x640] sm:$0xff]  ;;  %v1360_v1 = vld [vmem:[%s15602_s5 + $0x728] sm:$0xff] }
  0xde   : > { %1491 = vmatpush.msra.mxu2 %v1271_v10  ;;  %1532 = vmatpush.msra.mxu3 %v1335_v11  ;;  %v1135_v55 = vld [vmem:[%s15602_s5 + $0x20] sm:$0xff]  ;;  %v1232_v2 = vld [vmem:[%s15602_s5 + $0x328] sm:$0xff]  ;;  %v9050_v10 = vld [vmem:[%s8867_s25 + $0x70] sm:$0xff] }
  0xdf   : > { %1410 = vmatpush.msra.mxu0 %v1139_v52  ;;  %1451 = vmatpush.msra.mxu1 %v1203_v53  ;;  %v8888_v20 = vld [vmem:[%s8867_s25] sm:$0xff]  ;;  %v1292_v3 = vld [vmem:[%s15602_s5 + $0x508] sm:$0xff]  ;;  %v9053_v11 = vld [vmem:[%s8867_s25 + $0x78] sm:$0xff] }
  0xe0   : > { %1492 = vmatpush.msra.mxu2 %v1267_v12  ;;  %1533 = vmatpush.msra.mxu3 %v1331_v54  ;;  %v8940_v36 = vld [vmem:[%s8867_s25 + $0x20] sm:$0xff]  ;;  %v1164_v61 = vld [vmem:[%s15602_s5 + $0x108] sm:$0xff] }
  0xe1   : > { %1411 = vmatpush.msra.mxu0 %v1135_v55  ;;  %1452 = vmatpush.msra.mxu1 %v1199_v13  ;;  %v8992_v56 = vld [vmem:[%s8867_s25 + $0x40] sm:$0xff]  ;;  %v1356_v62 = vld [vmem:[%s15602_s5 + $0x708] sm:$0xff] }
  0xe2   : > { %1493 = vmatpush.msra.mxu2 %v1263_v14  ;;  %1534 = vmatpush.msra.mxu3 %v1327_v15  ;;  %v1228_v63 = vld [vmem:[%s15602_s5 + $0x308] sm:$0xff]  ;;  %v9044_v8 = vld [vmem:[%s8867_s25 + $0x60] sm:$0xff] }
  0xe3   : > { %1412 = vmatpush.msra.mxu0 %v1131_v16  ;;  %1453 = vmatpush.msra.mxu1 %v1195_v17  ;;  %v1288_v4 = vld [vmem:[%s15602_s5 + $0x4e8] sm:$0xff] }
  0xe4   : > { %1494 = vmatpush.msra.mxu2 %v1259_v18  ;;  %1535 = vmatpush.msra.mxu3 %v1323_v19  ;;  %v1160_v5 = vld [vmem:[%s15602_s5 + $0xe8] sm:$0xff] }
  0xe5   : > { %1413 = vmatmul.f32.vlgmr.msra.gmra.mxu0 %v8888_v20  ;;  %1454 = vmatmul.f32.vlgmr.msra.gmra.mxu1 %v8891_v21  ;;  %v1352_v6 = vld [vmem:[%s15602_s5 + $0x6e8] sm:$0xff] }
  0xe6   : > { %1495 = vmatmul.f32.vlgmr.msra.gmra.mxu2 %v8894_v22  ;;  %1536 = vmatmul.f32.vlgmr.msra.gmra.mxu3 %v8897_v23  ;;  %v1224_v7 = vld [vmem:[%s15602_s5 + $0x2e8] sm:$0xff] }
  0xe7   : > { %1643 = vmatpush.msrb.mxu2 %v1320_v24  ;;  %1561 = vmatpush.msrb.mxu0 %v1192_v25  ;;  %v9047_v9 = vld [vmem:[%s8867_s25 + $0x68] sm:$0xff]  ;;  %v9096_v24 = vld [vmem:[%s8867_s25 + $0x80] sm:$0xff] }
  0xe8   : > { %1684 = vmatpush.msrb.mxu3 %v1384_v26  ;;  %1602 = vmatpush.msrb.mxu1 %v1256_v27  ;;  %v1284_v52 = vld [vmem:[%s15602_s5 + $0x4c8] sm:$0xff]  ;;  %v9102_v26 = vld [vmem:[%s8867_s25 + $0x90] sm:$0xff]  ;;  %v9105_v27 = vld [vmem:[%s8867_s25 + $0x98] sm:$0xff] }
  0xe9   : > { %1644 = vmatpush.msrb.mxu2 %v1316_v28  ;;  %1562 = vmatpush.msrb.mxu0 %v1188_v29  ;;  %v1156_v53 = vld [vmem:[%s15602_s5 + $0xc8] sm:$0xff] }
  0xea   : > { %1685 = vmatpush.msrb.mxu3 %v1380_v30  ;;  %1603 = vmatpush.msrb.mxu1 %v1252_v31  ;;  %v1348_v12 = vld [vmem:[%s15602_s5 + $0x6c8] sm:$0xff] }
  0xeb   : > { %1645 = vmatpush.msrb.mxu2 %v1312_v32  ;;  %1563 = vmatpush.msrb.mxu0 %v1184_v33  ;;  %v1220_v54 = vld [vmem:[%s15602_s5 + $0x2c8] sm:$0xff] }
  0xec   : > { %1686 = vmatpush.msrb.mxu3 %v1376_v34  ;;  %1604 = vmatpush.msrb.mxu1 %v1248_v35  ;;  %v1280_v55 = vld [vmem:[%s15602_s5 + $0x4a8] sm:$0xff] }
  0xed   : > { %1416 = vmatmul.f32.gmra.mxu0 %v8940_v36  ;;  %1457 = vmatmul.f32.gmra.mxu1 %v8943_v37  ;;  %v1152_v13 = vld [vmem:[%s15602_s5 + $0xa8] sm:$0xff] }
  0xee   : > { %1498 = vmatmul.f32.gmra.mxu2 %v8946_v38  ;;  %1539 = vmatmul.f32.gmra.mxu3 %v8949_v39  ;;  %v1344_v14 = vld [vmem:[%s15602_s5 + $0x6a8] sm:$0xff] }
  0xef   : > { %1646 = vmatpush.msrb.mxu2 %v1308_v40  ;;  %1564 = vmatpush.msrb.mxu0 %v1180_v41  ;;  %v1216_v15 = vld [vmem:[%s15602_s5 + $0x2a8] sm:$0xff] }
  0xf0   : > { %1687 = vmatpush.msrb.mxu3 %v1372_v42  ;;  %1605 = vmatpush.msrb.mxu1 %v1244_v43  ;;  %v1276_v16 = vld [vmem:[%s15602_s5 + $0x488] sm:$0xff] }
  0xf1   : > { %1647 = vmatpush.msrb.mxu2 %v1304_v44  ;;  %1565 = vmatpush.msrb.mxu0 %v1176_v45  ;;  %v1148_v17 = vld [vmem:[%s15602_s5 + $0x88] sm:$0xff]  ;;  %v9107_v28 = vpop.f32.mrf.mxu0 }
  0xf2   : > { %1688 = vmatpush.msrb.mxu3 %v1368_v46  ;;  %1606 = vmatpush.msrb.mxu1 %v1240_v47  ;;  %v1212_v18 = vld [vmem:[%s15602_s5 + $0x288] sm:$0xff]  ;;  %v9117_v31 = vpop.f32.mrf.mxu1  ;;  %v9152_v46 = vld [vmem:[%s8867_s25 + $0xa0] sm:$0xff] }
  0xf3   : > { %1648 = vmatpush.msrb.mxu2 %v1300_v48  ;;  %1566 = vmatpush.msrb.mxu0 %v1172_v49  ;;  %v1340_v19 = vld [vmem:[%s15602_s5 + $0x688] sm:$0xff] }
  0xf4   : > { %1689 = vmatpush.msrb.mxu3 %v1364_v50  ;;  %1607 = vmatpush.msrb.mxu1 %v1236_v51  ;;  %v9099_v25 = vld [vmem:[%s8867_s25 + $0x88] sm:$0xff]  ;;  %v9162_v50 = vld [vmem:[%s8867_s25 + $0xb0] sm:$0xff]  ;;  %v9165_v51 = vld [vmem:[%s8867_s25 + $0xb8] sm:$0xff] }
  0xf5   : > { %1419 = vmatmul.f32.gmra.mxu0 %v8992_v56  ;;  %1460 = vmatmul.f32.gmra.mxu1 %v8995_v57  ;;  %v1144_v29 = vld [vmem:[%s15602_s5 + $0x68] sm:$0xff] }
  0xf6   : > { %1501 = vmatmul.f32.gmra.mxu2 %v8998_v58  ;;  %1542 = vmatmul.f32.gmra.mxu3 %v9001_v59  ;;  %v1208_v30 = vld [vmem:[%s15602_s5 + $0x268] sm:$0xff] }
  0xf7   : > { %1649 = vmatpush.msrb.mxu2 %v1296_v60  ;;  %1567 = vmatpush.msrb.mxu0 %v1168_v0  ;;  %v1272_v32 = vld [vmem:[%s15602_s5 + $0x468] sm:$0xff] }
  0xf8   : > { %1690 = vmatpush.msrb.mxu3 %v1360_v1  ;;  %1608 = vmatpush.msrb.mxu1 %v1232_v2  ;;  %v1336_v33 = vld [vmem:[%s15602_s5 + $0x668] sm:$0xff] }
  0xf9   : > { %1650 = vmatpush.msrb.mxu2 %v1292_v3  ;;  %1568 = vmatpush.msrb.mxu0 %v1164_v61  ;;  %v1140_v34 = vld [vmem:[%s15602_s5 + $0x48] sm:$0xff]  ;;  %v9157_v48 = vpop.f32.mrf.mxu2  ;;  %v9159_v49 = vpop.f32.mrf.mxu3 }
  0xfa   : > { %1691 = vmatpush.msrb.mxu3 %v1356_v62  ;;  %1609 = vmatpush.msrb.mxu1 %v1228_v63  ;;  %v1204_v35 = vld [vmem:[%s15602_s5 + $0x248] sm:$0xff]  ;;  %v1321_v62 = vld [vmem:[%s15602_s5 + $0x5f0] sm:$0xff] }
  0xfb   : > { %1651 = vmatpush.msrb.mxu2 %v1288_v4  ;;  %1569 = vmatpush.msrb.mxu0 %v1160_v5  ;;  %v1268_v40 = vld [vmem:[%s15602_s5 + $0x448] sm:$0xff]  ;;  %v1193_v63 = vld [vmem:[%s15602_s5 + $0x1f0] sm:$0xff] }
  0xfc   : > { %1692 = vmatpush.msrb.mxu3 %v1352_v6  ;;  %1610 = vmatpush.msrb.mxu1 %v1224_v7  ;;  %v1332_v41 = vld [vmem:[%s15602_s5 + $0x648] sm:$0xff]  ;;  %v1385_v4 = vld [vmem:[%s15602_s5 + $0x7f0] sm:$0xff]  ;;  %v9205_v7 = vld [vmem:[%s15601_s4] sm:$0xf] }
  0xfd   : > { %1422 = vmatmul.f32.gmra.mxu0 %v9044_v8  ;;  %1463 = vmatmul.f32.gmra.mxu1 %v9047_v9  ;;  %v1136_v42 = vld [vmem:[%s15602_s5 + $0x28] sm:$0xff]  ;;  %v1257_v5 = vld [vmem:[%s15602_s5 + $0x3f0] sm:$0xff] }
  0xfe   : > { %1504 = vmatmul.f32.gmra.mxu2 %v9050_v10  ;;  %1545 = vmatmul.f32.gmra.mxu3 %v9053_v11  ;;  %v1200_v43 = vld [vmem:[%s15602_s5 + $0x228] sm:$0xff]  ;;  %v1317_v6 = vld [vmem:[%s15602_s5 + $0x5d0] sm:$0xff] }
  0xff   : > { %1652 = vmatpush.msrb.mxu2 %v1284_v52  ;;  %1570 = vmatpush.msrb.mxu0 %v1156_v53  ;;  %v1264_v44 = vld [vmem:[%s15602_s5 + $0x428] sm:$0xff]  ;;  %v9208_v52 = vld [vmem:[%s8867_s25 + $0xc0] sm:$0xff] }
 0x100   : > { %1693 = vmatpush.msrb.mxu3 %v1348_v12  ;;  %1611 = vmatpush.msrb.mxu1 %v1220_v54  ;;  %v1328_v45 = vld [vmem:[%s15602_s5 + $0x628] sm:$0xff]  ;;  %v9214_v12 = vld [vmem:[%s8867_s25 + $0xd0] sm:$0xff]  ;;  %v9217_v54 = vld [vmem:[%s8867_s25 + $0xd8] sm:$0xff] }
 0x101   : > { %1653 = vmatpush.msrb.mxu2 %v1280_v55  ;;  %1571 = vmatpush.msrb.mxu0 %v1152_v13  ;;  %v9155_v47 = vld [vmem:[%s8867_s25 + $0xa8] sm:$0xff] }
 0x102   : > { %1694 = vmatpush.msrb.mxu3 %v1344_v14  ;;  %1612 = vmatpush.msrb.mxu1 %v1216_v15  ;;  %v1132_v0 = vld [vmem:[%s15602_s5 + $0x8] sm:$0xff]  ;;  %v15613_v14 = vperm.slane %v9205_v7, 1 }
 0x103   : > { %1654 = vmatpush.msrb.mxu2 %v1276_v16  ;;  %1572 = vmatpush.msrb.mxu0 %v1148_v17  ;;  %v1196_v1 = vld [vmem:[%s15602_s5 + $0x208] sm:$0xff]  ;;  %v1189_v16 = vld [vmem:[%s15602_s5 + $0x1d0] sm:$0xff] }
 0x104   : > { %1613 = vmatpush.msrb.mxu1 %v1212_v18  ;;  %1695 = vmatpush.msrb.mxu3 %v1340_v19  ;;  %v1260_v3 = vld [vmem:[%s15602_s5 + $0x408] sm:$0xff]  ;;  %v1381_v17 = vld [vmem:[%s15602_s5 + $0x7d0] sm:$0xff] }
 0x105   : > { %1425 = vmatmul.f32.gmra.mxu0 %v9096_v24  ;;  %1466 = vmatmul.f32.gmra.mxu1 %v9099_v25  ;;  %v1324_v61 = vld [vmem:[%s15602_s5 + $0x608] sm:$0xff]  ;;  %v1253_v18 = vld [vmem:[%s15602_s5 + $0x3d0] sm:$0xff] }
 0x106   : > { %1507 = vmatmul.f32.gmra.mxu2 %v9102_v26  ;;  %1548 = vmatmul.f32.gmra.mxu3 %v9105_v27  ;;  %v9211_v53 = vld [vmem:[%s8867_s25 + $0xc8] sm:$0xff] }
 0x107   : > { %1573 = vmatpush.msrb.mxu0 %v1144_v29  ;;  %1614 = vmatpush.msrb.mxu1 %v1208_v30  ;;  %v1313_v30 = vld [vmem:[%s15602_s5 + $0x5b0] sm:$0xff] }
 0x108   : > { %1655 = vmatpush.msrb.mxu2 %v1272_v32  ;;  %1696 = vmatpush.msrb.mxu3 %v1336_v33  ;;  %v1185_v32 = vld [vmem:[%s15602_s5 + $0x1b0] sm:$0xff] }
 0x109   : > { %1574 = vmatpush.msrb.mxu0 %v1140_v34  ;;  %1615 = vmatpush.msrb.mxu1 %v1204_v35  ;;  %v1377_v33 = vld [vmem:[%s15602_s5 + $0x7b0] sm:$0xff] }
 0x10a   : > { %1656 = vmatpush.msrb.mxu2 %v1268_v40  ;;  %1697 = vmatpush.msrb.mxu3 %v1332_v41  ;;  %v1249_v34 = vld [vmem:[%s15602_s5 + $0x3b0] sm:$0xff]  ;;  %v9255_v40 = vld [vmem:[%s8867_s25 + $0xe0] sm:$0xff]  ;;  %v9258_v41 = vld [vmem:[%s8867_s25 + $0xe8] sm:$0xff] }
 0x10b   : > { %1575 = vmatpush.msrb.mxu0 %v1136_v42  ;;  %1616 = vmatpush.msrb.mxu1 %v1200_v43  ;;  %v1309_v35 = vld [vmem:[%s15602_s5 + $0x590] sm:$0xff] }
 0x10c   : > { %v9167_v60 = vpop.f32.mrf.mxu0  ;;  %1657 = vmatpush.msrb.mxu2 %v1264_v44  ;;  %1698 = vmatpush.msrb.mxu3 %v1328_v45  ;;  %v9177_v2 = vpop.f32.mrf.mxu1  ;;  %v9261_v43 = vld [vmem:[%s8867_s25 + $0xf0] sm:$0xff]  ;;  %v9264_v44 = vld [vmem:[%s8867_s25 + $0xf8] sm:$0xff] }
 0x10d   : > { %15663 = vst [vmem:[#allocation8_spill] sm:$0xff] %v9167_v60  ;;  %1428 = vmatmul.f32.gmra.mxu0 %v9152_v46  ;;  %1469 = vmatmul.f32.gmra.mxu1 %v9155_v47 }
 0x10e   : > { %15664 = vst [vmem:[#allocation9_spill] sm:$0xff] %v9177_v2  ;;  %1510 = vmatmul.f32.gmra.mxu2 %v9162_v50  ;;  %1551 = vmatmul.f32.gmra.mxu3 %v9165_v51 }
 0x10f   : > { %1576 = vmatpush.msrb.mxu0 %v1132_v0  ;;  %1617 = vmatpush.msrb.mxu1 %v1196_v1 }
 0x110   : > { %1658 = vmatpush.msrb.mxu2 %v1260_v3  ;;  %1699 = vmatpush.msrb.mxu3 %v1324_v61  ;;  %v1181_v3 = vld [vmem:[%s15602_s5 + $0x190] sm:$0xff] }
 0x111   : > { %1725 = vmatpush.msra.mxu0 %v1193_v63  ;;  %1766 = vmatpush.msra.mxu1 %v1257_v5  ;;  %v1373_v61 = vld [vmem:[%s15602_s5 + $0x790] sm:$0xff] }
 0x112   : > { %1807 = vmatpush.msra.mxu2 %v1321_v62  ;;  %1848 = vmatpush.msra.mxu3 %v1385_v4  ;;  %v1245_v62 = vld [vmem:[%s15602_s5 + $0x390] sm:$0xff] }
 0x113   : > { %v9219_v55 = vpop.f32.mrf.mxu2  ;;  %v9221_v13 = vpop.f32.mrf.mxu3  ;;  %1726 = vmatpush.msra.mxu0 %v1189_v16  ;;  %1767 = vmatpush.msra.mxu1 %v1253_v18  ;;  %v1305_v63 = vld [vmem:[%s15602_s5 + $0x570] sm:$0xff] }
 0x114   : > { %15665 = vst [vmem:[#allocation10_spill] sm:$0xff] %v9219_v55  ;;  %1808 = vmatpush.msra.mxu2 %v1317_v6  ;;  %1849 = vmatpush.msra.mxu3 %v1381_v17  ;;  %v1177_v4 = vld [vmem:[%s15602_s5 + $0x170] sm:$0xff] }
 0x115   : > { %15666 = vst [vmem:[#allocation11_spill] sm:$0xff] %v9221_v13  ;;  %1431 = vmatmul.f32.gmra.mxu0 %v9208_v52  ;;  %1472 = vmatmul.f32.gmra.mxu1 %v9211_v53  ;;  %v1369_v5 = vld [vmem:[%s15602_s5 + $0x770] sm:$0xff] }
 0x116   : > { %1513 = vmatmul.f32.gmra.mxu2 %v9214_v12  ;;  %1554 = vmatmul.f32.gmra.mxu3 %v9217_v54  ;;  %v872_v15 = vpop.f32.mrf.mxu0  ;;  %v895_v29 = vpop.f32.mrf.mxu1  ;;  %v1301_v16 = vld [vmem:[%s15602_s5 + $0x550] sm:$0xff] }
 0x117   : > { %v873_v19 = vadd.f32 %v872_v15, %v15613_v14  ;;  %1809 = vmatpush.msra.mxu2 %v1313_v30  ;;  %1727 = vmatpush.msra.mxu0 %v1185_v32  ;;  %v1241_v15 = vld [vmem:[%s15602_s5 + $0x370] sm:$0xff] }
 0x118   : > { %1850 = vmatpush.msra.mxu3 %v1377_v33  ;;  %1768 = vmatpush.msra.mxu1 %v1249_v34  ;;  %v1173_v17 = vld [vmem:[%s15602_s5 + $0x150] sm:$0xff] }
 0x119   : > { %v896_v42 = vadd.f32 %v895_v29, %v873_v19  ;;  %1810 = vmatpush.msra.mxu2 %v1309_v35  ;;  %1728 = vmatpush.msra.mxu0 %v1181_v3  ;;  %v1365_v18 = vld [vmem:[%s15602_s5 + $0x750] sm:$0xff] }
 0x11a   : > { %1851 = vmatpush.msra.mxu3 %v1373_v61  ;;  %1769 = vmatpush.msra.mxu1 %v1245_v62  ;;  %v1237_v19 = vld [vmem:[%s15602_s5 + $0x350] sm:$0xff] }
 0x11b   : > { %1811 = vmatpush.msra.mxu2 %v1305_v63  ;;  %1729 = vmatpush.msra.mxu0 %v1177_v4  ;;  %v1297_v29 = vld [vmem:[%s15602_s5 + $0x530] sm:$0xff] }
 0x11c   : > { %1852 = vmatpush.msra.mxu3 %v1369_v5  ;;  %1770 = vmatpush.msra.mxu1 %v1241_v15  ;;  %v1169_v30 = vld [vmem:[%s15602_s5 + $0x130] sm:$0xff] }
 0x11d   : > { %1434 = vmatmul.f32.gmra.mxu0 %v9255_v40  ;;  %1475 = vmatmul.f32.gmra.mxu1 %v9258_v41  ;;  %v918_v45 = vpop.f32.mrf.mxu2  ;;  %v941_v0 = vpop.f32.mrf.mxu3  ;;  %v1361_v32 = vld [vmem:[%s15602_s5 + $0x730] sm:$0xff] }
 0x11e   : > { %1516 = vmatmul.f32.gmra.mxu2 %v9261_v43  ;;  %1557 = vmatmul.f32.gmra.mxu3 %v9264_v44  ;;  %v919_v1 = vadd.f32 %v918_v45, %v896_v42  ;;  %v1233_v33 = vld [vmem:[%s15602_s5 + $0x330] sm:$0xff] }
 0x11f   : > { %1812 = vmatpush.msra.mxu2 %v1301_v16  ;;  %1730 = vmatpush.msra.mxu0 %v1173_v17  ;;  %v1293_v34 = vld [vmem:[%s15602_s5 + $0x510] sm:$0xff] }
 0x120   : > { %v9288_v6 = vadd.f32 %v941_v0, %v919_v1  ;;  %1853 = vmatpush.msra.mxu3 %v1365_v18  ;;  %1771 = vmatpush.msra.mxu1 %v1237_v19  ;;  %v1165_v35 = vld [vmem:[%s15602_s5 + $0x110] sm:$0xff] }
 0x121   : > { %1813 = vmatpush.msra.mxu2 %v1297_v29  ;;  %1731 = vmatpush.msra.mxu0 %v1169_v30  ;;  %v1357_v42 = vld [vmem:[%s15602_s5 + $0x710] sm:$0xff] }
 0x122   : > { %15667 = vst [vmem:[#allocation12_spill] sm:$0xff] %v9288_v6  ;;  %3145 = vrot.lane.b32.xlu2 %v9288_v6, %s7740_s19  ;;  %1854 = vmatpush.msra.mxu3 %v1361_v32  ;;  %v1229_v45 = vld [vmem:[%s15602_s5 + $0x310] sm:$0xff]  ;;  %v1314_v6 = vld [vmem:[%s15602_s5 + $0x5b8] sm:$0xff] }
 0x123   : > { %1772 = vmatpush.msra.mxu1 %v1233_v33  ;;  %1814 = vmatpush.msra.mxu2 %v1293_v34  ;;  %v1289_v0 = vld [vmem:[%s15602_s5 + $0x4f0] sm:$0xff] }
 0x124   : > { %1732 = vmatpush.msra.mxu0 %v1165_v35  ;;  %1855 = vmatpush.msra.mxu3 %v1357_v42  ;;  %v1161_v1 = vld [vmem:[%s15602_s5 + $0xf0] sm:$0xff] }
 0x125   : > { %1577 = vmatmul.f32.vlgmr.msrb.gmra.mxu0 %v8888_v20  ;;  %1618 = vmatmul.f32.vlgmr.msrb.gmra.mxu1 %v8891_v21  ;;  %v1353_v3 = vld [vmem:[%s15602_s5 + $0x6f0] sm:$0xff] }
 0x126   : > { %1659 = vmatmul.f32.vlgmr.msrb.gmra.mxu2 %v8894_v22  ;;  %1700 = vmatmul.f32.vlgmr.msrb.gmra.mxu3 %v8897_v23  ;;  %v1225_v63 = vld [vmem:[%s15602_s5 + $0x2f0] sm:$0xff] }
 0x127   : > { %1773 = vmatpush.msra.mxu1 %v1229_v45  ;;  %1815 = vmatpush.msra.mxu2 %v1289_v0  ;;  %v1285_v4 = vld [vmem:[%s15602_s5 + $0x4d0] sm:$0xff] }
 0x128   : > { %1733 = vmatpush.msra.mxu0 %v1161_v1  ;;  %1856 = vmatpush.msra.mxu3 %v1353_v3  ;;  %v1157_v5 = vld [vmem:[%s15602_s5 + $0xd0] sm:$0xff] }
 0x129   : > { %1774 = vmatpush.msra.mxu1 %v1225_v63  ;;  %1816 = vmatpush.msra.mxu2 %v1285_v4  ;;  %v1349_v15 = vld [vmem:[%s15602_s5 + $0x6d0] sm:$0xff] }
 0x12a   : > { %v1221_v16 = vld [vmem:[%s15602_s5 + $0x2d0] sm:$0xff]  ;;  %1734 = vmatpush.msra.mxu0 %v1157_v5  ;;  %1857 = vmatpush.msra.mxu3 %v1349_v15 }
 0x12b   : > { %v1281_v19 = vld [vmem:[%s15602_s5 + $0x4b0] sm:$0xff]  ;;  %1775 = vmatpush.msra.mxu1 %v1221_v16 }
 0x12c   : > { %1817 = vmatpush.msra.mxu2 %v1281_v19  ;;  %v1153_v29 = vld [vmem:[%s15602_s5 + $0xb0] sm:$0xff] }
 0x12d   : > { %1580 = vmatmul.f32.gmra.mxu0 %v8940_v36  ;;  %1621 = vmatmul.f32.gmra.mxu1 %v8943_v37  ;;  %v1345_v30 = vld [vmem:[%s15602_s5 + $0x6b0] sm:$0xff] }
 0x12e   : > { %1662 = vmatmul.f32.gmra.mxu2 %v8946_v38  ;;  %1703 = vmatmul.f32.gmra.mxu3 %v8949_v39  ;;  %v9348_v61 = vpop.f32.mrf.mxu0  ;;  %v9350_v62 = vpop.f32.mrf.mxu1  ;;  %v1217_v34 = vld [vmem:[%s15602_s5 + $0x2b0] sm:$0xff] }
 0x12f   : > { %1735 = vmatpush.msra.mxu0 %v1153_v29  ;;  %1858 = vmatpush.msra.mxu3 %v1345_v30  ;;  %v1277_v35 = vld [vmem:[%s15602_s5 + $0x490] sm:$0xff] }
 0x130   : > { %1776 = vmatpush.msra.mxu1 %v1217_v34  ;;  %v1149_v42 = vld [vmem:[%s15602_s5 + $0x90] sm:$0xff]  ;;  %1818 = vmatpush.msra.mxu2 %v1277_v35 }
 0x131   : > { %1736 = vmatpush.msra.mxu0 %v1149_v42  ;;  %v1213_v45 = vld [vmem:[%s15602_s5 + $0x290] sm:$0xff] }
 0x132   : > { %v1341_v0 = vld [vmem:[%s15602_s5 + $0x690] sm:$0xff]  ;;  %1777 = vmatpush.msra.mxu1 %v1213_v45 }
 0x133   : > { %v1145_v1 = vld [vmem:[%s15602_s5 + $0x70] sm:$0xff]  ;;  %1859 = vmatpush.msra.mxu3 %v1341_v0 }
 0x134   : > { %v1209_v3 = vld [vmem:[%s15602_s5 + $0x270] sm:$0xff]  ;;  %1737 = vmatpush.msra.mxu0 %v1145_v1 }
 0x135   : > { %1583 = vmatmul.f32.gmra.mxu0 %v8992_v56  ;;  %1624 = vmatmul.f32.gmra.mxu1 %v8995_v57  ;;  %v9371_v17 = vpop.f32.mrf.mxu2  ;;  %v9373_v18 = vpop.f32.mrf.mxu3  ;;  %v1273_v63 = vld [vmem:[%s15602_s5 + $0x470] sm:$0xff] }
 0x136   : > { %1665 = vmatmul.f32.gmra.mxu2 %v8998_v58  ;;  %1706 = vmatmul.f32.gmra.mxu3 %v9001_v59  ;;  %v1337_v4 = vld [vmem:[%s15602_s5 + $0x670] sm:$0xff] }
 0x137   : > { %1819 = vmatpush.msra.mxu2 %v1273_v63  ;;  %v1141_v5 = vld [vmem:[%s15602_s5 + $0x50] sm:$0xff]  ;;  %1778 = vmatpush.msra.mxu1 %v1209_v3 }
 0x138   : > { %v9384_v32 = vpop.f32.mrf.mxu0  ;;  %v9386_v33 = vpop.f32.mrf.mxu1  ;;  %v1205_v15 = vld [vmem:[%s15602_s5 + $0x250] sm:$0xff]  ;;  %1860 = vmatpush.msra.mxu3 %v1337_v4  ;;  %1738 = vmatpush.msra.mxu0 %v1141_v5 }
 0x139   : > { %15668 = vst [vmem:[#allocation13_spill] sm:$0xff] %v9384_v32  ;;  %v1269_v16 = vld [vmem:[%s15602_s5 + $0x450] sm:$0xff]  ;;  %1779 = vmatpush.msra.mxu1 %v1205_v15 }
 0x13a   : > { %15669 = vst [vmem:[#allocation14_spill] sm:$0xff] %v9386_v33  ;;  %v1333_v30 = vld [vmem:[%s15602_s5 + $0x650] sm:$0xff]  ;;  %1820 = vmatpush.msra.mxu2 %v1269_v16 }
 0x13b   : > { %v1137_v34 = vld [vmem:[%s15602_s5 + $0x30] sm:$0xff]  ;;  %1861 = vmatpush.msra.mxu3 %v1333_v30  ;;  %v758_v30 = vperm.slane %v9205_v7, 3 }
 0x13c   : > { %v1265_v35 = vld [vmem:[%s15602_s5 + $0x430] sm:$0xff]  ;;  %1739 = vmatpush.msra.mxu0 %v1137_v34 }
 0x13d   : > { %1586 = vmatmul.f32.gmra.mxu0 %v9044_v8  ;;  %1627 = vmatmul.f32.gmra.mxu1 %v9047_v9  ;;  %v1201_v0 = vld [vmem:[%s15602_s5 + $0x230] sm:$0xff] }
 0x13e   : > { %1668 = vmatmul.f32.gmra.mxu2 %v9050_v10  ;;  %1709 = vmatmul.f32.gmra.mxu3 %v9053_v11  ;;  %v1329_v1 = vld [vmem:[%s15602_s5 + $0x630] sm:$0xff] }
 0x13f   : > { %v9428_v19 = vpop.f32.mrf.mxu2  ;;  %v9430_v29 = vpop.f32.mrf.mxu3  ;;  %1821 = vmatpush.msra.mxu2 %v1265_v35  ;;  %v1133_v3 = vld [vmem:[%s15602_s5 + $0x10] sm:$0xff]  ;;  %1780 = vmatpush.msra.mxu1 %v1201_v0  ;;  %v1322_v0 = vld [vmem:[%s15602_s5 + $0x5f8] sm:$0xff] }
 0x140   : > { %15670 = vst [vmem:[#allocation15_spill] sm:$0xff] %v9428_v19  ;;  %v1261_v63 = vld [vmem:[%s15602_s5 + $0x410] sm:$0xff]  ;;  %1862 = vmatpush.msra.mxu3 %v1329_v1  ;;  %1740 = vmatpush.msra.mxu0 %v1133_v3  ;;  %v1370_v19 = vld [vmem:[%s15602_s5 + $0x778] sm:$0xff] }
 0x141   : > { %15671 = vst [vmem:[#allocation16_spill] sm:$0xff] %v9430_v29  ;;  %v1197_v4 = vld [vmem:[%s15602_s5 + $0x210] sm:$0xff]  ;;  %1822 = vmatpush.msra.mxu2 %v1261_v63  ;;  %v1194_v63 = vld [vmem:[%s15602_s5 + $0x1f8] sm:$0xff] }
 0x142   : > { %v1325_v5 = vld [vmem:[%s15602_s5 + $0x610] sm:$0xff]  ;;  %1781 = vmatpush.msra.mxu1 %v1197_v4  ;;  %v1386_v4 = vld [vmem:[%s15602_s5 + $0x7f8] sm:$0xff]  ;;  %1889 = vmatpush.msrb.mxu0 %v1194_v63 }
 0x143   : > { %1863 = vmatpush.msra.mxu3 %v1325_v5  ;;  %1971 = vmatpush.msrb.mxu2 %v1322_v0  ;;  %v1382_v63 = vld [vmem:[%s15602_s5 + $0x7d8] sm:$0xff]  ;;  %v2295_v32 = vld [vmem:[%s15604_s7 + $0x790] sm:$0xff] }
 0x144   : > { %v9441_v42 = vpop.f32.mrf.mxu0  ;;  %v9443_v45 = vpop.f32.mrf.mxu1 }
 0x145   : > { %1589 = vmatmul.f32.gmra.mxu0 %v9096_v24  ;;  %1630 = vmatmul.f32.gmra.mxu1 %v9099_v25 }
 0x146   : > { %1671 = vmatmul.f32.gmra.mxu2 %v9102_v26  ;;  %1712 = vmatmul.f32.gmra.mxu3 %v9105_v27 }
 0x147   : > { %2012 = vmatpush.msrb.mxu3 %v1386_v4  ;;  %v1254_v4 = vld [vmem:[%s15602_s5 + $0x3d8] sm:$0xff] }
 0x149   : > { %2013 = vmatpush.msrb.mxu3 %v1382_v63 }
 0x14b   : > { %v9467_v15 = vpop.f32.mrf.mxu2  ;;  %v9469_v16 = vpop.f32.mrf.mxu3 }
 0x14c   : > { %15672 = vst [vmem:[#allocation17_spill] sm:$0xff] %v9467_v15 }
 0x14d   : > { %15673 = vst [vmem:[#allocation18_spill] sm:$0xff] %v9469_v16  ;;  %1592 = vmatmul.f32.gmra.mxu0 %v9152_v46  ;;  %1633 = vmatmul.f32.gmra.mxu1 %v9155_v47 }
 0x14e   : > { %1674 = vmatmul.f32.gmra.mxu2 %v9162_v50  ;;  %1715 = vmatmul.f32.gmra.mxu3 %v9165_v51  ;;  %v1056_v34 = vpop.f32.mrf.mxu0  ;;  %v1079_v35 = vpop.f32.mrf.mxu1 }
 0x14f   : > { %v1057_v1 = vadd.f32 %v1056_v34, %v758_v30  ;;  %v1258_v34 = vld [vmem:[%s15602_s5 + $0x3f8] sm:$0xff] }
 0x150   : > { %1930 = vmatpush.msrb.mxu1 %v1258_v34  ;;  %v1186_v34 = vld [vmem:[%s15602_s5 + $0x1b8] sm:$0xff] }
 0x151   : > { %v1080_v3 = vadd.f32 %v1079_v35, %v1057_v1  ;;  %v1318_v35 = vld [vmem:[%s15602_s5 + $0x5d8] sm:$0xff] }
 0x152   : > { %v1190_v1 = vld [vmem:[%s15602_s5 + $0x1d8] sm:$0xff]  ;;  %1972 = vmatpush.msrb.mxu2 %v1318_v35  ;;  %1931 = vmatpush.msrb.mxu1 %v1254_v4 }
 0x153   : > { %1890 = vmatpush.msrb.mxu0 %v1190_v1  ;;  %v1378_v35 = vld [vmem:[%s15602_s5 + $0x7b8] sm:$0xff] }
 0x154   : > { %1973 = vmatpush.msrb.mxu2 %v1314_v6  ;;  %2014 = vmatpush.msrb.mxu3 %v1378_v35  ;;  %v1250_v6 = vld [vmem:[%s15602_s5 + $0x3b8] sm:$0xff] }
 0x155   : > { %1595 = vmatmul.f32.gmra.mxu0 %v9208_v52  ;;  %1636 = vmatmul.f32.gmra.mxu1 %v9211_v53  ;;  %v1102_v5 = vpop.f32.mrf.mxu2  ;;  %v1125_v14 = vpop.f32.mrf.mxu3 }
 0x156   : > { %1677 = vmatmul.f32.gmra.mxu2 %v9214_v12  ;;  %1718 = vmatmul.f32.gmra.mxu3 %v9217_v54  ;;  %v1103_v0 = vadd.f32 %v1102_v5, %v1080_v3 }
 0x157   : > { %1891 = vmatpush.msrb.mxu0 %v1186_v34  ;;  %1932 = vmatpush.msrb.mxu1 %v1250_v6 }
 0x158   : > { %v9507_v13 = vadd.f32 %v1125_v14, %v1103_v0  ;;  %v1059_v3 = vpop.f32.mrf.mxu0  ;;  %v1082_v5 = vpop.f32.mrf.mxu1  ;;  %v9518_v14 = vld [vmem:[%s15603_s6] sm:$0xf]  ;;  %v1374_v0 = vld [vmem:[%s15602_s5 + $0x798] sm:$0xff] }
 0x159   : > { %v1060_v55 = vadd.f32 %v1059_v3, %v758_v30  ;;  %v1310_v30 = vld [vmem:[%s15602_s5 + $0x598] sm:$0xff]  ;;  %v9537_v4 = vperm.slane %v9518_v14, 0  ;;  %2015 = vmatpush.msrb.mxu3 %v1374_v0 }
 0x15a   : > { %15674 = vst [vmem:[#allocation19_spill] sm:$0xff] %v9507_v13  ;;  %1974 = vmatpush.msrb.mxu2 %v1310_v30  ;;  %v1246_v3 = vld [vmem:[%s15602_s5 + $0x398] sm:$0xff] }
 0x15b   : > { %v1083_v2 = vadd.f32 %v1082_v5, %v1060_v55  ;;  %v1182_v55 = vld [vmem:[%s15602_s5 + $0x198] sm:$0xff]  ;;  %1933 = vmatpush.msrb.mxu1 %v1246_v3  ;;  %2016 = vmatpush.msrb.mxu3 %v1370_v19 }
 0x15c   : > { %v1306_v5 = vld [vmem:[%s15602_s5 + $0x578] sm:$0xff]  ;;  %1892 = vmatpush.msrb.mxu0 %v1182_v55 }
 0x15d   : > { %1598 = vmatmul.f32.gmra.mxu0 %v9255_v40  ;;  %1639 = vmatmul.f32.gmra.mxu1 %v9258_v41  ;;  %v1178_v30 = vld [vmem:[%s15602_s5 + $0x178] sm:$0xff] }
 0x15e   : > { %1680 = vmatmul.f32.gmra.mxu2 %v9261_v43  ;;  %1721 = vmatmul.f32.gmra.mxu3 %v9264_v44 }
 0x15f   : > { %v1105_v1 = vpop.f32.mrf.mxu2  ;;  %v1128_v63 = vpop.f32.mrf.mxu3  ;;  %1975 = vmatpush.msrb.mxu2 %v1306_v5  ;;  %1893 = vmatpush.msrb.mxu0 %v1178_v30  ;;  %v1170_v5 = vld [vmem:[%s15602_s5 + $0x138] sm:$0xff] }
 0x160   : > { %v1106_v34 = vadd.f32 %v1105_v1, %v1083_v2  ;;  %v1242_v2 = vld [vmem:[%s15602_s5 + $0x378] sm:$0xff] }
 0x161   : > { %1934 = vmatpush.msrb.mxu1 %v1242_v2  ;;  %v1166_v2 = vld [vmem:[%s15602_s5 + $0x118] sm:$0xff] }
 0x162   : > { %v9545_v35 = vadd.f32 %v1128_v63, %v1106_v34  ;;  %v1414_v60 = vpop.f32.mrf.mxu0  ;;  %v1455_v29 = vpop.f32.mrf.mxu1  ;;  %v1362_v34 = vld [vmem:[%s15602_s5 + $0x738] sm:$0xff] }
 0x163   : > { %v1415_v6 = vadd.f32 %v1414_v60, %v9537_v4  ;;  %v1302_v60 = vld [vmem:[%s15602_s5 + $0x558] sm:$0xff] }
 0x164   : > { %15675 = vst [vmem:[#allocation20_spill] sm:$0xff] %v9545_v35  ;;  %1976 = vmatpush.msrb.mxu2 %v1302_v60 }
 0x165   : > { %v1456_v33 = vadd.f32 %v1455_v29, %v1415_v6  ;;  %1741 = vmatmul.f32.vlgmr.msra.gmra.mxu0 %v8888_v20  ;;  %1782 = vmatmul.f32.vlgmr.msra.gmra.mxu1 %v8891_v21  ;;  %v1174_v29 = vld [vmem:[%s15602_s5 + $0x158] sm:$0xff] }
 0x166   : > { %1823 = vmatmul.f32.vlgmr.msra.gmra.mxu2 %v8894_v22  ;;  %1864 = vmatmul.f32.vlgmr.msra.gmra.mxu3 %v8897_v23  ;;  %v1366_v20 = vld [vmem:[%s15602_s5 + $0x758] sm:$0xff] }
 0x167   : > { %v1238_v21 = vld [vmem:[%s15602_s5 + $0x358] sm:$0xff]  ;;  %1894 = vmatpush.msrb.mxu0 %v1174_v29  ;;  %2017 = vmatpush.msrb.mxu3 %v1366_v20 }
 0x168   : > { %v1298_v22 = vld [vmem:[%s15602_s5 + $0x538] sm:$0xff]  ;;  %1935 = vmatpush.msrb.mxu1 %v1238_v21 }
 0x169   : > { %v1496_v23 = vpop.f32.mrf.mxu2  ;;  %v1537_v55 = vpop.f32.mrf.mxu3  ;;  %1977 = vmatpush.msrb.mxu2 %v1298_v22  ;;  %v1294_v6 = vld [vmem:[%s15602_s5 + $0x518] sm:$0xff]  ;;  %1895 = vmatpush.msrb.mxu0 %v1170_v5 }
 0x16a   : > { %v1497_v0 = vadd.f32 %v1496_v23, %v1456_v33  ;;  %v1417_v1 = vpop.f32.mrf.mxu0  ;;  %v1458_v63 = vpop.f32.mrf.mxu1  ;;  %v1234_v33 = vld [vmem:[%s15602_s5 + $0x338] sm:$0xff]  ;;  %2018 = vmatpush.msrb.mxu3 %v1362_v34 }
 0x16b   : > { %v1418_v19 = vadd.f32 %v1417_v1, %v9537_v4  ;;  %1936 = vmatpush.msrb.mxu1 %v1234_v33  ;;  %1978 = vmatpush.msrb.mxu2 %v1294_v6  ;;  %v1226_v1 = vld [vmem:[%s15602_s5 + $0x2f8] sm:$0xff] }
 0x16c   : > { %v9577_v3 = vadd.f32 %v1537_v55, %v1497_v0  ;;  %1896 = vmatpush.msrb.mxu0 %v1166_v2  ;;  %v1162_v55 = vld [vmem:[%s15602_s5 + $0xf8] sm:$0xff] }
 0x16d   : > { %1744 = vmatmul.f32.gmra.mxu0 %v8940_v36  ;;  %1785 = vmatmul.f32.gmra.mxu1 %v8943_v37  ;;  %v1459_v30 = vadd.f32 %v1458_v63, %v1418_v19  ;;  %v1358_v36 = vld [vmem:[%s15602_s5 + $0x718] sm:$0xff] }
 0x16e   : > { %15676 = vst [vmem:[#allocation21_spill] sm:$0xff] %v9577_v3  ;;  %1826 = vmatmul.f32.gmra.mxu2 %v8946_v38  ;;  %1867 = vmatmul.f32.gmra.mxu3 %v8949_v39  ;;  %v1230_v37 = vld [vmem:[%s15602_s5 + $0x318] sm:$0xff] }
 0x16f   : > { %v1290_v38 = vld [vmem:[%s15602_s5 + $0x4f8] sm:$0xff]  ;;  %2019 = vmatpush.msrb.mxu3 %v1358_v36  ;;  %1937 = vmatpush.msrb.mxu1 %v1230_v37 }
 0x170   : > { %1979 = vmatpush.msrb.mxu2 %v1290_v38  ;;  %v1354_v0 = vld [vmem:[%s15602_s5 + $0x6f8] sm:$0xff]  ;;  %1897 = vmatpush.msrb.mxu0 %v1162_v55 }
 0x171   : > { %v1499_v39 = vpop.f32.mrf.mxu2  ;;  %v1540_v60 = vpop.f32.mrf.mxu3  ;;  %v1286_v19 = vld [vmem:[%s15602_s5 + $0x4d8] sm:$0xff]  ;;  %2020 = vmatpush.msrb.mxu3 %v1354_v0  ;;  %1938 = vmatpush.msrb.mxu1 %v1226_v1 }
 0x172   : > { %v1500_v29 = vadd.f32 %v1499_v39, %v1459_v30  ;;  %v1420_v20 = vpop.f32.mrf.mxu0  ;;  %v1461_v21 = vpop.f32.mrf.mxu1  ;;  %1980 = vmatpush.msrb.mxu2 %v1286_v19  ;;  %v1154_v36 = vld [vmem:[%s15602_s5 + $0xb8] sm:$0xff] }
 0x173   : > { %v1421_v22 = vadd.f32 %v1420_v20, %v9537_v4  ;;  %v1346_v37 = vld [vmem:[%s15602_s5 + $0x6b8] sm:$0xff] }
 0x174   : > { %v9608_v23 = vadd.f32 %v1540_v60, %v1500_v29  ;;  %v1218_v39 = vld [vmem:[%s15602_s5 + $0x2b8] sm:$0xff] }
 0x175   : > { %1747 = vmatmul.f32.gmra.mxu0 %v8992_v56  ;;  %1788 = vmatmul.f32.gmra.mxu1 %v8995_v57  ;;  %v1462_v63 = vadd.f32 %v1461_v21, %v1421_v22  ;;  %v1158_v56 = vld [vmem:[%s15602_s5 + $0xd8] sm:$0xff] }
 0x176   : > { %15677 = vst [vmem:[#allocation22_spill] sm:$0xff] %v9608_v23  ;;  %1829 = vmatmul.f32.gmra.mxu2 %v8998_v58  ;;  %1870 = vmatmul.f32.gmra.mxu3 %v9001_v59  ;;  %v1350_v57 = vld [vmem:[%s15602_s5 + $0x6d8] sm:$0xff] }
 0x177   : > { %3035 = vrot.lane.b32.xlu1 %v9608_v23, %s7740_s19  ;;  %v1222_v58 = vld [vmem:[%s15602_s5 + $0x2d8] sm:$0xff]  ;;  %1898 = vmatpush.msrb.mxu0 %v1158_v56 }
 0x178   : > { %v1282_v59 = vld [vmem:[%s15602_s5 + $0x4b8] sm:$0xff]  ;;  %2021 = vmatpush.msrb.mxu3 %v1350_v57  ;;  %1939 = vmatpush.msrb.mxu1 %v1222_v58 }
 0x179   : > { %v1502_v5 = vpop.f32.mrf.mxu2  ;;  %v1543_v34 = vpop.f32.mrf.mxu3  ;;  %1981 = vmatpush.msrb.mxu2 %v1282_v59  ;;  %1899 = vmatpush.msrb.mxu0 %v1154_v36  ;;  %v1278_v60 = vld [vmem:[%s15602_s5 + $0x498] sm:$0xff] }
 0x17a   : > { %v1503_v33 = vadd.f32 %v1502_v5, %v1462_v63  ;;  %v1423_v6 = vpop.f32.mrf.mxu0  ;;  %v1464_v30 = vpop.f32.mrf.mxu1  ;;  %2022 = vmatpush.msrb.mxu3 %v1346_v37  ;;  %v1150_v29 = vld [vmem:[%s15602_s5 + $0x98] sm:$0xff]  ;;  %1940 = vmatpush.msrb.mxu1 %v1218_v39 }
 0x17b   : > { %v1424_v2 = vadd.f32 %v1423_v6, %v9537_v4  ;;  %v1214_v21 = vld [vmem:[%s15602_s5 + $0x298] sm:$0xff]  ;;  %1982 = vmatpush.msrb.mxu2 %v1278_v60  ;;  %1900 = vmatpush.msrb.mxu0 %v1150_v29 }
 0x17c   : > { %v9647_v38 = vadd.f32 %v1543_v34, %v1503_v33  ;;  %v1338_v22 = vld [vmem:[%s15602_s5 + $0x678] sm:$0xff]  ;;  %1941 = vmatpush.msrb.mxu1 %v1214_v21 }
 0x17d   : > { %1750 = vmatmul.f32.gmra.mxu0 %v9044_v8  ;;  %1791 = vmatmul.f32.gmra.mxu1 %v9047_v9  ;;  %v1465_v20 = vadd.f32 %v1464_v30, %v1424_v2  ;;  %v1342_v8 = vld [vmem:[%s15602_s5 + $0x698] sm:$0xff] }
 0x17e   : > { %15678 = vst [vmem:[#allocation23_spill] sm:$0xff] %v9647_v38  ;;  %1832 = vmatmul.f32.gmra.mxu2 %v9050_v10  ;;  %1873 = vmatmul.f32.gmra.mxu3 %v9053_v11  ;;  %v1146_v9 = vld [vmem:[%s15602_s5 + $0x78] sm:$0xff] }
 0x17f   : > { %3037 = vrot.lane.b32.xlu0 %v9647_v38, %s7740_s19  ;;  %v1274_v10 = vld [vmem:[%s15602_s5 + $0x478] sm:$0xff]  ;;  %2023 = vmatpush.msrb.mxu3 %v1342_v8  ;;  %v10333_v38 = vld [vmem:[%s10063_s24 + $0xa8] sm:$0xff] }
 0x180   : > { %v1210_v11 = vld [vmem:[%s15602_s5 + $0x278] sm:$0xff]  ;;  %1901 = vmatpush.msrb.mxu0 %v1146_v9  ;;  %1983 = vmatpush.msrb.mxu2 %v1274_v10  ;;  %v2241_v10 = vld [vmem:[%s15604_s7 + $0x5e0] sm:$0xff] }
 0x181   : > { %v1505_v55 = vpop.f32.mrf.mxu2  ;;  %v1546_v0 = vpop.f32.mrf.mxu3  ;;  %v1142_v1 = vld [vmem:[%s15602_s5 + $0x58] sm:$0xff]  ;;  %1942 = vmatpush.msrb.mxu1 %v1210_v11  ;;  %2024 = vmatpush.msrb.mxu3 %v1338_v22 }
 0x182   : > { %v1270_v63 = vld [vmem:[%s15602_s5 + $0x458] sm:$0xff]  ;;  %v1506_v19 = vadd.f32 %v1505_v55, %v1465_v20  ;;  %v1426_v56 = vpop.f32.mrf.mxu0  ;;  %v1467_v57 = vpop.f32.mrf.mxu1  ;;  %1902 = vmatpush.msrb.mxu0 %v1142_v1 }
 0x183   : > { %v1427_v58 = vadd.f32 %v1426_v56, %v9537_v4  ;;  %v1206_v5 = vld [vmem:[%s15602_s5 + $0x258] sm:$0xff]  ;;  %1984 = vmatpush.msrb.mxu2 %v1270_v63  ;;  %v2177_v63 = vld [vmem:[%s15604_s7 + $0x3e0] sm:$0xff] }
 0x184   : > { %v9689_v59 = vadd.f32 %v1546_v0, %v1506_v19  ;;  %v1334_v34 = vld [vmem:[%s15602_s5 + $0x658] sm:$0xff]  ;;  %1943 = vmatpush.msrb.mxu1 %v1206_v5  ;;  %v2237_v56 = vld [vmem:[%s15604_s7 + $0x5c0] sm:$0xff] }
 0x185   : > { %1753 = vmatmul.f32.gmra.mxu0 %v9096_v24  ;;  %1794 = vmatmul.f32.gmra.mxu1 %v9099_v25  ;;  %v1138_v33 = vld [vmem:[%s15602_s5 + $0x38] sm:$0xff]  ;;  %v1468_v6 = vadd.f32 %v1467_v57, %v1427_v58 }
 0x186   : > { %15679 = vst [vmem:[#allocation24_spill] sm:$0xff] %v9689_v59  ;;  %1835 = vmatmul.f32.gmra.mxu2 %v9102_v26  ;;  %1876 = vmatmul.f32.gmra.mxu3 %v9105_v27  ;;  %v1202_v30 = vld [vmem:[%s15602_s5 + $0x238] sm:$0xff] }
 0x187   : > { %v1266_v24 = vld [vmem:[%s15602_s5 + $0x438] sm:$0xff]  ;;  %3039 = vrot.lane.b32.xlu2 %v9689_v59, %s7740_s19  ;;  %2025 = vmatpush.msrb.mxu3 %v1334_v34 }
 0x188   : > { %v1330_v25 = vld [vmem:[%s15602_s5 + $0x638] sm:$0xff]  ;;  %1903 = vmatpush.msrb.mxu0 %v1138_v33  ;;  %1944 = vmatpush.msrb.mxu1 %v1202_v30 }
 0x189   : > { %v1134_v26 = vld [vmem:[%s15602_s5 + $0x18] sm:$0xff]  ;;  %v1508_v36 = vpop.f32.mrf.mxu2  ;;  %v1549_v37 = vpop.f32.mrf.mxu3  ;;  %1985 = vmatpush.msrb.mxu2 %v1266_v24  ;;  %2026 = vmatpush.msrb.mxu3 %v1330_v25  ;;  %v2105_v24 = vld [vmem:[%s15604_s7 + $0x1a0] sm:$0xff] }
 0x18a   : > { %v1198_v27 = vld [vmem:[%s15602_s5 + $0x218] sm:$0xff]  ;;  %v1509_v60 = vadd.f32 %v1508_v36, %v1468_v6  ;;  %v1429_v29 = vpop.f32.mrf.mxu0  ;;  %v1470_v20 = vpop.f32.mrf.mxu1  ;;  %1904 = vmatpush.msrb.mxu0 %v1134_v26  ;;  %v2297_v25 = vld [vmem:[%s15604_s7 + $0x7a0] sm:$0xff] }
 0x18b   : > { %v1262_v2 = vld [vmem:[%s15602_s5 + $0x418] sm:$0xff]  ;;  %v1430_v21 = vadd.f32 %v1429_v29, %v9537_v4  ;;  %1945 = vmatpush.msrb.mxu1 %v1198_v27  ;;  %v2169_v26 = vld [vmem:[%s15604_s7 + $0x3a0] sm:$0xff] }
 0x18c   : > { %v1326_v39 = vld [vmem:[%s15602_s5 + $0x618] sm:$0xff]  ;;  %1986 = vmatpush.msrb.mxu2 %v1262_v2  ;;  %v9728_v8 = vadd.f32 %v1549_v37, %v1509_v60  ;;  %v2229_v27 = vld [vmem:[%s15604_s7 + $0x580] sm:$0xff] }
 0x18d   : > { %2027 = vmatpush.msrb.mxu3 %v1326_v39  ;;  %1756 = vmatmul.f32.gmra.mxu0 %v9152_v46  ;;  %v1471_v9 = vadd.f32 %v1470_v20, %v1430_v21  ;;  %v2225_v2 = vld [vmem:[%s15604_s7 + $0x560] sm:$0xff]  ;;  %v10284_v23 = vld [vmem:[%s10063_s24 + $0x98] sm:$0xff] }
 0x18e   : > { %15680 = vst [vmem:[#allocation25_spill] sm:$0xff] %v9728_v8  ;;  %1797 = vmatmul.f32.gmra.mxu1 %v9155_v47  ;;  %1838 = vmatmul.f32.gmra.mxu2 %v9162_v50  ;;  %v2113_v50 = vld [vmem:[%s15604_s7 + $0x1e0] sm:$0xff] }
 0x18f   : > { %1879 = vmatmul.f32.gmra.mxu3 %v9165_v51  ;;  %3041 = vrot.lane.b32.xlu2 %v9728_v8, %s7740_s19  ;;  %v2305_v51 = vld [vmem:[%s15604_s7 + $0x7e0] sm:$0xff] }
 0x190   : > { %2401 = vmatpush.msra.mxu2 %v2241_v10  ;;  %2319 = vmatpush.msra.mxu0 %v2113_v50  ;;  %v7610_v10 = vld [vmem:[%s8867_s25] sm:$0xff] }
 0x191   : > { %v1511_v11 = vpop.f32.mrf.mxu2  ;;  %v1552_v22 = vpop.f32.mrf.mxu3  ;;  %2442 = vmatpush.msra.mxu3 %v2305_v51  ;;  %2360 = vmatpush.msra.mxu1 %v2177_v63  ;;  %v2221_v50 = vld [vmem:[%s15604_s7 + $0x540] sm:$0xff] }
 0x192   : > { %v1512_v55 = vadd.f32 %v1511_v11, %v1471_v9  ;;  %v1432_v0 = vpop.f32.mrf.mxu0  ;;  %v1473_v46 = vpop.f32.mrf.mxu1  ;;  %2402 = vmatpush.msra.mxu2 %v2237_v56  ;;  %v2097_v9 = vld [vmem:[%s15604_s7 + $0x160] sm:$0xff]  ;;  %v7611_v11 = vld [vmem:[%s8867_s25 + $0x8] sm:$0xff] }
 0x193   : > { %v1433_v47 = vadd.f32 %v1432_v0, %v9537_v4  ;;  %v2093_v51 = vld [vmem:[%s15604_s7 + $0x140] sm:$0xff] }
 0x194   : > { %v9740_v1 = vadd.f32 %v1552_v22, %v1512_v55  ;;  %v2289_v22 = vld [vmem:[%s15604_s7 + $0x760] sm:$0xff] }
 0x195   : > { %1759 = vmatmul.f32.gmra.mxu0 %v9208_v52  ;;  %v1474_v19 = vadd.f32 %v1473_v46, %v1433_v47  ;;  %v2109_v52 = vld [vmem:[%s15604_s7 + $0x1c0] sm:$0xff]  ;;  %v7612_v46 = vld [vmem:[%s8867_s25 + $0x10] sm:$0xff]  ;;  %v7613_v47 = vld [vmem:[%s8867_s25 + $0x18] sm:$0xff] }
 0x196   : > { %15681 = vst [vmem:[#allocation26_spill] sm:$0xff] %v9740_v1  ;;  %1800 = vmatmul.f32.gmra.mxu1 %v9211_v53  ;;  %1841 = vmatmul.f32.gmra.mxu2 %v9214_v12  ;;  %v2301_v53 = vld [vmem:[%s15604_s7 + $0x7c0] sm:$0xff] }
 0x197   : > { %1882 = vmatmul.f32.gmra.mxu3 %v9217_v54  ;;  %3043 = vrot.lane.b32.xlu2 %v9740_v1, %s7740_s19  ;;  %v2173_v12 = vld [vmem:[%s15604_s7 + $0x3c0] sm:$0xff]  ;;  %v10394_v1 = vld [vmem:[%s10063_s24 + $0xd8] sm:$0xff] }
 0x198   : > { %v2233_v54 = vld [vmem:[%s15604_s7 + $0x5a0] sm:$0xff]  ;;  %2320 = vmatpush.msra.mxu0 %v2109_v52  ;;  %2443 = vmatpush.msra.mxu3 %v2301_v53 }
 0x199   : > { %v1514_v57 = vpop.f32.mrf.mxu2  ;;  %v1555_v58 = vpop.f32.mrf.mxu3  ;;  %2361 = vmatpush.msra.mxu1 %v2173_v12  ;;  %2403 = vmatpush.msra.mxu2 %v2233_v54  ;;  %v2161_v55 = vld [vmem:[%s15604_s7 + $0x360] sm:$0xff] }
 0x19a   : > { %v1515_v5 = vadd.f32 %v1514_v57, %v1474_v19  ;;  %v1435_v34 = vpop.f32.mrf.mxu0  ;;  %v1476_v33 = vpop.f32.mrf.mxu1  ;;  %2321 = vmatpush.msra.mxu0 %v2105_v24  ;;  %2444 = vmatpush.msra.mxu3 %v2297_v25  ;;  %v2285_v63 = vld [vmem:[%s15604_s7 + $0x740] sm:$0xff] }
 0x19b   : > { %v1436_v6 = vadd.f32 %v1435_v34, %v9537_v4  ;;  %2362 = vmatpush.msra.mxu1 %v2169_v26  ;;  %2404 = vmatpush.msra.mxu2 %v2229_v27  ;;  %v2157_v19 = vld [vmem:[%s15604_s7 + $0x340] sm:$0xff]  ;;  %v7617_v27 = vld [vmem:[%s8867_s25 + $0x38] sm:$0xff] }
 0x19c   : > { %v9773_v30 = vadd.f32 %v1555_v58, %v1515_v5  ;;  %v2217_v56 = vld [vmem:[%s15604_s7 + $0x520] sm:$0xff] }
 0x19d   : > { %1762 = vmatmul.f32.gmra.mxu0 %v9255_v40  ;;  %v1477_v4 = vadd.f32 %v1476_v33, %v1436_v6  ;;  %v2101_v40 = vld [vmem:[%s15604_s7 + $0x180] sm:$0xff]  ;;  %2405 = vmatpush.msra.mxu2 %v2225_v2  ;;  %v7615_v6 = vld [vmem:[%s8867_s25 + $0x28] sm:$0xff] }
 0x19e   : > { %15682 = vst [vmem:[#allocation27_spill] sm:$0xff] %v9773_v30  ;;  %1803 = vmatmul.f32.gmra.mxu1 %v9258_v41  ;;  %1844 = vmatmul.f32.gmra.mxu2 %v9261_v43  ;;  %v9797_v41 = vperm.slane %v9518_v14, 1  ;;  %v2293_v43 = vld [vmem:[%s15604_s7 + $0x780] sm:$0xff] }
 0x19f   : > { %1885 = vmatmul.f32.gmra.mxu3 %v9264_v44  ;;  %3045 = vrot.lane.b32.xlu2 %v9773_v30, %s7740_s19  ;;  %v2165_v44 = vld [vmem:[%s15604_s7 + $0x380] sm:$0xff]  ;;  %v10448_v30 = vld [vmem:[%s10063_s24 + $0xf8] sm:$0xff] }
 0x1a0   : > { %2322 = vmatpush.msra.mxu0 %v2101_v40  ;;  %2445 = vmatpush.msra.mxu3 %v2293_v43  ;;  %v2089_v34 = vld [vmem:[%s15604_s7 + $0x120] sm:$0xff] }
 0x1a1   : > { %v1517_v36 = vpop.f32.mrf.mxu2  ;;  %v1558_v37 = vpop.f32.mrf.mxu3  ;;  %2363 = vmatpush.msra.mxu1 %v2165_v44  ;;  %2406 = vmatpush.msra.mxu2 %v2221_v50  ;;  %v7614_v33 = vld [vmem:[%s8867_s25 + $0x20] sm:$0xff]  ;;  %v7620_v50 = vld [vmem:[%s8867_s25 + $0x50] sm:$0xff] }
 0x1a2   : > { %v1518_v39 = vadd.f32 %v1517_v36, %v1477_v4  ;;  %v1578_v60 = vpop.f32.mrf.mxu0  ;;  %v1619_v29 = vpop.f32.mrf.mxu1  ;;  %2323 = vmatpush.msra.mxu0 %v2097_v9  ;;  %2446 = vmatpush.msra.mxu3 %v2289_v22  ;;  %v2281_v24 = vld [vmem:[%s15604_s7 + $0x720] sm:$0xff]  ;;  %v7616_v4 = vld [vmem:[%s8867_s25 + $0x30] sm:$0xff] }
 0x1a3   : > { %v1579_v20 = vadd.f32 %v1578_v60, %v9797_v41  ;;  %2364 = vmatpush.msra.mxu1 %v2161_v55  ;;  %2407 = vmatpush.msra.mxu2 %v2217_v56  ;;  %v2153_v25 = vld [vmem:[%s15604_s7 + $0x320] sm:$0xff]  ;;  %v7619_v55 = vld [vmem:[%s8867_s25 + $0x48] sm:$0xff] }
 0x1a4   : > { %v9809_v21 = vadd.f32 %v1558_v37, %v1518_v39  ;;  %2324 = vmatpush.msra.mxu0 %v2093_v51  ;;  %2447 = vmatpush.msra.mxu3 %v2285_v63  ;;  %v2213_v40 = vld [vmem:[%s15604_s7 + $0x500] sm:$0xff]  ;;  %v7621_v51 = vld [vmem:[%s8867_s25 + $0x58] sm:$0xff] }
 0x1a5   : > { %1905 = vmatmul.f32.vlgmr.msrb.gmra.mxu0 %v7610_v10  ;;  %v1620_v0 = vadd.f32 %v1619_v29, %v1579_v20  ;;  %2365 = vmatpush.msra.mxu1 %v2157_v19  ;;  %v2085_v43 = vld [vmem:[%s15604_s7 + $0x100] sm:$0xff] }
 0x1a6   : > { %1946 = vmatmul.f32.vlgmr.msrb.gmra.mxu1 %v7611_v11  ;;  %1987 = vmatmul.f32.vlgmr.msrb.gmra.mxu2 %v7612_v46  ;;  %v2277_v44 = vld [vmem:[%s15604_s7 + $0x700] sm:$0xff] }
 0x1a7   : > { %2028 = vmatmul.f32.vlgmr.msrb.gmra.mxu3 %v7613_v47  ;;  %3047 = vrot.lane.b32.xlu1 %v9809_v21, %s7740_s19  ;;  %v2149_v2 = vld [vmem:[%s15604_s7 + $0x300] sm:$0xff] }
 0x1a8   : > { %2325 = vmatpush.msra.mxu0 %v2089_v34  ;;  %2448 = vmatpush.msra.mxu3 %v2281_v24  ;;  %v2209_v36 = vld [vmem:[%s15604_s7 + $0x4e0] sm:$0xff] }
 0x1a9   : > { %v1660_v52 = vpop.f32.mrf.mxu2  ;;  %v1701_v53 = vpop.f32.mrf.mxu3  ;;  %2366 = vmatpush.msra.mxu1 %v2153_v25  ;;  %2408 = vmatpush.msra.mxu2 %v2213_v40  ;;  %v2081_v11 = vld [vmem:[%s15604_s7 + $0xe0] sm:$0xff] }
 0x1aa   : > { %v1661_v12 = vadd.f32 %v1660_v52, %v1620_v0  ;;  %v1581_v54 = vpop.f32.mrf.mxu0  ;;  %v1622_v57 = vpop.f32.mrf.mxu1  ;;  %2326 = vmatpush.msra.mxu0 %v2085_v43  ;;  %2449 = vmatpush.msra.mxu3 %v2277_v44  ;;  %v7618_v22 = vld [vmem:[%s8867_s25 + $0x40] sm:$0xff] }
 0x1ab   : > { %v1582_v58 = vadd.f32 %v1581_v54, %v9797_v41  ;;  %2367 = vmatpush.msra.mxu1 %v2149_v2  ;;  %2409 = vmatpush.msra.mxu2 %v2209_v36  ;;  %v2273_v0 = vld [vmem:[%s15604_s7 + $0x6e0] sm:$0xff]  ;;  %v7624_v2 = vld [vmem:[%s8867_s25 + $0x70] sm:$0xff]  ;;  %v7625_v36 = vld [vmem:[%s8867_s25 + $0x78] sm:$0xff] }
 0x1ac   : > { %v9842_v5 = vadd.f32 %v1701_v53, %v1661_v12  ;;  %v2145_v46 = vld [vmem:[%s15604_s7 + $0x2e0] sm:$0xff]  ;;  %2327 = vmatpush.msra.mxu0 %v2081_v11  ;;  %2450 = vmatpush.msra.mxu3 %v2273_v0 }
 0x1ad   : > { %1908 = vmatmul.f32.gmra.mxu0 %v7614_v33  ;;  %v1623_v26 = vadd.f32 %v1622_v57, %v1582_v58  ;;  %v2205_v63 = vld [vmem:[%s15604_s7 + $0x4c0] sm:$0xff]  ;;  %2368 = vmatpush.msra.mxu1 %v2145_v46 }
 0x1ae   : > { %15683 = vst [vmem:[#allocation28_spill] sm:$0xff] %v9842_v5  ;;  %1949 = vmatmul.f32.gmra.mxu1 %v7615_v6  ;;  %1990 = vmatmul.f32.gmra.mxu2 %v7616_v4  ;;  %v2077_v19 = vld [vmem:[%s15604_s7 + $0xc0] sm:$0xff] }
 0x1af   : > { %2031 = vmatmul.f32.gmra.mxu3 %v7617_v27  ;;  %3149 = vrot.lane.b32.xlu1 %v9842_v5, %s7740_s19  ;;  %v2269_v56 = vld [vmem:[%s15604_s7 + $0x6c0] sm:$0xff]  ;;  %v7623_v27 = vld [vmem:[%s8867_s25 + $0x68] sm:$0xff] }
 0x1b0   : > { %v2141_v52 = vld [vmem:[%s15604_s7 + $0x2c0] sm:$0xff]  ;;  %2410 = vmatpush.msra.mxu2 %v2205_v63  ;;  %2328 = vmatpush.msra.mxu0 %v2077_v19 }
 0x1b1   : > { %v1663_v37 = vpop.f32.mrf.mxu2  ;;  %v1704_v39 = vpop.f32.mrf.mxu3  ;;  %v2201_v53 = vld [vmem:[%s15604_s7 + $0x4a0] sm:$0xff]  ;;  %2451 = vmatpush.msra.mxu3 %v2269_v56  ;;  %2369 = vmatpush.msra.mxu1 %v2141_v52  ;;  %v7627_v52 = vld [vmem:[%s8867_s25 + $0x88] sm:$0xff] }
 0x1b2   : > { %v1664_v60 = vadd.f32 %v1663_v37, %v1623_v26  ;;  %v1584_v29 = vpop.f32.mrf.mxu0  ;;  %v1625_v20 = vpop.f32.mrf.mxu1  ;;  %2411 = vmatpush.msra.mxu2 %v2201_v53  ;;  %v2073_v6 = vld [vmem:[%s15604_s7 + $0xa0] sm:$0xff] }
 0x1b3   : > { %v1585_v9 = vadd.f32 %v1584_v29, %v9797_v41  ;;  %v2265_v24 = vld [vmem:[%s15604_s7 + $0x6a0] sm:$0xff]  ;;  %2329 = vmatpush.msra.mxu0 %v2073_v6 }
 0x1b4   : > { %v9875_v10 = vadd.f32 %v1704_v39, %v1664_v60  ;;  %2452 = vmatpush.msra.mxu3 %v2265_v24  ;;  %v2137_v26 = vld [vmem:[%s15604_s7 + $0x2a0] sm:$0xff] }
 0x1b5   : > { %1911 = vmatmul.f32.gmra.mxu0 %v7618_v22  ;;  %v1626_v47 = vadd.f32 %v1625_v20, %v1585_v9  ;;  %v7622_v4 = vld [vmem:[%s8867_s25 + $0x60] sm:$0xff]  ;;  %2370 = vmatpush.msra.mxu1 %v2137_v26 }
 0x1b6   : > { %15684 = vst [vmem:[#allocation29_spill] sm:$0xff] %v9875_v10  ;;  %1952 = vmatmul.f32.gmra.mxu1 %v7619_v55  ;;  %1993 = vmatmul.f32.gmra.mxu2 %v7620_v50  ;;  %v2197_v40 = vld [vmem:[%s15604_s7 + $0x480] sm:$0xff] }
 0x1b7   : > { %2034 = vmatmul.f32.gmra.mxu3 %v7621_v51  ;;  %3151 = vrot.lane.b32.xlu0 %v9875_v10, %s7740_s19  ;;  %v2069_v43 = vld [vmem:[%s15604_s7 + $0x80] sm:$0xff]  ;;  %v10281_v10 = vld [vmem:[%s10063_s24 + $0x90] sm:$0xff] }
 0x1b8   : > { %v2133_v37 = vld [vmem:[%s15604_s7 + $0x280] sm:$0xff]  ;;  %2412 = vmatpush.msra.mxu2 %v2197_v40  ;;  %2330 = vmatpush.msra.mxu0 %v2069_v43 }
 0x1b9   : > { %v1666_v12 = vpop.f32.mrf.mxu2  ;;  %v1707_v54 = vpop.f32.mrf.mxu3  ;;  %v2261_v39 = vld [vmem:[%s15604_s7 + $0x680] sm:$0xff]  ;;  %2371 = vmatpush.msra.mxu1 %v2133_v37 }
 0x1ba   : > { %v1667_v57 = vadd.f32 %v1666_v12, %v1626_v47  ;;  %v1587_v58 = vpop.f32.mrf.mxu0  ;;  %v1628_v34 = vpop.f32.mrf.mxu1  ;;  %v2065_v60 = vld [vmem:[%s15604_s7 + $0x60] sm:$0xff]  ;;  %2453 = vmatpush.msra.mxu3 %v2261_v39 }
 0x1bb   : > { %v1588_v33 = vadd.f32 %v1587_v58, %v9797_v41  ;;  %v2193_v29 = vld [vmem:[%s15604_s7 + $0x460] sm:$0xff]  ;;  %2331 = vmatpush.msra.mxu0 %v2065_v60  ;;  %v7629_v58 = vld [vmem:[%s8867_s25 + $0x98] sm:$0xff] }
 0x1bc   : > { %v9914_v25 = vadd.f32 %v1707_v54, %v1667_v57  ;;  %v2129_v20 = vld [vmem:[%s15604_s7 + $0x260] sm:$0xff]  ;;  %2413 = vmatpush.msra.mxu2 %v2193_v29  ;;  %v7628_v57 = vld [vmem:[%s8867_s25 + $0x90] sm:$0xff]  ;;  %v7631_v29 = vld [vmem:[%s8867_s25 + $0xa8] sm:$0xff] }
 0x1bd   : > { %1914 = vmatmul.f32.gmra.mxu0 %v7622_v4  ;;  %v1629_v44 = vadd.f32 %v1628_v34, %v1588_v33  ;;  %v2257_v9 = vld [vmem:[%s15604_s7 + $0x660] sm:$0xff]  ;;  %2372 = vmatpush.msra.mxu1 %v2129_v20 }
 0x1be   : > { %15685 = vst [vmem:[#allocation30_spill] sm:$0xff] %v9914_v25  ;;  %1955 = vmatmul.f32.gmra.mxu1 %v7623_v27  ;;  %1996 = vmatmul.f32.gmra.mxu2 %v7624_v2  ;;  %v2061_v55 = vld [vmem:[%s15604_s7 + $0x40] sm:$0xff] }
 0x1bf   : > { %2037 = vmatmul.f32.gmra.mxu3 %v7625_v36  ;;  %3153 = vrot.lane.b32.xlu0 %v9914_v25, %s7740_s19  ;;  %v2189_v0 = vld [vmem:[%s15604_s7 + $0x440] sm:$0xff] }
 0x1c0   : > { %2454 = vmatpush.msra.mxu3 %v2257_v9  ;;  %2332 = vmatpush.msra.mxu0 %v2061_v55  ;;  %v2125_v19 = vld [vmem:[%s15604_s7 + $0x240] sm:$0xff]  ;;  %v7632_v9 = vld [vmem:[%s8867_s25 + $0xb0] sm:$0xff] }
 0x1c1   : > { %v1669_v11 = vpop.f32.mrf.mxu2  ;;  %v1710_v22 = vpop.f32.mrf.mxu3  ;;  %2414 = vmatpush.msra.mxu2 %v2189_v0  ;;  %v7626_v56 = vld [vmem:[%s8867_s25 + $0x80] sm:$0xff]  ;;  %2373 = vmatpush.msra.mxu1 %v2125_v19 }
 0x1c2   : > { %v1670_v46 = vadd.f32 %v1669_v11, %v1629_v44  ;;  %v1590_v47 = vpop.f32.mrf.mxu0  ;;  %v1631_v50 = vpop.f32.mrf.mxu1  ;;  %v2253_v53 = vld [vmem:[%s15604_s7 + $0x640] sm:$0xff]  ;;  %v7633_v11 = vld [vmem:[%s8867_s25 + $0xb8] sm:$0xff] }
 0x1c3   : > { %v1591_v51 = vadd.f32 %v1590_v47, %v9797_v41  ;;  %v2057_v12 = vld [vmem:[%s15604_s7 + $0x20] sm:$0xff]  ;;  %2455 = vmatpush.msra.mxu3 %v2253_v53  ;;  %v2114_v53 = vld [vmem:[%s15604_s7 + $0x1e8] sm:$0xff] }
 0x1c4   : > { %v9956_v63 = vadd.f32 %v1710_v22, %v1670_v46  ;;  %v2121_v34 = vld [vmem:[%s15604_s7 + $0x220] sm:$0xff]  ;;  %2333 = vmatpush.msra.mxu0 %v2057_v12  ;;  %v2242_v22 = vld [vmem:[%s15604_s7 + $0x5e8] sm:$0xff] }
 0x1c5   : > { %1917 = vmatmul.f32.gmra.mxu0 %v7626_v56  ;;  %v1632_v54 = vadd.f32 %v1631_v50, %v1591_v51  ;;  %v2185_v33 = vld [vmem:[%s15604_s7 + $0x420] sm:$0xff]  ;;  %2374 = vmatpush.msra.mxu1 %v2121_v34  ;;  %v2306_v12 = vld [vmem:[%s15604_s7 + $0x7e8] sm:$0xff] }
 0x1c6   : > { %15686 = vst [vmem:[#allocation31_spill] sm:$0xff] %v9956_v63  ;;  %1958 = vmatmul.f32.gmra.mxu1 %v7627_v52  ;;  %1999 = vmatmul.f32.gmra.mxu2 %v7628_v57  ;;  %v2249_v6 = vld [vmem:[%s15604_s7 + $0x620] sm:$0xff]  ;;  %v7635_v52 = vld [vmem:[%s8867_s25 + $0xc8] sm:$0xff]  ;;  %v7636_v57 = vld [vmem:[%s8867_s25 + $0xd0] sm:$0xff] }
 0x1c7   : > { %2040 = vmatmul.f32.gmra.mxu3 %v7629_v58  ;;  %3155 = vrot.lane.b32.xlu0 %v9956_v63, %s7740_s19  ;;  %v2053_v24 = vld [vmem:[%s15604_s7] sm:$0xff]  ;;  %v7637_v58 = vld [vmem:[%s8867_s25 + $0xd8] sm:$0xff]  ;;  %v2178_v34 = vld [vmem:[%s15604_s7 + $0x3e8] sm:$0xff] }
 0x1c8   : > { %v2117_v26 = vld [vmem:[%s15604_s7 + $0x200] sm:$0xff]  ;;  %2415 = vmatpush.msra.mxu2 %v2185_v33  ;;  %2456 = vmatpush.msra.mxu3 %v2249_v6  ;;  %v2238_v33 = vld [vmem:[%s15604_s7 + $0x5c8] sm:$0xff] }
 0x1c9   : > { %v2181_v4 = vld [vmem:[%s15604_s7 + $0x400] sm:$0xff]  ;;  %v1672_v27 = vpop.f32.mrf.mxu2  ;;  %v1713_v40 = vpop.f32.mrf.mxu3  ;;  %2334 = vmatpush.msra.mxu0 %v2053_v24  ;;  %2375 = vmatpush.msra.mxu1 %v2117_v26  ;;  %v2110_v6 = vld [vmem:[%s15604_s7 + $0x1c8] sm:$0xff] }
 0x1ca   : > { %v2245_v43 = vld [vmem:[%s15604_s7 + $0x600] sm:$0xff]  ;;  %v1673_v44 = vadd.f32 %v1672_v27, %v1632_v54  ;;  %v1593_v2 = vpop.f32.mrf.mxu0  ;;  %v1634_v36 = vpop.f32.mrf.mxu1  ;;  %2416 = vmatpush.msra.mxu2 %v2181_v4  ;;  %v2302_v24 = vld [vmem:[%s15604_s7 + $0x7c8] sm:$0xff] }
 0x1cb   : > { %v1594_v37 = vadd.f32 %v1593_v2, %v9797_v41  ;;  %2457 = vmatpush.msra.mxu3 %v2245_v43  ;;  %v7630_v60 = vld [vmem:[%s8867_s25 + $0xa0] sm:$0xff]  ;;  %2483 = vmatpush.msrb.mxu0 %v2114_v53  ;;  %v2174_v26 = vld [vmem:[%s15604_s7 + $0x3c8] sm:$0xff] }
 0x1cc   : > { %v9995_v39 = vadd.f32 %v1713_v40, %v1673_v44  ;;  %2565 = vmatpush.msrb.mxu2 %v2242_v22  ;;  %v7634_v56 = vld [vmem:[%s8867_s25 + $0xc0] sm:$0xff]  ;;  %2524 = vmatpush.msrb.mxu1 %v2178_v34  ;;  %v2234_v40 = vld [vmem:[%s15604_s7 + $0x5a8] sm:$0xff]  ;;  %v7640_v22 = vld [vmem:[%s8867_s25 + $0xf0] sm:$0xff] }
 0x1cd   : > { %1920 = vmatmul.f32.gmra.mxu0 %v7630_v60  ;;  %v1635_v20 = vadd.f32 %v1634_v36, %v1594_v37  ;;  %2606 = vmatpush.msrb.mxu3 %v2306_v12  ;;  %v7638_v60 = vld [vmem:[%s8867_s25 + $0xe0] sm:$0xff] }
 0x1ce   : > { %15687 = vst [vmem:[#allocation32_spill] sm:$0xff] %v9995_v39  ;;  %1961 = vmatmul.f32.gmra.mxu1 %v7631_v29  ;;  %2002 = vmatmul.f32.gmra.mxu2 %v7632_v9  ;;  %v7639_v29 = vld [vmem:[%s8867_s25 + $0xe8] sm:$0xff] }
 0x1cf   : > { %2043 = vmatmul.f32.gmra.mxu3 %v7633_v11  ;;  %3157 = vrot.lane.b32.xlu2 %v9995_v39, %s7740_s19  ;;  %v2298_v9 = vld [vmem:[%s15604_s7 + $0x7a8] sm:$0xff]  ;;  %v10339_v39 = vld [vmem:[%s10063_s24 + $0xb8] sm:$0xff] }
 0x1d0   : > { %2566 = vmatpush.msrb.mxu2 %v2238_v33  ;;  %2484 = vmatpush.msrb.mxu0 %v2110_v6  ;;  %v10090_v33 = vld [vmem:[%s10063_s24 + $0x10] sm:$0xff]  ;;  %v10093_v6 = vld [vmem:[%s10063_s24 + $0x18] sm:$0xff] }
 0x1d1   : > { %v1675_v55 = vpop.f32.mrf.mxu2  ;;  %v1716_v0 = vpop.f32.mrf.mxu3  ;;  %2607 = vmatpush.msrb.mxu3 %v2302_v24  ;;  %2525 = vmatpush.msrb.mxu1 %v2174_v26 }
 0x1d2   : > { %v1676_v46 = vadd.f32 %v1675_v55, %v1635_v20  ;;  %v1596_v47 = vpop.f32.mrf.mxu0  ;;  %v1637_v50 = vpop.f32.mrf.mxu1  ;;  %2567 = vmatpush.msrb.mxu2 %v2234_v40  ;;  %v2106_v20 = vld [vmem:[%s15604_s7 + $0x1a8] sm:$0xff] }
 0x1d3   : > { %v1597_v51 = vadd.f32 %v1596_v47, %v9797_v41  ;;  %v2170_v55 = vld [vmem:[%s15604_s7 + $0x3a8] sm:$0xff]  ;;  %2485 = vmatpush.msrb.mxu0 %v2106_v20  ;;  %2608 = vmatpush.msrb.mxu3 %v2298_v9  ;;  %v10128_v9 = vld [vmem:[%s10063_s24 + $0x20] sm:$0xff] }
 0x1d4   : > { %v10007_v19 = vadd.f32 %v1716_v0, %v1676_v46  ;;  %v2230_v0 = vld [vmem:[%s15604_s7 + $0x588] sm:$0xff]  ;;  %v10068_v46 = vperm.slane %v9518_v14, 2  ;;  %2526 = vmatpush.msrb.mxu1 %v2170_v55 }
 0x1d5   : > { %1923 = vmatmul.f32.gmra.mxu0 %v7634_v56  ;;  %v1638_v54 = vadd.f32 %v1637_v50, %v1597_v51  ;;  %v2102_v47 = vld [vmem:[%s15604_s7 + $0x188] sm:$0xff]  ;;  %2568 = vmatpush.msrb.mxu2 %v2230_v0  ;;  %v10134_v0 = vld [vmem:[%s10063_s24 + $0x30] sm:$0xff] }
 0x1d6   : > { %15688 = vst [vmem:[#allocation33_spill] sm:$0xff] %v10007_v19  ;;  %1964 = vmatmul.f32.gmra.mxu1 %v7635_v52  ;;  %2005 = vmatmul.f32.gmra.mxu2 %v7636_v57  ;;  %v2294_v50 = vld [vmem:[%s15604_s7 + $0x788] sm:$0xff] }
 0x1d7   : > { %2046 = vmatmul.f32.gmra.mxu3 %v7637_v58  ;;  %3159 = vrot.lane.b32.xlu1 %v10007_v19, %s7740_s19  ;;  %v2166_v51 = vld [vmem:[%s15604_s7 + $0x388] sm:$0xff] }
 0x1d8   : > { %2486 = vmatpush.msrb.mxu0 %v2102_v47  ;;  %v2226_v14 = vld [vmem:[%s15604_s7 + $0x568] sm:$0xff]  ;;  %2609 = vmatpush.msrb.mxu3 %v2294_v50  ;;  %v10137_v47 = vld [vmem:[%s10063_s24 + $0x38] sm:$0xff] }
 0x1d9   : > { %v1678_v4 = vpop.f32.mrf.mxu2  ;;  %v1719_v27 = vpop.f32.mrf.mxu3  ;;  %v10086_v57 = vld [vmem:[%s10063_s24 + $0x8] sm:$0xff]  ;;  %2527 = vmatpush.msrb.mxu1 %v2166_v51  ;;  %2569 = vmatpush.msrb.mxu2 %v2226_v14 }
 0x1da   : > { %v1679_v43 = vadd.f32 %v1678_v4, %v1638_v54  ;;  %v1599_v44 = vpop.f32.mrf.mxu0  ;;  %v1640_v2 = vpop.f32.mrf.mxu1  ;;  %v10083_v54 = vld [vmem:[%s10063_s24] sm:$0xff]  ;;  %v2098_v4 = vld [vmem:[%s15604_s7 + $0x168] sm:$0xff] }
 0x1db   : > { %v1600_v36 = vadd.f32 %v1599_v44, %v9797_v41  ;;  %v7641_v41 = vld [vmem:[%s8867_s25 + $0xf8] sm:$0xff]  ;;  %v2162_v40 = vld [vmem:[%s15604_s7 + $0x368] sm:$0xff]  ;;  %2487 = vmatpush.msrb.mxu0 %v2098_v4 }
 0x1dc   : > { %v10040_v37 = vadd.f32 %v1719_v27, %v1679_v43  ;;  %v2290_v27 = vld [vmem:[%s15604_s7 + $0x768] sm:$0xff]  ;;  %2528 = vmatpush.msrb.mxu1 %v2162_v40 }
 0x1dd   : > { %1926 = vmatmul.f32.gmra.mxu0 %v7638_v60  ;;  %v1641_v11 = vadd.f32 %v1640_v2, %v1600_v36  ;;  %v2222_v43 = vld [vmem:[%s15604_s7 + $0x548] sm:$0xff]  ;;  %2610 = vmatpush.msrb.mxu3 %v2290_v27 }
 0x1de   : > { %15689 = vst [vmem:[#allocation34_spill] sm:$0xff] %v10040_v37  ;;  %1967 = vmatmul.f32.gmra.mxu1 %v7639_v29  ;;  %2008 = vmatmul.f32.gmra.mxu2 %v7640_v22  ;;  %v2094_v44 = vld [vmem:[%s15604_s7 + $0x148] sm:$0xff] }
 0x1df   : > { %2049 = vmatmul.f32.gmra.mxu3 %v7641_v41  ;;  %3161 = vrot.lane.b32.xlu0 %v10040_v37, %s7740_s19  ;;  %v2286_v2 = vld [vmem:[%s15604_s7 + $0x748] sm:$0xff] }
 0x1e0   : > { %v2158_v36 = vld [vmem:[%s15604_s7 + $0x348] sm:$0xff]  ;;  %2570 = vmatpush.msrb.mxu2 %v2222_v43  ;;  %2488 = vmatpush.msrb.mxu0 %v2094_v44  ;;  %v10171_v43 = vld [vmem:[%s10063_s24 + $0x40] sm:$0xff] }
 0x1e1   : > { %v1681_v56 = vpop.f32.mrf.mxu2  ;;  %v1722_v53 = vpop.f32.mrf.mxu3  ;;  %v2218_v60 = vld [vmem:[%s15604_s7 + $0x528] sm:$0xff]  ;;  %2611 = vmatpush.msrb.mxu3 %v2286_v2  ;;  %2529 = vmatpush.msrb.mxu1 %v2158_v36 }
 0x1e2   : > { %v1682_v52 = vadd.f32 %v1681_v56, %v1641_v11  ;;  %v1742_v12 = vpop.f32.mrf.mxu0  ;;  %v1783_v34 = vpop.f32.mrf.mxu1  ;;  %v10131_v11 = vld [vmem:[%s10063_s24 + $0x28] sm:$0xff]  ;;  %2571 = vmatpush.msrb.mxu2 %v2218_v60 }
 0x1e3   : > { %v1743_v58 = vadd.f32 %v1742_v12, %v10068_v46  ;;  %v2090_v56 = vld [vmem:[%s15604_s7 + $0x128] sm:$0xff] }
 0x1e4   : > { %v10095_v24 = vadd.f32 %v1722_v53, %v1682_v52  ;;  %v2282_v14 = vld [vmem:[%s15604_s7 + $0x728] sm:$0xff]  ;;  %2489 = vmatpush.msrb.mxu0 %v2090_v56 }
 0x1e5   : > { %v1784_v26 = vadd.f32 %v1783_v34, %v1743_v58  ;;  %2335 = vmatmul.f32.vlgmr.msra.gmra.mxu0 %v10083_v54  ;;  %v2154_v53 = vld [vmem:[%s15604_s7 + $0x328] sm:$0xff]  ;;  %2612 = vmatpush.msrb.mxu3 %v2282_v14 }
 0x1e6   : > { %2376 = vmatmul.f32.vlgmr.msra.gmra.mxu1 %v10086_v57  ;;  %2417 = vmatmul.f32.vlgmr.msra.gmra.mxu2 %v10090_v33  ;;  %v2214_v12 = vld [vmem:[%s15604_s7 + $0x508] sm:$0xff] }
 0x1e7   : > { %2458 = vmatmul.f32.vlgmr.msra.gmra.mxu3 %v10093_v6  ;;  %3163 = vrot.lane.b32.xlu0 %v10095_v24, %s7740_s19  ;;  %v2086_v58 = vld [vmem:[%s15604_s7 + $0x108] sm:$0xff] }
 0x1e8   : > { %2530 = vmatpush.msrb.mxu1 %v2154_v53  ;;  %2572 = vmatpush.msrb.mxu2 %v2214_v12  ;;  %v2278_v34 = vld [vmem:[%s15604_s7 + $0x708] sm:$0xff] }
 0x1e9   : > { %v1824_v29 = vpop.f32.mrf.mxu2  ;;  %v1865_v20 = vpop.f32.mrf.mxu3  ;;  %2490 = vmatpush.msrb.mxu0 %v2086_v58  ;;  %2613 = vmatpush.msrb.mxu3 %v2278_v34  ;;  %v2210_v4 = vld [vmem:[%s15604_s7 + $0x4e8] sm:$0xff] }
 0x1ea   : > { %v1825_v22 = vadd.f32 %v1824_v29, %v1784_v26  ;;  %v1745_v41 = vpop.f32.mrf.mxu0  ;;  %v1786_v55 = vpop.f32.mrf.mxu1  ;;  %v2150_v26 = vld [vmem:[%s15604_s7 + $0x308] sm:$0xff]  ;;  %2573 = vmatpush.msrb.mxu2 %v2210_v4  ;;  %v10177_v29 = vld [vmem:[%s10063_s24 + $0x50] sm:$0xff] }
 0x1eb   : > { %v1746_v50 = vadd.f32 %v1745_v41, %v10068_v46  ;;  %v10174_v44 = vld [vmem:[%s10063_s24 + $0x48] sm:$0xff]  ;;  %2531 = vmatpush.msrb.mxu1 %v2150_v26 }
 0x1ec   : > { %v10140_v51 = vadd.f32 %v1865_v20, %v1825_v22  ;;  %v10180_v20 = vld [vmem:[%s10063_s24 + $0x58] sm:$0xff]  ;;  %v2146_v14 = vld [vmem:[%s15604_s7 + $0x2e8] sm:$0xff] }
 0x1ed   : > { %2338 = vmatmul.f32.gmra.mxu0 %v10128_v9  ;;  %v1787_v52 = vadd.f32 %v1786_v55, %v1746_v50  ;;  %v2082_v55 = vld [vmem:[%s15604_s7 + $0xe8] sm:$0xff]  ;;  %2532 = vmatpush.msrb.mxu1 %v2146_v14 }
 0x1ee   : > { %15691 = vst [vmem:[#allocation35_spill] sm:$0xff] %v10140_v51  ;;  %2379 = vmatmul.f32.gmra.mxu1 %v10131_v11  ;;  %2420 = vmatmul.f32.gmra.mxu2 %v10134_v0  ;;  %v2274_v50 = vld [vmem:[%s15604_s7 + $0x6e8] sm:$0xff] }
 0x1ef   : > { %2461 = vmatmul.f32.gmra.mxu3 %v10137_v47  ;;  %2491 = vmatpush.msrb.mxu0 %v2082_v55  ;;  %v2078_v53 = vld [vmem:[%s15604_s7 + $0xc8] sm:$0xff]  ;;  %v10223_v55 = vld [vmem:[%s10063_s24 + $0x78] sm:$0xff] }
 0x1f0   : > { %2614 = vmatpush.msrb.mxu3 %v2274_v50  ;;  %v2270_v12 = vld [vmem:[%s15604_s7 + $0x6c8] sm:$0xff] }
 0x1f1   : > { %v1827_v27 = vpop.f32.mrf.mxu2  ;;  %v1868_v40 = vpop.f32.mrf.mxu3  ;;  %v2142_v58 = vld [vmem:[%s15604_s7 + $0x2c8] sm:$0xff]  ;;  %2492 = vmatpush.msrb.mxu0 %v2078_v53 }
 0x1f2   : > { %v1828_v2 = vadd.f32 %v1827_v27, %v1787_v52  ;;  %v1748_v36 = vpop.f32.mrf.mxu0  ;;  %v1789_v60 = vpop.f32.mrf.mxu1  ;;  %v2206_v52 = vld [vmem:[%s15604_s7 + $0x4c8] sm:$0xff]  ;;  %2615 = vmatpush.msrb.mxu3 %v2270_v12  ;;  %v10214_v27 = vld [vmem:[%s10063_s24 + $0x60] sm:$0xff]  ;;  %2533 = vmatpush.msrb.mxu1 %v2142_v58 }
 0x1f3   : > { %v1749_v22 = vadd.f32 %v1748_v36, %v10068_v46  ;;  %2574 = vmatpush.msrb.mxu2 %v2206_v52  ;;  %v2202_v34 = vld [vmem:[%s15604_s7 + $0x4a8] sm:$0xff] }
 0x1f4   : > { %v10183_v41 = vadd.f32 %v1868_v40, %v1828_v2  ;;  %v10217_v40 = vld [vmem:[%s10063_s24 + $0x68] sm:$0xff]  ;;  %v10220_v2 = vld [vmem:[%s10063_s24 + $0x70] sm:$0xff] }
 0x1f5   : > { %2341 = vmatmul.f32.gmra.mxu0 %v10171_v43  ;;  %v1790_v56 = vadd.f32 %v1789_v60, %v1749_v22  ;;  %2575 = vmatpush.msrb.mxu2 %v2202_v34  ;;  %v2074_v50 = vld [vmem:[%s15604_s7 + $0xa8] sm:$0xff] }
 0x1f6   : > { %15692 = vst [vmem:[#allocation36_spill] sm:$0xff] %v10183_v41  ;;  %2382 = vmatmul.f32.gmra.mxu1 %v10174_v44  ;;  %2423 = vmatmul.f32.gmra.mxu2 %v10177_v29  ;;  %v2266_v14 = vld [vmem:[%s15604_s7 + $0x6a8] sm:$0xff]  ;;  %v2307_v41 = vld [vmem:[%s15604_s7 + $0x7f0] sm:$0xff] }
 0x1f7   : > { %2464 = vmatmul.f32.gmra.mxu3 %v10180_v20  ;;  %2493 = vmatpush.msrb.mxu0 %v2074_v50  ;;  %v2198_v12 = vld [vmem:[%s15604_s7 + $0x488] sm:$0xff] }
 0x1f8   : > { %2616 = vmatpush.msrb.mxu3 %v2266_v14  ;;  %v2070_v58 = vld [vmem:[%s15604_s7 + $0x88] sm:$0xff]  ;;  %2576 = vmatpush.msrb.mxu2 %v2198_v12 }
 0x1f9   : > { %v1830_v26 = vpop.f32.mrf.mxu2  ;;  %v1871_v4 = vpop.f32.mrf.mxu3  ;;  %2494 = vmatpush.msrb.mxu0 %v2070_v58  ;;  %v2258_v50 = vld [vmem:[%s15604_s7 + $0x668] sm:$0xff]  ;;  %v10272_v58 = vld [vmem:[%s10063_s24 + $0x80] sm:$0xff] }
 0x1fa   : > { %v1831_v36 = vadd.f32 %v1830_v26, %v1790_v56  ;;  %v1751_v60 = vpop.f32.mrf.mxu0  ;;  %v1792_v22 = vpop.f32.mrf.mxu1  ;;  %v2138_v56 = vld [vmem:[%s15604_s7 + $0x2a8] sm:$0xff] }
 0x1fb   : > { %v1752_v52 = vadd.f32 %v1751_v60, %v10068_v46  ;;  %v2134_v26 = vld [vmem:[%s15604_s7 + $0x288] sm:$0xff]  ;;  %2534 = vmatpush.msrb.mxu1 %v2138_v56 }
 0x1fc   : > { %v10235_v53 = vadd.f32 %v1871_v4, %v1831_v36  ;;  %v2262_v4 = vld [vmem:[%s15604_s7 + $0x688] sm:$0xff] }
 0x1fd   : > { %2344 = vmatmul.f32.gmra.mxu0 %v10214_v27  ;;  %v1793_v34 = vadd.f32 %v1792_v22, %v1752_v52  ;;  %v2066_v36 = vld [vmem:[%s15604_s7 + $0x68] sm:$0xff]  ;;  %2617 = vmatpush.msrb.mxu3 %v2262_v4 }
 0x1fe   : > { %15693 = vst [vmem:[#allocation37_spill] sm:$0xff] %v10235_v53  ;;  %2385 = vmatmul.f32.gmra.mxu1 %v10217_v40  ;;  %2426 = vmatmul.f32.gmra.mxu2 %v10220_v2  ;;  %v2130_v60 = vld [vmem:[%s15604_s7 + $0x268] sm:$0xff]  ;;  %v2219_v53 = vld [vmem:[%s15604_s7 + $0x530] sm:$0xff] }
 0x1ff   : > { %2467 = vmatmul.f32.gmra.mxu3 %v10223_v55  ;;  %v2194_v22 = vld [vmem:[%s15604_s7 + $0x468] sm:$0xff]  ;;  %2535 = vmatpush.msrb.mxu1 %v2134_v26 }
 0x200   : > { %2577 = vmatpush.msrb.mxu2 %v2194_v22  ;;  %v2062_v14 = vld [vmem:[%s15604_s7 + $0x48] sm:$0xff]  ;;  %2495 = vmatpush.msrb.mxu0 %v2066_v36 }
 0x201   : > { %v2190_v52 = vld [vmem:[%s15604_s7 + $0x448] sm:$0xff]  ;;  %v1833_v56 = vpop.f32.mrf.mxu2  ;;  %v1874_v12 = vpop.f32.mrf.mxu3  ;;  %2618 = vmatpush.msrb.mxu3 %v2258_v50  ;;  %2536 = vmatpush.msrb.mxu1 %v2130_v60 }
 0x202   : > { %v10275_v4 = vld [vmem:[%s10063_s24 + $0x88] sm:$0xff]  ;;  %v1834_v22 = vadd.f32 %v1833_v56, %v1793_v34  ;;  %v1754_v35 = vpop.f32.mrf.mxu0  ;;  %v1795_v5 = vpop.f32.mrf.mxu1  ;;  %2578 = vmatpush.msrb.mxu2 %v2190_v52  ;;  %2496 = vmatpush.msrb.mxu0 %v2062_v14 }
 0x203   : > { %v2254_v26 = vld [vmem:[%s15604_s7 + $0x648] sm:$0xff]  ;;  %v1755_v25 = vadd.f32 %v1754_v35, %v10068_v46 }
 0x204   : > { %v2126_v36 = vld [vmem:[%s15604_s7 + $0x248] sm:$0xff]  ;;  %2619 = vmatpush.msrb.mxu3 %v2254_v26  ;;  %v10293_v50 = vadd.f32 %v1874_v12, %v1834_v22  ;;  %v2115_v26 = vld [vmem:[%s15604_s7 + $0x1f0] sm:$0xff] }
 0x205   : > { %v2058_v34 = vld [vmem:[%s15604_s7 + $0x28] sm:$0xff]  ;;  %2347 = vmatmul.f32.gmra.mxu0 %v10272_v58  ;;  %v1796_v14 = vadd.f32 %v1795_v5, %v1755_v25  ;;  %2537 = vmatpush.msrb.mxu1 %v2126_v36  ;;  %v2179_v22 = vld [vmem:[%s15604_s7 + $0x3f0] sm:$0xff] }
 0x206   : > { %2388 = vmatmul.f32.gmra.mxu1 %v10275_v4  ;;  %v2186_v35 = vld [vmem:[%s15604_s7 + $0x428] sm:$0xff]  ;;  %2429 = vmatmul.f32.gmra.mxu2 %v10281_v10  ;;  %v2243_v36 = vld [vmem:[%s15604_s7 + $0x5f0] sm:$0xff] }
 0x207   : > { %v2250_v60 = vld [vmem:[%s15604_s7 + $0x628] sm:$0xff]  ;;  %2470 = vmatmul.f32.gmra.mxu3 %v10284_v23  ;;  %2497 = vmatpush.msrb.mxu0 %v2058_v34 }
 0x208   : > { %v2122_v52 = vld [vmem:[%s15604_s7 + $0x228] sm:$0xff]  ;;  %2579 = vmatpush.msrb.mxu2 %v2186_v35  ;;  %2620 = vmatpush.msrb.mxu3 %v2250_v60  ;;  %v10330_v60 = vld [vmem:[%s10063_s24 + $0xa0] sm:$0xff] }
 0x209   : > { %v2054_v56 = vld [vmem:[%s15604_s7 + $0x8] sm:$0xff]  ;;  %2538 = vmatpush.msrb.mxu1 %v2122_v52  ;;  %v1836_v34 = vpop.f32.mrf.mxu2  ;;  %v1877_v35 = vpop.f32.mrf.mxu3 }
 0x20a   : > { %v2182_v5 = vld [vmem:[%s15604_s7 + $0x408] sm:$0xff]  ;;  %2498 = vmatpush.msrb.mxu0 %v2054_v56  ;;  %v1837_v63 = vadd.f32 %v1836_v34, %v1796_v14  ;;  %v1757_v59 = vpop.f32.mrf.mxu0  ;;  %v10336_v56 = vld [vmem:[%s10063_s24 + $0xb0] sm:$0xff] }
 0x20b   : > { %v2246_v25 = vld [vmem:[%s15604_s7 + $0x608] sm:$0xff]  ;;  %2580 = vmatpush.msrb.mxu2 %v2182_v5  ;;  %v1798_v52 = vpop.f32.mrf.mxu1  ;;  %v1758_v8 = vadd.f32 %v1757_v59, %v10068_v46  ;;  %v2111_v14 = vld [vmem:[%s15604_s7 + $0x1d0] sm:$0xff] }
 0x20c   : > { %v2118_v12 = vld [vmem:[%s15604_s7 + $0x208] sm:$0xff]  ;;  %2621 = vmatpush.msrb.mxu3 %v2246_v25  ;;  %2647 = vmatpush.msra.mxu0 %v2115_v26  ;;  %v10348_v5 = vadd.f32 %v1877_v35, %v1837_v63  ;;  %v2175_v59 = vld [vmem:[%s15604_s7 + $0x3d0] sm:$0xff] }
 0x20d   : > { %2539 = vmatpush.msrb.mxu1 %v2118_v12  ;;  %2729 = vmatpush.msra.mxu2 %v2243_v36  ;;  %v2239_v25 = vld [vmem:[%s15604_s7 + $0x5d0] sm:$0xff]  ;;  %v1799_v26 = vadd.f32 %v1798_v52, %v1758_v8 }
 0x20e   : > { %2350 = vmatmul.f32.gmra.mxu0 %v10330_v60  ;;  %2391 = vmatmul.f32.gmra.mxu1 %v10333_v38  ;;  %v2303_v63 = vld [vmem:[%s15604_s7 + $0x7d0] sm:$0xff] }
 0x20f   : > { %2688 = vmatpush.msra.mxu1 %v2179_v22  ;;  %2432 = vmatmul.f32.gmra.mxu2 %v10336_v56  ;;  %v2107_v12 = vld [vmem:[%s15604_s7 + $0x1b0] sm:$0xff] }
 0x210   : > { %2473 = vmatmul.f32.gmra.mxu3 %v10339_v39  ;;  %2648 = vmatpush.msra.mxu0 %v2111_v14  ;;  %v2171_v22 = vld [vmem:[%s15604_s7 + $0x3b0] sm:$0xff] }
 0x211   : > { %2770 = vmatpush.msra.mxu3 %v2307_v41  ;;  %v2235_v36 = vld [vmem:[%s15604_s7 + $0x5b0] sm:$0xff]  ;;  %2689 = vmatpush.msra.mxu1 %v2175_v59  ;;  %v1839_v52 = vpop.f32.mrf.mxu2  ;;  %v10385_v59 = vld [vmem:[%s10063_s24 + $0xc0] sm:$0xff] }
 0x212   : > { %2730 = vmatpush.msra.mxu2 %v2239_v25  ;;  %v2299_v34 = vld [vmem:[%s15604_s7 + $0x7b0] sm:$0xff]  ;;  %2649 = vmatpush.msra.mxu0 %v2107_v12  ;;  %v1880_v14 = vpop.f32.mrf.mxu3  ;;  %v10388_v25 = vld [vmem:[%s10063_s24 + $0xc8] sm:$0xff]  ;;  %v1840_v3 = vadd.f32 %v1839_v52, %v1799_v26  ;;  %v1760_v19 = vpop.f32.mrf.mxu0 }
 0x213   : > { %v2103_v8 = vld [vmem:[%s15604_s7 + $0x190] sm:$0xff]  ;;  %2771 = vmatpush.msra.mxu3 %v2303_v63  ;;  %2690 = vmatpush.msra.mxu1 %v2171_v22  ;;  %v1801_v63 = vpop.f32.mrf.mxu1  ;;  %v1761_v16 = vadd.f32 %v1760_v19, %v10068_v46 }
 0x214   : > { %v2167_v41 = vld [vmem:[%s15604_s7 + $0x390] sm:$0xff]  ;;  %2731 = vmatpush.msra.mxu2 %v2235_v36  ;;  %2650 = vmatpush.msra.mxu0 %v2103_v8  ;;  %v10400_v37 = vadd.f32 %v1880_v14, %v1840_v3 }
 0x215   : > { %v2231_v35 = vld [vmem:[%s15604_s7 + $0x590] sm:$0xff]  ;;  %2772 = vmatpush.msra.mxu3 %v2299_v34  ;;  %2691 = vmatpush.msra.mxu1 %v2167_v41  ;;  %v1802_v36 = vadd.f32 %v1801_v63, %v1761_v16  ;;  %v10439_v63 = vld [vmem:[%s10063_s24 + $0xe0] sm:$0xff] }
 0x216   : > { %v10391_v12 = vld [vmem:[%s10063_s24 + $0xd0] sm:$0xff]  ;;  %2732 = vmatpush.msra.mxu2 %v2231_v35  ;;  %15694 = vst [vmem:[#allocation38_spill] sm:$0xff] %v10400_v37  ;;  %2353 = vmatmul.f32.gmra.mxu0 %v10385_v59 }
 0x217   : > { %2394 = vmatmul.f32.gmra.mxu1 %v10388_v25  ;;  %v2099_v26 = vld [vmem:[%s15604_s7 + $0x170] sm:$0xff]  ;;  %2435 = vmatmul.f32.gmra.mxu2 %v10391_v12 }
 0x218   : > { %v2163_v19 = vld [vmem:[%s15604_s7 + $0x370] sm:$0xff]  ;;  %2476 = vmatmul.f32.gmra.mxu3 %v10394_v1  ;;  %3275 = vrot.lane.b32.xlu2 %v10400_v37, %s7740_s19 }
 0x219   : > { %v2227_v3 = vld [vmem:[%s15604_s7 + $0x570] sm:$0xff]  ;;  %2773 = vmatpush.msra.mxu3 %v2295_v32  ;;  %2651 = vmatpush.msra.mxu0 %v2099_v26  ;;  %v1842_v52 = vpop.f32.mrf.mxu2  ;;  %v10442_v26 = vld [vmem:[%s10063_s24 + $0xe8] sm:$0xff] }
 0x21a   : > { %v2291_v22 = vld [vmem:[%s15604_s7 + $0x770] sm:$0xff]  ;;  %2692 = vmatpush.msra.mxu1 %v2163_v19  ;;  %2733 = vmatpush.msra.mxu2 %v2227_v3  ;;  %v1883_v14 = vpop.f32.mrf.mxu3  ;;  %v1843_v19 = vadd.f32 %v1842_v52, %v1802_v36  ;;  %v1763_v37 = vpop.f32.mrf.mxu0 }
 0x21b   : > { %v2095_v34 = vld [vmem:[%s15604_s7 + $0x150] sm:$0xff]  ;;  %2774 = vmatpush.msra.mxu3 %v2291_v22  ;;  %v1804_v3 = vpop.f32.mrf.mxu1  ;;  %v1764_v15 = vadd.f32 %v1763_v37, %v10068_v46 }
 0x21c   : > { %v2159_v8 = vld [vmem:[%s15604_s7 + $0x350] sm:$0xff]  ;;  %2652 = vmatpush.msra.mxu0 %v2095_v34  ;;  %v10454_v51 = vadd.f32 %v1883_v14, %v1843_v19 }
 0x21d   : > { %v2223_v16 = vld [vmem:[%s15604_s7 + $0x550] sm:$0xff]  ;;  %2693 = vmatpush.msra.mxu1 %v2159_v8  ;;  %v1805_v8 = vadd.f32 %v1804_v3, %v1764_v15 }
 0x21e   : > { %v2287_v32 = vld [vmem:[%s15604_s7 + $0x750] sm:$0xff]  ;;  %2734 = vmatpush.msra.mxu2 %v2223_v16  ;;  %15695 = vst [vmem:[#allocation39_spill] sm:$0xff] %v10454_v51  ;;  %2356 = vmatmul.f32.gmra.mxu0 %v10439_v63 }
 0x21f   : > { %v2091_v41 = vld [vmem:[%s15604_s7 + $0x130] sm:$0xff]  ;;  %2775 = vmatpush.msra.mxu3 %v2287_v32  ;;  %2397 = vmatmul.f32.gmra.mxu1 %v10442_v26 }
 0x220   : > { %v2155_v35 = vld [vmem:[%s15604_s7 + $0x330] sm:$0xff]  ;;  %2653 = vmatpush.msra.mxu0 %v2091_v41  ;;  %2479 = vmatmul.f32.gmra.mxu3 %v10448_v30  ;;  %v7642_v41 = vld [vmem:[%s15603_s6] sm:$0xf] }
 0x221   : > { %v10445_v22 = vld [vmem:[%s10063_s24 + $0xf0] sm:$0xff]  ;;  %2694 = vmatpush.msra.mxu1 %v2155_v35  ;;  %3277 = vrot.lane.b32.xlu1 %v10454_v51, %s7740_s19  ;;  %v10483_v35 = vperm.slane %v7642_v41, 3  ;;  %v1845_v19 = vpop.f32.mrf.mxu2 }
 0x222   : > { %v2283_v36 = vld [vmem:[%s15604_s7 + $0x730] sm:$0xff]  ;;  %2438 = vmatmul.f32.gmra.mxu2 %v10445_v22  ;;  %v1886_v3 = vpop.f32.mrf.mxu3 }
 0x223   : > { %v2087_v37 = vld [vmem:[%s15604_s7 + $0x110] sm:$0xff]  ;;  %2735 = vmatpush.msra.mxu2 %v2219_v53  ;;  %2776 = vmatpush.msra.mxu3 %v2283_v36  ;;  %v1846_v36 = vadd.f32 %v1845_v19, %v1805_v8  ;;  %v1947_v41 = vpop.f32.mrf.mxu1 }
 0x224   : > { %v2151_v46 = vld [vmem:[%s15604_s7 + $0x310] sm:$0xff]  ;;  %2654 = vmatpush.msra.mxu0 %v2087_v37  ;;  %v1906_v37 = vpop.f32.mrf.mxu0 }
 0x225   : > { %v2215_v34 = vld [vmem:[%s15604_s7 + $0x510] sm:$0xff]  ;;  %2695 = vmatpush.msra.mxu1 %v2151_v46  ;;  %v1907_v46 = vadd.f32 %v1906_v37, %v10483_v35  ;;  %v10501_v51 = vadd.f32 %v1886_v3, %v1846_v36 }
 0x226   : > { %v2279_v16 = vld [vmem:[%s15604_s7 + $0x710] sm:$0xff]  ;;  %2736 = vmatpush.msra.mxu2 %v2215_v34  ;;  %2499 = vmatmul.f32.vlgmr.msrb.gmra.mxu0 %v10083_v54 }
 0x227   : > { %v2083_v32 = vld [vmem:[%s15604_s7 + $0xf0] sm:$0xff]  ;;  %2777 = vmatpush.msra.mxu3 %v2279_v16  ;;  %2540 = vmatmul.f32.vlgmr.msrb.gmra.mxu1 %v10086_v57  ;;  %v1948_v57 = vadd.f32 %v1947_v41, %v1907_v46 }
 0x228   : > { %v2147_v15 = vld [vmem:[%s15604_s7 + $0x2f0] sm:$0xff]  ;;  %2655 = vmatpush.msra.mxu0 %v2083_v32  ;;  %2622 = vmatmul.f32.vlgmr.msrb.gmra.mxu3 %v10093_v6 }
 0x229   : > { %v2211_v53 = vld [vmem:[%s15604_s7 + $0x4f0] sm:$0xff]  ;;  %2696 = vmatpush.msra.mxu1 %v2147_v15  ;;  %3279 = vrot.lane.b32.xlu0 %v10501_v51, %s7740_s19  ;;  %v1988_v19 = vpop.f32.mrf.mxu2 }
 0x22a   : > { %v2275_v52 = vld [vmem:[%s15604_s7 + $0x6f0] sm:$0xff]  ;;  %2737 = vmatpush.msra.mxu2 %v2211_v53  ;;  %v2029_v3 = vpop.f32.mrf.mxu3  ;;  %v1989_v36 = vadd.f32 %v1988_v19, %v1948_v57 }
 0x22b   : > { %v2079_v14 = vld [vmem:[%s15604_s7 + $0xd0] sm:$0xff]  ;;  %2778 = vmatpush.msra.mxu3 %v2275_v52  ;;  %2581 = vmatmul.f32.vlgmr.msrb.gmra.mxu2 %v10090_v33  ;;  %v1950_v41 = vpop.f32.mrf.mxu1 }
 0x22c   : > { %2656 = vmatpush.msra.mxu0 %v2079_v14  ;;  %v2143_v34 = vld [vmem:[%s15604_s7 + $0x2d0] sm:$0xff]  ;;  %v1909_v37 = vpop.f32.mrf.mxu0 }
 0x22d   : > { %v2207_v8 = vld [vmem:[%s15604_s7 + $0x4d0] sm:$0xff]  ;;  %2697 = vmatpush.msra.mxu1 %v2143_v34  ;;  %v1910_v46 = vadd.f32 %v1909_v37, %v10483_v35 }
 0x22e   : > { %v2271_v16 = vld [vmem:[%s15604_s7 + $0x6d0] sm:$0xff]  ;;  %2738 = vmatpush.msra.mxu2 %v2207_v8  ;;  %2502 = vmatmul.f32.gmra.mxu0 %v10128_v9 }
 0x22f   : > { %v2075_v32 = vld [vmem:[%s15604_s7 + $0xb0] sm:$0xff]  ;;  %2779 = vmatpush.msra.mxu3 %v2271_v16  ;;  %v10546_v16 = vadd.f32 %v2029_v3, %v1989_v36  ;;  %2543 = vmatmul.f32.gmra.mxu1 %v10131_v11  ;;  %v1951_v57 = vadd.f32 %v1950_v41, %v1910_v46 }
 0x230   : > { %v2139_v54 = vld [vmem:[%s15604_s7 + $0x2b0] sm:$0xff]  ;;  %2657 = vmatpush.msra.mxu0 %v2075_v32  ;;  %2625 = vmatmul.f32.gmra.mxu3 %v10137_v47 }
 0x231   : > { %v2203_v15 = vld [vmem:[%s15604_s7 + $0x4b0] sm:$0xff]  ;;  %2698 = vmatpush.msra.mxu1 %v2139_v54 }
 0x232   : > { %v2267_v33 = vld [vmem:[%s15604_s7 + $0x6b0] sm:$0xff]  ;;  %2739 = vmatpush.msra.mxu2 %v2203_v15 }
 0x233   : > { %v2071_v6 = vld [vmem:[%s15604_s7 + $0x90] sm:$0xff]  ;;  %2780 = vmatpush.msra.mxu3 %v2267_v33  ;;  %2584 = vmatmul.f32.gmra.mxu2 %v10134_v0  ;;  %v1953_v36 = vpop.f32.mrf.mxu1 }
 0x234   : > { %v2135_v53 = vld [vmem:[%s15604_s7 + $0x290] sm:$0xff]  ;;  %2658 = vmatpush.msra.mxu0 %v2071_v6  ;;  %v1912_v3 = vpop.f32.mrf.mxu0 }
 0x235   : > { %v2199_v52 = vld [vmem:[%s15604_s7 + $0x490] sm:$0xff]  ;;  %2699 = vmatpush.msra.mxu1 %v2135_v53  ;;  %v1913_v37 = vadd.f32 %v1912_v3, %v10483_v35 }
 0x236   : > { %v2263_v14 = vld [vmem:[%s15604_s7 + $0x690] sm:$0xff]  ;;  %2740 = vmatpush.msra.mxu2 %v2199_v52  ;;  %v1991_v52 = vpop.f32.mrf.mxu2  ;;  %2505 = vmatmul.f32.gmra.mxu0 %v10171_v43  ;;  %v2180_v43 = vld [vmem:[%s15604_s7 + $0x3f8] sm:$0xff] }
 0x237   : > { %2781 = vmatpush.msra.mxu3 %v2263_v14  ;;  %v2067_v34 = vld [vmem:[%s15604_s7 + $0x70] sm:$0xff]  ;;  %v2032_v14 = vpop.f32.mrf.mxu3  ;;  %v1992_v19 = vadd.f32 %v1991_v52, %v1951_v57  ;;  %2546 = vmatmul.f32.gmra.mxu1 %v10174_v44  ;;  %v1954_v44 = vadd.f32 %v1953_v36, %v1913_v37  ;;  %v2244_v57 = vld [vmem:[%s15604_s7 + $0x5f8] sm:$0xff] }
 0x238   : > { %v2131_v8 = vld [vmem:[%s15604_s7 + $0x270] sm:$0xff]  ;;  %2659 = vmatpush.msra.mxu0 %v2067_v34  ;;  %2628 = vmatmul.f32.gmra.mxu3 %v10180_v20  ;;  %v2112_v20 = vld [vmem:[%s15604_s7 + $0x1d8] sm:$0xff] }
 0x239   : > { %v2195_v32 = vld [vmem:[%s15604_s7 + $0x470] sm:$0xff]  ;;  %2700 = vmatpush.msra.mxu1 %v2131_v8  ;;  %v10589_v34 = vadd.f32 %v2032_v14, %v1992_v19  ;;  %v2108_v19 = vld [vmem:[%s15604_s7 + $0x1b8] sm:$0xff] }
 0x23a   : > { %v2259_v54 = vld [vmem:[%s15604_s7 + $0x670] sm:$0xff]  ;;  %2741 = vmatpush.msra.mxu2 %v2195_v32  ;;  %v2172_v36 = vld [vmem:[%s15604_s7 + $0x3b8] sm:$0xff] }
 0x23b   : > { %v2063_v15 = vld [vmem:[%s15604_s7 + $0x50] sm:$0xff]  ;;  %2782 = vmatpush.msra.mxu3 %v2259_v54  ;;  %2587 = vmatmul.f32.gmra.mxu2 %v10177_v29  ;;  %v2116_v54 = vld [vmem:[%s15604_s7 + $0x1f8] sm:$0xff]  ;;  %v1956_v52 = vpop.f32.mrf.mxu1 }
 0x23c   : > { %v2127_v9 = vld [vmem:[%s15604_s7 + $0x250] sm:$0xff]  ;;  %2660 = vmatpush.msra.mxu0 %v2063_v15  ;;  %v2308_v29 = vld [vmem:[%s15604_s7 + $0x7f8] sm:$0xff] }
 0x23d   : > { %v2191_v11 = vld [vmem:[%s15604_s7 + $0x450] sm:$0xff]  ;;  %2701 = vmatpush.msra.mxu1 %v2127_v9  ;;  %v2176_v15 = vld [vmem:[%s15604_s7 + $0x3d8] sm:$0xff]  ;;  %v10619_v9 = vpop.permute.xlu0 %3037 }
 0x23e   : > { %v2255_v0 = vld [vmem:[%s15604_s7 + $0x650] sm:$0xff]  ;;  %2742 = vmatpush.msra.mxu2 %v2191_v11  ;;  %v2240_v11 = vld [vmem:[%s15604_s7 + $0x5d8] sm:$0xff]  ;;  %2508 = vmatmul.f32.gmra.mxu0 %v10214_v27 }
 0x23f   : > { %v2059_v47 = vld [vmem:[%s15604_s7 + $0x30] sm:$0xff]  ;;  %2783 = vmatpush.msra.mxu3 %v2255_v0  ;;  %v2304_v0 = vld [vmem:[%s15604_s7 + $0x7d8] sm:$0xff]  ;;  %2549 = vmatmul.f32.gmra.mxu1 %v10217_v40 }
 0x240   : > { %v2123_v33 = vld [vmem:[%s15604_s7 + $0x230] sm:$0xff]  ;;  %2661 = vmatpush.msra.mxu0 %v2059_v47  ;;  %v1994_v47 = vpop.f32.mrf.mxu2  ;;  %v2236_v37 = vld [vmem:[%s15604_s7 + $0x5b8] sm:$0xff]  ;;  %2631 = vmatmul.f32.gmra.mxu3 %v10223_v55 }
 0x241   : > { %v2187_v6 = vld [vmem:[%s15604_s7 + $0x430] sm:$0xff]  ;;  %2702 = vmatpush.msra.mxu1 %v2123_v33  ;;  %v2035_v33 = vpop.f32.mrf.mxu3  ;;  %v2104_v27 = vld [vmem:[%s15604_s7 + $0x198] sm:$0xff] }
 0x242   : > { %v2251_v53 = vld [vmem:[%s15604_s7 + $0x630] sm:$0xff]  ;;  %2743 = vmatpush.msra.mxu2 %v2187_v6  ;;  %v1995_v6 = vadd.f32 %v1994_v47, %v1954_v44  ;;  %v2296_v55 = vld [vmem:[%s15604_s7 + $0x798] sm:$0xff] }
 0x243   : > { %2784 = vmatpush.msra.mxu3 %v2251_v53  ;;  %v2055_v41 = vld [vmem:[%s15604_s7 + $0x10] sm:$0xff]  ;;  %v1915_v53 = vpop.f32.mrf.mxu0  ;;  %2590 = vmatmul.f32.gmra.mxu2 %v10220_v2  ;;  %v2232_v2 = vld [vmem:[%s15604_s7 + $0x598] sm:$0xff] }
 0x244   : > { %v2119_v46 = vld [vmem:[%s15604_s7 + $0x210] sm:$0xff]  ;;  %2662 = vmatpush.msra.mxu0 %v2055_v41  ;;  %v1916_v14 = vadd.f32 %v1915_v53, %v10483_v35  ;;  %v10631_v3 = vadd.f32 %v2035_v33, %v1995_v6  ;;  %v2300_v41 = vld [vmem:[%s15604_s7 + $0x7b8] sm:$0xff] }
 0x245   : > { %v2183_v8 = vld [vmem:[%s15604_s7 + $0x410] sm:$0xff]  ;;  %2703 = vmatpush.msra.mxu1 %v2119_v46  ;;  %v2168_v46 = vld [vmem:[%s15604_s7 + $0x398] sm:$0xff] }
 0x246   : > { %v2247_v32 = vld [vmem:[%s15604_s7 + $0x610] sm:$0xff]  ;;  %2744 = vmatpush.msra.mxu2 %v2183_v8  ;;  %2811 = vmatpush.msrb.mxu0 %v2116_v54  ;;  %v1957_v40 = vadd.f32 %v1956_v52, %v1916_v14  ;;  %v2100_v8 = vld [vmem:[%s15604_s7 + $0x178] sm:$0xff] }
 0x247   : > { %2785 = vmatpush.msra.mxu3 %v2247_v32  ;;  %2852 = vmatpush.msrb.mxu1 %v2180_v43  ;;  %v15696_v32 = vperm.slane %v9205_v7, 1  ;;  %v10666_v43 = vpop.permute.xlu0 %3151  ;;  %v2164_v44 = vld [vmem:[%s15604_s7 + $0x378] sm:$0xff] }
 0x248   : > { %2893 = vmatpush.msrb.mxu2 %v2244_v57  ;;  %2812 = vmatpush.msrb.mxu0 %v2112_v20  ;;  %v2228_v57 = vld [vmem:[%s15604_s7 + $0x578] sm:$0xff] }
 0x249   : > { %2934 = vmatpush.msrb.mxu3 %v2308_v29  ;;  %2853 = vmatpush.msrb.mxu1 %v2176_v15  ;;  %v876_v54 = vadd.f32 %v9348_v61, %v15696_v32  ;;  %v1997_v29 = vpop.f32.mrf.mxu2  ;;  %v2038_v20 = vpop.f32.mrf.mxu3  ;;  %v2096_v6 = vld [vmem:[%s15604_s7 + $0x158] sm:$0xff] }
 0x24a   : > { %2894 = vmatpush.msrb.mxu2 %v2240_v11  ;;  %3385 = vrot.lane.b32.xlu0 %v10631_v3, %s7740_s19  ;;  %v1998_v15 = vadd.f32 %v1997_v29, %v1957_v40  ;;  %v1959_v11 = vpop.f32.mrf.mxu1  ;;  %v2160_v53 = vld [vmem:[%s15604_s7 + $0x358] sm:$0xff] }
 0x24b   : > { %2935 = vmatpush.msrb.mxu3 %v2304_v0  ;;  %2813 = vmatpush.msrb.mxu0 %v2108_v19  ;;  %v1918_v7 = vpop.f32.mrf.mxu0  ;;  %v2292_v0 = vld [vmem:[%s15604_s7 + $0x778] sm:$0xff]  ;;  %v899_v47 = vadd.f32 %v9350_v62, %v876_v54 }
 0x24c   : > { %2854 = vmatpush.msrb.mxu1 %v2172_v36  ;;  %2895 = vmatpush.msrb.mxu2 %v2236_v37  ;;  %v1919_v61 = vadd.f32 %v1918_v7, %v10483_v35  ;;  %v10679_v33 = vadd.f32 %v2038_v20, %v1998_v15  ;;  %v2224_v62 = vld [vmem:[%s15604_s7 + $0x558] sm:$0xff] }
 0x24d   : > { %2936 = vmatpush.msrb.mxu3 %v2300_v41  ;;  %2814 = vmatpush.msrb.mxu0 %v2104_v27  ;;  %v2220_v14 = vld [vmem:[%s15604_s7 + $0x538] sm:$0xff]  ;;  %v922_v36 = vadd.f32 %v9371_v17, %v899_v47 }
 0x24e   : > { %2855 = vmatpush.msrb.mxu1 %v2168_v46  ;;  %2896 = vmatpush.msrb.mxu2 %v2232_v2  ;;  %v1960_v52 = vadd.f32 %v1959_v11, %v1919_v61  ;;  %v2284_v19 = vld [vmem:[%s15604_s7 + $0x738] sm:$0xff] }
 0x24f   : > { %2937 = vmatpush.msrb.mxu3 %v2296_v55  ;;  %2815 = vmatpush.msrb.mxu0 %v2100_v8  ;;  %v2088_v37 = vld [vmem:[%s15604_s7 + $0x118] sm:$0xff]  ;;  %v10722_v8 = vadd.f32 %v9373_v18, %v922_v36  ;;  %v10724_v32 = vpop.permute.xlu0 %3153  ;;  %v10739_v18 = vld [vmem:[%s15601_s4] sm:$0xf]  ;;  %v10794_v36 = vpop.permute.xlu1 %3035 }
 0x250   : > { %2856 = vmatpush.msrb.mxu1 %v2164_v44  ;;  %2897 = vmatpush.msrb.mxu2 %v2228_v57  ;;  %v2152_v41 = vld [vmem:[%s15604_s7 + $0x318] sm:$0xff]  ;;  %v755_v29 = vperm.slane %v10739_v18, 0 }
 0x251   : > { %2511 = vmatmul.f32.gmra.mxu0 %v10272_v58  ;;  %2552 = vmatmul.f32.gmra.mxu1 %v10275_v4  ;;  %v2288_v58 = vld [vmem:[%s15604_s7 + $0x758] sm:$0xff]  ;;  %v10697_v4 = vpop.permute.xlu2 %3145  ;;  %v2000_v27 = vpop.f32.mrf.mxu2  ;;  %15698 = vst [vmem:[#allocation41_spill] sm:$0xff] %v10722_v8 }
 0x252   : > { %2593 = vmatmul.f32.gmra.mxu2 %v10281_v10  ;;  %2634 = vmatmul.f32.gmra.mxu3 %v10284_v23  ;;  %15697 = vst [vmem:[#allocation40_spill] sm:$0xff] %v10697_v4  ;;  %v2092_v10 = vld [vmem:[%s15604_s7 + $0x138] sm:$0xff]  ;;  %v2041_v40 = vpop.f32.mrf.mxu3  ;;  %v2001_v46 = vadd.f32 %v2000_v27, %v1960_v52  ;;  %v1962_v55 = vpop.f32.mrf.mxu1  ;;  %v781_v47 = vadd.f32 %v9107_v28, %v755_v29 }
 0x253   : > { %3387 = vrot.lane.b32.xlu0 %v10679_v33, %s7740_s19  ;;  %2938 = vmatpush.msrb.mxu3 %v2292_v0  ;;  %v2156_v23 = vld [vmem:[%s15604_s7 + $0x338] sm:$0xff]  ;;  %v1921_v2 = vpop.f32.mrf.mxu0 }
 0x254   : > { %2816 = vmatpush.msrb.mxu0 %v2096_v6  ;;  %2857 = vmatpush.msrb.mxu1 %v2160_v53  ;;  %v1922_v17 = vadd.f32 %v1921_v2, %v10483_v35  ;;  %v10726_v54 = vadd.f32 %v2041_v40, %v2001_v46  ;;  %v2216_v44 = vld [vmem:[%s15604_s7 + $0x518] sm:$0xff] }
 0x255   : > { %2898 = vmatpush.msrb.mxu2 %v2224_v62  ;;  %2939 = vmatpush.msrb.mxu3 %v2288_v58  ;;  %v2280_v57 = vld [vmem:[%s15604_s7 + $0x718] sm:$0xff] }
 0x256   : > { %2817 = vmatpush.msrb.mxu0 %v2092_v10  ;;  %2858 = vmatpush.msrb.mxu1 %v2156_v23  ;;  %v1963_v15 = vadd.f32 %v1962_v55, %v1922_v17  ;;  %v2080_v7 = vld [vmem:[%s15604_s7 + $0xd8] sm:$0xff] }
 0x257   : > { %2899 = vmatpush.msrb.mxu2 %v2220_v14  ;;  %2940 = vmatpush.msrb.mxu3 %v2284_v19  ;;  %v2144_v11 = vld [vmem:[%s15604_s7 + $0x2d8] sm:$0xff]  ;;  %v804_v14 = vadd.f32 %v9117_v31, %v781_v47 }
 0x258   : > { %2818 = vmatpush.msrb.mxu0 %v2088_v37  ;;  %2859 = vmatpush.msrb.mxu1 %v2152_v41  ;;  %v2208_v61 = vld [vmem:[%s15604_s7 + $0x4d8] sm:$0xff] }
 0x259   : > { %2514 = vmatmul.f32.gmra.mxu0 %v10330_v60  ;;  %2555 = vmatmul.f32.gmra.mxu1 %v10333_v38  ;;  %v2084_v38 = vld [vmem:[%s15604_s7 + $0xf8] sm:$0xff]  ;;  %v10750_v20 = vpop.permute.xlu2 %3039  ;;  %v2003_v6 = vpop.f32.mrf.mxu2  ;;  %v827_v55 = vadd.f32 %v9157_v48, %v804_v14 }
 0x25a   : > { %2596 = vmatmul.f32.gmra.mxu2 %v10336_v56  ;;  %2637 = vmatmul.f32.gmra.mxu3 %v10339_v39  ;;  %v2148_v60 = vld [vmem:[%s15604_s7 + $0x2f8] sm:$0xff]  ;;  %v2044_v53 = vpop.f32.mrf.mxu3  ;;  %v2004_v62 = vadd.f32 %v2003_v6, %v1963_v15  ;;  %v1965_v52 = vpop.f32.mrf.mxu1 }
 0x25b   : > { %3147 = vrot.lane.b32.xlu0 %v10722_v8, %s7740_s19  ;;  %3389 = vrot.lane.b32.xlu2 %v10726_v54, %s7740_s19  ;;  %v2212_v39 = vld [vmem:[%s15604_s7 + $0x4f8] sm:$0xff]  ;;  %v1924_v58 = vpop.f32.mrf.mxu0 }
 0x25c   : > { %v2276_v56 = vld [vmem:[%s15604_s7 + $0x6f8] sm:$0xff]  ;;  %2900 = vmatpush.msrb.mxu2 %v2216_v44  ;;  %2941 = vmatpush.msrb.mxu3 %v2280_v57  ;;  %v1925_v10 = vadd.f32 %v1924_v58, %v10483_v35  ;;  %v10778_v23 = vadd.f32 %v2044_v53, %v2004_v62 }
 0x25d   : > { %2819 = vmatpush.msrb.mxu0 %v2084_v38  ;;  %2860 = vmatpush.msrb.mxu1 %v2148_v60  ;;  %v2272_v0 = vld [vmem:[%s15604_s7 + $0x6d8] sm:$0xff] }
 0x25e   : > { %2901 = vmatpush.msrb.mxu2 %v2212_v39  ;;  %2942 = vmatpush.msrb.mxu3 %v2276_v56  ;;  %v2076_v28 = vld [vmem:[%s15604_s7 + $0xb8] sm:$0xff]  ;;  %v1966_v37 = vadd.f32 %v1965_v52, %v1925_v10  ;;  %v10836_v56 = vld [vmem:[%s15605_s8] sm:$0xf] }
 0x25f   : > { %2820 = vmatpush.msrb.mxu0 %v2080_v7  ;;  %2861 = vmatpush.msrb.mxu1 %v2144_v11  ;;  %v2140_v19 = vld [vmem:[%s15604_s7 + $0x2b8] sm:$0xff]  ;;  %15699 = vst [vmem:[#allocation42_spill] sm:$0xff] %v10836_v56  ;;  %v10839_v7 = vadd.f32 %v9159_v49, %v827_v55  ;;  %v10872_v58 = vperm.slane %v10836_v56, 0 }
 0x260   : > { %2902 = vmatpush.msrb.mxu2 %v2208_v61  ;;  %2943 = vmatpush.msrb.mxu3 %v2272_v0  ;;  %v2268_v31 = vld [vmem:[%s15604_s7 + $0x6b8] sm:$0xff]  ;;  %v10849_v61 = vpop.permute.xlu1 %3047 }
 0x261   : > { %2517 = vmatmul.f32.gmra.mxu0 %v10385_v59  ;;  %2558 = vmatmul.f32.gmra.mxu1 %v10388_v25  ;;  %v2204_v59 = vld [vmem:[%s15604_s7 + $0x4b8] sm:$0xff]  ;;  %v10796_v25 = vpop.permute.xlu0 %3155  ;;  %v10816_v40 = vpop.permute.xlu2 %3041  ;;  %15700 = vst [vmem:[#allocation43_spill] sm:$0xff] %v10839_v7 }
 0x262   : > { %2599 = vmatmul.f32.gmra.mxu2 %v10391_v12  ;;  %2640 = vmatmul.f32.gmra.mxu3 %v10394_v1  ;;  %v2072_v1 = vld [vmem:[%s15604_s7 + $0x98] sm:$0xff]  ;;  %v2006_v17 = vpop.f32.mrf.mxu2  ;;  %v2047_v44 = vpop.f32.mrf.mxu3 }
 0x263   : > { %3391 = vrot.lane.b32.xlu1 %v10778_v23, %s7740_s19  ;;  %3271 = vrot.lane.b32.xlu0 %v10293_v50, %s7740_s19  ;;  %v2136_v41 = vld [vmem:[%s15604_s7 + $0x298] sm:$0xff]  ;;  %v2007_v57 = vadd.f32 %v2006_v17, %v1966_v37  ;;  %v1927_v38 = vpop.f32.mrf.mxu0  ;;  %v1968_v60 = vpop.f32.mrf.mxu1 }
 0x264   : > { %3273 = vrot.lane.b32.xlu2 %v10348_v5, %s7740_s19  ;;  %2821 = vmatpush.msrb.mxu0 %v2076_v28  ;;  %v2200_v27 = vld [vmem:[%s15604_s7 + $0x498] sm:$0xff]  ;;  %v1928_v15 = vadd.f32 %v1927_v38, %v10483_v35 }
 0x265   : > { %2862 = vmatpush.msrb.mxu1 %v2140_v19  ;;  %2903 = vmatpush.msrb.mxu2 %v2204_v59  ;;  %v2264_v46 = vld [vmem:[%s15604_s7 + $0x698] sm:$0xff]  ;;  %v10826_v39 = vadd.f32 %v2047_v44, %v2007_v57 }
 0x266   : > { %v2068_v2 = vld [vmem:[%s15604_s7 + $0x78] sm:$0xff]  ;;  %2944 = vmatpush.msrb.mxu3 %v2268_v31  ;;  %2822 = vmatpush.msrb.mxu0 %v2072_v1  ;;  %v1969_v47 = vadd.f32 %v1968_v60, %v1928_v15  ;;  %v10906_v15 = vld [vmem:[%s10063_s24] sm:$0xff] }
 0x267   : > { %2863 = vmatpush.msrb.mxu1 %v2136_v41  ;;  %2904 = vmatpush.msrb.mxu2 %v2200_v27  ;;  %v2132_v48 = vld [vmem:[%s15604_s7 + $0x278] sm:$0xff] }
 0x268   : > { %2945 = vmatpush.msrb.mxu3 %v2264_v46  ;;  %2823 = vmatpush.msrb.mxu0 %v2068_v2  ;;  %v2196_v35 = vld [vmem:[%s15604_s7 + $0x478] sm:$0xff]  ;;  %v757_v46 = vperm.slane %v10739_v18, 2  ;;  %v15726_v18 = vld [vmem:[#allocation9_spill] sm:$0xff] }
 0x269   : > { %2520 = vmatmul.f32.gmra.mxu0 %v10439_v63  ;;  %2561 = vmatmul.f32.gmra.mxu1 %v10442_v26  ;;  %v2260_v11 = vld [vmem:[%s15604_s7 + $0x678] sm:$0xff]  ;;  %v10851_v0 = vpop.permute.xlu0 %3161  ;;  %v10893_v2 = vpop.permute.xlu2 %3043 }
 0x26a   : > { %2602 = vmatmul.f32.gmra.mxu2 %v10445_v22  ;;  %2643 = vmatmul.f32.gmra.mxu3 %v10448_v30  ;;  %v2064_v49 = vld [vmem:[%s15604_s7 + $0x58] sm:$0xff]  ;;  %v2009_v28 = vpop.f32.mrf.mxu2  ;;  %v2050_v14 = vpop.f32.mrf.mxu3  ;;  %v968_v57 = vadd.f32 %v9441_v42, %v757_v46 }
 0x26b   : > { %3393 = vrot.lane.b32.xlu1 %v10826_v39, %s7740_s19  ;;  %3377 = vrot.lane.b32.xlu0 %v9507_v13, %s7740_s19  ;;  %v2128_v6 = vld [vmem:[%s15604_s7 + $0x258] sm:$0xff]  ;;  %v2010_v37 = vadd.f32 %v2009_v28, %v1969_v47  ;;  %v2336_v31 = vpop.f32.mrf.mxu0  ;;  %v2377_v1 = vpop.f32.mrf.mxu1 }
 0x26c   : > { %3029 = vrot.lane.b32.xlu2 %v10839_v7, %s7740_s19  ;;  %2864 = vmatpush.msrb.mxu1 %v2132_v48  ;;  %v2192_v53 = vld [vmem:[%s15604_s7 + $0x458] sm:$0xff]  ;;  %v2337_v55 = vadd.f32 %v2336_v31, %v10872_v58  ;;  %v10910_v48 = vld [vmem:[%s10063_s24 + $0x8] sm:$0xff]  ;;  %v15740_v7 = vld [vmem:[#allocation20_spill] sm:$0xff] }
 0x26d   : > { %v2256_v62 = vld [vmem:[%s15604_s7 + $0x658] sm:$0xff]  ;;  %2905 = vmatpush.msrb.mxu2 %v2196_v35  ;;  %2946 = vmatpush.msrb.mxu3 %v2260_v11  ;;  %v10903_v38 = vadd.f32 %v2050_v14, %v2010_v37  ;;  %v10913_v35 = vpop.permute.xlu1 %3149  ;;  %v10916_v11 = vld [vmem:[%s10063_s24 + $0x10] sm:$0xff]  ;;  %v15704_v14 = vld [vmem:[#allocation17_spill] sm:$0xff] }
 0x26e   : > { %v2060_v52 = vld [vmem:[%s15604_s7 + $0x38] sm:$0xff]  ;;  %2824 = vmatpush.msrb.mxu0 %v2064_v49  ;;  %2865 = vmatpush.msrb.mxu1 %v2128_v6  ;;  %v2378_v60 = vadd.f32 %v2377_v1, %v2337_v55  ;;  %v991_v49 = vadd.f32 %v9443_v45, %v968_v57  ;;  %v15707_v31 = vld [vmem:[#allocation13_spill] sm:$0xff] }
 0x26f   : > { %v2124_v10 = vld [vmem:[%s15604_s7 + $0x238] sm:$0xff]  ;;  %2906 = vmatpush.msrb.mxu2 %v2192_v53  ;;  %2947 = vmatpush.msrb.mxu3 %v2256_v62  ;;  %v965_v1 = vadd.f32 %v15707_v31, %v757_v46  ;;  %v15708_v46 = vld [vmem:[#allocation18_spill] sm:$0xff] }
 0x270   : > { %v2188_v19 = vld [vmem:[%s15604_s7 + $0x438] sm:$0xff]  ;;  %2825 = vmatpush.msrb.mxu0 %v2060_v52  ;;  %2866 = vmatpush.msrb.mxu1 %v2124_v10 }
 0x271   : > { %v2252_v59 = vld [vmem:[%s15604_s7 + $0x638] sm:$0xff]  ;;  %2907 = vmatpush.msrb.mxu2 %v2188_v19  ;;  %2663 = vmatmul.f32.vlgmr.msra.gmra.mxu0 %v10906_v15  ;;  %v3164_v42 = vpop.permute.xlu0 %3163  ;;  %v1014_v19 = vadd.f32 %v15704_v14, %v991_v49  ;;  %v15713_v14 = vld [vmem:[#allocation21_spill] sm:$0xff] }
 0x272   : > { %v2056_v41 = vld [vmem:[%s15604_s7 + $0x18] sm:$0xff]  ;;  %2948 = vmatpush.msrb.mxu3 %v2252_v59  ;;  %2704 = vmatmul.f32.vlgmr.msra.gmra.mxu1 %v10910_v48  ;;  %v2418_v6 = vpop.f32.mrf.mxu2  ;;  %v2459_v53 = vpop.f32.mrf.mxu3 }
 0x273   : > { %v2120_v27 = vld [vmem:[%s15604_s7 + $0x218] sm:$0xff]  ;;  %2826 = vmatpush.msrb.mxu0 %v2056_v41  ;;  %2745 = vmatmul.f32.vlgmr.msra.gmra.mxu2 %v10916_v11  ;;  %v2419_v62 = vadd.f32 %v2418_v6, %v2378_v60  ;;  %v2339_v52 = vpop.f32.mrf.mxu0  ;;  %v2380_v10 = vpop.f32.mrf.mxu1  ;;  %v10962_v57 = vadd.f32 %v15708_v46, %v1014_v19  ;;  %v15710_v60 = vld [vmem:[#allocation26_spill] sm:$0xff]  ;;  %v15714_v19 = vld [vmem:[#allocation36_spill] sm:$0xff] }
 0x274   : > { %v2184_v17 = vld [vmem:[%s15604_s7 + $0x418] sm:$0xff]  ;;  %2867 = vmatpush.msrb.mxu1 %v2120_v27  ;;  %3395 = vrot.lane.b32.xlu1 %v10903_v38, %s7740_s19  ;;  %v3046_v59 = vpop.permute.xlu2 %3045  ;;  %v10950_v27 = vld [vmem:[%s10063_s24 + $0x20] sm:$0xff]  ;;  %v15711_v6 = vld [vmem:[#allocation14_spill] sm:$0xff] }
 0x275   : > { %v2248_v44 = vld [vmem:[%s15604_s7 + $0x618] sm:$0xff]  ;;  %2908 = vmatpush.msrb.mxu2 %v2184_v17  ;;  %7299 = vmatpush.xpose.msk.msra.mxu0 %vm2975_vm0, %v9809_v21  ;;  %v2340_v21 = vadd.f32 %v2339_v52, %v10872_v58  ;;  %v10938_v28 = vadd.f32 %v2459_v53, %v2419_v62  ;;  %v3160_v55 = vpop.permute.xlu1 %3159  ;;  %v10954_v17 = vld [vmem:[%s10063_s24 + $0x28] sm:$0xff]  ;;  %v988_v53 = vadd.f32 %v15711_v6, %v965_v1  ;;  %v15719_v6 = vld [vmem:[#allocation16_spill] sm:$0xff] }
 0x276   : > { %2949 = vmatpush.msrb.mxu3 %v2248_v44  ;;  %v10920_v47 = vld [vmem:[%s10063_s24 + $0x18] sm:$0xff]  ;;  %7309 = vmatpush.xpose.msk.msra.mxu1 %vm2975_vm0, %v10849_v61  ;;  %v15706_v61 = vld [vmem:[#allocation34_spill] sm:$0xff]  ;;  %v15712_v62 = vld [vmem:[#allocation33_spill] sm:$0xff] }
 0x277   : > { %2786 = vmatmul.f32.vlgmr.msra.gmra.mxu3 %v10920_v47  ;;  %7319 = vmatpush.xpose.msk.msra.mxu2 %vm2975_vm0, %v10095_v24  ;;  %v15701_v45 = vld [vmem:[#allocation35_spill] sm:$0xff]  ;;  %v15702_v24 = vld [vmem:[#allocation37_spill] sm:$0xff]  ;;  %v2381_v41 = vadd.f32 %v2380_v10, %v2340_v21  ;;  %v10958_v44 = vld [vmem:[%s10063_s24 + $0x30] sm:$0xff] }
 0x278   : > { %7329 = vmatpush.xpose.msk.msra.mxu3 %vm2975_vm0, %v3164_v42  ;;  %3265 = vrot.lane.b32.xlu0 %v15701_v45, %s7740_s19  ;;  %15703 = vst [vmem:[#allocation35_spill] sm:$0xff] %v10938_v28  ;;  %v15705_v37 = vld [vmem:[#allocation27_spill] sm:$0xff]  ;;  %v11005_v46 = vld [vmem:[%s10063_s24 + $0x48] sm:$0xff] }
 0x279   : > { %3269 = vrot.lane.b32.xlu2 %v15702_v24, %s7740_s19  ;;  %7300 = vmatpush.xpose.msk.msra.mxu0 %vm2975_vm0, %v15705_v37  ;;  %15709 = vst [vmem:[#allocation37_spill] sm:$0xff] %v10962_v57  ;;  %v15717_v31 = vld [vmem:[#allocation15_spill] sm:$0xff] }
 0x27a   : > { %7310 = vmatpush.xpose.msk.msra.mxu1 %vm2975_vm0, %v3046_v59  ;;  %2666 = vmatmul.f32.gmra.mxu0 %v10950_v27  ;;  %v2421_v42 = vpop.f32.mrf.mxu2  ;;  %v2462_v49 = vpop.f32.mrf.mxu3  ;;  %v1011_v1 = vadd.f32 %v15717_v31, %v988_v53  ;;  %v11130_v28 = vld [vmem:[%s10063_s24 + $0xb8] sm:$0xff] }
 0x27b   : > { %7320 = vmatpush.xpose.msk.msra.mxu2 %vm2975_vm0, %v15706_v61  ;;  %2707 = vmatmul.f32.gmra.mxu1 %v10954_v17  ;;  %v2422_v52 = vadd.f32 %v2421_v42, %v2381_v41  ;;  %v10974_v10 = vpop.f32.mrf.mxu0  ;;  %v10976_v21 = vpop.f32.mrf.mxu1  ;;  %v15716_v61 = vld [vmem:[#allocation25_spill] sm:$0xff]  ;;  %v15718_v41 = vld [vmem:[#allocation32_spill] sm:$0xff]  ;;  %15739 = vst [vmem:[#allocation36_spill] sm:$0xff] %v11130_v28 }
 0x27c   : > { %7330 = vmatpush.xpose.msk.msra.mxu3 %vm2975_vm0, %v10851_v0  ;;  %2748 = vmatmul.f32.gmra.mxu2 %v10958_v44  ;;  %v10965_v0 = vld [vmem:[%s10063_s24 + $0x38] sm:$0xff]  ;;  %v3158_v37 = vpop.permute.xlu2 %3157  ;;  %v11017_v53 = vadd.f32 %v15719_v6, %v1011_v1  ;;  %v11056_v6 = vld [vmem:[%s10063_s24 + $0x68] sm:$0xff] }
 0x27d   : > { %7301 = vmatpush.xpose.msk.msra.mxu0 %vm2975_vm0, %v15710_v60  ;;  %3033 = vrot.lane.b32.xlu1 %v15713_v14, %s7740_s19  ;;  %v10986_v59 = vadd.f32 %v2462_v49, %v2422_v52  ;;  %v11009_v60 = vld [vmem:[%s10063_s24 + $0x58] sm:$0xff] }
 0x27e   : > { %7311 = vmatpush.xpose.msk.msra.mxu1 %vm2975_vm0, %v10893_v2  ;;  %v11001_v2 = vld [vmem:[%s10063_s24 + $0x50] sm:$0xff]  ;;  %15720 = vst [vmem:[#allocation27_spill] sm:$0xff] %v11017_v53  ;;  %v15724_v1 = vld [vmem:[#allocation23_spill] sm:$0xff] }
 0x27f   : > { %2789 = vmatmul.f32.gmra.mxu3 %v10965_v0  ;;  %7321 = vmatpush.xpose.msk.msra.mxu2 %vm2975_vm0, %v15712_v62  ;;  %15715 = vst [vmem:[#allocation17_spill] sm:$0xff] %v10986_v59  ;;  %v15722_v62 = vld [vmem:[#allocation31_spill] sm:$0xff] }
 0x280   : > { %7331 = vmatpush.xpose.msk.msra.mxu3 %vm2975_vm0, %v3160_v55  ;;  %3263 = vrot.lane.b32.xlu0 %v10962_v57, %s7740_s19  ;;  %v10995_v55 = vld [vmem:[%s10063_s24 + $0x40] sm:$0xff] }
 0x281   : > { %3267 = vrot.lane.b32.xlu2 %v15714_v19, %s7740_s19  ;;  %7302 = vmatpush.xpose.msk.msra.mxu0 %vm2975_vm0, %v15716_v61  ;;  %v15723_v61 = vld [vmem:[#allocation8_spill] sm:$0xff] }
 0x282   : > { %2669 = vmatmul.f32.gmra.mxu0 %v10995_v55  ;;  %7312 = vmatpush.xpose.msk.msra.mxu1 %vm2975_vm0, %v10816_v40  ;;  %v11012_v42 = vpop.f32.mrf.mxu2  ;;  %v11014_v49 = vpop.f32.mrf.mxu3  ;;  %v15721_v40 = vld [vmem:[#allocation24_spill] sm:$0xff]  ;;  %v784_v31 = vadd.f32 %v15723_v61, %v755_v29  ;;  %v15728_v61 = vld [vmem:[#allocation29_spill] sm:$0xff] }
 0x283   : > { %7322 = vmatpush.xpose.msk.msra.mxu2 %vm2975_vm0, %v15718_v41  ;;  %2710 = vmatmul.f32.gmra.mxu1 %v11005_v46  ;;  %v11023_v52 = vpop.f32.mrf.mxu0  ;;  %v15725_v41 = vld [vmem:[#allocation30_spill] sm:$0xff] }
 0x284   : > { %7332 = vmatpush.xpose.msk.msra.mxu3 %vm2975_vm0, %v3158_v37  ;;  %2751 = vmatmul.f32.gmra.mxu2 %v11001_v2  ;;  %v11025_v37 = vpop.f32.mrf.mxu1  ;;  %v807_v29 = vadd.f32 %v15726_v18, %v784_v31 }
 0x285   : > { %7303 = vmatpush.xpose.msk.msra.mxu0 %vm2975_vm0, %v15721_v40  ;;  %3383 = vrot.lane.b32.xlu1 %v10589_v34, %s7740_s19  ;;  %v11060_v40 = vld [vmem:[%s10063_s24 + $0x78] sm:$0xff] }
 0x286   : > { %7313 = vmatpush.xpose.msk.msra.mxu1 %vm2975_vm0, %v10750_v20  ;;  %v11051_v20 = vld [vmem:[%s10063_s24 + $0x70] sm:$0xff] }
 0x287   : > { %2792 = vmatmul.f32.gmra.mxu3 %v11009_v60  ;;  %7323 = vmatpush.xpose.msk.msra.mxu2 %vm2975_vm0, %v15722_v62 }
 0x288   : > { %7333 = vmatpush.xpose.msk.msra.mxu3 %vm2975_vm0, %v10796_v25  ;;  %v11045_v25 = vld [vmem:[%s10063_s24 + $0x60] sm:$0xff] }
 0x289   : > { %3261 = vrot.lane.b32.xlu2 %v11017_v53, %s7740_s19  ;;  %7304 = vmatpush.xpose.msk.msra.mxu0 %vm2975_vm0, %v15724_v1  ;;  %v11126_v53 = vld [vmem:[%s10063_s24 + $0xa8] sm:$0xff] }
 0x28a   : > { %2672 = vmatmul.f32.gmra.mxu0 %v11045_v25  ;;  %7314 = vmatpush.xpose.msk.msra.mxu1 %vm2975_vm0, %v10619_v9  ;;  %v11065_v62 = vpop.f32.mrf.mxu3  ;;  %v15727_v9 = vld [vmem:[#allocation22_spill] sm:$0xff]  ;;  %15738 = vst [vmem:[#allocation21_spill] sm:$0xff] %v11126_v53 }
 0x28b   : > { %7324 = vmatpush.xpose.msk.msra.mxu2 %vm2975_vm0, %v15725_v41  ;;  %2713 = vmatmul.f32.gmra.mxu1 %v11056_v6  ;;  %v11071_v31 = vpop.f32.mrf.mxu0  ;;  %v15729_v41 = vld [vmem:[#allocation10_spill] sm:$0xff] }
 0x28c   : > { %7334 = vmatpush.xpose.msk.msra.mxu3 %vm2975_vm0, %v10724_v32  ;;  %2754 = vmatmul.f32.gmra.mxu2 %v11051_v20  ;;  %v11063_v32 = vpop.f32.mrf.mxu2  ;;  %v11073_v1 = vpop.f32.mrf.mxu1  ;;  %v830_v18 = vadd.f32 %v15729_v41, %v807_v29  ;;  %v11104_v41 = vld [vmem:[%s10063_s24 + $0x98] sm:$0xff] }
 0x28d   : > { %7305 = vmatpush.xpose.msk.msra.mxu0 %vm2975_vm0, %v15727_v9  ;;  %3381 = vrot.lane.b32.xlu1 %v10546_v16, %s7740_s19  ;;  %v15730_v9 = vld [vmem:[#allocation28_spill] sm:$0xff]  ;;  %15735 = vst [vmem:[#allocation26_spill] sm:$0xff] %v11104_v41 }
 0x28e   : > { %7315 = vmatpush.xpose.msk.msra.mxu1 %vm2975_vm0, %v10794_v36  ;;  %v15732_v36 = vld [vmem:[#allocation11_spill] sm:$0xff] }
 0x28f   : > { %2795 = vmatmul.f32.gmra.mxu3 %v11060_v40  ;;  %7325 = vmatpush.xpose.msk.msra.mxu2 %vm2975_vm0, %v15728_v61  ;;  %v11089_v61 = vld [vmem:[%s10063_s24 + $0x80] sm:$0xff]  ;;  %v11097_v29 = vadd.f32 %v15732_v36, %v830_v18  ;;  %v11122_v36 = vld [vmem:[%s10063_s24 + $0xb0] sm:$0xff] }
 0x290   : > { %7335 = vmatpush.xpose.msk.msra.mxu3 %vm2975_vm0, %v10666_v43  ;;  %v11093_v43 = vld [vmem:[%s10063_s24 + $0x90] sm:$0xff]  ;;  %v11118_v18 = vld [vmem:[%s10063_s24 + $0xa0] sm:$0xff]  ;;  %15737 = vst [vmem:[#allocation33_spill] sm:$0xff] %v11122_v36 }
 0x291   : > { %7306 = vmatpush.xpose.msk.msra.mxu0 %vm2975_vm0, %v15713_v14  ;;  %15731 = vst [vmem:[#allocation34_spill] sm:$0xff] %v11093_v43  ;;  %v11100_v14 = vld [vmem:[%s10063_s24 + $0x88] sm:$0xff] }
 0x292   : > { %2675 = vmatmul.f32.gmra.mxu0 %v11089_v61  ;;  %15733 = vst [vmem:[#allocation13_spill] sm:$0xff] %v11097_v29 }
 0x293   : > { %7326 = vmatpush.xpose.msk.msra.mxu2 %vm2975_vm0, %v15730_v9  ;;  %15734 = vst [vmem:[#allocation18_spill] sm:$0xff] %v11100_v14  ;;  %2716 = vmatmul.f32.gmra.mxu1 %v11100_v14  ;;  %v11109_v9 = vpop.f32.mrf.mxu3  ;;  %v11111_v57 = vpop.f32.mrf.mxu0 }
 0x294   : > { %7336 = vmatpush.xpose.msk.msra.mxu3 %vm2975_vm0, %v10913_v35  ;;  %2757 = vmatmul.f32.gmra.mxu2 %v11093_v43  ;;  %v11107_v35 = vpop.f32.mrf.mxu2  ;;  %v11113_v13 = vpop.f32.mrf.mxu1  ;;  %15736 = vst [vmem:[#allocation14_spill] sm:$0xff] %v11118_v18 }
 0x295   : > { %3031 = vrot.lane.b32.xlu1 %v11097_v29, %s7740_s19 }
 0x297   : > { %2798 = vmatmul.f32.gmra.mxu3 %v11104_v41 }
 0x29a   : > { %2678 = vmatmul.f32.gmra.mxu0 %v11118_v18 }
 0x29b   : > { %2719 = vmatmul.f32.gmra.mxu1 %v11126_v53  ;;  %v11135_v8 = vpop.f32.mrf.mxu3  ;;  %v11137_v29 = vpop.f32.mrf.mxu0  ;;  %v11149_v53 = vld [vmem:[%s10063_s24 + $0xc8] sm:$0xff] }
 0x29c   : > { %2760 = vmatmul.f32.gmra.mxu2 %v11122_v36  ;;  %v11133_v59 = vpop.f32.mrf.mxu2  ;;  %v11139_v4 = vpop.f32.mrf.mxu1  ;;  %v11144_v36 = vld [vmem:[%s10063_s24 + $0xc0] sm:$0xff]  ;;  %15742 = vst [vmem:[#allocation15_spill] sm:$0xff] %v11149_v53 }
 0x29d   : > { %3379 = vrot.lane.b32.xlu1 %v15740_v7, %s7740_s19  ;;  %15741 = vst [vmem:[#allocation25_spill] sm:$0xff] %v11144_v36 }
 0x29f   : > { %2801 = vmatmul.f32.gmra.mxu3 %v11130_v28  ;;  %v11153_v28 = vld [vmem:[%s10063_s24 + $0xd8] sm:$0xff] }
 0x2a0   : > { %15743 = vst [vmem:[#allocation32_spill] sm:$0xff] %v11153_v28 }
 0x2a2   : > { %2681 = vmatmul.f32.gmra.mxu0 %v11144_v36 }
 0x2a3   : > { %2722 = vmatmul.f32.gmra.mxu1 %v11149_v53  ;;  %v11158_v41 = vpop.f32.mrf.mxu3  ;;  %v11160_v14 = vpop.f32.mrf.mxu0  ;;  %v2343_v53 = vadd.f32 %v10974_v10, %v10872_v58 }
 0x2a4   : > { %2763 = vmatmul.f32.gmra.mxu2 %v10391_v12  ;;  %v11156_v18 = vpop.f32.mrf.mxu2  ;;  %15744 = vst [vmem:[#allocation16_spill] sm:$0xff] %v11158_v41  ;;  %v11162_v7 = vpop.f32.mrf.mxu1  ;;  %v11166_v12 = vperm.slane %v10836_v56, 1 }
 0x2a5   : > { %15745 = vst [vmem:[#allocation24_spill] sm:$0xff] %v11162_v7  ;;  %v2384_v56 = vadd.f32 %v10976_v21, %v2343_v53 }
 0x2a7   : > { %2804 = vmatmul.f32.gmra.mxu3 %v11153_v28  ;;  %v2425_v10 = vadd.f32 %v11012_v42, %v2384_v56 }
 0x2a9   : > { %v11192_v42 = vadd.f32 %v11014_v49, %v2425_v10  ;;  %v2349_v49 = vadd.f32 %v11071_v31, %v10872_v58  ;;  %v11254_v10 = vpop.permute.xlu1 %3277 }
 0x2aa   : > { %2684 = vmatmul.f32.gmra.mxu0 %v10439_v63 }
 0x2ab   : > { %2725 = vmatmul.f32.gmra.mxu1 %v10442_v26  ;;  %v11175_v36 = vpop.f32.mrf.mxu3  ;;  %v2500_v41 = vpop.f32.mrf.mxu0  ;;  %v2346_v26 = vadd.f32 %v11023_v52, %v10872_v58  ;;  %v15747_v52 = vld [vmem:[#allocation38_spill] sm:$0xff] }
 0x2ac   : > { %2766 = vmatmul.f32.gmra.mxu2 %v10445_v22  ;;  %v11173_v28 = vpop.f32.mrf.mxu2  ;;  %v2541_v7 = vpop.f32.mrf.mxu1  ;;  %v2501_v63 = vadd.f32 %v2500_v41, %v11166_v12  ;;  %v2390_v41 = vadd.f32 %v11073_v1, %v2349_v49 }
 0x2ae   : > { %v2542_v43 = vadd.f32 %v2541_v7, %v2501_v63  ;;  %v2431_v63 = vadd.f32 %v11107_v35, %v2390_v41 }
 0x2af   : > { %2807 = vmatmul.f32.gmra.mxu3 %v10448_v30 }
 0x2b2   : > { %2827 = vmatmul.f32.vlgmr.msrb.gmra.mxu0 %v10906_v15 }
 0x2b3   : > { %7339 = vmatpush.xpose.msk.msrb.mxu0 %vm2975_vm0, %v10501_v51  ;;  %2868 = vmatmul.f32.vlgmr.msrb.gmra.mxu1 %v10910_v48  ;;  %v2623_v22 = vpop.f32.mrf.mxu3  ;;  %v2503_v15 = vpop.f32.mrf.mxu0  ;;  %v15746_v48 = vld [vmem:[#allocation39_spill] sm:$0xff] }
 0x2b4   : > { %2909 = vmatmul.f32.vlgmr.msrb.gmra.mxu2 %v10916_v11  ;;  %v2582_v30 = vpop.f32.mrf.mxu2  ;;  %v2544_v56 = vpop.f32.mrf.mxu1  ;;  %v2504_v21 = vadd.f32 %v2503_v15, %v11166_v12  ;;  %v2387_v11 = vadd.f32 %v11025_v37, %v2346_v26  ;;  %v15750_v15 = vld [vmem:[#allocation26_spill] sm:$0xff] }
 0x2b5   : > { %7359 = vmatpush.xpose.msk.msrb.mxu2 %vm2975_vm0, %v10903_v38  ;;  %v2583_v7 = vadd.f32 %v2582_v30, %v2542_v43  ;;  %v11280_v30 = vpop.permute.xlu0 %3279 }
 0x2b6   : > { %v2545_v38 = vadd.f32 %v2544_v56, %v2504_v21  ;;  %v2428_v53 = vadd.f32 %v11063_v32, %v2387_v11 }
 0x2b7   : > { %2950 = vmatmul.f32.vlgmr.msrb.gmra.mxu3 %v10920_v47  ;;  %v11195_v51 = vadd.f32 %v2623_v22, %v2583_v7  ;;  %7340 = vmatpush.xpose.msk.msrb.mxu0 %vm2975_vm0, %v15746_v48  ;;  %v15748_v22 = vld [vmem:[#allocation34_spill] sm:$0xff] }
 0x2b9   : > { %v7446_v47 = vpack.i.bf16 %v11195_v51, %v11192_v42  ;;  %7360 = vmatpush.xpose.msk.msrb.mxu2 %vm2975_vm0, %v10826_v39 }
 0x2ba   : > { %2830 = vmatmul.f32.gmra.mxu0 %v10950_v27 }
 0x2bb   : > { %7341 = vmatpush.xpose.msk.msrb.mxu0 %vm2975_vm0, %v15747_v52  ;;  %2871 = vmatmul.f32.gmra.mxu1 %v10954_v17  ;;  %v2626_v27 = vpop.f32.mrf.mxu3  ;;  %v2506_v32 = vpop.f32.mrf.mxu0 }
 0x2bc   : > { %2912 = vmatmul.f32.gmra.mxu2 %v10958_v44  ;;  %v2585_v37 = vpop.f32.mrf.mxu2  ;;  %7447 = vrot.lane.b32.xlu2 %v7446_v47, %s7740_s19  ;;  %v2507_v31 = vadd.f32 %v2506_v32, %v11166_v12  ;;  %v2547_v43 = vpop.f32.mrf.mxu1  ;;  %v11217_v44 = vadd.f32 %v11065_v62, %v2428_v53  ;;  %v2352_v62 = vadd.f32 %v11111_v57, %v10872_v58  ;;  %v15752_v47 = vld [vmem:[#allocation24_spill] sm:$0xff]  ;;  %v15754_v32 = vld [vmem:[#allocation33_spill] sm:$0xff] }
 0x2bd   : > { %7361 = vmatpush.xpose.msk.msrb.mxu2 %vm2975_vm0, %v10778_v23  ;;  %v2586_v39 = vadd.f32 %v2585_v37, %v2545_v38  ;;  %v11303_v37 = vpop.permute.xlu0 %3385 }
 0x2bf   : > { %2953 = vmatmul.f32.gmra.mxu3 %v10965_v0  ;;  %v11220_v17 = vadd.f32 %v2626_v27, %v2586_v39  ;;  %7342 = vmatpush.xpose.msk.msrb.mxu0 %vm2975_vm0, %v10348_v5  ;;  %v2548_v0 = vadd.f32 %v2547_v43, %v2507_v31  ;;  %v15753_v39 = vld [vmem:[#allocation14_spill] sm:$0xff]  ;;  %v15755_v31 = vld [vmem:[#allocation21_spill] sm:$0xff]  ;;  %v15756_v43 = vld [vmem:[#allocation36_spill] sm:$0xff] }
 0x2c1   : > { %v7451_v23 = vpack.i.bf16 %v11220_v17, %v11217_v44  ;;  %7362 = vmatpush.xpose.msk.msrb.mxu2 %vm2975_vm0, %v10726_v54 }
 0x2c2   : > { %2833 = vmatmul.f32.gmra.mxu0 %v10995_v55 }
 0x2c3   : > { %7343 = vmatpush.xpose.msk.msrb.mxu0 %vm2975_vm0, %v10293_v50  ;;  %2874 = vmatmul.f32.gmra.mxu1 %v11005_v46  ;;  %v2629_v55 = vpop.f32.mrf.mxu3  ;;  %v2509_v1 = vpop.f32.mrf.mxu0  ;;  %v2393_v50 = vadd.f32 %v11113_v13, %v2352_v62  ;;  %v2355_v13 = vadd.f32 %v11137_v29, %v10872_v58 }
 0x2c4   : > { %2915 = vmatmul.f32.gmra.mxu2 %v11001_v2  ;;  %v2588_v5 = vpop.f32.mrf.mxu2  ;;  %7452 = vrot.lane.b32.xlu1 %v7451_v23, %s7740_s19  ;;  %v2510_v57 = vadd.f32 %v2509_v1, %v11166_v12  ;;  %v2550_v35 = vpop.f32.mrf.mxu1  ;;  %v11242_v2 = vadd.f32 %v11109_v9, %v2431_v63 }
 0x2c5   : > { %7363 = vmatpush.xpose.msk.msrb.mxu2 %vm2975_vm0, %v10679_v33  ;;  %v2589_v54 = vadd.f32 %v2588_v5, %v2548_v0  ;;  %v2434_v9 = vadd.f32 %v11133_v59, %v2393_v50  ;;  %v3388_v50 = vpop.permute.xlu0 %3387 }
 0x2c7   : > { %2956 = vmatmul.f32.gmra.mxu3 %v11009_v60  ;;  %v11245_v46 = vadd.f32 %v2629_v55, %v2589_v54  ;;  %7344 = vmatpush.xpose.msk.msrb.mxu0 %vm2975_vm0, %v15702_v24  ;;  %v2551_v60 = vadd.f32 %v2550_v35, %v2510_v57  ;;  %v15757_v57 = vld [vmem:[#allocation25_spill] sm:$0xff]  ;;  %v7671_v35 = vld [vmem:[%s10063_s24 + $0xd0] sm:$0xff] }
 0x2c9   : > { %v7456_v33 = vpack.i.bf16 %v11245_v46, %v11242_v2  ;;  %7364 = vmatpush.xpose.msk.msrb.mxu2 %vm2975_vm0, %v10631_v3 }
 0x2ca   : > { %2836 = vmatmul.f32.gmra.mxu0 %v11045_v25 }
 0x2cb   : > { %7345 = vmatpush.xpose.msk.msrb.mxu0 %vm2975_vm0, %v15714_v19  ;;  %2877 = vmatmul.f32.gmra.mxu1 %v11056_v6  ;;  %v2632_v59 = vpop.f32.mrf.mxu3  ;;  %v2396_v19 = vadd.f32 %v11139_v4, %v2355_v13  ;;  %v2358_v4 = vadd.f32 %v11160_v14, %v10872_v58  ;;  %v15751_v58 = vld [vmem:[#allocation16_spill] sm:$0xff] }
 0x2cc   : > { %2918 = vmatmul.f32.gmra.mxu2 %v11051_v20  ;;  %v2591_v3 = vpop.f32.mrf.mxu2  ;;  %7457 = vrot.lane.b32.xlu1 %v7456_v33, %s7740_s19  ;;  %v11269_v20 = vadd.f32 %v11135_v8, %v2434_v9  ;;  %v15759_v9 = vld [vmem:[#allocation32_spill] sm:$0xff] }
 0x2cd   : > { %7365 = vmatpush.xpose.msk.msrb.mxu2 %vm2975_vm0, %v10589_v34  ;;  %v2592_v24 = vadd.f32 %v2591_v3, %v2551_v60  ;;  %v2437_v8 = vadd.f32 %v11156_v18, %v2396_v19  ;;  %v2399_v38 = vadd.f32 %v15752_v47, %v2358_v4  ;;  %v15758_v60 = vld [vmem:[#allocation15_spill] sm:$0xff]  ;;  %v7674_v4 = vld [vmem:[%s10063_s24 + $0xe8] sm:$0xff] }
 0x2ce   : > { %v2512_v25 = vpop.f32.mrf.mxu0  ;;  %v2553_v26 = vpop.f32.mrf.mxu1 }
 0x2cf   : > { %2959 = vmatmul.f32.gmra.mxu3 %v11060_v40  ;;  %v2513_v29 = vadd.f32 %v2512_v25, %v11166_v12  ;;  %v11272_v6 = vadd.f32 %v2632_v59, %v2592_v24  ;;  %7346 = vmatpush.xpose.msk.msrb.mxu0 %vm2975_vm0, %v15701_v45  ;;  %v15749_v45 = vld [vmem:[#allocation18_spill] sm:$0xff]  ;;  %v11296_v14 = vadd.f32 %v15751_v58, %v2437_v8 }
 0x2d0   : > { %v2440_v27 = vadd.f32 %v11173_v28, %v2399_v38  ;;  %v15760_v58 = vld [vmem:[#allocation42_spill] sm:$0xff] }
 0x2d1   : > { %v7461_v34 = vpack.i.bf16 %v11272_v6, %v11269_v20  ;;  %7366 = vmatpush.xpose.msk.msrb.mxu2 %vm2975_vm0, %v10546_v16  ;;  %v2554_v40 = vadd.f32 %v2553_v26, %v2513_v29  ;;  %v11334_v47 = vperm.slane %v15760_v58, 2 }
 0x2d2   : > { %2839 = vmatmul.f32.gmra.mxu0 %v11089_v61  ;;  %v11292_v61 = vpop.permute.xlu2 %3275  ;;  %v2481_v55 = vadd.f32 %v11175_v36, %v2440_v27  ;;  %v15763_v27 = vld [vmem:[#allocation40_spill] sm:$0xff] }
 0x2d3   : > { %2880 = vmatmul.f32.gmra.mxu1 %v15749_v45 }
 0x2d4   : > { %2921 = vmatmul.f32.gmra.mxu2 %v15748_v22  ;;  %7462 = vrot.lane.b32.xlu1 %v7461_v34, %s7740_s19  ;;  %v7672_v34 = vld [vmem:[%s10063_s24 + $0xe0] sm:$0xff] }
 0x2d5   : > { %v11287_v7 = vpop.permute.xlu1 %3391  ;;  %v2594_v56 = vpop.f32.mrf.mxu2 }
 0x2d6   : > { %v2595_v16 = vadd.f32 %v2594_v56, %v2554_v40  ;;  %v2635_v21 = vpop.f32.mrf.mxu3  ;;  %v2515_v11 = vpop.f32.mrf.mxu0  ;;  %v7673_v40 = vld [vmem:[%s10063_s24 + $0xf0] sm:$0xff] }
 0x2d7   : > { %2962 = vmatmul.f32.gmra.mxu3 %v15750_v15  ;;  %v2516_v18 = vadd.f32 %v2515_v11, %v11166_v12  ;;  %v2556_v48 = vpop.f32.mrf.mxu1  ;;  %v3148_v56 = vpop.permute.xlu0 %3147 }
 0x2d8   : > { %v11299_v53 = vadd.f32 %v2635_v21, %v2595_v16 }
 0x2d9   : > { %v2557_v52 = vadd.f32 %v2556_v48, %v2516_v18 }
 0x2da   : > { %v7466_v49 = vpack.i.bf16 %v11299_v53, %v11296_v14  ;;  %2842 = vmatmul.f32.gmra.mxu0 %v15753_v39  ;;  %v3390_v5 = vpop.permute.xlu2 %3389  ;;  %v15762_v39 = vld [vmem:[#allocation12_spill] sm:$0xff] }
 0x2db   : > { %2883 = vmatmul.f32.gmra.mxu1 %v15755_v31 }
 0x2dc   : > { %2924 = vmatmul.f32.gmra.mxu2 %v15754_v32  ;;  %7467 = vrot.lane.b32.xlu0 %v7466_v49, %s7740_s19 }
 0x2dd   : > { %v3394_v41 = vpop.permute.xlu1 %3393  ;;  %v2597_v23 = vpop.f32.mrf.mxu2 }
 0x2de   : > { %v2598_v0 = vadd.f32 %v2597_v23, %v2557_v52  ;;  %v2638_v63 = vpop.f32.mrf.mxu3  ;;  %v2518_v62 = vpop.f32.mrf.mxu0  ;;  %v15761_v52 = vld [vmem:[#allocation43_spill] sm:$0xff] }
 0x2df   : > { %2965 = vmatmul.f32.gmra.mxu3 %v15756_v43  ;;  %v2559_v54 = vpop.f32.mrf.mxu1  ;;  %v2519_v33 = vadd.f32 %v2518_v62, %v11166_v12 }
 0x2e0   : > { %v11312_v1 = vadd.f32 %v2638_v63, %v2598_v0  ;;  %v3272_v0 = vpop.permute.xlu0 %3271 }
 0x2e1   : > { %v2560_v26 = vadd.f32 %v2559_v54, %v2519_v33 }
 0x2e2   : > { %v7471_v28 = vpack.i.bf16 %v11312_v1, %v2481_v55  ;;  %2845 = vmatmul.f32.gmra.mxu0 %v15757_v57  ;;  %v11322_v29 = vpop.permute.xlu2 %3273  ;;  %v15767_v57 = vld [vmem:[#allocation35_spill] sm:$0xff] }
 0x2e3   : > { %2886 = vmatmul.f32.gmra.mxu1 %v15758_v60 }
 0x2e4   : > { %2927 = vmatmul.f32.gmra.mxu2 %v7671_v35  ;;  %7472 = vrot.lane.b32.xlu2 %v7471_v28, %s7740_s19  ;;  %v15769_v35 = vld [vmem:[#allocation19_spill] sm:$0xff] }
 0x2e5   : > { %v2600_v36 = vpop.f32.mrf.mxu2 }
 0x2e6   : > { %v2641_v13 = vpop.f32.mrf.mxu3  ;;  %v2521_v3 = vpop.f32.mrf.mxu0  ;;  %v2601_v8 = vadd.f32 %v2600_v36, %v2560_v26 }
 0x2e7   : > { %2968 = vmatmul.f32.gmra.mxu3 %v15759_v9  ;;  %v2522_v24 = vadd.f32 %v2521_v3, %v11166_v12  ;;  %v2562_v59 = vpop.f32.mrf.mxu1  ;;  %v3396_v25 = vpop.permute.xlu1 %3395  ;;  %v7675_v12 = vld [vmem:[%s10063_s24 + $0xf8] sm:$0xff]  ;;  %v15771_v3 = vld [vmem:[#allocation20_spill] sm:$0xff]  ;;  %s7198_s24 = scalar_lea.hbm %s15608_s11, %s7403_s15 }
 0x2e8   : > { %7369 = vmatpush.xpose.msk.msrb.mxu3 %vm2975_vm0, %v3396_v25  ;;  %v2642_v18 = vadd.f32 %v2641_v13, %v2601_v8  ;;  %v15770_v13 = vld [vmem:[#allocation37_spill] sm:$0xff]  ;;  %s7201_s29 = sshll.u32 %s7198_s24, 4  ;;  %s7202_s29 = int_to_ptr.hbm [resolvable:$true] %s7201_s29 }
 0x2e9   : > { %v2563_v19 = vadd.f32 %v2562_v59, %v2522_v24  ;;  %s7690_s30 = sshra.s32 %s7202_s29, 4  ;;  %s7691_s30 = int_to_ptr.hbm [resolvable:$true] %s7690_s30 }
 0x2ea   : > { %2848 = vmatmul.f32.gmra.mxu0 %v7672_v34  ;;  %v3030_v38 = vpop.permute.xlu2 %3029  ;;  %s7692_s16 = scalar_lea.hbm %s7691_s30, 64  ;;  %p7697_p0 = scmp.lt.s32.totalorder %s7691_s30, %s15608_s11 }
 0x2eb   : > { %2889 = vmatmul.f32.gmra.mxu1 %v7674_v4  ;;  %p7693_p11 = scmp.ne.s32.totalorder %s7691_s30, %s7692_s16 }
 0x2ec   : > { %2930 = vmatmul.f32.gmra.mxu2 %v7673_v40  ;;  %7370 = vmatpush.xpose.msk.msrb.mxu3 %vm2975_vm0, %v3394_v41 }
 0x2ed   : > { %v2603_v22 = vpop.f32.mrf.mxu2  ;;  %p7694_p12 = pnand %p7693_p11, %p7841_p5 }
 0x2ee   : > { %v2604_v45 = vadd.f32 %v2603_v22, %v2563_v19  ;;  %v2644_v15 = vpop.f32.mrf.mxu3  ;;  %v2664_v21 = vpop.f32.mrf.mxu0 }
 0x2ef   : > { %2971 = vmatmul.f32.gmra.mxu3 %v7675_v12  ;;  %v2705_v11 = vpop.f32.mrf.mxu1  ;;  %v3034_v48 = vpop.permute.xlu1 %3033  ;;  %p7695_p13 = pneg %p7694_p12 }
 0x2f0   : > { %v2645_v16 = vadd.f32 %v2644_v15, %v2604_v45  ;;  %7371 = vmatpush.xpose.msk.msrb.mxu3 %vm2975_vm0, %v11287_v7  ;;  %7316 = vmatpush.xpose.msk.msra.mxu1 %vm2975_vm0, %v3034_v48  ;;  %v2665_v7 = vadd.f32 %v2664_v21, %v11334_v47 }
 0x2f2   : > { %v7476_v49 = vpack.i.bf16 %v2642_v18, %v2645_v16  ;;  %7307 = vmatmul.msk.f32.vlgmr.msra.gmra.mxu0 %vm2975_vm0, %v15761_v52  ;;  %v2706_v63 = vadd.f32 %v2705_v11, %v2665_v7  ;;  %v3270_v62 = vpop.permute.xlu2 %3269 }
 0x2f3   : > { %6158 = vmatpush.msra.mxu0 %v2481_v55  ;;  %7317 = vmatmul.msk.f32.vlgmr.msra.gmra.mxu1 %vm2975_vm0, %v3030_v38 }
 0x2f4   : > { %7349 = vmatpush.xpose.msk.msrb.mxu1 %vm2975_vm0, %v11280_v30  ;;  %7327 = vmatmul.msk.f32.vlgmr.msra.gmra.mxu2 %vm2975_vm0, %v15762_v39 }
 0x2f5   : > { %7372 = vmatpush.xpose.msk.msrb.mxu3 %vm2975_vm0, %v3390_v5  ;;  %6248 = vmatpush.msra.mxu2 %v2645_v16  ;;  %v15765_v5 = vld [vmem:[#allocation41_spill] sm:$0xff] }
 0x2f6   : > { %7477 = vrot.lane.b32.xlu0 %v7476_v49, %s7740_s19  ;;  %v2746_v30 = vpop.f32.mrf.mxu2  ;;  %6159 = vmatpush.msra.mxu0 %v11296_v14 }
 0x2f7   : > { %7337 = vmatmul.msk.f32.vlgmr.msra.gmra.mxu3 %vm2975_vm0, %v15763_v27  ;;  %6249 = vmatpush.msra.mxu2 %v2642_v18  ;;  %v2667_v31 = vpop.f32.mrf.mxu0  ;;  %v3384_v43 = vpop.permute.xlu1 %3383 }
 0x2f8   : > { %7350 = vmatpush.xpose.msk.msrb.mxu1 %vm2975_vm0, %v11254_v10  ;;  %v2668_v41 = vadd.f32 %v2667_v31, %v11334_v47  ;;  %v2708_v23 = vpop.f32.mrf.mxu1  ;;  %6160 = vmatpush.msra.mxu0 %v11269_v20  ;;  %v15764_v10 = vld [vmem:[#allocation13_spill] sm:$0xff]  ;;  %v2747_v20 = vadd.f32 %v2746_v30, %v2706_v63 }
 0x2f9   : > { %7373 = vmatpush.xpose.msk.msrb.mxu3 %vm2975_vm0, %v3388_v50  ;;  %6250 = vmatpush.msra.mxu2 %v11312_v1  ;;  %v15766_v1 = vld [vmem:[#allocation17_spill] sm:$0xff] }
 0x2fa   : > { %v2787_v32 = vpop.f32.mrf.mxu3  ;;  %7308 = vmatmul.msk.f32.gmra.mxu0 %vm2975_vm0, %v15764_v10  ;;  %v2709_v14 = vadd.f32 %v2708_v23, %v2668_v41  ;;  %v3268_v50 = vpop.permute.xlu2 %3267 }
 0x2fb   : > { %6161 = vmatpush.msra.mxu0 %v11242_v2  ;;  %6251 = vmatpush.msra.mxu2 %v11299_v53  ;;  %v11375_v55 = vadd.f32 %v2787_v32, %v2747_v20  ;;  %v11415_v32 = vperm.slane %v15760_v58, 3 }
 0x2fc   : > { %7351 = vmatpush.xpose.msk.msrb.mxu1 %vm2975_vm0, %v11292_v61  ;;  %7328 = vmatmul.msk.f32.gmra.mxu2 %vm2975_vm0, %v15765_v5 }
 0x2fd   : > { %7374 = vmatpush.xpose.msk.msrb.mxu3 %vm2975_vm0, %v11303_v37  ;;  %6162 = vmatpush.msra.mxu0 %v11217_v44 }
 0x2fe   : > { %6252 = vmatpush.msra.mxu2 %v11272_v6 }
 0x2ff   : > { %7338 = vmatmul.msk.f32.gmra.mxu3 %vm2975_vm0, %v3148_v56  ;;  %v2749_v2 = vpop.f32.mrf.mxu2  ;;  %6163 = vmatpush.msra.mxu0 %v11192_v42  ;;  %v11371_v54 = vpop.f32.mrf.mxu0 }
 0x300   : > { %7352 = vmatpush.xpose.msk.msrb.mxu1 %vm2975_vm0, %v11322_v29  ;;  %v2750_v61 = vadd.f32 %v2749_v2, %v2709_v14  ;;  %v3382_v37 = vpop.permute.xlu1 %3381  ;;  %6253 = vmatpush.msra.mxu2 %v11245_v46  ;;  %v11380_v28 = vpop.f32.mrf.mxu1  ;;  %v15768_v46 = vld [vmem:[#allocation27_spill] sm:$0xff] }
 0x301   : > { %7375 = vmatpush.xpose.msk.msrb.mxu3 %vm2975_vm0, %v3384_v43  ;;  %6164 = vmatpush.msra.mxu0 %v15766_v1  ;;  %v3378_v42 = vpop.permute.xlu0 %3377  ;;  %v2671_v43 = vadd.f32 %v11371_v54, %v11334_v47 }
 0x302   : > { %v2790_v53 = vpop.f32.mrf.mxu3  ;;  %6254 = vmatpush.msra.mxu2 %v11220_v17  ;;  %7347 = vmatmul.msk.f32.vlgmr.msrb.gmra.mxu0 %vm2975_vm0, %v15768_v46  ;;  %v3262_v29 = vpop.permute.xlu2 %3261 }
 0x303   : > { %v11377_v44 = vadd.f32 %v2790_v53, %v2750_v61  ;;  %6165 = vmatpush.msra.mxu0 %v15767_v57  ;;  %v2712_v61 = vadd.f32 %v11380_v28, %v2671_v43 }
 0x304   : > { %7353 = vmatpush.xpose.msk.msrb.mxu1 %vm2975_vm0, %v3272_v0  ;;  %6255 = vmatpush.msra.mxu2 %v11195_v51 }
 0x305   : > { %7376 = vmatpush.xpose.msk.msrb.mxu3 %vm2975_vm0, %v3382_v37  ;;  %7367 = vmatmul.msk.f32.vlgmr.msrb.gmra.mxu2 %vm2975_vm0, %v15769_v35 }
 0x307   : > { %v11394_v17 = vpop.f32.mrf.mxu2  ;;  %v2673_v60 = vpop.f32.mrf.mxu0 }
 0x308   : > { %7354 = vmatpush.xpose.msk.msrb.mxu1 %vm2975_vm0, %v3270_v62  ;;  %7377 = vmatmul.msk.f32.vlgmr.msrb.gmra.mxu3 %vm2975_vm0, %v3378_v42  ;;  %v3032_v9 = vpop.permute.xlu1 %3031  ;;  %v2714_v51 = vpop.f32.mrf.mxu1  ;;  %v2674_v27 = vadd.f32 %v2673_v60, %v11334_v47  ;;  %v2753_v35 = vadd.f32 %v11394_v17, %v2712_v61 }
 0x309   : > { %7318 = vmatmul.msk.f32.gmra.mxu1 %vm2975_vm0, %v3032_v9  ;;  %v3266_v36 = vpop.permute.xlu0 %3265 }
 0x30a   : > { %v11397_v33 = vpop.f32.mrf.mxu3  ;;  %7348 = vmatmul.msk.f32.gmra.mxu0 %vm2975_vm0, %v15770_v13  ;;  %v2715_v14 = vadd.f32 %v2714_v51, %v2674_v27 }
 0x30c   : > { %7355 = vmatpush.xpose.msk.msrb.mxu1 %vm2975_vm0, %v3268_v50 }
 0x30d   : > { %7368 = vmatmul.msk.f32.gmra.mxu2 %vm2975_vm0, %v15771_v3 }
 0x30f   : > { %v2755_v24 = vpop.f32.mrf.mxu2  ;;  %v2676_v25 = vpop.f32.mrf.mxu0 }
 0x310   : > { %7356 = vmatpush.xpose.msk.msrb.mxu1 %vm2975_vm0, %v3266_v36  ;;  %v3380_v26 = vpop.permute.xlu1 %3379  ;;  %v2717_v19 = vpop.f32.mrf.mxu1  ;;  %v2677_v52 = vadd.f32 %v2676_v25, %v11334_v47  ;;  %v11441_v25 = vadd.f32 %v11397_v33, %v2753_v35 }
 0x311   : > { %7378 = vmatmul.msk.f32.gmra.mxu3 %vm2975_vm0, %v3380_v26  ;;  %v3264_v8 = vpop.permute.xlu0 %3263 }
 0x312   : > { %v2796_v59 = vpop.f32.mrf.mxu3  ;;  %v2718_v41 = vadd.f32 %v2717_v19, %v2677_v52 }
 0x313   : > { %7357 = vmatmul.msk.f32.vlgmr.msrb.gmra.mxu1 %vm2975_vm0, %v3262_v29 }
 0x316   : > { %v11426_v54 = vpop.permute.xlu2 %7447 }
 0x317   : > { %v2758_v34 = vpop.f32.mrf.mxu2  ;;  %v2679_v4 = vpop.f32.mrf.mxu0 }
 0x318   : > { %v2720_v22 = vpop.f32.mrf.mxu1  ;;  %v2680_v48 = vadd.f32 %v2679_v4, %v11334_v47  ;;  %v2759_v58 = vadd.f32 %v2758_v34, %v2718_v41 }
 0x31a   : > { %v2799_v40 = vpop.f32.mrf.mxu3  ;;  %v2721_v30 = vadd.f32 %v2720_v22, %v2680_v48 }
 0x31b   : > { %7358 = vmatmul.msk.f32.gmra.mxu1 %vm2975_vm0, %v3264_v8  ;;  %v11430_v50 = vadd.f32 %v2799_v40, %v2759_v58 }
 0x31f   : > { %v2761_v12 = vpop.f32.mrf.mxu2  ;;  %v2682_v15 = vpop.f32.mrf.mxu0 }
 0x320   : > { %v2723_v56 = vpop.f32.mrf.mxu1  ;;  %v2683_v21 = vadd.f32 %v2682_v15, %v11334_v47  ;;  %v2762_v62 = vadd.f32 %v2761_v12, %v2721_v30 }
 0x322   : > { %v2802_v45 = vpop.f32.mrf.mxu3  ;;  %v2724_v39 = vadd.f32 %v2723_v56, %v2683_v21 }
 0x323   : > { %v2803_v42 = vadd.f32 %v2802_v45, %v2762_v62 }
 0x327   : > { %v2764_v16 = vpop.f32.mrf.mxu2  ;;  %v2685_v18 = vpop.f32.mrf.mxu0 }
 0x328   : > { %v2686_v38 = vadd.f32 %v2685_v18, %v11334_v47  ;;  %v2726_v49 = vpop.f32.mrf.mxu1  ;;  %v2765_v23 = vadd.f32 %v2764_v16, %v2724_v39  ;;  %v2756_v47 = vadd.f32 %v2755_v24, %v2715_v14 }
 0x32a   : > { %v2805_v11 = vpop.f32.mrf.mxu3  ;;  %v2727_v7 = vadd.f32 %v2726_v49, %v2686_v38  ;;  %v11432_v51 = vadd.f32 %v2796_v59, %v2756_v47 }
 0x32b   : > { %v11423_v53 = vadd.f32 %v2805_v11, %v2765_v23 }
 0x32f   : > { %v2767_v31 = vpop.f32.mrf.mxu2  ;;  %v2828_v10 = vpop.f32.mrf.mxu0 }
 0x330   : > { %v2768_v0 = vadd.f32 %v2767_v31, %v2727_v7  ;;  %v2829_v20 = vadd.f32 %v2828_v10, %v11415_v32  ;;  %v2869_v2 = vpop.f32.mrf.mxu1 }
 0x332   : > { %v2808_v63 = vpop.f32.mrf.mxu3  ;;  %v2870_v37 = vadd.f32 %v2869_v2, %v2829_v20  ;;  %v7449_v2 = vunpack.i.l.bf16 %v11426_v54 }
 0x333   : > { %v11419_v5 = vadd.f32 %v2808_v63, %v2768_v0 }
 0x335   : > { %6338 = vmatpush.msrb.mxu0 %v11419_v5 }
 0x336   : > { %v11436_v13 = vpop.permute.xlu1 %7452 }
 0x337   : > { %6339 = vmatpush.msrb.mxu0 %v11423_v53  ;;  %v2910_v46 = vpop.f32.mrf.mxu2  ;;  %v2831_v28 = vpop.f32.mrf.mxu0  ;;  %v7454_v20 = vunpack.i.l.bf16 %v11436_v13 }
 0x338   : > { %v2911_v60 = vadd.f32 %v2910_v46, %v2870_v37  ;;  %v2832_v3 = vadd.f32 %v2831_v28, %v11415_v32  ;;  %v2872_v24 = vpop.f32.mrf.mxu1 }
 0x339   : > { %6340 = vmatpush.msrb.mxu0 %v2803_v42 }
 0x33a   : > { %v2951_v9 = vpop.f32.mrf.mxu3  ;;  %v2873_v17 = vadd.f32 %v2872_v24, %v2832_v3 }
 0x33b   : > { %v11434_v36 = vadd.f32 %v2951_v9, %v2911_v60  ;;  %6341 = vmatpush.msrb.mxu0 %v11430_v50 }
 0x33d   : > { %6342 = vmatpush.msrb.mxu0 %v11432_v51 }
 0x33e   : > { %v11445_v29 = vpop.permute.xlu2 %7472  ;;  %v11455_v12 = vpop.permute.xlu1 %7457 }
 0x33f   : > { %6343 = vmatpush.msrb.mxu0 %v11441_v25  ;;  %v2913_v59 = vpop.f32.mrf.mxu2  ;;  %v7474_v26 = vunpack.i.l.bf16 %v11445_v29  ;;  %v2834_v40 = vpop.f32.mrf.mxu0  ;;  %v7459_v10 = vunpack.i.l.bf16 %v11455_v12 }
 0x340   : > { %v2914_v19 = vadd.f32 %v2913_v59, %v2873_v17  ;;  %v2835_v33 = vadd.f32 %v2834_v40, %v11415_v32  ;;  %v2875_v4 = vpop.f32.mrf.mxu1 }
 0x341   : > { %6344 = vmatpush.msrb.mxu0 %v11377_v44  ;;  %6219 = vmatpush.msra.mxu1 %v7474_v26 }
 0x342   : > { %v2954_v34 = vpop.f32.mrf.mxu3  ;;  %v2876_v45 = vadd.f32 %v2875_v4, %v2835_v33 }
 0x343   : > { %v11449_v8 = vadd.f32 %v2954_v34, %v2914_v19  ;;  %6345 = vmatpush.msrb.mxu0 %v11375_v55 }
 0x346   : > { %v11462_v52 = vpop.permute.xlu1 %7462 }
 0x347   : > { %v2916_v15 = vpop.f32.mrf.mxu2  ;;  %v2837_v21 = vpop.f32.mrf.mxu0  ;;  %v7464_v43 = vunpack.i.l.bf16 %v11462_v52 }
 0x348   : > { %v2917_v56 = vadd.f32 %v2916_v15, %v2876_v45  ;;  %v2838_v18 = vadd.f32 %v2837_v21, %v11415_v32  ;;  %v2878_v48 = vpop.f32.mrf.mxu1 }
 0x34a   : > { %v2957_v16 = vpop.f32.mrf.mxu3  ;;  %v2879_v49 = vadd.f32 %v2878_v48, %v2838_v18 }
 0x34b   : > { %v11457_v11 = vadd.f32 %v2957_v16, %v2917_v56 }
 0x34e   : > { %v11464_v39 = vpop.permute.xlu0 %7467 }
 0x34f   : > { %v2919_v7 = vpop.f32.mrf.mxu2  ;;  %v7469_v27 = vunpack.i.l.bf16 %v11464_v39  ;;  %v2840_v41 = vpop.f32.mrf.mxu0 }
 0x350   : > { %v2920_v30 = vadd.f32 %v2919_v7, %v2879_v49  ;;  %v2841_v0 = vadd.f32 %v2840_v41, %v11415_v32  ;;  %v2881_v63 = vpop.f32.mrf.mxu1  ;;  %v7465_v41 = vunpack.i.h.bf16 %v11462_v52 }
 0x351   : > { %6220 = vmatpush.msra.mxu1 %v7469_v27 }
 0x352   : > { %v2960_v31 = vpop.f32.mrf.mxu3  ;;  %v2882_v62 = vadd.f32 %v2881_v63, %v2841_v0 }
 0x353   : > { %v11468_v23 = vadd.f32 %v2960_v31, %v2920_v30  ;;  %6221 = vmatpush.msra.mxu1 %v7464_v43  ;;  %v7470_v30 = vunpack.i.h.bf16 %v11464_v39  ;;  %v7450_v39 = vunpack.i.h.bf16 %v11426_v54 }
 0x355   : > { %v7481_v14 = vpack.i.bf16 %v11468_v23, %v2803_v42  ;;  %6222 = vmatpush.msra.mxu1 %v7459_v10 }
 0x357   : > { %7482 = vrot.lane.b32.xlu2 %v7481_v14, %s7740_s19  ;;  %v2922_v61 = vpop.f32.mrf.mxu2  ;;  %6223 = vmatpush.msra.mxu1 %v7454_v20  ;;  %v2843_v47 = vpop.f32.mrf.mxu0 }
 0x358   : > { %v2923_v58 = vadd.f32 %v2922_v61, %v2882_v62  ;;  %v2844_v35 = vadd.f32 %v2843_v47, %v11415_v32  ;;  %v2884_v60 = vpop.f32.mrf.mxu1 }
 0x359   : > { %6224 = vmatpush.msra.mxu1 %v7449_v2 }
 0x35a   : > { %v2963_v37 = vpop.f32.mrf.mxu3  ;;  %v2885_v9 = vadd.f32 %v2884_v60, %v2844_v35 }
 0x35b   : > { %v2964_v46 = vadd.f32 %v2963_v37, %v2923_v58 }
 0x35d   : > { %v7486_v42 = vpack.i.bf16 %v2964_v46, %v11423_v53 }
 0x35f   : > { %7487 = vrot.lane.b32.xlu1 %v7486_v42, %s7740_s19  ;;  %v2925_v28 = vpop.f32.mrf.mxu2  ;;  %v2846_v17 = vpop.f32.mrf.mxu0 }
 0x360   : > { %v2926_v3 = vadd.f32 %v2925_v28, %v2885_v9  ;;  %v2847_v26 = vadd.f32 %v2846_v17, %v11415_v32  ;;  %v2887_v19 = vpop.f32.mrf.mxu1 }
 0x362   : > { %v2966_v24 = vpop.f32.mrf.mxu3  ;;  %v2888_v40 = vadd.f32 %v2887_v19, %v2847_v26 }
 0x363   : > { %v2967_v59 = vadd.f32 %v2966_v24, %v2926_v3 }
 0x365   : > { %v7491_v34 = vpack.i.bf16 %v2967_v59, %v11419_v5  ;;  %v7475_v5 = vunpack.i.h.bf16 %v11445_v29  ;;  %v7455_v29 = vunpack.i.h.bf16 %v11436_v13 }
 0x367   : > { %7492 = vrot.lane.b32.xlu1 %v7491_v34, %s7740_s19  ;;  %v2928_v33 = vpop.f32.mrf.mxu2  ;;  %v2849_v15 = vpop.f32.mrf.mxu0 }
 0x368   : > { %v2929_v4 = vadd.f32 %v2928_v33, %v2888_v40  ;;  %v7478_v53 = vpop.permute.xlu0 %7477  ;;  %v2850_v21 = vadd.f32 %v2849_v15, %v11415_v32  ;;  %v2890_v18 = vpop.f32.mrf.mxu1 }
 0x369   : > { %v7479_v16 = vunpack.i.l.bf16 %v7478_v53  ;;  %v7480_v49 = vunpack.i.h.bf16 %v7478_v53 }
 0x36a   : > { %v2969_v45 = vpop.f32.mrf.mxu3  ;;  %v2891_v7 = vadd.f32 %v2890_v18, %v2850_v21 }
 0x36b   : > { %v2970_v56 = vadd.f32 %v2969_v45, %v2929_v4  ;;  %6309 = vmatpush.msra.mxu3 %v7479_v16 }
 0x36d   : > { %v7496_v48 = vpack.i.bf16 %v2970_v56, %v15767_v57  ;;  %6310 = vmatpush.msra.mxu3 %v7480_v49  ;;  %v7460_v57 = vunpack.i.h.bf16 %v11455_v12 }
 0x36f   : > { %7497 = vrot.lane.b32.xlu1 %v7496_v48, %s7740_s19  ;;  %v2931_v27 = vpop.f32.mrf.mxu2  ;;  %6311 = vmatpush.msra.mxu3 %v7475_v5 }
 0x370   : > { %v2932_v31 = vadd.f32 %v2931_v27, %v2891_v7  ;;  %v3086_v63 = vpop.f32.mrf.mxu1 }
 0x371   : > { %6312 = vmatpush.msra.mxu3 %v7470_v30  ;;  %v11493_v52 = vmul.f32 0.125, %v3086_v63 }
 0x372   : > { %v2972_v43 = vpop.f32.mrf.mxu3 }
 0x373   : > { %v2973_v32 = vadd.f32 %v2972_v43, %v2932_v31  ;;  %6313 = vmatpush.msra.mxu3 %v7465_v41 }
 0x375   : > { %v7501_v0 = vpack.i.bf16 %v2973_v32, %v15766_v1  ;;  %6428 = vmatpush.msrb.mxu2 %v2973_v32  ;;  %6314 = vmatpush.msra.mxu3 %v7460_v57  ;;  %v3462_v1 = vsel %vm2975_vm0, %v11493_v52, -inf }
 0x377   : > { %7502 = vrot.lane.b32.xlu0 %v7501_v0, %s7740_s19  ;;  %6429 = vmatpush.msrb.mxu2 %v2970_v56  ;;  %v3139_v12 = vpop.f32.mrf.mxu2 }
 0x378   : > { %6315 = vmatpush.msra.mxu3 %v7455_v29  ;;  %v11500_v13 = vmul.f32 0.125, %v3139_v12 }
 0x379   : > { %6430 = vmatpush.msrb.mxu2 %v2967_v59 }
 0x37a   : > { %6316 = vmatpush.msra.mxu3 %v7450_v39  ;;  %v3468_v54 = vsel %vm2975_vm0, %v11500_v13, -inf  ;;  %v3202_v62 = vpop.f32.mrf.mxu3 }
 0x37b   : > { %6431 = vmatpush.msrb.mxu2 %v2964_v46  ;;  %v11511_v58 = vmul.f32 0.125, %v3202_v62 }
 0x37d   : > { %6432 = vmatpush.msrb.mxu2 %v11468_v23  ;;  %v3023_v23 = vpop.f32.mrf.mxu0  ;;  %v3474_v35 = vsel %vm2975_vm0, %v11511_v58, -inf }
 0x37e   : > { %v11519_v9 = vmul.f32 0.125, %v3023_v23 }
 0x37f   : > { %6433 = vmatpush.msrb.mxu2 %v11457_v11  ;;  %v3142_v2 = vpop.f32.mrf.mxu2 }
 0x380   : > { %3463 = vmax.xlane.f32.xlu2 %v3462_v1  ;;  %v11509_v61 = vmul.f32 0.125, %v3142_v2  ;;  %v3456_v17 = vsel %vm2975_vm0, %v11519_v9, -inf }
 0x381   : > { %6434 = vmatpush.msrb.mxu2 %v11449_v8 }
 0x382   : > { %v3471_v47 = vsel %vm2975_vm0, %v11509_v61, -inf  ;;  %v3205_v60 = vpop.f32.mrf.mxu3 }
 0x383   : > { %6435 = vmatpush.msrb.mxu2 %v11434_v36  ;;  %v11531_v34 = vmul.f32 0.125, %v3205_v60 }
 0x385   : > { %v3026_v37 = vpop.f32.mrf.mxu0  ;;  %v3477_v45 = vsel %vm2975_vm0, %v11531_v34, -inf }
 0x386   : > { %v3089_v10 = vpop.f32.mrf.mxu1  ;;  %v11521_v28 = vmul.f32 0.125, %v3026_v37 }
 0x387   : > { %v11505_v14 = vmul.f32 0.125, %v3089_v10 }
 0x388   : > { %3469 = vmax.xlane.f32.xlu2 %v3468_v54  ;;  %v3459_v59 = vsel %vm2975_vm0, %v11521_v28, -inf  ;;  %v3371_v33 = vpop.f32.mrf.mxu2 }
 0x389   : > { %v3465_v20 = vsel %vm2975_vm0, %v11505_v14, -inf  ;;  %v11541_v56 = vmul.f32 0.125, %v3371_v33 }
 0x38b   : > { %v3434_v26 = vpop.f32.mrf.mxu3  ;;  %v3492_v21 = vsel %vm2975_vm0, %v11541_v56, -inf }
 0x38c   : > { %v11533_v40 = vmul.f32 0.125, %v3434_v26 }
 0x38d   : > { %v3255_v24 = vpop.f32.mrf.mxu0 }
 0x38e   : > { %v11529_v19 = vmul.f32 0.125, %v3255_v24  ;;  %v3498_v53 = vsel %vm2975_vm0, %v11533_v40, -inf }
 0x390   : > { %3466 = vmax.xlane.f32.xlu2 %v3465_v20  ;;  %v3318_v46 = vpop.f32.mrf.mxu1  ;;  %v3480_v4 = vsel %vm2975_vm0, %v11529_v19, -inf  ;;  %v3374_v49 = vpop.f32.mrf.mxu2 }
 0x391   : > { %v11517_v42 = vmul.f32 0.125, %v3318_v46  ;;  %v11551_v5 = vmul.f32 0.125, %v3374_v49 }
 0x393   : > { %v3486_v3 = vsel %vm2975_vm0, %v11517_v42, -inf  ;;  %v3495_v27 = vsel %vm2975_vm0, %v11551_v5, -inf }
 0x394   : > { %v3437_v31 = vpop.f32.mrf.mxu3 }
 0x395   : > { %v3258_v48 = vpop.f32.mrf.mxu0  ;;  %v11557_v43 = vmul.f32 0.125, %v3437_v31 }
 0x396   : > { %v11549_v7 = vmul.f32 0.125, %v3258_v48 }
 0x397   : > { %v3501_v41 = vsel %vm2975_vm0, %v11557_v43, -inf }
 0x398   : > { %3472 = vmax.xlane.f32.xlu2 %v3471_v47  ;;  %v3321_v15 = vpop.f32.mrf.mxu1  ;;  %15772 = vst [vmem:[#allocation31_spill] sm:$0xff] %v11549_v7  ;;  %v3483_v30 = vsel %vm2975_vm0, %v11549_v7, -inf }
 0x399   : > { %3475 = vmax.xlane.f32.xlu1 %v3474_v35  ;;  %v11543_v16 = vmul.f32 0.125, %v3321_v15 }
 0x39b   : > { %v3489_v18 = vsel %vm2975_vm0, %v11543_v16, -inf }
 0x3a0   : > { %3487 = vmax.xlane.f32.xlu2 %v3486_v3 }
 0x3a1   : > { %3457 = vmax.xlane.f32.xlu0 %v3456_v17  ;;  %3460 = vmax.xlane.f32.xlu1 %v3459_v59 }
 0x3a8   : > { %3481 = vmax.xlane.f32.xlu2 %v3480_v4 }
 0x3a9   : > { %3478 = vmax.xlane.f32.xlu0 %v3477_v45  ;;  %3499 = vmax.xlane.f32.xlu1 %v3498_v53 }
 0x3b1   : > { %3493 = vmax.xlane.f32.xlu0 %v3492_v21  ;;  %3490 = vmax.xlane.f32.xlu1 %v3489_v18  ;;  %v7483_v1 = vpop.permute.xlu2 %7482 }
 0x3b2   : > { %v7484_v2 = vunpack.i.l.bf16 %v7483_v1  ;;  %v7485_v37 = vunpack.i.h.bf16 %v7483_v1 }
 0x3b9   : > { %3496 = vmax.xlane.f32.xlu1 %v3495_v27  ;;  %3484 = vmax.xlane.f32.xlu0 %v3483_v30 }
 0x3c1   : > { %3502 = vmax.xlane.f32.xlu0 %v3501_v41 }
 0x3d1   : > { %v7488_v32 = vpop.permute.xlu1 %7487 }
 0x3d2   : > { %v7489_v62 = vunpack.i.l.bf16 %v7488_v32  ;;  %v7490_v20 = vunpack.i.h.bf16 %v7488_v32 }
 0x3d9   : > { %v7493_v57 = vpop.permute.xlu1 %7492 }
 0x3da   : > { %v7494_v10 = vunpack.i.l.bf16 %v7493_v57  ;;  %v7495_v23 = vunpack.i.h.bf16 %v7493_v57 }
 0x3e1   : > { %v7498_v0 = vpop.permute.xlu1 %7497 }
 0x3e2   : > { %v7500_v12 = vunpack.i.h.bf16 %v7498_v0  ;;  %v7499_v54 = vunpack.i.l.bf16 %v7498_v0 }
 0x3e9   : > { %v7503_v29 = vpop.permute.xlu0 %7502 }
 0x3ea   : > { %v7505_v63 = vunpack.i.h.bf16 %v7503_v29  ;;  %v7504_v39 = vunpack.i.l.bf16 %v7503_v29 }
 0x3ec   : > { %6225 = vmatpush.msra.mxu1 %v7504_v39  ;;  %6489 = vmatpush.msrb.mxu3 %v7505_v63 }
 0x3ee   : > { %6226 = vmatpush.msra.mxu1 %v7499_v54  ;;  %6490 = vmatpush.msrb.mxu3 %v7500_v12 }
 0x3f0   : > { %6399 = vmatpush.msrb.mxu1 %v7494_v10  ;;  %6491 = vmatpush.msrb.mxu3 %v7495_v23 }
 0x3f2   : > { %6400 = vmatpush.msrb.mxu1 %v7489_v62  ;;  %6492 = vmatpush.msrb.mxu3 %v7490_v20 }
 0x3f3   : > { %v11561_v47 = vpop.xlane.xlu2 %3463 }
 0x3f4   : > { %6401 = vmatpush.msrb.mxu1 %v7484_v2  ;;  %vm3506_vm1 = vcmp.eq.f32.partialorder %v11493_v52, %v11561_v47  ;;  %6493 = vmatpush.msrb.mxu3 %v7485_v37 }
 0x3f5   : > { %v11566_v46 = vsel %vm3506_vm1, -inf, %v11493_v52 }
 0x3f6   : > { %v3542_v35 = vsel %vm2975_vm0, %v11566_v46, -inf }
 0x3f7   : > { %3543 = vmax.xlane.f32.xlu0 %v3542_v35 }
 0x3fb   : > { %v11570_v60 = vpop.xlane.xlu2 %3469 }
 0x3fc   : > { %vm3508_vm2 = vcmp.eq.f32.partialorder %v11500_v13, %v11570_v60 }
 0x3fd   : > { %v11575_v3 = vsel %vm3508_vm2, -inf, %v11500_v13 }
 0x3fe   : > { %v3548_v24 = vsel %vm2975_vm0, %v11575_v3, -inf }
 0x3ff   : > { %3549 = vmax.xlane.f32.xlu0 %v3548_v24 }
 0x403   : > { %v11579_v17 = vpop.xlane.xlu2 %3466 }
 0x404   : > { %vm3507_vm9 = vcmp.eq.f32.partialorder %v11505_v14, %v11579_v17 }
 0x405   : > { %v11651_v12 = vsel %vm3507_vm9, -inf, %v11505_v14 }
 0x406   : > { %v3545_v62 = vsel %vm2975_vm0, %v11651_v12, -inf }
 0x40b   : > { %v11581_v59 = vpop.xlane.xlu2 %3472 }
 0x40c   : > { %vm3509_vm3 = vcmp.eq.f32.partialorder %v11509_v61, %v11581_v59  ;;  %v11585_v26 = vpop.xlane.xlu1 %3475 }
 0x40d   : > { %v11588_v33 = vsel %vm3509_vm3, -inf, %v11509_v61  ;;  %vm3510_vm6 = vcmp.eq.f32.partialorder %v11511_v58, %v11585_v26 }
 0x40e   : > { %v3551_v4 = vsel %vm2975_vm0, %v11588_v33, -inf  ;;  %v11623_v41 = vsel %vm3510_vm6, -inf, %v11511_v58 }
 0x40f   : > { %3552 = vmax.xlane.f32.xlu0 %v3551_v4  ;;  %v3554_v29 = vsel %vm2975_vm0, %v11623_v41, -inf }
 0x413   : > { %v11592_v45 = vpop.xlane.xlu2 %3487 }
 0x414   : > { %v11594_v53 = vpop.xlane.xlu0 %3457  ;;  %v11596_v15 = vpop.xlane.xlu1 %3460  ;;  %vm3514_vm11 = vcmp.eq.f32.partialorder %v11517_v42, %v11592_v45 }
 0x415   : > { %vm3504_vm4 = vcmp.eq.f32.partialorder %v11519_v9, %v11594_v53  ;;  %vm3505_vm5 = vcmp.eq.f32.partialorder %v11521_v28, %v11596_v15  ;;  %v11656_v10 = vsel %vm3514_vm11, -inf, %v11517_v42 }
 0x416   : > { %v11603_v21 = vsel %vm3504_vm4, -inf, %v11519_v9  ;;  %v11606_v18 = vsel %vm3505_vm5, -inf, %v11521_v28  ;;  %v3566_v20 = vsel %vm2975_vm0, %v11656_v10, -inf }
 0x417   : > { %v3536_v48 = vsel %vm2975_vm0, %v11603_v21, -inf  ;;  %v3539_v49 = vsel %vm2975_vm0, %v11606_v18, -inf }
 0x418   : > { %3537 = vmax.xlane.f32.xlu1 %v3536_v48  ;;  %3540 = vmax.xlane.f32.xlu2 %v3539_v49 }
 0x41b   : > { %v11614_v27 = vpop.xlane.xlu2 %3481 }
 0x41c   : > { %vm3512_vm7 = vcmp.eq.f32.partialorder %v11529_v19, %v11614_v27  ;;  %v11618_v30 = vpop.xlane.xlu0 %3478  ;;  %v11620_v31 = vpop.xlane.xlu1 %3499 }
 0x41d   : > { %vm3511_vm8 = vcmp.eq.f32.partialorder %v11531_v34, %v11618_v30  ;;  %v11628_v32 = vsel %vm3512_vm7, -inf, %v11529_v19  ;;  %vm3518_vm10 = vcmp.eq.f32.partialorder %v11533_v40, %v11620_v31 }
 0x41e   : > { %v11631_v57 = vsel %vm3511_vm8, -inf, %v11531_v34  ;;  %v3560_v0 = vsel %vm2975_vm0, %v11628_v32, -inf  ;;  %v11648_v1 = vsel %vm3518_vm10, -inf, %v11533_v40 }
 0x41f   : > { %v3557_v63 = vsel %vm2975_vm0, %v11631_v57, -inf  ;;  %3561 = vmax.xlane.f32.xlu0 %v3560_v0  ;;  %v3578_v23 = vsel %vm2975_vm0, %v11648_v1, -inf }
 0x420   : > { %3555 = vmax.xlane.f32.xlu1 %v3554_v29  ;;  %3558 = vmax.xlane.f32.xlu2 %v3557_v63 }
 0x424   : > { %v11645_v39 = vpop.xlane.xlu0 %3493  ;;  %v11653_v54 = vpop.xlane.xlu1 %3490 }
 0x425   : > { %vm3516_vm12 = vcmp.eq.f32.partialorder %v11541_v56, %v11645_v39  ;;  %vm3515_vm13 = vcmp.eq.f32.partialorder %v11543_v16, %v11653_v54 }
 0x426   : > { %v11671_v37 = vsel %vm3516_vm12, -inf, %v11541_v56  ;;  %v11674_v35 = vsel %vm3515_vm13, -inf, %v11543_v16 }
 0x427   : > { %3579 = vmax.xlane.f32.xlu0 %v3578_v23  ;;  %v3572_v4 = vsel %vm2975_vm0, %v11671_v37, -inf  ;;  %v3569_v48 = vsel %vm2975_vm0, %v11674_v35, -inf }
 0x428   : > { %3546 = vmax.xlane.f32.xlu1 %v3545_v62  ;;  %3567 = vmax.xlane.f32.xlu2 %v3566_v20 }
 0x42c   : > { %v11668_v2 = vpop.xlane.xlu0 %3484  ;;  %v11676_v24 = vpop.xlane.xlu1 %3496 }
 0x42d   : > { %15773 = vst [vmem:[#allocation8_spill] sm:$0xff] %v11668_v2  ;;  %vm3513_vm14 = vcmp.eq.f32.partialorder %v11549_v7, %v11668_v2  ;;  %vm3517_vm15 = vcmp.eq.f32.partialorder %v11551_v5, %v11676_v24 }
 0x42e   : > { %v11687_v49 = vsel %vm3513_vm14, -inf, %v11549_v7  ;;  %v11690_v0 = vsel %vm3517_vm15, -inf, %v11551_v5 }
 0x42f   : > { %v3563_v63 = vsel %vm2975_vm0, %v11687_v49, -inf  ;;  %v3575_v23 = vsel %vm2975_vm0, %v11690_v0, -inf }
 0x430   : > { %3573 = vmax.xlane.f32.xlu1 %v3572_v4  ;;  %3570 = vmax.xlane.f32.xlu2 %v3569_v48 }
 0x434   : > { %v11692_v29 = vpop.xlane.xlu0 %3502 }
 0x435   : > { %vm3519_vm1 = vcmp.eq.f32.partialorder %v11557_v43, %v11692_v29 }
 0x436   : > { %v11701_v62 = vsel %vm3519_vm1, -inf, %v11557_v43 }
 0x437   : > { %v3581_v20 = vsel %vm2975_vm0, %v11701_v62, -inf }
 0x438   : > { %3564 = vmax.xlane.f32.xlu1 %v3563_v63  ;;  %3576 = vmax.xlane.f32.xlu2 %v3575_v23 }
 0x440   : > { %3582 = vmax.xlane.f32.xlu1 %v3581_v20 }
 0x46a   : > { %v3544_v4 = vpop.xlane.xlu0 %3543 }
 0x46b   : > { %vm3586_vm2 = vcmp.eq.f32.partialorder %v11566_v46, %v3544_v4 }
 0x46c   : > { %v11707_v48 = vsel %vm3586_vm2, -inf, %v11566_v46 }
 0x46d   : > { %v3622_v63 = vsel %vm2975_vm0, %v11707_v48, -inf }
 0x46e   : > { %3623 = vmax.xlane.f32.xlu1 %v3622_v63 }
 0x472   : > { %v3550_v6 = vpop.xlane.xlu0 %3549 }
 0x473   : > { %vm3588_vm3 = vcmp.eq.f32.partialorder %v11575_v3, %v3550_v6 }
 0x474   : > { %v11713_v23 = vsel %vm3588_vm3, -inf, %v11575_v3 }
 0x475   : > { %v3628_v22 = vsel %vm2975_vm0, %v11713_v23, -inf }
 0x476   : > { %3629 = vmax.xlane.f32.xlu1 %v3628_v22 }
 0x482   : > { %v3553_v20 = vpop.xlane.xlu0 %3552 }
 0x483   : > { %vm3589_vm4 = vcmp.eq.f32.partialorder %v11588_v33, %v3553_v20 }
 0x484   : > { %v11719_v46 = vsel %vm3589_vm4, -inf, %v11588_v33 }
 0x485   : > { %v3631_v4 = vsel %vm2975_vm0, %v11719_v46, -inf }
 0x486   : > { %3632 = vmax.xlane.f32.xlu1 %v3631_v4 }
 0x48b   : > { %v3538_v63 = vpop.xlane.xlu1 %3537  ;;  %v3541_v38 = vpop.xlane.xlu2 %3540 }
 0x48c   : > { %vm3584_vm5 = vcmp.eq.f32.partialorder %v11603_v21, %v3538_v63  ;;  %vm3585_vm6 = vcmp.eq.f32.partialorder %v11606_v18, %v3541_v38 }
 0x48d   : > { %v11726_v6 = vsel %vm3584_vm5, -inf, %v11603_v21  ;;  %v11729_v22 = vsel %vm3585_vm6, -inf, %v11606_v18 }
 0x48e   : > { %v3616_v3 = vsel %vm2975_vm0, %v11726_v6, -inf  ;;  %v3619_v33 = vsel %vm2975_vm0, %v11729_v22, -inf }
 0x48f   : > { %3617 = vmax.xlane.f32.xlu2 %v3616_v3  ;;  %3620 = vmax.xlane.f32.xlu0 %v3619_v33 }
 0x492   : > { %v3562_v20 = vpop.xlane.xlu0 %3561 }
 0x493   : > { %v3556_v4 = vpop.xlane.xlu1 %3555  ;;  %vm3592_vm7 = vcmp.eq.f32.partialorder %v11628_v32, %v3562_v20  ;;  %v3559_v38 = vpop.xlane.xlu2 %3558 }
 0x494   : > { %vm3590_vm8 = vcmp.eq.f32.partialorder %v11623_v41, %v3556_v4  ;;  %vm3591_vm9 = vcmp.eq.f32.partialorder %v11631_v57, %v3559_v38  ;;  %v11739_v21 = vsel %vm3592_vm7, -inf, %v11628_v32 }
 0x495   : > { %v11742_v18 = vsel %vm3590_vm8, -inf, %v11623_v41  ;;  %v3640_v63 = vsel %vm2975_vm0, %v11739_v21, -inf  ;;  %v11749_v33 = vsel %vm3591_vm9, -inf, %v11631_v57 }
 0x496   : > { %v3634_v3 = vsel %vm2975_vm0, %v11742_v18, -inf  ;;  %3641 = vmax.xlane.f32.xlu1 %v3640_v63  ;;  %v3637_v20 = vsel %vm2975_vm0, %v11749_v33, -inf }
 0x497   : > { %3635 = vmax.xlane.f32.xlu2 %v3634_v3  ;;  %3638 = vmax.xlane.f32.xlu0 %v3637_v20 }
 0x49a   : > { %v3580_v32 = vpop.xlane.xlu0 %3579 }
 0x49b   : > { %v3547_v4 = vpop.xlane.xlu1 %3546  ;;  %vm3598_vm10 = vcmp.eq.f32.partialorder %v11648_v1, %v3580_v32  ;;  %v3568_v41 = vpop.xlane.xlu2 %3567 }
 0x49c   : > { %vm3587_vm11 = vcmp.eq.f32.partialorder %v11651_v12, %v3547_v4  ;;  %vm3594_vm12 = vcmp.eq.f32.partialorder %v11656_v10, %v3568_v41  ;;  %v11757_v38 = vsel %vm3598_vm10, -inf, %v11648_v1 }
 0x49d   : > { %v11760_v57 = vsel %vm3587_vm11, -inf, %v11651_v12  ;;  %v3658_v63 = vsel %vm2975_vm0, %v11757_v38, -inf  ;;  %v11767_v20 = vsel %vm3594_vm12, -inf, %v11656_v10 }
 0x49e   : > { %v3625_v3 = vsel %vm2975_vm0, %v11760_v57, -inf  ;;  %3659 = vmax.xlane.f32.xlu1 %v3658_v63  ;;  %v3646_v32 = vsel %vm2975_vm0, %v11767_v20, -inf }
 0x49f   : > { %3626 = vmax.xlane.f32.xlu2 %v3625_v3  ;;  %3647 = vmax.xlane.f32.xlu0 %v3646_v32 }
 0x4a3   : > { %v3574_v1 = vpop.xlane.xlu1 %3573  ;;  %v3571_v12 = vpop.xlane.xlu2 %3570 }
 0x4a4   : > { %vm3596_vm13 = vcmp.eq.f32.partialorder %v11671_v37, %v3574_v1  ;;  %vm3595_vm14 = vcmp.eq.f32.partialorder %v11674_v35, %v3571_v12 }
 0x4a5   : > { %v11774_v4 = vsel %vm3596_vm13, -inf, %v11671_v37  ;;  %v11779_v10 = vsel %vm3595_vm14, -inf, %v11674_v35 }
 0x4a6   : > { %v3652_v41 = vsel %vm2975_vm0, %v11774_v4, -inf  ;;  %v3649_v63 = vsel %vm2975_vm0, %v11779_v10, -inf }
 0x4a7   : > { %3653 = vmax.xlane.f32.xlu2 %v3652_v41  ;;  %3650 = vmax.xlane.f32.xlu0 %v3649_v63 }
 0x4ab   : > { %v3565_v3 = vpop.xlane.xlu1 %3564  ;;  %v3577_v32 = vpop.xlane.xlu2 %3576 }
 0x4ac   : > { %vm3593_vm15 = vcmp.eq.f32.partialorder %v11687_v49, %v3565_v3  ;;  %vm3597_vm1 = vcmp.eq.f32.partialorder %v11690_v0, %v3577_v32 }
 0x4ad   : > { %v11786_v37 = vsel %vm3593_vm15, -inf, %v11687_v49  ;;  %v11789_v1 = vsel %vm3597_vm1, -inf, %v11690_v0 }
 0x4ae   : > { %v3643_v35 = vsel %vm2975_vm0, %v11786_v37, -inf  ;;  %v3655_v12 = vsel %vm2975_vm0, %v11789_v1, -inf }
 0x4af   : > { %3644 = vmax.xlane.f32.xlu2 %v3643_v35  ;;  %3656 = vmax.xlane.f32.xlu0 %v3655_v12 }
 0x4b3   : > { %v3583_v41 = vpop.xlane.xlu1 %3582 }
 0x4b4   : > { %vm3599_vm2 = vcmp.eq.f32.partialorder %v11701_v62, %v3583_v41 }
 0x4b5   : > { %v11797_v63 = vsel %vm3599_vm2, -inf, %v11701_v62 }
 0x4b6   : > { %v3661_v49 = vsel %vm2975_vm0, %v11797_v63, -inf }
 0x4b7   : > { %3662 = vmax.xlane.f32.xlu2 %v3661_v49 }
 0x4e1   : > { %v3624_v0 = vpop.xlane.xlu1 %3623 }
 0x4e2   : > { %vm3666_vm3 = vcmp.eq.f32.partialorder %v11707_v48, %v3624_v0 }
 0x4e3   : > { %v11803_v3 = vsel %vm3666_vm3, -inf, %v11707_v48 }
 0x4e4   : > { %v3702_v32 = vsel %vm2975_vm0, %v11803_v3, -inf }
 0x4e5   : > { %3703 = vmax.xlane.f32.xlu2 %v3702_v32 }
 0x4e9   : > { %v3630_v35 = vpop.xlane.xlu1 %3629 }
 0x4ea   : > { %vm3668_vm4 = vcmp.eq.f32.partialorder %v11713_v23, %v3630_v35 }
 0x4eb   : > { %v11809_v62 = vsel %vm3668_vm4, -inf, %v11713_v23 }
 0x4ec   : > { %v3708_v12 = vsel %vm2975_vm0, %v11809_v62, -inf }
 0x4ed   : > { %3709 = vmax.xlane.f32.xlu2 %v3708_v12 }
 0x4f9   : > { %v3633_v41 = vpop.xlane.xlu1 %3632 }
 0x4fa   : > { %vm3669_vm5 = vcmp.eq.f32.partialorder %v11719_v46, %v3633_v41 }
 0x4fb   : > { %v11815_v48 = vsel %vm3669_vm5, -inf, %v11719_v46 }
 0x4fc   : > { %v3711_v49 = vsel %vm2975_vm0, %v11815_v48, -inf }
 0x4fd   : > { %3712 = vmax.xlane.f32.xlu2 %v3711_v49 }
 0x502   : > { %v3618_v0 = vpop.xlane.xlu2 %3617  ;;  %v3621_v32 = vpop.xlane.xlu0 %3620 }
 0x503   : > { %vm3664_vm6 = vcmp.eq.f32.partialorder %v11726_v6, %v3618_v0  ;;  %vm3665_vm7 = vcmp.eq.f32.partialorder %v11729_v22, %v3621_v32 }
 0x504   : > { %v11822_v23 = vsel %vm3664_vm6, -inf, %v11726_v6  ;;  %v11825_v35 = vsel %vm3665_vm7, -inf, %v11729_v22 }
 0x505   : > { %v3696_v46 = vsel %vm2975_vm0, %v11822_v23, -inf  ;;  %v3699_v12 = vsel %vm2975_vm0, %v11825_v35, -inf }
 0x506   : > { %3697 = vmax.xlane.f32.xlu0 %v3696_v46  ;;  %3700 = vmax.xlane.f32.xlu1 %v3699_v12 }
 0x509   : > { %v3642_v41 = vpop.xlane.xlu1 %3641 }
 0x50a   : > { %v3636_v49 = vpop.xlane.xlu2 %3635  ;;  %vm3672_vm8 = vcmp.eq.f32.partialorder %v11739_v21, %v3642_v41  ;;  %v3639_v0 = vpop.xlane.xlu0 %3638 }
 0x50b   : > { %vm3670_vm9 = vcmp.eq.f32.partialorder %v11742_v18, %v3636_v49  ;;  %vm3671_vm10 = vcmp.eq.f32.partialorder %v11749_v33, %v3639_v0  ;;  %v11835_v6 = vsel %vm3672_vm8, -inf, %v11739_v21 }
 0x50c   : > { %v11838_v22 = vsel %vm3670_vm9, -inf, %v11742_v18  ;;  %v3720_v32 = vsel %vm2975_vm0, %v11835_v6, -inf  ;;  %v11845_v12 = vsel %vm3671_vm10, -inf, %v11749_v33 }
 0x50d   : > { %v3714_v46 = vsel %vm2975_vm0, %v11838_v22, -inf  ;;  %3721 = vmax.xlane.f32.xlu2 %v3720_v32  ;;  %v3717_v41 = vsel %vm2975_vm0, %v11845_v12, -inf }
 0x50e   : > { %3715 = vmax.xlane.f32.xlu0 %v3714_v46  ;;  %3718 = vmax.xlane.f32.xlu1 %v3717_v41 }
 0x511   : > { %v3660_v21 = vpop.xlane.xlu1 %3659 }
 0x512   : > { %v3627_v49 = vpop.xlane.xlu2 %3626  ;;  %vm3678_vm11 = vcmp.eq.f32.partialorder %v11757_v38, %v3660_v21  ;;  %v3648_v18 = vpop.xlane.xlu0 %3647 }
 0x513   : > { %vm3667_vm12 = vcmp.eq.f32.partialorder %v11760_v57, %v3627_v49  ;;  %vm3674_vm13 = vcmp.eq.f32.partialorder %v11767_v20, %v3648_v18  ;;  %v11853_v0 = vsel %vm3678_vm11, -inf, %v11757_v38 }
 0x514   : > { %v11856_v33 = vsel %vm3667_vm12, -inf, %v11760_v57  ;;  %v3738_v32 = vsel %vm2975_vm0, %v11853_v0, -inf  ;;  %v11863_v41 = vsel %vm3674_vm13, -inf, %v11767_v20 }
 0x515   : > { %v3705_v46 = vsel %vm2975_vm0, %v11856_v33, -inf  ;;  %3739 = vmax.xlane.f32.xlu2 %v3738_v32  ;;  %v3726_v21 = vsel %vm2975_vm0, %v11863_v41, -inf }
 0x516   : > { %3706 = vmax.xlane.f32.xlu0 %v3705_v46  ;;  %3727 = vmax.xlane.f32.xlu1 %v3726_v21 }
 0x51a   : > { %v3654_v38 = vpop.xlane.xlu2 %3653  ;;  %v3651_v57 = vpop.xlane.xlu0 %3650 }
 0x51b   : > { %vm3676_vm14 = vcmp.eq.f32.partialorder %v11774_v4, %v3654_v38  ;;  %vm3675_vm15 = vcmp.eq.f32.partialorder %v11779_v10, %v3651_v57 }
 0x51c   : > { %v11870_v49 = vsel %vm3676_vm14, -inf, %v11774_v4  ;;  %v11875_v20 = vsel %vm3675_vm15, -inf, %v11779_v10 }
 0x51d   : > { %v3732_v18 = vsel %vm2975_vm0, %v11870_v49, -inf  ;;  %v3729_v32 = vsel %vm2975_vm0, %v11875_v20, -inf }
 0x51e   : > { %3733 = vmax.xlane.f32.xlu0 %v3732_v18  ;;  %3730 = vmax.xlane.f32.xlu1 %v3729_v32 }
 0x522   : > { %v3645_v46 = vpop.xlane.xlu2 %3644  ;;  %v3657_v21 = vpop.xlane.xlu0 %3656 }
 0x523   : > { %vm3673_vm1 = vcmp.eq.f32.partialorder %v11786_v37, %v3645_v46  ;;  %vm3677_vm2 = vcmp.eq.f32.partialorder %v11789_v1, %v3657_v21 }
 0x524   : > { %v11882_v4 = vsel %vm3673_vm1, -inf, %v11786_v37  ;;  %v11887_v10 = vsel %vm3677_vm2, -inf, %v11789_v1 }
 0x525   : > { %v3723_v38 = vsel %vm2975_vm0, %v11882_v4, -inf  ;;  %v3735_v57 = vsel %vm2975_vm0, %v11887_v10, -inf }
 0x526   : > { %3724 = vmax.xlane.f32.xlu0 %v3723_v38  ;;  %3736 = vmax.xlane.f32.xlu1 %v3735_v57 }
 0x52a   : > { %v3663_v18 = vpop.xlane.xlu2 %3662 }
 0x52b   : > { %vm3679_vm3 = vcmp.eq.f32.partialorder %v11797_v63, %v3663_v18 }
 0x52c   : > { %v11893_v32 = vsel %vm3679_vm3, -inf, %v11797_v63 }
 0x52d   : > { %v3741_v37 = vsel %vm2975_vm0, %v11893_v32, -inf }
 0x52e   : > { %3742 = vmax.xlane.f32.xlu0 %v3741_v37 }
 0x558   : > { %v3704_v46 = vpop.xlane.xlu2 %3703 }
 0x559   : > { %vm3746_vm4 = vcmp.eq.f32.partialorder %v11803_v3, %v3704_v46 }
 0x55a   : > { %v11899_v1 = vsel %vm3746_vm4, -inf, %v11803_v3 }
 0x55b   : > { %v3782_v21 = vsel %vm2975_vm0, %v11899_v1, -inf }
 0x55c   : > { %3783 = vmax.xlane.f32.xlu0 %v3782_v21 }
 0x560   : > { %v3710_v38 = vpop.xlane.xlu2 %3709 }
 0x561   : > { %vm3748_vm5 = vcmp.eq.f32.partialorder %v11809_v62, %v3710_v38 }
 0x562   : > { %v11905_v63 = vsel %vm3748_vm5, -inf, %v11809_v62 }
 0x563   : > { %v3788_v57 = vsel %vm2975_vm0, %v11905_v63, -inf }
 0x564   : > { %3789 = vmax.xlane.f32.xlu0 %v3788_v57 }
 0x570   : > { %v3713_v18 = vpop.xlane.xlu2 %3712 }
 0x571   : > { %vm3749_vm6 = vcmp.eq.f32.partialorder %v11815_v48, %v3713_v18 }
 0x572   : > { %v11911_v3 = vsel %vm3749_vm6, -inf, %v11815_v48 }
 0x573   : > { %v3791_v37 = vsel %vm2975_vm0, %v11911_v3, -inf }
 0x574   : > { %3792 = vmax.xlane.f32.xlu0 %v3791_v37 }
 0x579   : > { %v3701_v46 = vpop.xlane.xlu1 %3700  ;;  %v3698_v21 = vpop.xlane.xlu0 %3697 }
 0x57a   : > { %vm3745_vm7 = vcmp.eq.f32.partialorder %v11825_v35, %v3701_v46  ;;  %vm3744_vm8 = vcmp.eq.f32.partialorder %v11822_v23, %v3698_v21 }
 0x57b   : > { %v11918_v62 = vsel %vm3745_vm7, -inf, %v11825_v35  ;;  %v11921_v38 = vsel %vm3744_vm8, -inf, %v11822_v23 }
 0x57c   : > { %v3779_v48 = vsel %vm2975_vm0, %v11918_v62, -inf  ;;  %v3776_v57 = vsel %vm2975_vm0, %v11921_v38, -inf }
 0x57d   : > { %3780 = vmax.xlane.f32.xlu2 %v3779_v48  ;;  %3777 = vmax.xlane.f32.xlu1 %v3776_v57 }
 0x580   : > { %v3722_v18 = vpop.xlane.xlu2 %3721 }
 0x581   : > { %v3716_v37 = vpop.xlane.xlu0 %3715  ;;  %vm3752_vm9 = vcmp.eq.f32.partialorder %v11835_v6, %v3722_v18  ;;  %v3719_v46 = vpop.xlane.xlu1 %3718 }
 0x582   : > { %vm3750_vm10 = vcmp.eq.f32.partialorder %v11838_v22, %v3716_v37  ;;  %vm3751_vm11 = vcmp.eq.f32.partialorder %v11845_v12, %v3719_v46  ;;  %v11931_v23 = vsel %vm3752_vm9, -inf, %v11835_v6 }
 0x583   : > { %v11934_v35 = vsel %vm3750_vm10, -inf, %v11838_v22  ;;  %v3800_v21 = vsel %vm2975_vm0, %v11931_v23, -inf  ;;  %v11939_v48 = vsel %vm3751_vm11, -inf, %v11845_v12 }
 0x584   : > { %v3794_v57 = vsel %vm2975_vm0, %v11934_v35, -inf  ;;  %3801 = vmax.xlane.f32.xlu0 %v3800_v21  ;;  %v3797_v18 = vsel %vm2975_vm0, %v11939_v48, -inf }
 0x585   : > { %3795 = vmax.xlane.f32.xlu1 %v3794_v57  ;;  %3798 = vmax.xlane.f32.xlu2 %v3797_v18 }
 0x588   : > { %v3740_v6 = vpop.xlane.xlu2 %3739 }
 0x589   : > { %v3707_v37 = vpop.xlane.xlu0 %3706  ;;  %vm3758_vm12 = vcmp.eq.f32.partialorder %v11853_v0, %v3740_v6  ;;  %v3728_v22 = vpop.xlane.xlu1 %3727 }
 0x58a   : > { %vm3747_vm13 = vcmp.eq.f32.partialorder %v11856_v33, %v3707_v37  ;;  %vm3754_vm14 = vcmp.eq.f32.partialorder %v11863_v41, %v3728_v22  ;;  %v11949_v12 = vsel %vm3758_vm12, -inf, %v11853_v0 }
 0x58b   : > { %v11952_v46 = vsel %vm3747_vm13, -inf, %v11856_v33  ;;  %v3818_v21 = vsel %vm2975_vm0, %v11949_v12, -inf  ;;  %v11957_v57 = vsel %vm3754_vm14, -inf, %v11863_v41 }
 0x58c   : > { %v3785_v18 = vsel %vm2975_vm0, %v11952_v46, -inf  ;;  %3819 = vmax.xlane.f32.xlu0 %v3818_v21  ;;  %v3806_v6 = vsel %vm2975_vm0, %v11957_v57, -inf }
 0x58d   : > { %3786 = vmax.xlane.f32.xlu1 %v3785_v18  ;;  %3807 = vmax.xlane.f32.xlu2 %v3806_v6 }
 0x591   : > { %v3734_v0 = vpop.xlane.xlu0 %3733  ;;  %v3731_v37 = vpop.xlane.xlu1 %3730 }
 0x592   : > { %vm3756_vm15 = vcmp.eq.f32.partialorder %v11870_v49, %v3734_v0  ;;  %vm3755_vm1 = vcmp.eq.f32.partialorder %v11875_v20, %v3731_v37 }
 0x593   : > { %v11966_v33 = vsel %vm3756_vm15, -inf, %v11870_v49  ;;  %v11969_v41 = vsel %vm3755_vm1, -inf, %v11875_v20 }
 0x594   : > { %v3812_v22 = vsel %vm2975_vm0, %v11966_v33, -inf  ;;  %v3809_v21 = vsel %vm2975_vm0, %v11969_v41, -inf }
 0x595   : > { %3813 = vmax.xlane.f32.xlu1 %v3812_v22  ;;  %3810 = vmax.xlane.f32.xlu2 %v3809_v21 }
 0x599   : > { %v3725_v18 = vpop.xlane.xlu0 %3724  ;;  %v3737_v6 = vpop.xlane.xlu1 %3736 }
 0x59a   : > { %vm3753_vm2 = vcmp.eq.f32.partialorder %v11882_v4, %v3725_v18  ;;  %vm3757_vm3 = vcmp.eq.f32.partialorder %v11887_v10, %v3737_v6 }
 0x59b   : > { %v11978_v49 = vsel %vm3753_vm2, -inf, %v11882_v4  ;;  %v11981_v20 = vsel %vm3757_vm3, -inf, %v11887_v10 }
 0x59c   : > { %v3803_v0 = vsel %vm2975_vm0, %v11978_v49, -inf  ;;  %v3815_v37 = vsel %vm2975_vm0, %v11981_v20, -inf }
 0x59d   : > { %3804 = vmax.xlane.f32.xlu1 %v3803_v0  ;;  %3816 = vmax.xlane.f32.xlu2 %v3815_v37 }
 0x5a1   : > { %v3743_v22 = vpop.xlane.xlu0 %3742 }
 0x5a2   : > { %vm3759_vm4 = vcmp.eq.f32.partialorder %v11893_v32, %v3743_v22 }
 0x5a3   : > { %v11989_v21 = vsel %vm3759_vm4, -inf, %v11893_v32 }
 0x5a4   : > { %v3821_v4 = vsel %vm2975_vm0, %v11989_v21, -inf }
 0x5a5   : > { %3822 = vmax.xlane.f32.xlu1 %v3821_v4 }
 0x5cf   : > { %v3784_v10 = vpop.xlane.xlu0 %3783 }
 0x5d0   : > { %vm3826_vm5 = vcmp.eq.f32.partialorder %v11899_v1, %v3784_v10 }
 0x5d1   : > { %v11995_v18 = vsel %vm3826_vm5, -inf, %v11899_v1 }
 0x5d2   : > { %v3862_v6 = vsel %vm2975_vm0, %v11995_v18, -inf }
 0x5d3   : > { %3863 = vmax.xlane.f32.xlu1 %v3862_v6 }
 0x5d7   : > { %v3790_v0 = vpop.xlane.xlu0 %3789 }
 0x5d8   : > { %vm3828_vm6 = vcmp.eq.f32.partialorder %v11905_v63, %v3790_v0 }
 0x5d9   : > { %v12001_v32 = vsel %vm3828_vm6, -inf, %v11905_v63 }
 0x5da   : > { %v3868_v37 = vsel %vm2975_vm0, %v12001_v32, -inf }
 0x5db   : > { %3869 = vmax.xlane.f32.xlu1 %v3868_v37 }
 0x5e7   : > { %v3793_v22 = vpop.xlane.xlu0 %3792 }
 0x5e8   : > { %vm3829_vm7 = vcmp.eq.f32.partialorder %v11911_v3, %v3793_v22 }
 0x5e9   : > { %v12007_v1 = vsel %vm3829_vm7, -inf, %v11911_v3 }
 0x5ea   : > { %v3871_v4 = vsel %vm2975_vm0, %v12007_v1, -inf }
 0x5eb   : > { %3872 = vmax.xlane.f32.xlu1 %v3871_v4 }
 0x5f0   : > { %v3781_v10 = vpop.xlane.xlu2 %3780  ;;  %v3778_v6 = vpop.xlane.xlu1 %3777 }
 0x5f1   : > { %vm3825_vm8 = vcmp.eq.f32.partialorder %v11918_v62, %v3781_v10  ;;  %vm3824_vm9 = vcmp.eq.f32.partialorder %v11921_v38, %v3778_v6 }
 0x5f2   : > { %v12014_v63 = vsel %vm3825_vm8, -inf, %v11918_v62  ;;  %v12017_v0 = vsel %vm3824_vm9, -inf, %v11921_v38 }
 0x5f3   : > { %v3859_v3 = vsel %vm2975_vm0, %v12014_v63, -inf  ;;  %v3856_v37 = vsel %vm2975_vm0, %v12017_v0, -inf }
 0x5f4   : > { %3860 = vmax.xlane.f32.xlu0 %v3859_v3  ;;  %3857 = vmax.xlane.f32.xlu2 %v3856_v37 }
 0x5f7   : > { %v3802_v22 = vpop.xlane.xlu0 %3801 }
 0x5f8   : > { %v3796_v4 = vpop.xlane.xlu1 %3795  ;;  %vm3832_vm10 = vcmp.eq.f32.partialorder %v11931_v23, %v3802_v22  ;;  %v3799_v10 = vpop.xlane.xlu2 %3798 }
 0x5f9   : > { %vm3830_vm11 = vcmp.eq.f32.partialorder %v11934_v35, %v3796_v4  ;;  %v12026_v62 = vsel %vm3832_vm10, -inf, %v11931_v23  ;;  %vm3831_vm12 = vcmp.eq.f32.partialorder %v11939_v48, %v3799_v10 }
 0x5fa   : > { %v12030_v38 = vsel %vm3830_vm11, -inf, %v11934_v35  ;;  %v3880_v6 = vsel %vm2975_vm0, %v12026_v62, -inf  ;;  %v12035_v3 = vsel %vm3831_vm12, -inf, %v11939_v48 }
 0x5fb   : > { %v3874_v37 = vsel %vm2975_vm0, %v12030_v38, -inf  ;;  %3881 = vmax.xlane.f32.xlu1 %v3880_v6  ;;  %v3877_v22 = vsel %vm2975_vm0, %v12035_v3, -inf }
 0x5fc   : > { %3875 = vmax.xlane.f32.xlu2 %v3874_v37  ;;  %3878 = vmax.xlane.f32.xlu0 %v3877_v22 }
 0x5ff   : > { %v3820_v23 = vpop.xlane.xlu0 %3819 }
 0x600   : > { %v3787_v4 = vpop.xlane.xlu1 %3786  ;;  %vm3838_vm13 = vcmp.eq.f32.partialorder %v11949_v12, %v3820_v23  ;;  %v3808_v35 = vpop.xlane.xlu2 %3807 }
 0x601   : > { %vm3827_vm14 = vcmp.eq.f32.partialorder %v11952_v46, %v3787_v4  ;;  %v12044_v10 = vsel %vm3838_vm13, -inf, %v11949_v12  ;;  %vm3834_vm15 = vcmp.eq.f32.partialorder %v11957_v57, %v3808_v35 }
 0x602   : > { %v12048_v48 = vsel %vm3827_vm14, -inf, %v11952_v46  ;;  %v3898_v6 = vsel %vm2975_vm0, %v12044_v10, -inf  ;;  %v12053_v37 = vsel %vm3834_vm15, -inf, %v11957_v57 }
 0x603   : > { %v3865_v22 = vsel %vm2975_vm0, %v12048_v48, -inf  ;;  %3899 = vmax.xlane.f32.xlu1 %v3898_v6  ;;  %v3886_v23 = vsel %vm2975_vm0, %v12053_v37, -inf }
 0x604   : > { %3866 = vmax.xlane.f32.xlu2 %v3865_v22  ;;  %3887 = vmax.xlane.f32.xlu0 %v3886_v23 }
 0x608   : > { %v3814_v12 = vpop.xlane.xlu1 %3813  ;;  %v3811_v4 = vpop.xlane.xlu2 %3810 }
 0x609   : > { %vm3836_vm1 = vcmp.eq.f32.partialorder %v11966_v33, %v3814_v12  ;;  %vm3835_vm2 = vcmp.eq.f32.partialorder %v11969_v41, %v3811_v4 }
 0x60a   : > { %v12062_v46 = vsel %vm3836_vm1, -inf, %v11966_v33  ;;  %v12065_v57 = vsel %vm3835_vm2, -inf, %v11969_v41 }
 0x60b   : > { %v3892_v35 = vsel %vm2975_vm0, %v12062_v46, -inf  ;;  %v3889_v6 = vsel %vm2975_vm0, %v12065_v57, -inf }
 0x60c   : > { %3893 = vmax.xlane.f32.xlu2 %v3892_v35  ;;  %3890 = vmax.xlane.f32.xlu0 %v3889_v6 }
 0x610   : > { %v3805_v22 = vpop.xlane.xlu1 %3804  ;;  %v3817_v23 = vpop.xlane.xlu2 %3816 }
 0x611   : > { %vm3833_vm3 = vcmp.eq.f32.partialorder %v11978_v49, %v3805_v22  ;;  %vm3837_vm4 = vcmp.eq.f32.partialorder %v11981_v20, %v3817_v23 }
 0x612   : > { %v12074_v33 = vsel %vm3833_vm3, -inf, %v11978_v49  ;;  %v12077_v41 = vsel %vm3837_vm4, -inf, %v11981_v20 }
 0x613   : > { %v3883_v12 = vsel %vm2975_vm0, %v12074_v33, -inf  ;;  %v3895_v4 = vsel %vm2975_vm0, %v12077_v41, -inf }
 0x614   : > { %3884 = vmax.xlane.f32.xlu2 %v3883_v12  ;;  %3896 = vmax.xlane.f32.xlu0 %v3895_v4 }
 0x618   : > { %v3823_v35 = vpop.xlane.xlu1 %3822 }
 0x619   : > { %vm3839_vm5 = vcmp.eq.f32.partialorder %v11989_v21, %v3823_v35 }
 0x61a   : > { %v12085_v6 = vsel %vm3839_vm5, -inf, %v11989_v21 }
 0x61b   : > { %v3901_v49 = vsel %vm2975_vm0, %v12085_v6, -inf }
 0x61c   : > { %3902 = vmax.xlane.f32.xlu2 %v3901_v49 }
 0x646   : > { %v3864_v20 = vpop.xlane.xlu1 %3863 }
 0x647   : > { %vm3906_vm6 = vcmp.eq.f32.partialorder %v11995_v18, %v3864_v20 }
 0x648   : > { %v12091_v22 = vsel %vm3906_vm6, -inf, %v11995_v18 }
 0x649   : > { %v3942_v23 = vsel %vm2975_vm0, %v12091_v22, -inf }
 0x64a   : > { %3943 = vmax.xlane.f32.xlu2 %v3942_v23 }
 0x64e   : > { %v3870_v12 = vpop.xlane.xlu1 %3869 }
 0x64f   : > { %vm3908_vm7 = vcmp.eq.f32.partialorder %v12001_v32, %v3870_v12 }
 0x650   : > { %v12097_v21 = vsel %vm3908_vm7, -inf, %v12001_v32 }
 0x651   : > { %v3948_v4 = vsel %vm2975_vm0, %v12097_v21, -inf }
 0x652   : > { %3949 = vmax.xlane.f32.xlu2 %v3948_v4 }
 0x65e   : > { %v3873_v35 = vpop.xlane.xlu1 %3872 }
 0x65f   : > { %vm3909_vm8 = vcmp.eq.f32.partialorder %v12007_v1, %v3873_v35 }
 0x660   : > { %v12103_v18 = vsel %vm3909_vm8, -inf, %v12007_v1 }
 0x661   : > { %v3951_v49 = vsel %vm2975_vm0, %v12103_v18, -inf }
 0x662   : > { %3952 = vmax.xlane.f32.xlu2 %v3951_v49 }
 0x667   : > { %v3858_v20 = vpop.xlane.xlu2 %3857  ;;  %v3861_v23 = vpop.xlane.xlu0 %3860 }
 0x668   : > { %vm3904_vm9 = vcmp.eq.f32.partialorder %v12017_v0, %v3858_v20  ;;  %vm3905_vm10 = vcmp.eq.f32.partialorder %v12014_v63, %v3861_v23 }
 0x669   : > { %v12110_v32 = vsel %vm3905_vm10, -inf, %v12014_v63  ;;  %v12113_v12 = vsel %vm3904_vm9, -inf, %v12017_v0 }
 0x66a   : > { %v3936_v1 = vsel %vm2975_vm0, %v12113_v12, -inf  ;;  %v3939_v4 = vsel %vm2975_vm0, %v12110_v32, -inf }
 0x66b   : > { %3937 = vmax.xlane.f32.xlu0 %v3936_v1  ;;  %3940 = vmax.xlane.f32.xlu1 %v3939_v4 }
 0x66e   : > { %v3882_v35 = vpop.xlane.xlu1 %3881 }
 0x66f   : > { %v3876_v49 = vpop.xlane.xlu2 %3875  ;;  %vm3912_vm11 = vcmp.eq.f32.partialorder %v12026_v62, %v3882_v35  ;;  %v3879_v20 = vpop.xlane.xlu0 %3878 }
 0x670   : > { %vm3910_vm12 = vcmp.eq.f32.partialorder %v12030_v38, %v3876_v49  ;;  %v12122_v63 = vsel %vm3912_vm11, -inf, %v12026_v62  ;;  %vm3911_vm13 = vcmp.eq.f32.partialorder %v12035_v3, %v3879_v20 }
 0x671   : > { %v12125_v0 = vsel %vm3910_vm12, -inf, %v12030_v38  ;;  %v12129_v23 = vsel %vm3911_vm13, -inf, %v12035_v3  ;;  %v3960_v1 = vsel %vm2975_vm0, %v12122_v63, -inf }
 0x672   : > { %v3954_v4 = vsel %vm2975_vm0, %v12125_v0, -inf  ;;  %3961 = vmax.xlane.f32.xlu2 %v3960_v1  ;;  %v3957_v62 = vsel %vm2975_vm0, %v12129_v23, -inf }
 0x673   : > { %3955 = vmax.xlane.f32.xlu0 %v3954_v4  ;;  %3958 = vmax.xlane.f32.xlu1 %v3957_v62 }
 0x676   : > { %v3900_v35 = vpop.xlane.xlu1 %3899 }
 0x677   : > { %v3867_v38 = vpop.xlane.xlu2 %3866  ;;  %vm3918_vm14 = vcmp.eq.f32.partialorder %v12044_v10, %v3900_v35  ;;  %v3888_v3 = vpop.xlane.xlu0 %3887 }
 0x678   : > { %vm3907_vm15 = vcmp.eq.f32.partialorder %v12048_v48, %v3867_v38  ;;  %v12140_v49 = vsel %vm3918_vm14, -inf, %v12044_v10  ;;  %vm3914_vm1 = vcmp.eq.f32.partialorder %v12053_v37, %v3888_v3 }
 0x679   : > { %v12143_v20 = vsel %vm3907_vm15, -inf, %v12048_v48  ;;  %v12147_v1 = vsel %vm3914_vm1, -inf, %v12053_v37  ;;  %v3978_v4 = vsel %vm2975_vm0, %v12140_v49, -inf }
 0x67a   : > { %v3945_v62 = vsel %vm2975_vm0, %v12143_v20, -inf  ;;  %3979 = vmax.xlane.f32.xlu2 %v3978_v4  ;;  %v3966_v10 = vsel %vm2975_vm0, %v12147_v1, -inf }
 0x67b   : > { %3946 = vmax.xlane.f32.xlu0 %v3945_v62  ;;  %3967 = vmax.xlane.f32.xlu1 %v3966_v10 }
 0x67f   : > { %v3894_v35 = vpop.xlane.xlu2 %3893  ;;  %v3891_v48 = vpop.xlane.xlu0 %3890 }
 0x680   : > { %vm3916_vm2 = vcmp.eq.f32.partialorder %v12062_v46, %v3894_v35  ;;  %vm3915_vm3 = vcmp.eq.f32.partialorder %v12065_v57, %v3891_v48 }
 0x681   : > { %v12157_v38 = vsel %vm3916_vm2, -inf, %v12062_v46  ;;  %v12161_v37 = vsel %vm3915_vm3, -inf, %v12065_v57 }
 0x682   : > { %v3972_v3 = vsel %vm2975_vm0, %v12157_v38, -inf  ;;  %v3969_v4 = vsel %vm2975_vm0, %v12161_v37, -inf }
 0x683   : > { %3973 = vmax.xlane.f32.xlu0 %v3972_v3  ;;  %3970 = vmax.xlane.f32.xlu1 %v3969_v4 }
 0x687   : > { %v3885_v62 = vpop.xlane.xlu2 %3884  ;;  %v3897_v10 = vpop.xlane.xlu0 %3896 }
 0x688   : > { %vm3913_vm4 = vcmp.eq.f32.partialorder %v12074_v33, %v3885_v62  ;;  %vm3917_vm5 = vcmp.eq.f32.partialorder %v12077_v41, %v3897_v10 }
 0x689   : > { %v12169_v46 = vsel %vm3913_vm4, -inf, %v12074_v33  ;;  %v12173_v57 = vsel %vm3917_vm5, -inf, %v12077_v41 }
 0x68a   : > { %v3963_v35 = vsel %vm2975_vm0, %v12169_v46, -inf  ;;  %v3975_v48 = vsel %vm2975_vm0, %v12173_v57, -inf }
 0x68b   : > { %3964 = vmax.xlane.f32.xlu0 %v3963_v35  ;;  %3976 = vmax.xlane.f32.xlu1 %v3975_v48 }
 0x68f   : > { %v3903_v3 = vpop.xlane.xlu2 %3902 }
 0x690   : > { %vm3919_vm6 = vcmp.eq.f32.partialorder %v12085_v6, %v3903_v3 }
 0x691   : > { %v12181_v4 = vsel %vm3919_vm6, -inf, %v12085_v6 }
 0x692   : > { %v3981_v33 = vsel %vm2975_vm0, %v12181_v4, -inf }
 0x693   : > { %3982 = vmax.xlane.f32.xlu0 %v3981_v33 }
 0x6bd   : > { %v3944_v41 = vpop.xlane.xlu2 %3943 }
 0x6be   : > { %vm3986_vm7 = vcmp.eq.f32.partialorder %v12091_v22, %v3944_v41 }
 0x6bf   : > { %v12187_v62 = vsel %vm3986_vm7, -inf, %v12091_v22 }
 0x6c0   : > { %v4022_v10 = vsel %vm2975_vm0, %v12187_v62, -inf }
 0x6c1   : > { %4023 = vmax.xlane.f32.xlu0 %v4022_v10 }
 0x6c5   : > { %v3950_v35 = vpop.xlane.xlu2 %3949 }
 0x6c6   : > { %vm3988_vm8 = vcmp.eq.f32.partialorder %v12097_v21, %v3950_v35 }
 0x6c7   : > { %v12193_v6 = vsel %vm3988_vm8, -inf, %v12097_v21 }
 0x6c8   : > { %v4028_v48 = vsel %vm2975_vm0, %v12193_v6, -inf }
 0x6c9   : > { %4029 = vmax.xlane.f32.xlu0 %v4028_v48 }
 0x6d5   : > { %v3953_v3 = vpop.xlane.xlu2 %3952 }
 0x6d6   : > { %vm3989_vm9 = vcmp.eq.f32.partialorder %v12103_v18, %v3953_v3 }
 0x6d7   : > { %v12199_v22 = vsel %vm3989_vm9, -inf, %v12103_v18 }
 0x6d8   : > { %v4031_v33 = vsel %vm2975_vm0, %v12199_v22, -inf }
 0x6d9   : > { %4032 = vmax.xlane.f32.xlu0 %v4031_v33 }
 0x6de   : > { %v3941_v41 = vpop.xlane.xlu1 %3940  ;;  %v3938_v10 = vpop.xlane.xlu0 %3937 }
 0x6df   : > { %vm3985_vm10 = vcmp.eq.f32.partialorder %v12110_v32, %v3941_v41  ;;  %vm3984_vm11 = vcmp.eq.f32.partialorder %v12113_v12, %v3938_v10 }
 0x6e0   : > { %v12206_v21 = vsel %vm3985_vm10, -inf, %v12110_v32  ;;  %v12209_v35 = vsel %vm3984_vm11, -inf, %v12113_v12 }
 0x6e1   : > { %v4019_v18 = vsel %vm2975_vm0, %v12206_v21, -inf  ;;  %v4016_v48 = vsel %vm2975_vm0, %v12209_v35, -inf }
 0x6e2   : > { %4020 = vmax.xlane.f32.xlu2 %v4019_v18  ;;  %4017 = vmax.xlane.f32.xlu1 %v4016_v48 }
 0x6e5   : > { %v3962_v3 = vpop.xlane.xlu2 %3961 }
 0x6e6   : > { %v3956_v33 = vpop.xlane.xlu0 %3955  ;;  %vm3992_vm12 = vcmp.eq.f32.partialorder %v12122_v63, %v3962_v3  ;;  %v3959_v41 = vpop.xlane.xlu1 %3958 }
 0x6e7   : > { %vm3990_vm13 = vcmp.eq.f32.partialorder %v12125_v0, %v3956_v33  ;;  %v12218_v32 = vsel %vm3992_vm12, -inf, %v12122_v63  ;;  %vm3991_vm14 = vcmp.eq.f32.partialorder %v12129_v23, %v3959_v41 }
 0x6e8   : > { %v12222_v12 = vsel %vm3990_vm13, -inf, %v12125_v0  ;;  %v12225_v10 = vsel %vm3991_vm14, -inf, %v12129_v23  ;;  %v4040_v18 = vsel %vm2975_vm0, %v12218_v32, -inf }
 0x6e9   : > { %v4034_v48 = vsel %vm2975_vm0, %v12222_v12, -inf  ;;  %4041 = vmax.xlane.f32.xlu0 %v4040_v18  ;;  %v4037_v3 = vsel %vm2975_vm0, %v12225_v10, -inf }
 0x6ea   : > { %4035 = vmax.xlane.f32.xlu1 %v4034_v48  ;;  %4038 = vmax.xlane.f32.xlu2 %v4037_v3 }
 0x6ed   : > { %v3980_v63 = vpop.xlane.xlu2 %3979 }
 0x6ee   : > { %v3947_v33 = vpop.xlane.xlu0 %3946  ;;  %vm3998_vm15 = vcmp.eq.f32.partialorder %v12140_v49, %v3980_v63  ;;  %v3968_v0 = vpop.xlane.xlu1 %3967 }
 0x6ef   : > { %vm3987_vm1 = vcmp.eq.f32.partialorder %v12143_v20, %v3947_v33  ;;  %v12236_v23 = vsel %vm3998_vm15, -inf, %v12140_v49  ;;  %vm3994_vm2 = vcmp.eq.f32.partialorder %v12147_v1, %v3968_v0 }
 0x6f0   : > { %v12240_v41 = vsel %vm3987_vm1, -inf, %v12143_v20  ;;  %v12243_v18 = vsel %vm3994_vm2, -inf, %v12147_v1  ;;  %v4058_v48 = vsel %vm2975_vm0, %v12236_v23, -inf }
 0x6f1   : > { %v4025_v3 = vsel %vm2975_vm0, %v12240_v41, -inf  ;;  %4059 = vmax.xlane.f32.xlu0 %v4058_v48  ;;  %v4046_v63 = vsel %vm2975_vm0, %v12243_v18, -inf }
 0x6f2   : > { %4026 = vmax.xlane.f32.xlu1 %v4025_v3  ;;  %4047 = vmax.xlane.f32.xlu2 %v4046_v63 }
 0x6f6   : > { %v3974_v49 = vpop.xlane.xlu0 %3973  ;;  %v3971_v33 = vpop.xlane.xlu1 %3970 }
 0x6f7   : > { %vm3996_vm3 = vcmp.eq.f32.partialorder %v12157_v38, %v3974_v49  ;;  %vm3995_vm4 = vcmp.eq.f32.partialorder %v12161_v37, %v3971_v33 }
 0x6f8   : > { %v12254_v20 = vsel %vm3996_vm3, -inf, %v12157_v38  ;;  %v12257_v1 = vsel %vm3995_vm4, -inf, %v12161_v37 }
 0x6f9   : > { %v4052_v0 = vsel %vm2975_vm0, %v12254_v20, -inf  ;;  %v4049_v48 = vsel %vm2975_vm0, %v12257_v1, -inf }
 0x6fa   : > { %4053 = vmax.xlane.f32.xlu1 %v4052_v0  ;;  %4050 = vmax.xlane.f32.xlu2 %v4049_v48 }
 0x6fe   : > { %v3965_v3 = vpop.xlane.xlu0 %3964  ;;  %v3977_v63 = vpop.xlane.xlu1 %3976 }
 0x6ff   : > { %vm3993_vm5 = vcmp.eq.f32.partialorder %v12169_v46, %v3965_v3  ;;  %vm3997_vm6 = vcmp.eq.f32.partialorder %v12173_v57, %v3977_v63 }
 0x700   : > { %v12266_v38 = vsel %vm3993_vm5, -inf, %v12169_v46  ;;  %v12269_v37 = vsel %vm3997_vm6, -inf, %v12173_v57 }
 0x701   : > { %v4043_v49 = vsel %vm2975_vm0, %v12266_v38, -inf  ;;  %v4055_v33 = vsel %vm2975_vm0, %v12269_v37, -inf }
 0x702   : > { %4044 = vmax.xlane.f32.xlu1 %v4043_v49  ;;  %4056 = vmax.xlane.f32.xlu2 %v4055_v33 }
 0x706   : > { %v3983_v0 = vpop.xlane.xlu0 %3982 }
 0x707   : > { %vm3999_vm7 = vcmp.eq.f32.partialorder %v12181_v4, %v3983_v0 }
 0x708   : > { %v12277_v48 = vsel %vm3999_vm7, -inf, %v12181_v4 }
 0x709   : > { %v4061_v46 = vsel %vm2975_vm0, %v12277_v48, -inf }
 0x70a   : > { %4062 = vmax.xlane.f32.xlu1 %v4061_v46 }
 0x734   : > { %v4024_v57 = vpop.xlane.xlu0 %4023 }
 0x735   : > { %vm4066_vm8 = vcmp.eq.f32.partialorder %v12187_v62, %v4024_v57 }
 0x736   : > { %v12283_v3 = vsel %vm4066_vm8, -inf, %v12187_v62 }
 0x737   : > { %v4102_v63 = vsel %vm2975_vm0, %v12283_v3, -inf }
 0x738   : > { %4103 = vmax.xlane.f32.xlu1 %v4102_v63 }
 0x73c   : > { %v4030_v49 = vpop.xlane.xlu0 %4029 }
 0x73d   : > { %vm4068_vm9 = vcmp.eq.f32.partialorder %v12193_v6, %v4030_v49 }
 0x73e   : > { %v12289_v4 = vsel %vm4068_vm9, -inf, %v12193_v6 }
 0x73f   : > { %v4108_v33 = vsel %vm2975_vm0, %v12289_v4, -inf }
 0x740   : > { %4109 = vmax.xlane.f32.xlu1 %v4108_v33 }
 0x74c   : > { %v4033_v0 = vpop.xlane.xlu0 %4032 }
 0x74d   : > { %vm4069_vm10 = vcmp.eq.f32.partialorder %v12199_v22, %v4033_v0 }
 0x74e   : > { %v12295_v62 = vsel %vm4069_vm10, -inf, %v12199_v22 }
 0x74f   : > { %v4111_v46 = vsel %vm2975_vm0, %v12295_v62, -inf }
 0x750   : > { %4112 = vmax.xlane.f32.xlu1 %v4111_v46 }
 0x755   : > { %v4021_v57 = vpop.xlane.xlu2 %4020  ;;  %v4018_v63 = vpop.xlane.xlu1 %4017 }
 0x756   : > { %vm4065_vm11 = vcmp.eq.f32.partialorder %v12206_v21, %v4021_v57  ;;  %vm4064_vm12 = vcmp.eq.f32.partialorder %v12209_v35, %v4018_v63 }
 0x757   : > { %v12302_v6 = vsel %vm4065_vm11, -inf, %v12206_v21  ;;  %v12305_v49 = vsel %vm4064_vm12, -inf, %v12209_v35 }
 0x758   : > { %v4099_v22 = vsel %vm2975_vm0, %v12302_v6, -inf  ;;  %v4096_v33 = vsel %vm2975_vm0, %v12305_v49, -inf }
 0x759   : > { %4100 = vmax.xlane.f32.xlu0 %v4099_v22  ;;  %4097 = vmax.xlane.f32.xlu2 %v4096_v33 }
 0x75c   : > { %v4042_v0 = vpop.xlane.xlu0 %4041 }
 0x75d   : > { %v4036_v46 = vpop.xlane.xlu1 %4035  ;;  %vm4072_vm13 = vcmp.eq.f32.partialorder %v12218_v32, %v4042_v0  ;;  %v4039_v57 = vpop.xlane.xlu2 %4038 }
 0x75e   : > { %vm4070_vm14 = vcmp.eq.f32.partialorder %v12222_v12, %v4036_v46  ;;  %v12314_v21 = vsel %vm4072_vm13, -inf, %v12218_v32  ;;  %vm4071_vm15 = vcmp.eq.f32.partialorder %v12225_v10, %v4039_v57 }
 0x75f   : > { %v12318_v35 = vsel %vm4070_vm14, -inf, %v12222_v12  ;;  %v12321_v63 = vsel %vm4071_vm15, -inf, %v12225_v10  ;;  %v4120_v22 = vsel %vm2975_vm0, %v12314_v21, -inf }
 0x760   : > { %v4114_v33 = vsel %vm2975_vm0, %v12318_v35, -inf  ;;  %4121 = vmax.xlane.f32.xlu1 %v4120_v22  ;;  %v4117_v0 = vsel %vm2975_vm0, %v12321_v63, -inf }
 0x761   : > { %4115 = vmax.xlane.f32.xlu2 %v4114_v33  ;;  %4118 = vmax.xlane.f32.xlu0 %v4117_v0 }
 0x764   : > { %v4060_v32 = vpop.xlane.xlu0 %4059 }
 0x765   : > { %v4027_v46 = vpop.xlane.xlu1 %4026  ;;  %vm4078_vm1 = vcmp.eq.f32.partialorder %v12236_v23, %v4060_v32  ;;  %v4048_v12 = vpop.xlane.xlu2 %4047 }
 0x766   : > { %vm4067_vm2 = vcmp.eq.f32.partialorder %v12240_v41, %v4027_v46  ;;  %v12332_v10 = vsel %vm4078_vm1, -inf, %v12236_v23  ;;  %vm4074_vm3 = vcmp.eq.f32.partialorder %v12243_v18, %v4048_v12 }
 0x767   : > { %v12336_v57 = vsel %vm4067_vm2, -inf, %v12240_v41  ;;  %v12339_v22 = vsel %vm4074_vm3, -inf, %v12243_v18  ;;  %v4138_v33 = vsel %vm2975_vm0, %v12332_v10, -inf }
 0x768   : > { %v4105_v0 = vsel %vm2975_vm0, %v12336_v57, -inf  ;;  %4139 = vmax.xlane.f32.xlu1 %v4138_v33  ;;  %v4126_v32 = vsel %vm2975_vm0, %v12339_v22, -inf }
 0x769   : > { %4106 = vmax.xlane.f32.xlu2 %v4105_v0  ;;  %4127 = vmax.xlane.f32.xlu0 %v4126_v32 }
 0x76d   : > { %v4054_v23 = vpop.xlane.xlu1 %4053  ;;  %v4051_v46 = vpop.xlane.xlu2 %4050 }
 0x76e   : > { %vm4076_vm4 = vcmp.eq.f32.partialorder %v12254_v20, %v4054_v23  ;;  %vm4075_vm5 = vcmp.eq.f32.partialorder %v12257_v1, %v4051_v46 }
 0x76f   : > { %v12350_v41 = vsel %vm4076_vm4, -inf, %v12254_v20  ;;  %v12353_v18 = vsel %vm4075_vm5, -inf, %v12257_v1 }
 0x770   : > { %v4132_v12 = vsel %vm2975_vm0, %v12350_v41, -inf  ;;  %v4129_v33 = vsel %vm2975_vm0, %v12353_v18, -inf }
 0x771   : > { %4133 = vmax.xlane.f32.xlu2 %v4132_v12  ;;  %4130 = vmax.xlane.f32.xlu0 %v4129_v33 }
 0x775   : > { %v4045_v0 = vpop.xlane.xlu1 %4044  ;;  %v4057_v32 = vpop.xlane.xlu2 %4056 }
 0x776   : > { %vm4073_vm6 = vcmp.eq.f32.partialorder %v12266_v38, %v4045_v0  ;;  %vm4077_vm7 = vcmp.eq.f32.partialorder %v12269_v37, %v4057_v32 }
 0x777   : > { %v12362_v20 = vsel %vm4073_vm6, -inf, %v12266_v38  ;;  %v12365_v1 = vsel %vm4077_vm7, -inf, %v12269_v37 }
 0x778   : > { %v4123_v23 = vsel %vm2975_vm0, %v12362_v20, -inf  ;;  %v4135_v46 = vsel %vm2975_vm0, %v12365_v1, -inf }
 0x779   : > { %4124 = vmax.xlane.f32.xlu2 %v4123_v23  ;;  %4136 = vmax.xlane.f32.xlu0 %v4135_v46 }
 0x77d   : > { %v4063_v12 = vpop.xlane.xlu1 %4062 }
 0x77e   : > { %vm4079_vm8 = vcmp.eq.f32.partialorder %v12277_v48, %v4063_v12 }
 0x77f   : > { %v12373_v33 = vsel %vm4079_vm8, -inf, %v12277_v48 }
 0x780   : > { %v4141_v38 = vsel %vm2975_vm0, %v12373_v33, -inf }
 0x781   : > { %4142 = vmax.xlane.f32.xlu2 %v4141_v38 }
 0x7ab   : > { %v4104_v37 = vpop.xlane.xlu1 %4103 }
 0x7ac   : > { %vm4146_vm9 = vcmp.eq.f32.partialorder %v12283_v3, %v4104_v37 }
 0x7ad   : > { %v12379_v0 = vsel %vm4146_vm9, -inf, %v12283_v3 }
 0x7ae   : > { %v4182_v32 = vsel %vm2975_vm0, %v12379_v0, -inf }
 0x7af   : > { %4183 = vmax.xlane.f32.xlu2 %v4182_v32 }
 0x7b3   : > { %v4110_v23 = vpop.xlane.xlu1 %4109 }
 0x7b4   : > { %vm4148_vm10 = vcmp.eq.f32.partialorder %v12289_v4, %v4110_v23 }
 0x7b5   : > { %v12385_v48 = vsel %vm4148_vm10, -inf, %v12289_v4 }
 0x7b6   : > { %v4188_v46 = vsel %vm2975_vm0, %v12385_v48, -inf }
 0x7b7   : > { %4189 = vmax.xlane.f32.xlu2 %v4188_v46 }
 0x7c3   : > { %v4113_v12 = vpop.xlane.xlu1 %4112 }
 0x7c4   : > { %vm4149_vm11 = vcmp.eq.f32.partialorder %v12295_v62, %v4113_v12 }
 0x7c5   : > { %v12391_v3 = vsel %vm4149_vm11, -inf, %v12295_v62 }
 0x7c6   : > { %v4191_v38 = vsel %vm2975_vm0, %v12391_v3, -inf }
 0x7c7   : > { %4192 = vmax.xlane.f32.xlu2 %v4191_v38 }
 0x7cc   : > { %v4098_v37 = vpop.xlane.xlu2 %4097  ;;  %v4101_v32 = vpop.xlane.xlu0 %4100 }
 0x7cd   : > { %vm4144_vm12 = vcmp.eq.f32.partialorder %v12305_v49, %v4098_v37  ;;  %vm4145_vm13 = vcmp.eq.f32.partialorder %v12302_v6, %v4101_v32 }
 0x7ce   : > { %v12398_v4 = vsel %vm4144_vm12, -inf, %v12305_v49  ;;  %v12401_v23 = vsel %vm4145_vm13, -inf, %v12302_v6 }
 0x7cf   : > { %v4176_v62 = vsel %vm2975_vm0, %v12398_v4, -inf  ;;  %v4179_v46 = vsel %vm2975_vm0, %v12401_v23, -inf }
 0x7d0   : > { %4177 = vmax.xlane.f32.xlu0 %v4176_v62  ;;  %4180 = vmax.xlane.f32.xlu1 %v4179_v46 }
 0x7d3   : > { %v4122_v12 = vpop.xlane.xlu1 %4121 }
 0x7d4   : > { %v4116_v38 = vpop.xlane.xlu2 %4115  ;;  %vm4152_vm14 = vcmp.eq.f32.partialorder %v12314_v21, %v4122_v12  ;;  %v4119_v37 = vpop.xlane.xlu0 %4118 }
 0x7d5   : > { %vm4150_vm15 = vcmp.eq.f32.partialorder %v12318_v35, %v4116_v38  ;;  %v12410_v49 = vsel %vm4152_vm14, -inf, %v12314_v21  ;;  %vm4151_vm1 = vcmp.eq.f32.partialorder %v12321_v63, %v4119_v37 }
 0x7d6   : > { %v12413_v6 = vsel %vm4150_vm15, -inf, %v12318_v35  ;;  %v12417_v32 = vsel %vm4151_vm1, -inf, %v12321_v63  ;;  %v4200_v62 = vsel %vm2975_vm0, %v12410_v49, -inf }
 0x7d7   : > { %v4194_v46 = vsel %vm2975_vm0, %v12413_v6, -inf  ;;  %4201 = vmax.xlane.f32.xlu2 %v4200_v62  ;;  %v4197_v21 = vsel %vm2975_vm0, %v12417_v32, -inf }
 0x7d8   : > { %4195 = vmax.xlane.f32.xlu0 %v4194_v46  ;;  %4198 = vmax.xlane.f32.xlu1 %v4197_v21 }
 0x7db   : > { %v4140_v12 = vpop.xlane.xlu1 %4139 }
 0x7dc   : > { %v4107_v35 = vpop.xlane.xlu2 %4106  ;;  %vm4158_vm2 = vcmp.eq.f32.partialorder %v12332_v10, %v4140_v12  ;;  %v4128_v63 = vpop.xlane.xlu0 %4127 }
 0x7dd   : > { %vm4147_vm3 = vcmp.eq.f32.partialorder %v12336_v57, %v4107_v35  ;;  %v12428_v38 = vsel %vm4158_vm2, -inf, %v12332_v10  ;;  %vm4154_vm4 = vcmp.eq.f32.partialorder %v12339_v22, %v4128_v63 }
 0x7de   : > { %v12431_v37 = vsel %vm4147_vm3, -inf, %v12336_v57  ;;  %v12435_v62 = vsel %vm4154_vm4, -inf, %v12339_v22  ;;  %v4218_v46 = vsel %vm2975_vm0, %v12428_v38, -inf }
 0x7df   : > { %v4185_v21 = vsel %vm2975_vm0, %v12431_v37, -inf  ;;  %4219 = vmax.xlane.f32.xlu2 %v4218_v46  ;;  %v4206_v10 = vsel %vm2975_vm0, %v12435_v62, -inf }
 0x7e0   : > { %4186 = vmax.xlane.f32.xlu0 %v4185_v21  ;;  %4207 = vmax.xlane.f32.xlu1 %v4206_v10 }
 0x7e4   : > { %v4134_v12 = vpop.xlane.xlu2 %4133  ;;  %v4131_v57 = vpop.xlane.xlu0 %4130 }
 0x7e5   : > { %vm4156_vm5 = vcmp.eq.f32.partialorder %v12350_v41, %v4134_v12  ;;  %vm4155_vm6 = vcmp.eq.f32.partialorder %v12353_v18, %v4131_v57 }
 0x7e6   : > { %v12445_v35 = vsel %vm4156_vm5, -inf, %v12350_v41  ;;  %v12449_v22 = vsel %vm4155_vm6, -inf, %v12353_v18 }
 0x7e7   : > { %v4212_v63 = vsel %vm2975_vm0, %v12445_v35, -inf  ;;  %v4209_v46 = vsel %vm2975_vm0, %v12449_v22, -inf }
 0x7e8   : > { %4213 = vmax.xlane.f32.xlu0 %v4212_v63  ;;  %4210 = vmax.xlane.f32.xlu1 %v4209_v46 }
 0x7ec   : > { %v4125_v21 = vpop.xlane.xlu2 %4124  ;;  %v4137_v10 = vpop.xlane.xlu0 %4136 }
 0x7ed   : > { %vm4153_vm7 = vcmp.eq.f32.partialorder %v12362_v20, %v4125_v21  ;;  %vm4157_vm8 = vcmp.eq.f32.partialorder %v12365_v1, %v4137_v10 }
 0x7ee   : > { %v12457_v41 = vsel %vm4153_vm7, -inf, %v12362_v20  ;;  %v12461_v18 = vsel %vm4157_vm8, -inf, %v12365_v1 }
 0x7ef   : > { %v4203_v12 = vsel %vm2975_vm0, %v12457_v41, -inf  ;;  %v4215_v57 = vsel %vm2975_vm0, %v12461_v18, -inf }
 0x7f0   : > { %4204 = vmax.xlane.f32.xlu0 %v4203_v12  ;;  %4216 = vmax.xlane.f32.xlu1 %v4215_v57 }
 0x7f4   : > { %v4143_v63 = vpop.xlane.xlu2 %4142 }
 0x7f5   : > { %vm4159_vm9 = vcmp.eq.f32.partialorder %v12373_v33, %v4143_v63 }
 0x7f6   : > { %v12469_v46 = vsel %vm4159_vm9, -inf, %v12373_v33 }
 0x7f7   : > { %v4221_v20 = vsel %vm2975_vm0, %v12469_v46, -inf }
 0x7f8   : > { %4222 = vmax.xlane.f32.xlu0 %v4221_v20 }
 0x822   : > { %v4184_v1 = vpop.xlane.xlu2 %4183 }
 0x823   : > { %vm4226_vm10 = vcmp.eq.f32.partialorder %v12379_v0, %v4184_v1 }
 0x824   : > { %v12475_v21 = vsel %vm4226_vm10, -inf, %v12379_v0 }
 0x825   : > { %v4262_v10 = vsel %vm2975_vm0, %v12475_v21, -inf }
 0x826   : > { %4263 = vmax.xlane.f32.xlu0 %v4262_v10 }
 0x82a   : > { %v4190_v12 = vpop.xlane.xlu2 %4189 }
 0x82b   : > { %vm4228_vm11 = vcmp.eq.f32.partialorder %v12385_v48, %v4190_v12 }
 0x82c   : > { %v12481_v33 = vsel %vm4228_vm11, -inf, %v12385_v48 }
 0x82d   : > { %v4268_v57 = vsel %vm2975_vm0, %v12481_v33, -inf }
 0x82e   : > { %4269 = vmax.xlane.f32.xlu0 %v4268_v57 }
 0x83a   : > { %v4193_v63 = vpop.xlane.xlu2 %4192 }
 0x83b   : > { %vm4229_vm12 = vcmp.eq.f32.partialorder %v12391_v3, %v4193_v63 }
 0x83c   : > { %v12487_v0 = vsel %vm4229_vm12, -inf, %v12391_v3 }
 0x83d   : > { %v4271_v20 = vsel %vm2975_vm0, %v12487_v0, -inf }
 0x83e   : > { %4272 = vmax.xlane.f32.xlu0 %v4271_v20 }
 0x843   : > { %v4181_v1 = vpop.xlane.xlu1 %4180  ;;  %v4178_v10 = vpop.xlane.xlu0 %4177 }
 0x844   : > { %vm4225_vm13 = vcmp.eq.f32.partialorder %v12401_v23, %v4181_v1  ;;  %vm4224_vm14 = vcmp.eq.f32.partialorder %v12398_v4, %v4178_v10 }
 0x845   : > { %v12494_v48 = vsel %vm4225_vm13, -inf, %v12401_v23  ;;  %v12497_v12 = vsel %vm4224_vm14, -inf, %v12398_v4 }
 0x846   : > { %v4259_v3 = vsel %vm2975_vm0, %v12494_v48, -inf  ;;  %v4256_v57 = vsel %vm2975_vm0, %v12497_v12, -inf }
 0x847   : > { %4260 = vmax.xlane.f32.xlu2 %v4259_v3  ;;  %4257 = vmax.xlane.f32.xlu1 %v4256_v57 }
 0x84a   : > { %v4202_v63 = vpop.xlane.xlu2 %4201 }
 0x84b   : > { %v4196_v20 = vpop.xlane.xlu0 %4195  ;;  %vm4232_vm15 = vcmp.eq.f32.partialorder %v12410_v49, %v4202_v63  ;;  %v4199_v1 = vpop.xlane.xlu1 %4198 }
 0x84c   : > { %vm4230_vm1 = vcmp.eq.f32.partialorder %v12413_v6, %v4196_v20  ;;  %v12506_v23 = vsel %vm4232_vm15, -inf, %v12410_v49  ;;  %vm4231_vm2 = vcmp.eq.f32.partialorder %v12417_v32, %v4199_v1 }
 0x84d   : > { %v12510_v4 = vsel %vm4230_vm1, -inf, %v12413_v6  ;;  %v12513_v10 = vsel %vm4231_vm2, -inf, %v12417_v32  ;;  %v4280_v3 = vsel %vm2975_vm0, %v12506_v23, -inf }
 0x84e   : > { %v4274_v57 = vsel %vm2975_vm0, %v12510_v4, -inf  ;;  %4281 = vmax.xlane.f32.xlu0 %v4280_v3  ;;  %v4277_v63 = vsel %vm2975_vm0, %v12513_v10, -inf }
 0x84f   : > { %4275 = vmax.xlane.f32.xlu1 %v4274_v57  ;;  %4278 = vmax.xlane.f32.xlu2 %v4277_v63 }
 0x852   : > { %v4220_v49 = vpop.xlane.xlu2 %4219 }
 0x853   : > { %v4187_v20 = vpop.xlane.xlu0 %4186  ;;  %vm4238_vm3 = vcmp.eq.f32.partialorder %v12428_v38, %v4220_v49  ;;  %v4208_v6 = vpop.xlane.xlu1 %4207 }
 0x854   : > { %vm4227_vm4 = vcmp.eq.f32.partialorder %v12431_v37, %v4187_v20  ;;  %v12524_v32 = vsel %vm4238_vm3, -inf, %v12428_v38  ;;  %vm4234_vm5 = vcmp.eq.f32.partialorder %v12435_v62, %v4208_v6 }
 0x855   : > { %v12528_v1 = vsel %vm4227_vm4, -inf, %v12431_v37  ;;  %v12531_v3 = vsel %vm4234_vm5, -inf, %v12435_v62  ;;  %v4298_v57 = vsel %vm2975_vm0, %v12524_v32, -inf }
 0x856   : > { %v4265_v63 = vsel %vm2975_vm0, %v12528_v1, -inf  ;;  %4299 = vmax.xlane.f32.xlu0 %v4298_v57  ;;  %v4286_v49 = vsel %vm2975_vm0, %v12531_v3, -inf }
 0x857   : > { %4266 = vmax.xlane.f32.xlu1 %v4265_v63  ;;  %4287 = vmax.xlane.f32.xlu2 %v4286_v49 }
 0x85b   : > { %v4214_v38 = vpop.xlane.xlu0 %4213  ;;  %v4211_v20 = vpop.xlane.xlu1 %4210 }
 0x85c   : > { %vm4236_vm6 = vcmp.eq.f32.partialorder %v12445_v35, %v4214_v38  ;;  %vm4235_vm7 = vcmp.eq.f32.partialorder %v12449_v22, %v4211_v20 }
 0x85d   : > { %v12542_v37 = vsel %vm4236_vm6, -inf, %v12445_v35  ;;  %v12545_v62 = vsel %vm4235_vm7, -inf, %v12449_v22 }
 0x85e   : > { %v4292_v6 = vsel %vm2975_vm0, %v12542_v37, -inf  ;;  %v4289_v57 = vsel %vm2975_vm0, %v12545_v62, -inf }
 0x85f   : > { %4293 = vmax.xlane.f32.xlu1 %v4292_v6  ;;  %4290 = vmax.xlane.f32.xlu2 %v4289_v57 }
 0x863   : > { %v4205_v63 = vpop.xlane.xlu0 %4204  ;;  %v4217_v49 = vpop.xlane.xlu1 %4216 }
 0x864   : > { %vm4233_vm8 = vcmp.eq.f32.partialorder %v12457_v41, %v4205_v63  ;;  %vm4237_vm9 = vcmp.eq.f32.partialorder %v12461_v18, %v4217_v49 }
 0x865   : > { %v12554_v35 = vsel %vm4233_vm8, -inf, %v12457_v41  ;;  %v12557_v22 = vsel %vm4237_vm9, -inf, %v12461_v18 }
 0x866   : > { %v4283_v38 = vsel %vm2975_vm0, %v12554_v35, -inf  ;;  %v4295_v20 = vsel %vm2975_vm0, %v12557_v22, -inf }
 0x867   : > { %4284 = vmax.xlane.f32.xlu1 %v4283_v38  ;;  %4296 = vmax.xlane.f32.xlu2 %v4295_v20 }
 0x86b   : > { %v4223_v6 = vpop.xlane.xlu0 %4222 }
 0x86c   : > { %vm4239_vm10 = vcmp.eq.f32.partialorder %v12469_v46, %v4223_v6 }
 0x86d   : > { %v12565_v57 = vsel %vm4239_vm10, -inf, %v12469_v46 }
 0x86e   : > { %v4301_v41 = vsel %vm2975_vm0, %v12565_v57, -inf }
 0x86f   : > { %4302 = vmax.xlane.f32.xlu1 %v4301_v41 }
 0x899   : > { %v4264_v18 = vpop.xlane.xlu0 %4263 }
 0x89a   : > { %vm4306_vm11 = vcmp.eq.f32.partialorder %v12475_v21, %v4264_v18 }
 0x89b   : > { %v12571_v63 = vsel %vm4306_vm11, -inf, %v12475_v21 }
 0x89c   : > { %v4342_v49 = vsel %vm2975_vm0, %v12571_v63, -inf }
 0x89d   : > { %4343 = vmax.xlane.f32.xlu1 %v4342_v49 }
 0x8a1   : > { %v4270_v38 = vpop.xlane.xlu0 %4269 }
 0x8a2   : > { %vm4308_vm12 = vcmp.eq.f32.partialorder %v12481_v33, %v4270_v38 }
 0x8a3   : > { %v12577_v46 = vsel %vm4308_vm12, -inf, %v12481_v33 }
 0x8a4   : > { %v4348_v20 = vsel %vm2975_vm0, %v12577_v46, -inf }
 0x8a5   : > { %4349 = vmax.xlane.f32.xlu1 %v4348_v20 }
 0x8b1   : > { %v4273_v6 = vpop.xlane.xlu0 %4272 }
 0x8b2   : > { %vm4309_vm13 = vcmp.eq.f32.partialorder %v12487_v0, %v4273_v6 }
 0x8b3   : > { %v12583_v21 = vsel %vm4309_vm13, -inf, %v12487_v0 }
 0x8b4   : > { %v4351_v41 = vsel %vm2975_vm0, %v12583_v21, -inf }
 0x8b5   : > { %4352 = vmax.xlane.f32.xlu1 %v4351_v41 }
 0x8ba   : > { %v4261_v18 = vpop.xlane.xlu2 %4260  ;;  %v4258_v49 = vpop.xlane.xlu1 %4257 }
 0x8bb   : > { %vm4305_vm14 = vcmp.eq.f32.partialorder %v12494_v48, %v4261_v18  ;;  %vm4304_vm15 = vcmp.eq.f32.partialorder %v12497_v12, %v4258_v49 }
 0x8bc   : > { %v12590_v33 = vsel %vm4305_vm14, -inf, %v12494_v48  ;;  %v12593_v38 = vsel %vm4304_vm15, -inf, %v12497_v12 }
 0x8bd   : > { %v4339_v0 = vsel %vm2975_vm0, %v12590_v33, -inf  ;;  %v4336_v20 = vsel %vm2975_vm0, %v12593_v38, -inf }
 0x8be   : > { %4340 = vmax.xlane.f32.xlu0 %v4339_v0  ;;  %4337 = vmax.xlane.f32.xlu2 %v4336_v20 }
 0x8c1   : > { %v4282_v6 = vpop.xlane.xlu0 %4281 }
 0x8c2   : > { %v4276_v41 = vpop.xlane.xlu1 %4275  ;;  %vm4312_vm1 = vcmp.eq.f32.partialorder %v12506_v23, %v4282_v6  ;;  %v4279_v18 = vpop.xlane.xlu2 %4278 }
 0x8c3   : > { %vm4310_vm2 = vcmp.eq.f32.partialorder %v12510_v4, %v4276_v41  ;;  %v12602_v48 = vsel %vm4312_vm1, -inf, %v12506_v23  ;;  %vm4311_vm3 = vcmp.eq.f32.partialorder %v12513_v10, %v4279_v18 }
 0x8c4   : > { %v12606_v12 = vsel %vm4310_vm2, -inf, %v12510_v4  ;;  %v12609_v49 = vsel %vm4311_vm3, -inf, %v12513_v10  ;;  %v4360_v0 = vsel %vm2975_vm0, %v12602_v48, -inf }
 0x8c5   : > { %v4354_v20 = vsel %vm2975_vm0, %v12606_v12, -inf  ;;  %4361 = vmax.xlane.f32.xlu1 %v4360_v0  ;;  %v4357_v6 = vsel %vm2975_vm0, %v12609_v49, -inf }
 0x8c6   : > { %4355 = vmax.xlane.f32.xlu2 %v4354_v20  ;;  %4358 = vmax.xlane.f32.xlu0 %v4357_v6 }
 0x8c9   : > { %v4300_v23 = vpop.xlane.xlu0 %4299 }
 0x8ca   : > { %v4267_v41 = vpop.xlane.xlu1 %4266  ;;  %vm4318_vm4 = vcmp.eq.f32.partialorder %v12524_v32, %v4300_v23  ;;  %v4288_v4 = vpop.xlane.xlu2 %4287 }
 0x8cb   : > { %vm4307_vm5 = vcmp.eq.f32.partialorder %v12528_v1, %v4267_v41  ;;  %v12620_v10 = vsel %vm4318_vm4, -inf, %v12524_v32  ;;  %vm4314_vm6 = vcmp.eq.f32.partialorder %v12531_v3, %v4288_v4 }
 0x8cc   : > { %v12624_v18 = vsel %vm4307_vm5, -inf, %v12528_v1  ;;  %v12627_v0 = vsel %vm4314_vm6, -inf, %v12531_v3  ;;  %v4378_v20 = vsel %vm2975_vm0, %v12620_v10, -inf }
 0x8cd   : > { %v4345_v6 = vsel %vm2975_vm0, %v12624_v18, -inf  ;;  %4379 = vmax.xlane.f32.xlu1 %v4378_v20  ;;  %v4366_v23 = vsel %vm2975_vm0, %v12627_v0, -inf }
 0x8ce   : > { %4346 = vmax.xlane.f32.xlu2 %v4345_v6  ;;  %4367 = vmax.xlane.f32.xlu0 %v4366_v23 }
 0x8d2   : > { %v4294_v32 = vpop.xlane.xlu1 %4293  ;;  %v4291_v41 = vpop.xlane.xlu2 %4290 }
 0x8d3   : > { %vm4316_vm7 = vcmp.eq.f32.partialorder %v12542_v37, %v4294_v32  ;;  %vm4315_vm8 = vcmp.eq.f32.partialorder %v12545_v62, %v4291_v41 }
 0x8d4   : > { %v12638_v1 = vsel %vm4316_vm7, -inf, %v12542_v37  ;;  %v12641_v3 = vsel %vm4315_vm8, -inf, %v12545_v62 }
 0x8d5   : > { %v4372_v4 = vsel %vm2975_vm0, %v12638_v1, -inf  ;;  %v4369_v20 = vsel %vm2975_vm0, %v12641_v3, -inf }
 0x8d6   : > { %4373 = vmax.xlane.f32.xlu2 %v4372_v4  ;;  %4370 = vmax.xlane.f32.xlu0 %v4369_v20 }
 0x8da   : > { %v4285_v6 = vpop.xlane.xlu1 %4284  ;;  %v4297_v23 = vpop.xlane.xlu2 %4296 }
 0x8db   : > { %vm4313_vm9 = vcmp.eq.f32.partialorder %v12554_v35, %v4285_v6  ;;  %vm4317_vm10 = vcmp.eq.f32.partialorder %v12557_v22, %v4297_v23 }
 0x8dc   : > { %v12650_v37 = vsel %vm4313_vm9, -inf, %v12554_v35  ;;  %v12653_v62 = vsel %vm4317_vm10, -inf, %v12557_v22 }
 0x8dd   : > { %v4363_v32 = vsel %vm2975_vm0, %v12650_v37, -inf  ;;  %v4375_v41 = vsel %vm2975_vm0, %v12653_v62, -inf }
 0x8de   : > { %4364 = vmax.xlane.f32.xlu2 %v4363_v32  ;;  %4376 = vmax.xlane.f32.xlu0 %v4375_v41 }
 0x8e2   : > { %v4303_v4 = vpop.xlane.xlu1 %4302 }
 0x8e3   : > { %vm4319_vm11 = vcmp.eq.f32.partialorder %v12565_v57, %v4303_v4 }
 0x8e4   : > { %v12661_v20 = vsel %vm4319_vm11, -inf, %v12565_v57 }
 0x8e5   : > { %v4381_v35 = vsel %vm2975_vm0, %v12661_v20, -inf }
 0x8e6   : > { %4382 = vmax.xlane.f32.xlu2 %v4381_v35 }
 0x910   : > { %v4344_v22 = vpop.xlane.xlu1 %4343 }
 0x911   : > { %vm4386_vm12 = vcmp.eq.f32.partialorder %v12571_v63, %v4344_v22 }
 0x912   : > { %v12667_v6 = vsel %vm4386_vm12, -inf, %v12571_v63 }
 0x913   : > { %v4422_v23 = vsel %vm2975_vm0, %v12667_v6, -inf }
 0x914   : > { %4423 = vmax.xlane.f32.xlu2 %v4422_v23 }
 0x918   : > { %v4350_v32 = vpop.xlane.xlu1 %4349 }
 0x919   : > { %vm4388_vm13 = vcmp.eq.f32.partialorder %v12577_v46, %v4350_v32 }
 0x91a   : > { %v12673_v57 = vsel %vm4388_vm13, -inf, %v12577_v46 }
 0x91b   : > { %v4428_v41 = vsel %vm2975_vm0, %v12673_v57, -inf }
 0x91c   : > { %4429 = vmax.xlane.f32.xlu2 %v4428_v41 }
 0x928   : > { %v4353_v4 = vpop.xlane.xlu1 %4352 }
 0x929   : > { %vm4389_vm14 = vcmp.eq.f32.partialorder %v12583_v21, %v4353_v4 }
 0x92a   : > { %v12679_v63 = vsel %vm4389_vm14, -inf, %v12583_v21 }
 0x92b   : > { %v4431_v35 = vsel %vm2975_vm0, %v12679_v63, -inf }
 0x92c   : > { %4432 = vmax.xlane.f32.xlu2 %v4431_v35 }
 0x931   : > { %v4338_v22 = vpop.xlane.xlu2 %4337  ;;  %v4341_v23 = vpop.xlane.xlu0 %4340 }
 0x932   : > { %vm4384_vm15 = vcmp.eq.f32.partialorder %v12593_v38, %v4338_v22  ;;  %vm4385_vm1 = vcmp.eq.f32.partialorder %v12590_v33, %v4341_v23 }
 0x933   : > { %v12686_v46 = vsel %vm4384_vm15, -inf, %v12593_v38  ;;  %v12689_v32 = vsel %vm4385_vm1, -inf, %v12590_v33 }
 0x934   : > { %v4416_v21 = vsel %vm2975_vm0, %v12686_v46, -inf  ;;  %v4419_v41 = vsel %vm2975_vm0, %v12689_v32, -inf }
 0x935   : > { %4417 = vmax.xlane.f32.xlu0 %v4416_v21  ;;  %4420 = vmax.xlane.f32.xlu1 %v4419_v41 }
 0x938   : > { %v4362_v4 = vpop.xlane.xlu1 %4361 }
 0x939   : > { %v4356_v35 = vpop.xlane.xlu2 %4355  ;;  %vm4392_vm2 = vcmp.eq.f32.partialorder %v12602_v48, %v4362_v4  ;;  %v4359_v22 = vpop.xlane.xlu0 %4358 }
 0x93a   : > { %vm4390_vm3 = vcmp.eq.f32.partialorder %v12606_v12, %v4356_v35  ;;  %v12698_v38 = vsel %vm4392_vm2, -inf, %v12602_v48  ;;  %vm4391_vm4 = vcmp.eq.f32.partialorder %v12609_v49, %v4359_v22 }
 0x93b   : > { %v12701_v33 = vsel %vm4390_vm3, -inf, %v12606_v12  ;;  %v12705_v23 = vsel %vm4391_vm4, -inf, %v12609_v49  ;;  %v4440_v21 = vsel %vm2975_vm0, %v12698_v38, -inf }
 0x93c   : > { %v4434_v41 = vsel %vm2975_vm0, %v12701_v33, -inf  ;;  %4441 = vmax.xlane.f32.xlu2 %v4440_v21  ;;  %v4437_v48 = vsel %vm2975_vm0, %v12705_v23, -inf }
 0x93d   : > { %4435 = vmax.xlane.f32.xlu0 %v4434_v41  ;;  %4438 = vmax.xlane.f32.xlu1 %v4437_v48 }
 0x940   : > { %v4380_v4 = vpop.xlane.xlu1 %4379 }
 0x941   : > { %v4347_v12 = vpop.xlane.xlu2 %4346  ;;  %vm4398_vm5 = vcmp.eq.f32.partialorder %v12620_v10, %v4380_v4  ;;  %v4368_v49 = vpop.xlane.xlu0 %4367 }
 0x942   : > { %vm4387_vm6 = vcmp.eq.f32.partialorder %v12624_v18, %v4347_v12  ;;  %v12716_v35 = vsel %vm4398_vm5, -inf, %v12620_v10  ;;  %vm4394_vm7 = vcmp.eq.f32.partialorder %v12627_v0, %v4368_v49 }
 0x943   : > { %v12719_v22 = vsel %vm4387_vm6, -inf, %v12624_v18  ;;  %v12723_v21 = vsel %vm4394_vm7, -inf, %v12627_v0  ;;  %v4458_v41 = vsel %vm2975_vm0, %v12716_v35, -inf }
 0x944   : > { %v4425_v48 = vsel %vm2975_vm0, %v12719_v22, -inf  ;;  %4459 = vmax.xlane.f32.xlu2 %v4458_v41  ;;  %v4446_v10 = vsel %vm2975_vm0, %v12723_v21, -inf }
 0x945   : > { %4426 = vmax.xlane.f32.xlu0 %v4425_v48  ;;  %4447 = vmax.xlane.f32.xlu1 %v4446_v10 }
 0x949   : > { %v4374_v4 = vpop.xlane.xlu2 %4373  ;;  %v4371_v18 = vpop.xlane.xlu0 %4370 }
 0x94a   : > { %vm4396_vm8 = vcmp.eq.f32.partialorder %v12638_v1, %v4374_v4  ;;  %vm4395_vm9 = vcmp.eq.f32.partialorder %v12641_v3, %v4371_v18 }
 0x94b   : > { %v12733_v12 = vsel %vm4396_vm8, -inf, %v12638_v1  ;;  %v12737_v0 = vsel %vm4395_vm9, -inf, %v12641_v3 }
 0x94c   : > { %v4452_v49 = vsel %vm2975_vm0, %v12733_v12, -inf  ;;  %v4449_v41 = vsel %vm2975_vm0, %v12737_v0, -inf }
 0x94d   : > { %4453 = vmax.xlane.f32.xlu0 %v4452_v49  ;;  %4450 = vmax.xlane.f32.xlu1 %v4449_v41 }
 0x951   : > { %v4365_v48 = vpop.xlane.xlu2 %4364  ;;  %v4377_v10 = vpop.xlane.xlu0 %4376 }
 0x952   : > { %vm4393_vm10 = vcmp.eq.f32.partialorder %v12650_v37, %v4365_v48  ;;  %vm4397_vm11 = vcmp.eq.f32.partialorder %v12653_v62, %v4377_v10 }
 0x953   : > { %v12745_v1 = vsel %vm4393_vm10, -inf, %v12650_v37  ;;  %v12749_v3 = vsel %vm4397_vm11, -inf, %v12653_v62 }
 0x954   : > { %v4443_v4 = vsel %vm2975_vm0, %v12745_v1, -inf  ;;  %v4455_v18 = vsel %vm2975_vm0, %v12749_v3, -inf }
 0x955   : > { %4444 = vmax.xlane.f32.xlu0 %v4443_v4  ;;  %4456 = vmax.xlane.f32.xlu1 %v4455_v18 }
 0x959   : > { %v4383_v49 = vpop.xlane.xlu2 %4382 }
 0x95a   : > { %vm4399_vm12 = vcmp.eq.f32.partialorder %v12661_v20, %v4383_v49 }
 0x95b   : > { %v12757_v41 = vsel %vm4399_vm12, -inf, %v12661_v20 }
 0x95c   : > { %v4461_v37 = vsel %vm2975_vm0, %v12757_v41, -inf }
 0x95d   : > { %4462 = vmax.xlane.f32.xlu0 %v4461_v37 }
 0x987   : > { %v4424_v62 = vpop.xlane.xlu2 %4423 }
 0x988   : > { %vm4466_vm13 = vcmp.eq.f32.partialorder %v12667_v6, %v4424_v62 }
 0x989   : > { %v12763_v48 = vsel %vm4466_vm13, -inf, %v12667_v6 }
 0x98a   : > { %v4502_v10 = vsel %vm2975_vm0, %v12763_v48, -inf }
 0x98b   : > { %4503 = vmax.xlane.f32.xlu0 %v4502_v10 }
 0x98f   : > { %v4430_v4 = vpop.xlane.xlu2 %4429 }
 0x990   : > { %vm4468_vm14 = vcmp.eq.f32.partialorder %v12673_v57, %v4430_v4 }
 0x991   : > { %v12769_v20 = vsel %vm4468_vm14, -inf, %v12673_v57 }
 0x992   : > { %v4508_v18 = vsel %vm2975_vm0, %v12769_v20, -inf }
 0x993   : > { %4509 = vmax.xlane.f32.xlu0 %v4508_v18 }
 0x99f   : > { %v4433_v49 = vpop.xlane.xlu2 %4432 }
 0x9a0   : > { %vm4469_vm15 = vcmp.eq.f32.partialorder %v12679_v63, %v4433_v49 }
 0x9a1   : > { %v12775_v6 = vsel %vm4469_vm15, -inf, %v12679_v63 }
 0x9a2   : > { %v4511_v37 = vsel %vm2975_vm0, %v12775_v6, -inf }
 0x9a3   : > { %4512 = vmax.xlane.f32.xlu0 %v4511_v37 }
 0x9a8   : > { %v4421_v62 = vpop.xlane.xlu1 %4420  ;;  %v4418_v10 = vpop.xlane.xlu0 %4417 }
 0x9a9   : > { %vm4465_vm1 = vcmp.eq.f32.partialorder %v12689_v32, %v4421_v62  ;;  %vm4464_vm2 = vcmp.eq.f32.partialorder %v12686_v46, %v4418_v10 }
 0x9aa   : > { %v12782_v57 = vsel %vm4465_vm1, -inf, %v12689_v32  ;;  %v12785_v4 = vsel %vm4464_vm2, -inf, %v12686_v46 }
 0x9ab   : > { %v4499_v63 = vsel %vm2975_vm0, %v12782_v57, -inf  ;;  %v4496_v18 = vsel %vm2975_vm0, %v12785_v4, -inf }
 0x9ac   : > { %4500 = vmax.xlane.f32.xlu2 %v4499_v63  ;;  %4497 = vmax.xlane.f32.xlu1 %v4496_v18 }
 0x9af   : > { %v4442_v49 = vpop.xlane.xlu2 %4441 }
 0x9b0   : > { %v4436_v37 = vpop.xlane.xlu0 %4435  ;;  %vm4472_vm3 = vcmp.eq.f32.partialorder %v12698_v38, %v4442_v49  ;;  %v4439_v62 = vpop.xlane.xlu1 %4438 }
 0x9b1   : > { %vm4470_vm4 = vcmp.eq.f32.partialorder %v12701_v33, %v4436_v37  ;;  %v12794_v32 = vsel %vm4472_vm3, -inf, %v12698_v38  ;;  %vm4471_vm5 = vcmp.eq.f32.partialorder %v12705_v23, %v4439_v62 }
 0x9b2   : > { %v12798_v46 = vsel %vm4470_vm4, -inf, %v12701_v33  ;;  %v12801_v10 = vsel %vm4471_vm5, -inf, %v12705_v23  ;;  %v4520_v63 = vsel %vm2975_vm0, %v12794_v32, -inf }
 0x9b3   : > { %v4514_v18 = vsel %vm2975_vm0, %v12798_v46, -inf  ;;  %4521 = vmax.xlane.f32.xlu0 %v4520_v63  ;;  %v4517_v49 = vsel %vm2975_vm0, %v12801_v10, -inf }
 0x9b4   : > { %4515 = vmax.xlane.f32.xlu1 %v4514_v18  ;;  %4518 = vmax.xlane.f32.xlu2 %v4517_v49 }
 0x9b7   : > { %v4460_v38 = vpop.xlane.xlu2 %4459 }
 0x9b8   : > { %v4427_v37 = vpop.xlane.xlu0 %4426  ;;  %vm4478_vm6 = vcmp.eq.f32.partialorder %v12716_v35, %v4460_v38  ;;  %v4448_v33 = vpop.xlane.xlu1 %4447 }
 0x9b9   : > { %vm4467_vm7 = vcmp.eq.f32.partialorder %v12719_v22, %v4427_v37  ;;  %v12812_v23 = vsel %vm4478_vm6, -inf, %v12716_v35  ;;  %vm4474_vm8 = vcmp.eq.f32.partialorder %v12723_v21, %v4448_v33 }
 0x9ba   : > { %v12816_v62 = vsel %vm4467_vm7, -inf, %v12719_v22  ;;  %v12819_v63 = vsel %vm4474_vm8, -inf, %v12723_v21  ;;  %v4538_v18 = vsel %vm2975_vm0, %v12812_v23, -inf }
 0x9bb   : > { %v4505_v49 = vsel %vm2975_vm0, %v12816_v62, -inf  ;;  %4539 = vmax.xlane.f32.xlu0 %v4538_v18  ;;  %v4526_v38 = vsel %vm2975_vm0, %v12819_v63, -inf }
 0x9bc   : > { %4506 = vmax.xlane.f32.xlu1 %v4505_v49  ;;  %4527 = vmax.xlane.f32.xlu2 %v4526_v38 }
 0x9c0   : > { %v4454_v35 = vpop.xlane.xlu0 %4453  ;;  %v4451_v37 = vpop.xlane.xlu1 %4450 }
 0x9c1   : > { %vm4476_vm9 = vcmp.eq.f32.partialorder %v12733_v12, %v4454_v35  ;;  %vm4475_vm10 = vcmp.eq.f32.partialorder %v12737_v0, %v4451_v37 }
 0x9c2   : > { %v12830_v22 = vsel %vm4476_vm9, -inf, %v12733_v12  ;;  %v12833_v21 = vsel %vm4475_vm10, -inf, %v12737_v0 }
 0x9c3   : > { %v4532_v33 = vsel %vm2975_vm0, %v12830_v22, -inf  ;;  %v4529_v18 = vsel %vm2975_vm0, %v12833_v21, -inf }
 0x9c4   : > { %4533 = vmax.xlane.f32.xlu1 %v4532_v33  ;;  %4530 = vmax.xlane.f32.xlu2 %v4529_v18 }
 0x9c8   : > { %v4445_v49 = vpop.xlane.xlu0 %4444  ;;  %v4457_v38 = vpop.xlane.xlu1 %4456 }
 0x9c9   : > { %vm4473_vm11 = vcmp.eq.f32.partialorder %v12745_v1, %v4445_v49  ;;  %vm4477_vm12 = vcmp.eq.f32.partialorder %v12749_v3, %v4457_v38 }
 0x9ca   : > { %v12842_v12 = vsel %vm4473_vm11, -inf, %v12745_v1  ;;  %v12845_v0 = vsel %vm4477_vm12, -inf, %v12749_v3 }
 0x9cb   : > { %v4523_v35 = vsel %vm2975_vm0, %v12842_v12, -inf  ;;  %v4535_v37 = vsel %vm2975_vm0, %v12845_v0, -inf }
 0x9cc   : > { %4524 = vmax.xlane.f32.xlu1 %v4523_v35  ;;  %4536 = vmax.xlane.f32.xlu2 %v4535_v37 }
 0x9d0   : > { %v4463_v33 = vpop.xlane.xlu0 %4462 }
 0x9d1   : > { %vm4479_vm13 = vcmp.eq.f32.partialorder %v12757_v41, %v4463_v33 }
 0x9d2   : > { %v12853_v18 = vsel %vm4479_vm13, -inf, %v12757_v41 }
 0x9d3   : > { %v4541_v1 = vsel %vm2975_vm0, %v12853_v18, -inf }
 0x9d4   : > { %4542 = vmax.xlane.f32.xlu1 %v4541_v1 }
 0x9fe   : > { %v4504_v3 = vpop.xlane.xlu0 %4503 }
 0x9ff   : > { %vm4546_vm14 = vcmp.eq.f32.partialorder %v12763_v48, %v4504_v3 }
 0xa00   : > { %v12859_v49 = vsel %vm4546_vm14, -inf, %v12763_v48 }
 0xa01   : > { %v4582_v38 = vsel %vm2975_vm0, %v12859_v49, -inf }
 0xa02   : > { %4583 = vmax.xlane.f32.xlu1 %v4582_v38 }
 0xa06   : > { %v4510_v35 = vpop.xlane.xlu0 %4509 }
 0xa07   : > { %vm4548_vm15 = vcmp.eq.f32.partialorder %v12769_v20, %v4510_v35 }
 0xa08   : > { %v12865_v41 = vsel %vm4548_vm15, -inf, %v12769_v20 }
 0xa09   : > { %v4588_v37 = vsel %vm2975_vm0, %v12865_v41, -inf }
 0xa0a   : > { %4589 = vmax.xlane.f32.xlu1 %v4588_v37 }
 0xa16   : > { %v4513_v33 = vpop.xlane.xlu0 %4512 }
 0xa17   : > { %vm4549_vm1 = vcmp.eq.f32.partialorder %v12775_v6, %v4513_v33 }
 0xa18   : > { %v12871_v48 = vsel %vm4549_vm1, -inf, %v12775_v6 }
 0xa19   : > { %v4591_v1 = vsel %vm2975_vm0, %v12871_v48, -inf }
 0xa1a   : > { %4592 = vmax.xlane.f32.xlu1 %v4591_v1 }
 0xa1f   : > { %v4501_v3 = vpop.xlane.xlu2 %4500  ;;  %v4498_v38 = vpop.xlane.xlu1 %4497 }
 0xa20   : > { %vm4545_vm2 = vcmp.eq.f32.partialorder %v12782_v57, %v4501_v3  ;;  %vm4544_vm3 = vcmp.eq.f32.partialorder %v12785_v4, %v4498_v38 }
 0xa21   : > { %v12878_v20 = vsel %vm4545_vm2, -inf, %v12782_v57  ;;  %v12881_v35 = vsel %vm4544_vm3, -inf, %v12785_v4 }
 0xa22   : > { %v4579_v6 = vsel %vm2975_vm0, %v12878_v20, -inf  ;;  %v4576_v37 = vsel %vm2975_vm0, %v12881_v35, -inf }
 0xa23   : > { %4580 = vmax.xlane.f32.xlu0 %v4579_v6  ;;  %4577 = vmax.xlane.f32.xlu2 %v4576_v37 }
 0xa26   : > { %v4522_v33 = vpop.xlane.xlu0 %4521 }
 0xa27   : > { %v4516_v1 = vpop.xlane.xlu1 %4515  ;;  %vm4552_vm4 = vcmp.eq.f32.partialorder %v12794_v32, %v4522_v33  ;;  %v4519_v3 = vpop.xlane.xlu2 %4518 }
 0xa28   : > { %vm4550_vm5 = vcmp.eq.f32.partialorder %v12798_v46, %v4516_v1  ;;  %v12890_v57 = vsel %vm4552_vm4, -inf, %v12794_v32  ;;  %vm4551_vm6 = vcmp.eq.f32.partialorder %v12801_v10, %v4519_v3 }
 0xa29   : > { %v12894_v4 = vsel %vm4550_vm5, -inf, %v12798_v46  ;;  %v12897_v38 = vsel %vm4551_vm6, -inf, %v12801_v10  ;;  %v4600_v6 = vsel %vm2975_vm0, %v12890_v57, -inf }
 0xa2a   : > { %v4594_v37 = vsel %vm2975_vm0, %v12894_v4, -inf  ;;  %4601 = vmax.xlane.f32.xlu1 %v4600_v6  ;;  %v4597_v33 = vsel %vm2975_vm0, %v12897_v38, -inf }
 0xa2b   : > { %4595 = vmax.xlane.f32.xlu2 %v4594_v37  ;;  %4598 = vmax.xlane.f32.xlu0 %v4597_v33 }
 0xa2e   : > { %v4540_v32 = vpop.xlane.xlu0 %4539 }
 0xa2f   : > { %v4507_v1 = vpop.xlane.xlu1 %4506  ;;  %vm4558_vm7 = vcmp.eq.f32.partialorder %v12812_v23, %v4540_v32  ;;  %v4528_v46 = vpop.xlane.xlu2 %4527 }
 0xa30   : > { %vm4547_vm8 = vcmp.eq.f32.partialorder %v12816_v62, %v4507_v1  ;;  %v12908_v10 = vsel %vm4558_vm7, -inf, %v12812_v23  ;;  %vm4554_vm9 = vcmp.eq.f32.partialorder %v12819_v63, %v4528_v46 }
 0xa31   : > { %v12912_v3 = vsel %vm4547_vm8, -inf, %v12816_v62  ;;  %v12915_v6 = vsel %vm4554_vm9, -inf, %v12819_v63  ;;  %v4618_v37 = vsel %vm2975_vm0, %v12908_v10, -inf }
 0xa32   : > { %v4585_v33 = vsel %vm2975_vm0, %v12912_v3, -inf  ;;  %4619 = vmax.xlane.f32.xlu1 %v4618_v37  ;;  %v4606_v32 = vsel %vm2975_vm0, %v12915_v6, -inf }
 0xa33   : > { %4586 = vmax.xlane.f32.xlu2 %v4585_v33  ;;  %4607 = vmax.xlane.f32.xlu0 %v4606_v32 }
 0xa37   : > { %v4534_v23 = vpop.xlane.xlu1 %4533  ;;  %v4531_v1 = vpop.xlane.xlu2 %4530 }
 0xa38   : > { %vm4556_vm10 = vcmp.eq.f32.partialorder %v12830_v22, %v4534_v23  ;;  %vm4555_vm11 = vcmp.eq.f32.partialorder %v12833_v21, %v4531_v1 }
 0xa39   : > { %v12926_v62 = vsel %vm4556_vm10, -inf, %v12830_v22  ;;  %v12929_v63 = vsel %vm4555_vm11, -inf, %v12833_v21 }
 0xa3a   : > { %v4612_v46 = vsel %vm2975_vm0, %v12926_v62, -inf  ;;  %v4609_v37 = vsel %vm2975_vm0, %v12929_v63, -inf }
 0xa3b   : > { %4613 = vmax.xlane.f32.xlu2 %v4612_v46  ;;  %4610 = vmax.xlane.f32.xlu0 %v4609_v37 }
 0xa3f   : > { %v4525_v33 = vpop.xlane.xlu1 %4524  ;;  %v4537_v32 = vpop.xlane.xlu2 %4536 }
 0xa40   : > { %vm4553_vm12 = vcmp.eq.f32.partialorder %v12842_v12, %v4525_v33  ;;  %vm4557_vm13 = vcmp.eq.f32.partialorder %v12845_v0, %v4537_v32 }
 0xa41   : > { %v12938_v22 = vsel %vm4553_vm12, -inf, %v12842_v12  ;;  %v12941_v21 = vsel %vm4557_vm13, -inf, %v12845_v0 }
 0xa42   : > { %v4603_v23 = vsel %vm2975_vm0, %v12938_v22, -inf  ;;  %v4615_v1 = vsel %vm2975_vm0, %v12941_v21, -inf }
 0xa43   : > { %4604 = vmax.xlane.f32.xlu2 %v4603_v23  ;;  %4616 = vmax.xlane.f32.xlu0 %v4615_v1 }
 0xa47   : > { %v4543_v46 = vpop.xlane.xlu1 %4542 }
 0xa48   : > { %vm4559_vm14 = vcmp.eq.f32.partialorder %v12853_v18, %v4543_v46 }
 0xa49   : > { %v12949_v37 = vsel %vm4559_vm14, -inf, %v12853_v18 }
 0xa4a   : > { %v4621_v12 = vsel %vm2975_vm0, %v12949_v37, -inf }
 0xa4b   : > { %4622 = vmax.xlane.f32.xlu2 %v4621_v12 }
 0xa75   : > { %v4584_v0 = vpop.xlane.xlu1 %4583 }
 0xa76   : > { %vm4626_vm15 = vcmp.eq.f32.partialorder %v12859_v49, %v4584_v0 }
 0xa77   : > { %v12955_v33 = vsel %vm4626_vm15, -inf, %v12859_v49 }
 0xa78   : > { %v4662_v32 = vsel %vm2975_vm0, %v12955_v33, -inf }
 0xa79   : > { %4663 = vmax.xlane.f32.xlu2 %v4662_v32 }
 0xa7d   : > { %v4590_v23 = vpop.xlane.xlu1 %4589 }
 0xa7e   : > { %vm4628_vm1 = vcmp.eq.f32.partialorder %v12865_v41, %v4590_v23 }
 0xa7f   : > { %v12961_v18 = vsel %vm4628_vm1, -inf, %v12865_v41 }
 0xa80   : > { %v4668_v1 = vsel %vm2975_vm0, %v12961_v18, -inf }
 0xa81   : > { %4669 = vmax.xlane.f32.xlu2 %v4668_v1 }
 0xa8d   : > { %v4593_v46 = vpop.xlane.xlu1 %4592 }
 0xa8e   : > { %vm4629_vm2 = vcmp.eq.f32.partialorder %v12871_v48, %v4593_v46 }
 0xa8f   : > { %v12967_v49 = vsel %vm4629_vm2, -inf, %v12871_v48 }
 0xa90   : > { %v4671_v12 = vsel %vm2975_vm0, %v12967_v49, -inf }
 0xa91   : > { %4672 = vmax.xlane.f32.xlu2 %v4671_v12 }
 0xa96   : > { %v4578_v0 = vpop.xlane.xlu2 %4577  ;;  %v4581_v32 = vpop.xlane.xlu0 %4580 }
 0xa97   : > { %vm4624_vm3 = vcmp.eq.f32.partialorder %v12881_v35, %v4578_v0  ;;  %vm4625_vm4 = vcmp.eq.f32.partialorder %v12878_v20, %v4581_v32 }
 0xa98   : > { %v12974_v41 = vsel %vm4624_vm3, -inf, %v12881_v35  ;;  %v12977_v23 = vsel %vm4625_vm4, -inf, %v12878_v20 }
 0xa99   : > { %v4656_v48 = vsel %vm2975_vm0, %v12974_v41, -inf  ;;  %v4659_v1 = vsel %vm2975_vm0, %v12977_v23, -inf }
 0xa9a   : > { %4657 = vmax.xlane.f32.xlu0 %v4656_v48  ;;  %4660 = vmax.xlane.f32.xlu1 %v4659_v1 }
 0xa9d   : > { %v4602_v46 = vpop.xlane.xlu1 %4601 }
 0xa9e   : > { %v4596_v12 = vpop.xlane.xlu2 %4595  ;;  %vm4632_vm5 = vcmp.eq.f32.partialorder %v12890_v57, %v4602_v46  ;;  %v4599_v0 = vpop.xlane.xlu0 %4598 }
 0xa9f   : > { %vm4630_vm6 = vcmp.eq.f32.partialorder %v12894_v4, %v4596_v12  ;;  %v12986_v35 = vsel %vm4632_vm5, -inf, %v12890_v57  ;;  %vm4631_vm7 = vcmp.eq.f32.partialorder %v12897_v38, %v4599_v0 }
 0xaa0   : > { %v12989_v20 = vsel %vm4630_vm6, -inf, %v12894_v4  ;;  %v12993_v32 = vsel %vm4631_vm7, -inf, %v12897_v38  ;;  %v4680_v48 = vsel %vm2975_vm0, %v12986_v35, -inf }
 0xaa1   : > { %v4674_v1 = vsel %vm2975_vm0, %v12989_v20, -inf  ;;  %4681 = vmax.xlane.f32.xlu2 %v4680_v48  ;;  %v4677_v57 = vsel %vm2975_vm0, %v12993_v32, -inf }
 0xaa2   : > { %4675 = vmax.xlane.f32.xlu0 %v4674_v1  ;;  %4678 = vmax.xlane.f32.xlu1 %v4677_v57 }
 0xaa5   : > { %v4620_v46 = vpop.xlane.xlu1 %4619 }
 0xaa6   : > { %v4587_v4 = vpop.xlane.xlu2 %4586  ;;  %vm4638_vm8 = vcmp.eq.f32.partialorder %v12908_v10, %v4620_v46  ;;  %v4608_v38 = vpop.xlane.xlu0 %4607 }
 0xaa7   : > { %vm4627_vm9 = vcmp.eq.f32.partialorder %v12912_v3, %v4587_v4  ;;  %v13004_v12 = vsel %vm4638_vm8, -inf, %v12908_v10  ;;  %vm4634_vm10 = vcmp.eq.f32.partialorder %v12915_v6, %v4608_v38 }
 0xaa8   : > { %v13007_v0 = vsel %vm4627_vm9, -inf, %v12912_v3  ;;  %v13011_v48 = vsel %vm4634_vm10, -inf, %v12915_v6  ;;  %v4698_v1 = vsel %vm2975_vm0, %v13004_v12, -inf }
 0xaa9   : > { %v4665_v57 = vsel %vm2975_vm0, %v13007_v0, -inf  ;;  %4699 = vmax.xlane.f32.xlu2 %v4698_v1  ;;  %v4686_v10 = vsel %vm2975_vm0, %v13011_v48, -inf }
 0xaaa   : > { %4666 = vmax.xlane.f32.xlu0 %v4665_v57  ;;  %4687 = vmax.xlane.f32.xlu1 %v4686_v10 }
 0xaae   : > { %v4614_v46 = vpop.xlane.xlu2 %4613  ;;  %v4611_v3 = vpop.xlane.xlu0 %4610 }
 0xaaf   : > { %vm4636_vm11 = vcmp.eq.f32.partialorder %v12926_v62, %v4614_v46  ;;  %vm4635_vm12 = vcmp.eq.f32.partialorder %v12929_v63, %v4611_v3 }
 0xab0   : > { %v13021_v4 = vsel %vm4636_vm11, -inf, %v12926_v62  ;;  %v13025_v6 = vsel %vm4635_vm12, -inf, %v12929_v63 }
 0xab1   : > { %v4692_v38 = vsel %vm2975_vm0, %v13021_v4, -inf  ;;  %v4689_v1 = vsel %vm2975_vm0, %v13025_v6, -inf }
 0xab2   : > { %4693 = vmax.xlane.f32.xlu0 %v4692_v38  ;;  %4690 = vmax.xlane.f32.xlu1 %v4689_v1 }
 0xab6   : > { %v4605_v57 = vpop.xlane.xlu2 %4604  ;;  %v4617_v10 = vpop.xlane.xlu0 %4616 }
 0xab7   : > { %vm4633_vm13 = vcmp.eq.f32.partialorder %v12938_v22, %v4605_v57  ;;  %vm4637_vm14 = vcmp.eq.f32.partialorder %v12941_v21, %v4617_v10 }
 0xab8   : > { %v13033_v62 = vsel %vm4633_vm13, -inf, %v12938_v22  ;;  %v13037_v63 = vsel %vm4637_vm14, -inf, %v12941_v21 }
 0xab9   : > { %v4683_v46 = vsel %vm2975_vm0, %v13033_v62, -inf  ;;  %v4695_v3 = vsel %vm2975_vm0, %v13037_v63, -inf }
 0xaba   : > { %4684 = vmax.xlane.f32.xlu0 %v4683_v46  ;;  %4696 = vmax.xlane.f32.xlu1 %v4695_v3 }
 0xabe   : > { %v4623_v38 = vpop.xlane.xlu2 %4622 }
 0xabf   : > { %vm4639_vm15 = vcmp.eq.f32.partialorder %v12949_v37, %v4623_v38 }
 0xac0   : > { %v13045_v1 = vsel %vm4639_vm15, -inf, %v12949_v37 }
 0xac1   : > { %v4701_v22 = vsel %vm2975_vm0, %v13045_v1, -inf }
 0xac2   : > { %4702 = vmax.xlane.f32.xlu0 %v4701_v22 }
 0xaec   : > { %v4664_v21 = vpop.xlane.xlu2 %4663 }
 0xaed   : > { %vm4706_vm1 = vcmp.eq.f32.partialorder %v12955_v33, %v4664_v21 }
 0xaee   : > { %v13051_v57 = vsel %vm4706_vm1, -inf, %v12955_v33 }
 0xaef   : > { %v4742_v10 = vsel %vm2975_vm0, %v13051_v57, -inf }
 0xaf0   : > { %4743 = vmax.xlane.f32.xlu0 %v4742_v10 }
 0xaf4   : > { %v4670_v46 = vpop.xlane.xlu2 %4669 }
 0xaf5   : > { %vm4708_vm2 = vcmp.eq.f32.partialorder %v12961_v18, %v4670_v46 }
 0xaf6   : > { %v13057_v37 = vsel %vm4708_vm2, -inf, %v12961_v18 }
 0xaf7   : > { %v4748_v3 = vsel %vm2975_vm0, %v13057_v37, -inf }
 0xaf8   : > { %4749 = vmax.xlane.f32.xlu0 %v4748_v3 }
 0xb04   : > { %v4673_v38 = vpop.xlane.xlu2 %4672 }
 0xb05   : > { %vm4709_vm3 = vcmp.eq.f32.partialorder %v12967_v49, %v4673_v38 }
 0xb06   : > { %v13063_v33 = vsel %vm4709_vm3, -inf, %v12967_v49 }
 0xb07   : > { %v4751_v22 = vsel %vm2975_vm0, %v13063_v33, -inf }
 0xb08   : > { %4752 = vmax.xlane.f32.xlu0 %v4751_v22 }
 0xb0d   : > { %v4661_v21 = vpop.xlane.xlu1 %4660  ;;  %v4658_v10 = vpop.xlane.xlu0 %4657 }
 0xb0e   : > { %vm4705_vm4 = vcmp.eq.f32.partialorder %v12977_v23, %v4661_v21  ;;  %vm4704_vm5 = vcmp.eq.f32.partialorder %v12974_v41, %v4658_v10 }
 0xb0f   : > { %v13070_v18 = vsel %vm4705_vm4, -inf, %v12977_v23  ;;  %v13073_v46 = vsel %vm4704_vm5, -inf, %v12974_v41 }
 0xb10   : > { %v4739_v49 = vsel %vm2975_vm0, %v13070_v18, -inf  ;;  %v4736_v3 = vsel %vm2975_vm0, %v13073_v46, -inf }
 0xb11   : > { %4740 = vmax.xlane.f32.xlu2 %v4739_v49  ;;  %4737 = vmax.xlane.f32.xlu1 %v4736_v3 }
 0xb14   : > { %v4682_v38 = vpop.xlane.xlu2 %4681 }
 0xb15   : > { %v4676_v22 = vpop.xlane.xlu0 %4675  ;;  %vm4712_vm6 = vcmp.eq.f32.partialorder %v12986_v35, %v4682_v38  ;;  %v4679_v21 = vpop.xlane.xlu1 %4678 }
 0xb16   : > { %vm4710_vm7 = vcmp.eq.f32.partialorder %v12989_v20, %v4676_v22  ;;  %v13082_v23 = vsel %vm4712_vm6, -inf, %v12986_v35  ;;  %vm4711_vm8 = vcmp.eq.f32.partialorder %v12993_v32, %v4679_v21 }
 0xb17   : > { %v13086_v41 = vsel %vm4710_vm7, -inf, %v12989_v20  ;;  %v13089_v10 = vsel %vm4711_vm8, -inf, %v12993_v32  ;;  %v4760_v49 = vsel %vm2975_vm0, %v13082_v23, -inf }
 0xb18   : > { %v4754_v3 = vsel %vm2975_vm0, %v13086_v41, -inf  ;;  %4761 = vmax.xlane.f32.xlu0 %v4760_v49  ;;  %v4757_v38 = vsel %vm2975_vm0, %v13089_v10, -inf }
 0xb19   : > { %4755 = vmax.xlane.f32.xlu1 %v4754_v3  ;;  %4758 = vmax.xlane.f32.xlu2 %v4757_v38 }
 0xb1c   : > { %v4700_v35 = vpop.xlane.xlu2 %4699 }
 0xb1d   : > { %v4667_v22 = vpop.xlane.xlu0 %4666  ;;  %vm4718_vm9 = vcmp.eq.f32.partialorder %v13004_v12, %v4700_v35  ;;  %v4688_v20 = vpop.xlane.xlu1 %4687 }
 0xb1e   : > { %vm4707_vm10 = vcmp.eq.f32.partialorder %v13007_v0, %v4667_v22  ;;  %v13100_v32 = vsel %vm4718_vm9, -inf, %v13004_v12  ;;  %vm4714_vm11 = vcmp.eq.f32.partialorder %v13011_v48, %v4688_v20 }
 0xb1f   : > { %v13104_v21 = vsel %vm4707_vm10, -inf, %v13007_v0  ;;  %v13107_v49 = vsel %vm4714_vm11, -inf, %v13011_v48  ;;  %v4778_v3 = vsel %vm2975_vm0, %v13100_v32, -inf }
 0xb20   : > { %v4745_v38 = vsel %vm2975_vm0, %v13104_v21, -inf  ;;  %4779 = vmax.xlane.f32.xlu0 %v4778_v3  ;;  %v4766_v35 = vsel %vm2975_vm0, %v13107_v49, -inf }
 0xb21   : > { %4746 = vmax.xlane.f32.xlu1 %v4745_v38  ;;  %4767 = vmax.xlane.f32.xlu2 %v4766_v35 }
 0xb25   : > { %v4694_v12 = vpop.xlane.xlu0 %4693  ;;  %v4691_v22 = vpop.xlane.xlu1 %4690 }
 0xb26   : > { %vm4716_vm12 = vcmp.eq.f32.partialorder %v13021_v4, %v4694_v12  ;;  %vm4715_vm13 = vcmp.eq.f32.partialorder %v13025_v6, %v4691_v22 }
 0xb27   : > { %v13118_v0 = vsel %vm4716_vm12, -inf, %v13021_v4  ;;  %v13121_v48 = vsel %vm4715_vm13, -inf, %v13025_v6 }
 0xb28   : > { %v4772_v20 = vsel %vm2975_vm0, %v13118_v0, -inf  ;;  %v4769_v3 = vsel %vm2975_vm0, %v13121_v48, -inf }
 0xb29   : > { %4773 = vmax.xlane.f32.xlu1 %v4772_v20  ;;  %4770 = vmax.xlane.f32.xlu2 %v4769_v3 }
 0xb2d   : > { %v4685_v38 = vpop.xlane.xlu0 %4684  ;;  %v4697_v35 = vpop.xlane.xlu1 %4696 }
 0xb2e   : > { %vm4713_vm14 = vcmp.eq.f32.partialorder %v13033_v62, %v4685_v38  ;;  %vm4717_vm15 = vcmp.eq.f32.partialorder %v13037_v63, %v4697_v35 }
 0xb2f   : > { %v13130_v4 = vsel %vm4713_vm14, -inf, %v13033_v62  ;;  %v13133_v6 = vsel %vm4717_vm15, -inf, %v13037_v63 }
 0xb30   : > { %v4763_v12 = vsel %vm2975_vm0, %v13130_v4, -inf  ;;  %v4775_v22 = vsel %vm2975_vm0, %v13133_v6, -inf }
 0xb31   : > { %4764 = vmax.xlane.f32.xlu1 %v4763_v12  ;;  %4776 = vmax.xlane.f32.xlu2 %v4775_v22 }
 0xb35   : > { %v4703_v20 = vpop.xlane.xlu0 %4702 }
 0xb36   : > { %vm4719_vm1 = vcmp.eq.f32.partialorder %v13045_v1, %v4703_v20 }
 0xb37   : > { %v13141_v3 = vsel %vm4719_vm1, -inf, %v13045_v1 }
 0xb38   : > { %v4781_v62 = vsel %vm2975_vm0, %v13141_v3, -inf }
 0xb39   : > { %4782 = vmax.xlane.f32.xlu1 %v4781_v62 }
 0xb63   : > { %v4744_v63 = vpop.xlane.xlu0 %4743 }
 0xb64   : > { %vm4786_vm2 = vcmp.eq.f32.partialorder %v13051_v57, %v4744_v63 }
 0xb65   : > { %v13147_v38 = vsel %vm4786_vm2, -inf, %v13051_v57 }
 0xb66   : > { %v4822_v35 = vsel %vm2975_vm0, %v13147_v38, -inf }
 0xb67   : > { %4823 = vmax.xlane.f32.xlu1 %v4822_v35 }
 0xb6b   : > { %v4750_v12 = vpop.xlane.xlu0 %4749 }
 0xb6c   : > { %vm4788_vm3 = vcmp.eq.f32.partialorder %v13057_v37, %v4750_v12 }
 0xb6d   : > { %v13153_v1 = vsel %vm4788_vm3, -inf, %v13057_v37 }
 0xb6e   : > { %v4828_v22 = vsel %vm2975_vm0, %v13153_v1, -inf }
 0xb6f   : > { %4829 = vmax.xlane.f32.xlu1 %v4828_v22 }
 0xb7b   : > { %v4753_v20 = vpop.xlane.xlu0 %4752 }
 0xb7c   : > { %vm4789_vm4 = vcmp.eq.f32.partialorder %v13063_v33, %v4753_v20 }
 0xb7d   : > { %v13159_v57 = vsel %vm4789_vm4, -inf, %v13063_v33 }
 0xb7e   : > { %v4831_v62 = vsel %vm2975_vm0, %v13159_v57, -inf }
 0xb7f   : > { %4832 = vmax.xlane.f32.xlu1 %v4831_v62 }
 0xb84   : > { %v4741_v63 = vpop.xlane.xlu2 %4740  ;;  %v4738_v35 = vpop.xlane.xlu1 %4737 }
 0xb85   : > { %vm4785_vm5 = vcmp.eq.f32.partialorder %v13070_v18, %v4741_v63  ;;  %vm4784_vm6 = vcmp.eq.f32.partialorder %v13073_v46, %v4738_v35 }
 0xb86   : > { %v13166_v37 = vsel %vm4785_vm5, -inf, %v13070_v18  ;;  %v13169_v12 = vsel %vm4784_vm6, -inf, %v13073_v46 }
 0xb87   : > { %v4819_v33 = vsel %vm2975_vm0, %v13166_v37, -inf  ;;  %v4816_v22 = vsel %vm2975_vm0, %v13169_v12, -inf }
 0xb88   : > { %4820 = vmax.xlane.f32.xlu0 %v4819_v33  ;;  %4817 = vmax.xlane.f32.xlu2 %v4816_v22 }
 0xb8b   : > { %v4762_v20 = vpop.xlane.xlu0 %4761 }
 0xb8c   : > { %v4756_v62 = vpop.xlane.xlu1 %4755  ;;  %vm4792_vm7 = vcmp.eq.f32.partialorder %v13082_v23, %v4762_v20  ;;  %v4759_v63 = vpop.xlane.xlu2 %4758 }
 0xb8d   : > { %vm4790_vm8 = vcmp.eq.f32.partialorder %v13086_v41, %v4756_v62  ;;  %v13178_v18 = vsel %vm4792_vm7, -inf, %v13082_v23  ;;  %vm4791_vm9 = vcmp.eq.f32.partialorder %v13089_v10, %v4759_v63 }
 0xb8e   : > { %v13182_v46 = vsel %vm4790_vm8, -inf, %v13086_v41  ;;  %v13185_v35 = vsel %vm4791_vm9, -inf, %v13089_v10  ;;  %v4840_v33 = vsel %vm2975_vm0, %v13178_v18, -inf }
 0xb8f   : > { %v4834_v22 = vsel %vm2975_vm0, %v13182_v46, -inf  ;;  %4841 = vmax.xlane.f32.xlu1 %v4840_v33  ;;  %v4837_v20 = vsel %vm2975_vm0, %v13185_v35, -inf }
 0xb90   : > { %4835 = vmax.xlane.f32.xlu2 %v4834_v22  ;;  %4838 = vmax.xlane.f32.xlu0 %v4837_v20 }
 0xb93   : > { %v4780_v23 = vpop.xlane.xlu0 %4779 }
 0xb94   : > { %v4747_v62 = vpop.xlane.xlu1 %4746  ;;  %vm4798_vm10 = vcmp.eq.f32.partialorder %v13100_v32, %v4780_v23  ;;  %v4768_v41 = vpop.xlane.xlu2 %4767 }
 0xb95   : > { %vm4787_vm11 = vcmp.eq.f32.partialorder %v13104_v21, %v4747_v62  ;;  %v13196_v10 = vsel %vm4798_vm10, -inf, %v13100_v32  ;;  %vm4794_vm12 = vcmp.eq.f32.partialorder %v13107_v49, %v4768_v41 }
 0xb96   : > { %v13200_v63 = vsel %vm4787_vm11, -inf, %v13104_v21  ;;  %v13203_v33 = vsel %vm4794_vm12, -inf, %v13107_v49  ;;  %v4858_v22 = vsel %vm2975_vm0, %v13196_v10, -inf }
 0xb97   : > { %v4825_v20 = vsel %vm2975_vm0, %v13200_v63, -inf  ;;  %4859 = vmax.xlane.f32.xlu1 %v4858_v22  ;;  %v4846_v23 = vsel %vm2975_vm0, %v13203_v33, -inf }
 0xb98   : > { %4826 = vmax.xlane.f32.xlu2 %v4825_v20  ;;  %4847 = vmax.xlane.f32.xlu0 %v4846_v23 }
 0xb9c   : > { %v4774_v32 = vpop.xlane.xlu1 %4773  ;;  %v4771_v62 = vpop.xlane.xlu2 %4770 }
 0xb9d   : > { %vm4796_vm13 = vcmp.eq.f32.partialorder %v13118_v0, %v4774_v32  ;;  %vm4795_vm14 = vcmp.eq.f32.partialorder %v13121_v48, %v4771_v62 }
 0xb9e   : > { %v13214_v21 = vsel %vm4796_vm13, -inf, %v13118_v0  ;;  %v13217_v49 = vsel %vm4795_vm14, -inf, %v13121_v48 }
 0xb9f   : > { %v4852_v41 = vsel %vm2975_vm0, %v13214_v21, -inf  ;;  %v4849_v22 = vsel %vm2975_vm0, %v13217_v49, -inf }
 0xba0   : > { %4853 = vmax.xlane.f32.xlu2 %v4852_v41  ;;  %4850 = vmax.xlane.f32.xlu0 %v4849_v22 }
 0xba4   : > { %v4765_v20 = vpop.xlane.xlu1 %4764  ;;  %v4777_v23 = vpop.xlane.xlu2 %4776 }
 0xba5   : > { %vm4793_vm15 = vcmp.eq.f32.partialorder %v13130_v4, %v4765_v20  ;;  %vm4797_vm1 = vcmp.eq.f32.partialorder %v13133_v6, %v4777_v23 }
 0xba6   : > { %v13226_v0 = vsel %vm4793_vm15, -inf, %v13130_v4  ;;  %v13229_v48 = vsel %vm4797_vm1, -inf, %v13133_v6 }
 0xba7   : > { %v4843_v32 = vsel %vm2975_vm0, %v13226_v0, -inf  ;;  %v4855_v62 = vsel %vm2975_vm0, %v13229_v48, -inf }
 0xba8   : > { %4844 = vmax.xlane.f32.xlu2 %v4843_v32  ;;  %4856 = vmax.xlane.f32.xlu0 %v4855_v62 }
 0xbac   : > { %v4783_v41 = vpop.xlane.xlu1 %4782 }
 0xbad   : > { %vm4799_vm2 = vcmp.eq.f32.partialorder %v13141_v3, %v4783_v41 }
 0xbae   : > { %v13237_v22 = vsel %vm4799_vm2, -inf, %v13141_v3 }
 0xbaf   : > { %v4861_v4 = vsel %vm2975_vm0, %v13237_v22, -inf }
 0xbb0   : > { %4862 = vmax.xlane.f32.xlu2 %v4861_v4 }
 0xbda   : > { %v4824_v6 = vpop.xlane.xlu1 %4823 }
 0xbdb   : > { %vm4866_vm3 = vcmp.eq.f32.partialorder %v13147_v38, %v4824_v6 }
 0xbdc   : > { %v13243_v20 = vsel %vm4866_vm3, -inf, %v13147_v38 }
 0xbdd   : > { %v4902_v23 = vsel %vm2975_vm0, %v13243_v20, -inf }
 0xbde   : > { %4903 = vmax.xlane.f32.xlu2 %v4902_v23 }
 0xbe2   : > { %v4830_v32 = vpop.xlane.xlu1 %4829 }
 0xbe3   : > { %vm4868_vm4 = vcmp.eq.f32.partialorder %v13153_v1, %v4830_v32 }
 0xbe4   : > { %v13249_v3 = vsel %vm4868_vm4, -inf, %v13153_v1 }
 0xbe5   : > { %v4908_v62 = vsel %vm2975_vm0, %v13249_v3, -inf }
 0xbe6   : > { %4909 = vmax.xlane.f32.xlu2 %v4908_v62 }
 0xbf2   : > { %v4833_v41 = vpop.xlane.xlu1 %4832 }
 0xbf3   : > { %vm4869_vm5 = vcmp.eq.f32.partialorder %v13159_v57, %v4833_v41 }
 0xbf4   : > { %v13255_v38 = vsel %vm4869_vm5, -inf, %v13159_v57 }
 0xbf5   : > { %v4911_v4 = vsel %vm2975_vm0, %v13255_v38, -inf }
 0xbf6   : > { %4912 = vmax.xlane.f32.xlu2 %v4911_v4 }
 0xbfb   : > { %v4818_v6 = vpop.xlane.xlu2 %4817  ;;  %v4821_v23 = vpop.xlane.xlu0 %4820 }
 0xbfc   : > { %vm4864_vm6 = vcmp.eq.f32.partialorder %v13169_v12, %v4818_v6  ;;  %vm4865_vm7 = vcmp.eq.f32.partialorder %v13166_v37, %v4821_v23 }
 0xbfd   : > { %v13262_v1 = vsel %vm4864_vm6, -inf, %v13169_v12  ;;  %v13265_v32 = vsel %vm4865_vm7, -inf, %v13166_v37 }
 0xbfe   : > { %v4896_v57 = vsel %vm2975_vm0, %v13262_v1, -inf  ;;  %v4899_v62 = vsel %vm2975_vm0, %v13265_v32, -inf }
 0xbff   : > { %4897 = vmax.xlane.f32.xlu0 %v4896_v57  ;;  %4900 = vmax.xlane.f32.xlu1 %v4899_v62 }
 0xc02   : > { %v4842_v41 = vpop.xlane.xlu1 %4841 }
 0xc03   : > { %v4836_v4 = vpop.xlane.xlu2 %4835  ;;  %vm4872_vm8 = vcmp.eq.f32.partialorder %v13178_v18, %v4842_v41  ;;  %v4839_v6 = vpop.xlane.xlu0 %4838 }
 0xc04   : > { %vm4870_vm9 = vcmp.eq.f32.partialorder %v13182_v46, %v4836_v4  ;;  %v13274_v12 = vsel %vm4872_vm8, -inf, %v13178_v18  ;;  %vm4871_vm10 = vcmp.eq.f32.partialorder %v13185_v35, %v4839_v6 }
 0xc05   : > { %v13277_v37 = vsel %vm4870_vm9, -inf, %v13182_v46  ;;  %v13281_v23 = vsel %vm4871_vm10, -inf, %v13185_v35  ;;  %v4920_v57 = vsel %vm2975_vm0, %v13274_v12, -inf }
 0xc06   : > { %v4914_v62 = vsel %vm2975_vm0, %v13277_v37, -inf  ;;  %4921 = vmax.xlane.f32.xlu2 %v4920_v57  ;;  %v4917_v18 = vsel %vm2975_vm0, %v13281_v23, -inf }
 0xc07   : > { %4915 = vmax.xlane.f32.xlu0 %v4914_v62  ;;  %4918 = vmax.xlane.f32.xlu1 %v4917_v18 }
 0xc0a   : > { %v4860_v41 = vpop.xlane.xlu1 %4859 }
 0xc0b   : > { %v4827_v46 = vpop.xlane.xlu2 %4826  ;;  %vm4878_vm11 = vcmp.eq.f32.partialorder %v13196_v10, %v4860_v41  ;;  %v4848_v35 = vpop.xlane.xlu0 %4847 }
 0xc0c   : > { %vm4867_vm12 = vcmp.eq.f32.partialorder %v13200_v63, %v4827_v46  ;;  %v13292_v4 = vsel %vm4878_vm11, -inf, %v13196_v10  ;;  %vm4874_vm13 = vcmp.eq.f32.partialorder %v13203_v33, %v4848_v35 }
 0xc0d   : > { %v13295_v6 = vsel %vm4867_vm12, -inf, %v13200_v63  ;;  %v13299_v57 = vsel %vm4874_vm13, -inf, %v13203_v33  ;;  %v4938_v62 = vsel %vm2975_vm0, %v13292_v4, -inf }
 0xc0e   : > { %v4905_v18 = vsel %vm2975_vm0, %v13295_v6, -inf  ;;  %4939 = vmax.xlane.f32.xlu2 %v4938_v62  ;;  %v4926_v10 = vsel %vm2975_vm0, %v13299_v57, -inf }
 0xc0f   : > { %4906 = vmax.xlane.f32.xlu0 %v4905_v18  ;;  %4927 = vmax.xlane.f32.xlu1 %v4926_v10 }
 0xc13   : > { %v4854_v41 = vpop.xlane.xlu2 %4853  ;;  %v4851_v63 = vpop.xlane.xlu0 %4850 }
 0xc14   : > { %vm4876_vm14 = vcmp.eq.f32.partialorder %v13214_v21, %v4854_v41  ;;  %vm4875_vm15 = vcmp.eq.f32.partialorder %v13217_v49, %v4851_v63 }
 0xc15   : > { %v13309_v46 = vsel %vm4876_vm14, -inf, %v13214_v21  ;;  %v13313_v33 = vsel %vm4875_vm15, -inf, %v13217_v49 }
 0xc16   : > { %v4932_v35 = vsel %vm2975_vm0, %v13309_v46, -inf  ;;  %v4929_v62 = vsel %vm2975_vm0, %v13313_v33, -inf }
 0xc17   : > { %4933 = vmax.xlane.f32.xlu0 %v4932_v35  ;;  %4930 = vmax.xlane.f32.xlu1 %v4929_v62 }
 0xc1b   : > { %v4845_v18 = vpop.xlane.xlu2 %4844  ;;  %v4857_v10 = vpop.xlane.xlu0 %4856 }
 0xc1c   : > { %vm4873_vm1 = vcmp.eq.f32.partialorder %v13226_v0, %v4845_v18  ;;  %vm4877_vm2 = vcmp.eq.f32.partialorder %v13229_v48, %v4857_v10 }
 0xc1d   : > { %v13321_v21 = vsel %vm4873_vm1, -inf, %v13226_v0  ;;  %v13325_v49 = vsel %vm4877_vm2, -inf, %v13229_v48 }
 0xc1e   : > { %v4923_v41 = vsel %vm2975_vm0, %v13321_v21, -inf  ;;  %v4935_v63 = vsel %vm2975_vm0, %v13325_v49, -inf }
 0xc1f   : > { %4924 = vmax.xlane.f32.xlu0 %v4923_v41  ;;  %4936 = vmax.xlane.f32.xlu1 %v4935_v63 }
 0xc23   : > { %v4863_v35 = vpop.xlane.xlu2 %4862 }
 0xc24   : > { %vm4879_vm3 = vcmp.eq.f32.partialorder %v13237_v22, %v4863_v35 }
 0xc25   : > { %v13333_v62 = vsel %vm4879_vm3, -inf, %v13237_v22 }
 0xc26   : > { %v4941_v0 = vsel %vm2975_vm0, %v13333_v62, -inf }
 0xc27   : > { %4942 = vmax.xlane.f32.xlu0 %v4941_v0 }
 0xc51   : > { %v4904_v48 = vpop.xlane.xlu2 %4903 }
 0xc52   : > { %vm4946_vm4 = vcmp.eq.f32.partialorder %v13243_v20, %v4904_v48 }
 0xc53   : > { %v13339_v18 = vsel %vm4946_vm4, -inf, %v13243_v20 }
 0xc54   : > { %v4982_v10 = vsel %vm2975_vm0, %v13339_v18, -inf }
 0xc55   : > { %4983 = vmax.xlane.f32.xlu0 %v4982_v10 }
 0xc59   : > { %v4910_v41 = vpop.xlane.xlu2 %4909 }
 0xc5a   : > { %vm4948_vm5 = vcmp.eq.f32.partialorder %v13249_v3, %v4910_v41 }
 0xc5b   : > { %v13345_v22 = vsel %vm4948_vm5, -inf, %v13249_v3 }
 0xc5c   : > { %v4988_v63 = vsel %vm2975_vm0, %v13345_v22, -inf }
 0xc5d   : > { %4989 = vmax.xlane.f32.xlu0 %v4988_v63 }
 0xc69   : > { %v4913_v35 = vpop.xlane.xlu2 %4912 }
 0xc6a   : > { %vm4949_vm6 = vcmp.eq.f32.partialorder %v13255_v38, %v4913_v35 }
 0xc6b   : > { %v13351_v20 = vsel %vm4949_vm6, -inf, %v13255_v38 }
 0xc6c   : > { %v4991_v0 = vsel %vm2975_vm0, %v13351_v20, -inf }
 0xc6d   : > { %4992 = vmax.xlane.f32.xlu0 %v4991_v0 }
 0xc72   : > { %v4901_v48 = vpop.xlane.xlu1 %4900  ;;  %v4898_v10 = vpop.xlane.xlu0 %4897 }
 0xc73   : > { %vm4945_vm7 = vcmp.eq.f32.partialorder %v13265_v32, %v4901_v48  ;;  %vm4944_vm8 = vcmp.eq.f32.partialorder %v13262_v1, %v4898_v10 }
 0xc74   : > { %v13358_v3 = vsel %vm4945_vm7, -inf, %v13265_v32  ;;  %v13361_v41 = vsel %vm4944_vm8, -inf, %v13262_v1 }
 0xc75   : > { %v4979_v38 = vsel %vm2975_vm0, %v13358_v3, -inf  ;;  %v4976_v63 = vsel %vm2975_vm0, %v13361_v41, -inf }
 0xc76   : > { %4980 = vmax.xlane.f32.xlu2 %v4979_v38  ;;  %4977 = vmax.xlane.f32.xlu1 %v4976_v63 }
 0xc79   : > { %v4922_v35 = vpop.xlane.xlu2 %4921 }
 0xc7a   : > { %v4916_v0 = vpop.xlane.xlu0 %4915  ;;  %vm4952_vm9 = vcmp.eq.f32.partialorder %v13274_v12, %v4922_v35  ;;  %v4919_v48 = vpop.xlane.xlu1 %4918 }
 0xc7b   : > { %vm4950_vm10 = vcmp.eq.f32.partialorder %v13277_v37, %v4916_v0  ;;  %v13370_v32 = vsel %vm4952_vm9, -inf, %v13274_v12  ;;  %vm4951_vm11 = vcmp.eq.f32.partialorder %v13281_v23, %v4919_v48 }
 0xc7c   : > { %v13374_v1 = vsel %vm4950_vm10, -inf, %v13277_v37  ;;  %v13377_v10 = vsel %vm4951_vm11, -inf, %v13281_v23  ;;  %v5000_v38 = vsel %vm2975_vm0, %v13370_v32, -inf }
 0xc7d   : > { %v4994_v63 = vsel %vm2975_vm0, %v13374_v1, -inf  ;;  %5001 = vmax.xlane.f32.xlu0 %v5000_v38  ;;  %v4997_v35 = vsel %vm2975_vm0, %v13377_v10, -inf }
 0xc7e   : > { %4995 = vmax.xlane.f32.xlu1 %v4994_v63  ;;  %4998 = vmax.xlane.f32.xlu2 %v4997_v35 }
 0xc81   : > { %v4940_v12 = vpop.xlane.xlu2 %4939 }
 0xc82   : > { %v4907_v0 = vpop.xlane.xlu0 %4906  ;;  %vm4958_vm12 = vcmp.eq.f32.partialorder %v13292_v4, %v4940_v12  ;;  %v4928_v37 = vpop.xlane.xlu1 %4927 }
 0xc83   : > { %vm4947_vm13 = vcmp.eq.f32.partialorder %v13295_v6, %v4907_v0  ;;  %v13388_v23 = vsel %vm4958_vm12, -inf, %v13292_v4  ;;  %vm4954_vm14 = vcmp.eq.f32.partialorder %v13299_v57, %v4928_v37 }
 0xc84   : > { %v13392_v48 = vsel %vm4947_vm13, -inf, %v13295_v6  ;;  %v13395_v38 = vsel %vm4954_vm14, -inf, %v13299_v57  ;;  %v5018_v63 = vsel %vm2975_vm0, %v13388_v23, -inf }
 0xc85   : > { %v4985_v35 = vsel %vm2975_vm0, %v13392_v48, -inf  ;;  %5019 = vmax.xlane.f32.xlu0 %v5018_v63  ;;  %v5006_v12 = vsel %vm2975_vm0, %v13395_v38, -inf }
 0xc86   : > { %4986 = vmax.xlane.f32.xlu1 %v4985_v35  ;;  %5007 = vmax.xlane.f32.xlu2 %v5006_v12 }
 0xc8a   : > { %v4934_v4 = vpop.xlane.xlu0 %4933  ;;  %v4931_v0 = vpop.xlane.xlu1 %4930 }
 0xc8b   : > { %vm4956_vm15 = vcmp.eq.f32.partialorder %v13309_v46, %v4934_v4  ;;  %vm4955_vm1 = vcmp.eq.f32.partialorder %v13313_v33, %v4931_v0 }
 0xc8c   : > { %v13406_v6 = vsel %vm4956_vm15, -inf, %v13309_v46  ;;  %v13409_v57 = vsel %vm4955_vm1, -inf, %v13313_v33 }
 0xc8d   : > { %v5012_v37 = vsel %vm2975_vm0, %v13406_v6, -inf  ;;  %v5009_v63 = vsel %vm2975_vm0, %v13409_v57, -inf }
 0xc8e   : > { %5013 = vmax.xlane.f32.xlu1 %v5012_v37  ;;  %5010 = vmax.xlane.f32.xlu2 %v5009_v63 }
 0xc92   : > { %v4925_v35 = vpop.xlane.xlu0 %4924  ;;  %v4937_v12 = vpop.xlane.xlu1 %4936 }
 0xc93   : > { %vm4953_vm2 = vcmp.eq.f32.partialorder %v13321_v21, %v4925_v35  ;;  %vm4957_vm3 = vcmp.eq.f32.partialorder %v13325_v49, %v4937_v12 }
 0xc94   : > { %v13418_v46 = vsel %vm4953_vm2, -inf, %v13321_v21  ;;  %v13421_v33 = vsel %vm4957_vm3, -inf, %v13325_v49 }
 0xc95   : > { %v5003_v4 = vsel %vm2975_vm0, %v13418_v46, -inf  ;;  %v5015_v0 = vsel %vm2975_vm0, %v13421_v33, -inf }
 0xc96   : > { %5004 = vmax.xlane.f32.xlu1 %v5003_v4  ;;  %5016 = vmax.xlane.f32.xlu2 %v5015_v0 }
 0xc9a   : > { %v4943_v37 = vpop.xlane.xlu0 %4942 }
 0xc9b   : > { %vm4959_vm4 = vcmp.eq.f32.partialorder %v13333_v62, %v4943_v37 }
 0xc9c   : > { %v13429_v63 = vsel %vm4959_vm4, -inf, %v13333_v62 }
 0xc9d   : > { %v5021_v21 = vsel %vm2975_vm0, %v13429_v63, -inf }
 0xc9e   : > { %5022 = vmax.xlane.f32.xlu1 %v5021_v21 }
 0xcc8   : > { %v4984_v49 = vpop.xlane.xlu0 %4983 }
 0xcc9   : > { %vm5026_vm5 = vcmp.eq.f32.partialorder %v13339_v18, %v4984_v49 }
 0xcca   : > { %v13435_v35 = vsel %vm5026_vm5, -inf, %v13339_v18 }
 0xccb   : > { %v5062_v12 = vsel %vm2975_vm0, %v13435_v35, -inf }
 0xccc   : > { %5063 = vmax.xlane.f32.xlu1 %v5062_v12 }
 0xcd0   : > { %v4990_v4 = vpop.xlane.xlu0 %4989 }
 0xcd1   : > { %vm5028_vm6 = vcmp.eq.f32.partialorder %v13345_v22, %v4990_v4 }
 0xcd2   : > { %v13441_v62 = vsel %vm5028_vm6, -inf, %v13345_v22 }
 0xcd3   : > { %v5068_v0 = vsel %vm2975_vm0, %v13441_v62, -inf }
 0xcd4   : > { %5069 = vmax.xlane.f32.xlu1 %v5068_v0 }
 0xce0   : > { %v4993_v37 = vpop.xlane.xlu0 %4992 }
 0xce1   : > { %vm5029_vm7 = vcmp.eq.f32.partialorder %v13351_v20, %v4993_v37 }
 0xce2   : > { %v13447_v18 = vsel %vm5029_vm7, -inf, %v13351_v20 }
 0xce3   : > { %v5071_v21 = vsel %vm2975_vm0, %v13447_v18, -inf }
 0xce4   : > { %5072 = vmax.xlane.f32.xlu1 %v5071_v21 }
 0xce9   : > { %v4981_v49 = vpop.xlane.xlu2 %4980  ;;  %v4978_v12 = vpop.xlane.xlu1 %4977 }
 0xcea   : > { %vm5025_vm8 = vcmp.eq.f32.partialorder %v13358_v3, %v4981_v49  ;;  %vm5024_vm9 = vcmp.eq.f32.partialorder %v13361_v41, %v4978_v12 }
 0xceb   : > { %v13454_v22 = vsel %vm5025_vm8, -inf, %v13358_v3  ;;  %v13457_v4 = vsel %vm5024_vm9, -inf, %v13361_v41 }
 0xcec   : > { %v5059_v20 = vsel %vm2975_vm0, %v13454_v22, -inf  ;;  %v5056_v0 = vsel %vm2975_vm0, %v13457_v4, -inf }
 0xced   : > { %5060 = vmax.xlane.f32.xlu0 %v5059_v20  ;;  %5057 = vmax.xlane.f32.xlu2 %v5056_v0 }
 0xcf0   : > { %v5002_v37 = vpop.xlane.xlu0 %5001 }
 0xcf1   : > { %v4996_v21 = vpop.xlane.xlu1 %4995  ;;  %vm5032_vm10 = vcmp.eq.f32.partialorder %v13370_v32, %v5002_v37  ;;  %v4999_v49 = vpop.xlane.xlu2 %4998 }
 0xcf2   : > { %vm5030_vm11 = vcmp.eq.f32.partialorder %v13374_v1, %v4996_v21  ;;  %v13466_v3 = vsel %vm5032_vm10, -inf, %v13370_v32  ;;  %vm5031_vm12 = vcmp.eq.f32.partialorder %v13377_v10, %v4999_v49 }
 0xcf3   : > { %v13470_v41 = vsel %vm5030_vm11, -inf, %v13374_v1  ;;  %v13473_v12 = vsel %vm5031_vm12, -inf, %v13377_v10  ;;  %v5080_v20 = vsel %vm2975_vm0, %v13466_v3, -inf }
 0xcf4   : > { %v5074_v0 = vsel %vm2975_vm0, %v13470_v41, -inf  ;;  %5081 = vmax.xlane.f32.xlu1 %v5080_v20  ;;  %v5077_v37 = vsel %vm2975_vm0, %v13473_v12, -inf }
 0xcf5   : > { %5075 = vmax.xlane.f32.xlu2 %v5074_v0  ;;  %5078 = vmax.xlane.f32.xlu0 %v5077_v37 }
 0xcf8   : > { %v5020_v32 = vpop.xlane.xlu0 %5019 }
 0xcf9   : > { %v4987_v21 = vpop.xlane.xlu1 %4986  ;;  %vm5038_vm13 = vcmp.eq.f32.partialorder %v13388_v23, %v5020_v32  ;;  %v5008_v1 = vpop.xlane.xlu2 %5007 }
 0xcfa   : > { %vm5027_vm14 = vcmp.eq.f32.partialorder %v13392_v48, %v4987_v21  ;;  %v13484_v10 = vsel %vm5038_vm13, -inf, %v13388_v23  ;;  %vm5034_vm15 = vcmp.eq.f32.partialorder %v13395_v38, %v5008_v1 }
 0xcfb   : > { %v13488_v49 = vsel %vm5027_vm14, -inf, %v13392_v48  ;;  %v13491_v20 = vsel %vm5034_vm15, -inf, %v13395_v38  ;;  %v5098_v0 = vsel %vm2975_vm0, %v13484_v10, -inf }
 0xcfc   : > { %v5065_v37 = vsel %vm2975_vm0, %v13488_v49, -inf  ;;  %5099 = vmax.xlane.f32.xlu1 %v5098_v0  ;;  %v5086_v32 = vsel %vm2975_vm0, %v13491_v20, -inf }
 0xcfd   : > { %5066 = vmax.xlane.f32.xlu2 %v5065_v37  ;;  %5087 = vmax.xlane.f32.xlu0 %v5086_v32 }
 0xd01   : > { %v5014_v23 = vpop.xlane.xlu1 %5013  ;;  %v5011_v21 = vpop.xlane.xlu2 %5010 }
 0xd02   : > { %vm5036_vm1 = vcmp.eq.f32.partialorder %v13406_v6, %v5014_v23  ;;  %vm5035_vm2 = vcmp.eq.f32.partialorder %v13409_v57, %v5011_v21 }
 0xd03   : > { %v13502_v48 = vsel %vm5036_vm1, -inf, %v13406_v6  ;;  %v13505_v38 = vsel %vm5035_vm2, -inf, %v13409_v57 }
 0xd04   : > { %v5092_v1 = vsel %vm2975_vm0, %v13502_v48, -inf  ;;  %v5089_v0 = vsel %vm2975_vm0, %v13505_v38, -inf }
 0xd05   : > { %5093 = vmax.xlane.f32.xlu2 %v5092_v1  ;;  %5090 = vmax.xlane.f32.xlu0 %v5089_v0 }
 0xd09   : > { %v5005_v37 = vpop.xlane.xlu1 %5004  ;;  %v5017_v32 = vpop.xlane.xlu2 %5016 }
 0xd0a   : > { %vm5033_vm3 = vcmp.eq.f32.partialorder %v13418_v46, %v5005_v37  ;;  %vm5037_vm4 = vcmp.eq.f32.partialorder %v13421_v33, %v5017_v32 }
 0xd0b   : > { %v13514_v6 = vsel %vm5033_vm3, -inf, %v13418_v46  ;;  %v13517_v57 = vsel %vm5037_vm4, -inf, %v13421_v33 }
 0xd0c   : > { %v5083_v23 = vsel %vm2975_vm0, %v13514_v6, -inf  ;;  %v5095_v21 = vsel %vm2975_vm0, %v13517_v57, -inf }
 0xd0d   : > { %5084 = vmax.xlane.f32.xlu2 %v5083_v23  ;;  %5096 = vmax.xlane.f32.xlu0 %v5095_v21 }
 0xd11   : > { %v5023_v1 = vpop.xlane.xlu1 %5022 }
 0xd12   : > { %vm5039_vm5 = vcmp.eq.f32.partialorder %v13429_v63, %v5023_v1 }
 0xd13   : > { %v13525_v0 = vsel %vm5039_vm5, -inf, %v13429_v63 }
 0xd14   : > { %v5101_v46 = vsel %vm2975_vm0, %v13525_v0, -inf }
 0xd15   : > { %5102 = vmax.xlane.f32.xlu2 %v5101_v46 }
 0xd3f   : > { %v5064_v33 = vpop.xlane.xlu1 %5063 }
 0xd40   : > { %vm5106_vm6 = vcmp.eq.f32.partialorder %v13435_v35, %v5064_v33 }
 0xd41   : > { %v13531_v37 = vsel %vm5106_vm6, -inf, %v13435_v35 }
 0xd42   : > { %v5142_v32 = vsel %vm2975_vm0, %v13531_v37, -inf }
 0xd43   : > { %5143 = vmax.xlane.f32.xlu2 %v5142_v32 }
 0xd47   : > { %v5070_v23 = vpop.xlane.xlu1 %5069 }
 0xd48   : > { %vm5108_vm7 = vcmp.eq.f32.partialorder %v13441_v62, %v5070_v23 }
 0xd49   : > { %v13537_v63 = vsel %vm5108_vm7, -inf, %v13441_v62 }
 0xd4a   : > { %v5148_v21 = vsel %vm2975_vm0, %v13537_v63, -inf }
 0xd4b   : > { %5149 = vmax.xlane.f32.xlu2 %v5148_v21 }
 0xd57   : > { %v5073_v1 = vpop.xlane.xlu1 %5072 }
 0xd58   : > { %vm5109_vm8 = vcmp.eq.f32.partialorder %v13447_v18, %v5073_v1 }
 0xd59   : > { %v13543_v35 = vsel %vm5109_vm8, -inf, %v13447_v18 }
 0xd5a   : > { %v5151_v46 = vsel %vm2975_vm0, %v13543_v35, -inf }
 0xd5b   : > { %5152 = vmax.xlane.f32.xlu2 %v5151_v46 }
 0xd60   : > { %v5058_v33 = vpop.xlane.xlu2 %5057  ;;  %v5061_v32 = vpop.xlane.xlu0 %5060 }
 0xd61   : > { %vm5104_vm9 = vcmp.eq.f32.partialorder %v13457_v4, %v5058_v33  ;;  %vm5105_vm10 = vcmp.eq.f32.partialorder %v13454_v22, %v5061_v32 }
 0xd62   : > { %v13550_v62 = vsel %vm5104_vm9, -inf, %v13457_v4  ;;  %v13553_v23 = vsel %vm5105_vm10, -inf, %v13454_v22 }
 0xd63   : > { %v5136_v18 = vsel %vm2975_vm0, %v13550_v62, -inf  ;;  %v5139_v21 = vsel %vm2975_vm0, %v13553_v23, -inf }
 0xd64   : > { %5137 = vmax.xlane.f32.xlu0 %v5136_v18  ;;  %5140 = vmax.xlane.f32.xlu1 %v5139_v21 }
 0xd67   : > { %v5082_v1 = vpop.xlane.xlu1 %5081 }
 0xd68   : > { %v5076_v46 = vpop.xlane.xlu2 %5075  ;;  %vm5112_vm11 = vcmp.eq.f32.partialorder %v13466_v3, %v5082_v1  ;;  %v5079_v33 = vpop.xlane.xlu0 %5078 }
 0xd69   : > { %vm5110_vm12 = vcmp.eq.f32.partialorder %v13470_v41, %v5076_v46  ;;  %v13562_v4 = vsel %vm5112_vm11, -inf, %v13466_v3  ;;  %vm5111_vm13 = vcmp.eq.f32.partialorder %v13473_v12, %v5079_v33 }
 0xd6a   : > { %v13565_v22 = vsel %vm5110_vm12, -inf, %v13470_v41  ;;  %v13569_v32 = vsel %vm5111_vm13, -inf, %v13473_v12  ;;  %v5160_v18 = vsel %vm2975_vm0, %v13562_v4, -inf }
 0xd6b   : > { %v5154_v21 = vsel %vm2975_vm0, %v13565_v22, -inf  ;;  %5161 = vmax.xlane.f32.xlu2 %v5160_v18  ;;  %v5157_v3 = vsel %vm2975_vm0, %v13569_v32, -inf }
 0xd6c   : > { %5155 = vmax.xlane.f32.xlu0 %v5154_v21  ;;  %5158 = vmax.xlane.f32.xlu1 %v5157_v3 }
 0xd6f   : > { %v5100_v1 = vpop.xlane.xlu1 %5099 }
 0xd70   : > { %v5067_v41 = vpop.xlane.xlu2 %5066  ;;  %vm5118_vm14 = vcmp.eq.f32.partialorder %v13484_v10, %v5100_v1  ;;  %v5088_v12 = vpop.xlane.xlu0 %5087 }
 0xd71   : > { %vm5107_vm15 = vcmp.eq.f32.partialorder %v13488_v49, %v5067_v41  ;;  %v13580_v46 = vsel %vm5118_vm14, -inf, %v13484_v10  ;;  %vm5114_vm1 = vcmp.eq.f32.partialorder %v13491_v20, %v5088_v12 }
 0xd72   : > { %v13583_v33 = vsel %vm5107_vm15, -inf, %v13488_v49  ;;  %v13587_v18 = vsel %vm5114_vm1, -inf, %v13491_v20  ;;  %v5178_v21 = vsel %vm2975_vm0, %v13580_v46, -inf }
 0xd73   : > { %v5145_v3 = vsel %vm2975_vm0, %v13583_v33, -inf  ;;  %5179 = vmax.xlane.f32.xlu2 %v5178_v21  ;;  %v5166_v10 = vsel %vm2975_vm0, %v13587_v18, -inf }
 0xd74   : > { %5146 = vmax.xlane.f32.xlu0 %v5145_v3  ;;  %5167 = vmax.xlane.f32.xlu1 %v5166_v10 }
 0xd78   : > { %v5094_v1 = vpop.xlane.xlu2 %5093  ;;  %v5091_v49 = vpop.xlane.xlu0 %5090 }
 0xd79   : > { %vm5116_vm2 = vcmp.eq.f32.partialorder %v13502_v48, %v5094_v1  ;;  %vm5115_vm3 = vcmp.eq.f32.partialorder %v13505_v38, %v5091_v49 }
 0xd7a   : > { %v13597_v41 = vsel %vm5116_vm2, -inf, %v13502_v48  ;;  %v13601_v20 = vsel %vm5115_vm3, -inf, %v13505_v38 }
 0xd7b   : > { %v5172_v12 = vsel %vm2975_vm0, %v13597_v41, -inf  ;;  %v5169_v21 = vsel %vm2975_vm0, %v13601_v20, -inf }
 0xd7c   : > { %5173 = vmax.xlane.f32.xlu0 %v5172_v12  ;;  %5170 = vmax.xlane.f32.xlu1 %v5169_v21 }
 0xd80   : > { %v5085_v3 = vpop.xlane.xlu2 %5084  ;;  %v5097_v10 = vpop.xlane.xlu0 %5096 }
 0xd81   : > { %vm5113_vm4 = vcmp.eq.f32.partialorder %v13514_v6, %v5085_v3  ;;  %vm5117_vm5 = vcmp.eq.f32.partialorder %v13517_v57, %v5097_v10 }
 0xd82   : > { %v13609_v48 = vsel %vm5113_vm4, -inf, %v13514_v6  ;;  %v13613_v38 = vsel %vm5117_vm5, -inf, %v13517_v57 }
 0xd83   : > { %v5163_v1 = vsel %vm2975_vm0, %v13609_v48, -inf  ;;  %v5175_v49 = vsel %vm2975_vm0, %v13613_v38, -inf }
 0xd84   : > { %5164 = vmax.xlane.f32.xlu0 %v5163_v1  ;;  %5176 = vmax.xlane.f32.xlu1 %v5175_v49 }
 0xd88   : > { %v5103_v12 = vpop.xlane.xlu2 %5102 }
 0xd89   : > { %vm5119_vm6 = vcmp.eq.f32.partialorder %v13525_v0, %v5103_v12 }
 0xd8a   : > { %v13621_v21 = vsel %vm5119_vm6, -inf, %v13525_v0 }
 0xd8b   : > { %v5181_v6 = vsel %vm2975_vm0, %v13621_v21, -inf }
 0xd8c   : > { %5182 = vmax.xlane.f32.xlu0 %v5181_v6 }
 0xdb6   : > { %v5144_v57 = vpop.xlane.xlu2 %5143 }
 0xdb7   : > { %vm5186_vm7 = vcmp.eq.f32.partialorder %v13531_v37, %v5144_v57 }
 0xdb8   : > { %v13627_v3 = vsel %vm5186_vm7, -inf, %v13531_v37 }
 0xdb9   : > { %v5222_v10 = vsel %vm2975_vm0, %v13627_v3, -inf }
 0xdba   : > { %5223 = vmax.xlane.f32.xlu0 %v5222_v10 }
 0xdbe   : > { %v5150_v1 = vpop.xlane.xlu2 %5149 }
 0xdbf   : > { %vm5188_vm8 = vcmp.eq.f32.partialorder %v13537_v63, %v5150_v1 }
 0xdc0   : > { %v13633_v0 = vsel %vm5188_vm8, -inf, %v13537_v63 }
 0xdc1   : > { %v5228_v49 = vsel %vm2975_vm0, %v13633_v0, -inf }
 0xdc2   : > { %5229 = vmax.xlane.f32.xlu0 %v5228_v49 }
 0xdce   : > { %v5153_v12 = vpop.xlane.xlu2 %5152 }
 0xdcf   : > { %vm5189_vm9 = vcmp.eq.f32.partialorder %v13543_v35, %v5153_v12 }
 0xdd0   : > { %v13639_v37 = vsel %vm5189_vm9, -inf, %v13543_v35 }
 0xdd1   : > { %v5231_v6 = vsel %vm2975_vm0, %v13639_v37, -inf }
 0xdd2   : > { %5232 = vmax.xlane.f32.xlu0 %v5231_v6 }
 0xdd7   : > { %v5141_v57 = vpop.xlane.xlu1 %5140  ;;  %v5138_v10 = vpop.xlane.xlu0 %5137 }
 0xdd8   : > { %vm5185_vm10 = vcmp.eq.f32.partialorder %v13553_v23, %v5141_v57  ;;  %vm5184_vm11 = vcmp.eq.f32.partialorder %v13550_v62, %v5138_v10 }
 0xdd9   : > { %v13646_v63 = vsel %vm5185_vm10, -inf, %v13553_v23  ;;  %v13649_v1 = vsel %vm5184_vm11, -inf, %v13550_v62 }
 0xdda   : > { %v5219_v35 = vsel %vm2975_vm0, %v13646_v63, -inf  ;;  %v5216_v49 = vsel %vm2975_vm0, %v13649_v1, -inf }
 0xddb   : > { %5220 = vmax.xlane.f32.xlu2 %v5219_v35  ;;  %5217 = vmax.xlane.f32.xlu1 %v5216_v49 }
 0xdde   : > { %v5162_v12 = vpop.xlane.xlu2 %5161 }
 0xddf   : > { %v5156_v6 = vpop.xlane.xlu0 %5155  ;;  %vm5192_vm12 = vcmp.eq.f32.partialorder %v13562_v4, %v5162_v12  ;;  %v5159_v57 = vpop.xlane.xlu1 %5158 }
 0xde0   : > { %vm5190_vm13 = vcmp.eq.f32.partialorder %v13565_v22, %v5156_v6  ;;  %v13658_v23 = vsel %vm5192_vm12, -inf, %v13562_v4  ;;  %vm5191_vm14 = vcmp.eq.f32.partialorder %v13569_v32, %v5159_v57 }
 0xde1   : > { %v13662_v62 = vsel %vm5190_vm13, -inf, %v13565_v22  ;;  %v13665_v10 = vsel %vm5191_vm14, -inf, %v13569_v32  ;;  %v5240_v35 = vsel %vm2975_vm0, %v13658_v23, -inf }
 0xde2   : > { %v5234_v49 = vsel %vm2975_vm0, %v13662_v62, -inf  ;;  %5241 = vmax.xlane.f32.xlu0 %v5240_v35  ;;  %v5237_v12 = vsel %vm2975_vm0, %v13665_v10, -inf }
 0xde3   : > { %5235 = vmax.xlane.f32.xlu1 %v5234_v49  ;;  %5238 = vmax.xlane.f32.xlu2 %v5237_v12 }
 0xde6   : > { %v5180_v4 = vpop.xlane.xlu2 %5179 }
 0xde7   : > { %v5147_v6 = vpop.xlane.xlu0 %5146  ;;  %vm5198_vm15 = vcmp.eq.f32.partialorder %v13580_v46, %v5180_v4  ;;  %v5168_v22 = vpop.xlane.xlu1 %5167 }
 0xde8   : > { %vm5187_vm1 = vcmp.eq.f32.partialorder %v13583_v33, %v5147_v6  ;;  %v13676_v32 = vsel %vm5198_vm15, -inf, %v13580_v46  ;;  %vm5194_vm2 = vcmp.eq.f32.partialorder %v13587_v18, %v5168_v22 }
 0xde9   : > { %v13680_v57 = vsel %vm5187_vm1, -inf, %v13583_v33  ;;  %v13683_v35 = vsel %vm5194_vm2, -inf, %v13587_v18  ;;  %v5258_v49 = vsel %vm2975_vm0, %v13676_v32, -inf }
 0xdea   : > { %v5225_v12 = vsel %vm2975_vm0, %v13680_v57, -inf  ;;  %5259 = vmax.xlane.f32.xlu0 %v5258_v49  ;;  %v5246_v4 = vsel %vm2975_vm0, %v13683_v35, -inf }
 0xdeb   : > { %5226 = vmax.xlane.f32.xlu1 %v5225_v12  ;;  %5247 = vmax.xlane.f32.xlu2 %v5246_v4 }
 0xdef   : > { %v5174_v46 = vpop.xlane.xlu0 %5173  ;;  %v5171_v6 = vpop.xlane.xlu1 %5170 }
 0xdf0   : > { %vm5196_vm3 = vcmp.eq.f32.partialorder %v13597_v41, %v5174_v46  ;;  %vm5195_vm4 = vcmp.eq.f32.partialorder %v13601_v20, %v5171_v6 }
 0xdf1   : > { %v13694_v33 = vsel %vm5196_vm3, -inf, %v13597_v41  ;;  %v13697_v18 = vsel %vm5195_vm4, -inf, %v13601_v20 }
 0xdf2   : > { %v5252_v22 = vsel %vm2975_vm0, %v13694_v33, -inf  ;;  %v5249_v49 = vsel %vm2975_vm0, %v13697_v18, -inf }
 0xdf3   : > { %5253 = vmax.xlane.f32.xlu1 %v5252_v22  ;;  %5250 = vmax.xlane.f32.xlu2 %v5249_v49 }
 0xdf7   : > { %v5165_v12 = vpop.xlane.xlu0 %5164  ;;  %v5177_v4 = vpop.xlane.xlu1 %5176 }
 0xdf8   : > { %vm5193_vm5 = vcmp.eq.f32.partialorder %v13609_v48, %v5165_v12  ;;  %vm5197_vm6 = vcmp.eq.f32.partialorder %v13613_v38, %v5177_v4 }
 0xdf9   : > { %v13706_v41 = vsel %vm5193_vm5, -inf, %v13609_v48  ;;  %v13709_v20 = vsel %vm5197_vm6, -inf, %v13613_v38 }
 0xdfa   : > { %v5243_v46 = vsel %vm2975_vm0, %v13706_v41, -inf  ;;  %v5255_v6 = vsel %vm2975_vm0, %v13709_v20, -inf }
 0xdfb   : > { %5244 = vmax.xlane.f32.xlu1 %v5243_v46  ;;  %5256 = vmax.xlane.f32.xlu2 %v5255_v6 }
 0xdff   : > { %v5183_v22 = vpop.xlane.xlu0 %5182 }
 0xe00   : > { %vm5199_vm7 = vcmp.eq.f32.partialorder %v13621_v21, %v5183_v22 }
 0xe01   : > { %v13717_v49 = vsel %vm5199_vm7, -inf, %v13621_v21 }
 0xe02   : > { %v5261_v48 = vsel %vm2975_vm0, %v13717_v49, -inf }
 0xe03   : > { %5262 = vmax.xlane.f32.xlu1 %v5261_v48 }
 0xe2d   : > { %v5224_v38 = vpop.xlane.xlu0 %5223 }
 0xe2e   : > { %vm5266_vm8 = vcmp.eq.f32.partialorder %v13627_v3, %v5224_v38 }
 0xe2f   : > { %v13723_v12 = vsel %vm5266_vm8, -inf, %v13627_v3 }
 0xe30   : > { %v5302_v4 = vsel %vm2975_vm0, %v13723_v12, -inf }
 0xe31   : > { %5303 = vmax.xlane.f32.xlu1 %v5302_v4 }
 0xe35   : > { %v5230_v46 = vpop.xlane.xlu0 %5229 }
 0xe36   : > { %vm5268_vm9 = vcmp.eq.f32.partialorder %v13633_v0, %v5230_v46 }
 0xe37   : > { %v13729_v21 = vsel %vm5268_vm9, -inf, %v13633_v0 }
 0xe38   : > { %v5308_v6 = vsel %vm2975_vm0, %v13729_v21, -inf }
 0xe39   : > { %5309 = vmax.xlane.f32.xlu1 %v5308_v6 }
 0xe45   : > { %v5233_v22 = vpop.xlane.xlu0 %5232 }
 0xe46   : > { %vm5269_vm10 = vcmp.eq.f32.partialorder %v13639_v37, %v5233_v22 }
 0xe47   : > { %v13735_v3 = vsel %vm5269_vm10, -inf, %v13639_v37 }
 0xe48   : > { %v5311_v48 = vsel %vm2975_vm0, %v13735_v3, -inf }
 0xe49   : > { %5312 = vmax.xlane.f32.xlu1 %v5311_v48 }
 0xe4e   : > { %v5221_v38 = vpop.xlane.xlu2 %5220  ;;  %v5218_v4 = vpop.xlane.xlu1 %5217 }
 0xe4f   : > { %vm5265_vm11 = vcmp.eq.f32.partialorder %v13646_v63, %v5221_v38  ;;  %vm5264_vm12 = vcmp.eq.f32.partialorder %v13649_v1, %v5218_v4 }
 0xe50   : > { %v13742_v0 = vsel %vm5265_vm11, -inf, %v13646_v63  ;;  %v13745_v46 = vsel %vm5264_vm12, -inf, %v13649_v1 }
 0xe51   : > { %v5299_v37 = vsel %vm2975_vm0, %v13742_v0, -inf  ;;  %v5296_v6 = vsel %vm2975_vm0, %v13745_v46, -inf }
 0xe52   : > { %5300 = vmax.xlane.f32.xlu0 %v5299_v37  ;;  %5297 = vmax.xlane.f32.xlu2 %v5296_v6 }
 0xe55   : > { %v5242_v22 = vpop.xlane.xlu0 %5241 }
 0xe56   : > { %v5236_v48 = vpop.xlane.xlu1 %5235  ;;  %vm5272_vm13 = vcmp.eq.f32.partialorder %v13658_v23, %v5242_v22  ;;  %v5239_v38 = vpop.xlane.xlu2 %5238 }
 0xe57   : > { %vm5270_vm14 = vcmp.eq.f32.partialorder %v13662_v62, %v5236_v48  ;;  %v13754_v63 = vsel %vm5272_vm13, -inf, %v13658_v23  ;;  %vm5271_vm15 = vcmp.eq.f32.partialorder %v13665_v10, %v5239_v38 }
 0xe58   : > { %v13758_v1 = vsel %vm5270_vm14, -inf, %v13662_v62  ;;  %v13761_v4 = vsel %vm5271_vm15, -inf, %v13665_v10  ;;  %v5320_v37 = vsel %vm2975_vm0, %v13754_v63, -inf }
 0xe59   : > { %v5314_v6 = vsel %vm2975_vm0, %v13758_v1, -inf  ;;  %5321 = vmax.xlane.f32.xlu1 %v5320_v37  ;;  %v5317_v22 = vsel %vm2975_vm0, %v13761_v4, -inf }
 0xe5a   : > { %5315 = vmax.xlane.f32.xlu2 %v5314_v6  ;;  %5318 = vmax.xlane.f32.xlu0 %v5317_v22 }
 0xe5d   : > { %v5260_v23 = vpop.xlane.xlu0 %5259 }
 0xe5e   : > { %v5227_v48 = vpop.xlane.xlu1 %5226  ;;  %vm5278_vm1 = vcmp.eq.f32.partialorder %v13676_v32, %v5260_v23  ;;  %v5248_v62 = vpop.xlane.xlu2 %5247 }
 0xe5f   : > { %vm5267_vm2 = vcmp.eq.f32.partialorder %v13680_v57, %v5227_v48  ;;  %v13772_v10 = vsel %vm5278_vm1, -inf, %v13676_v32  ;;  %vm5274_vm3 = vcmp.eq.f32.partialorder %v13683_v35, %v5248_v62 }
 0xe60   : > { %v13776_v38 = vsel %vm5267_vm2, -inf, %v13680_v57  ;;  %v13779_v37 = vsel %vm5274_vm3, -inf, %v13683_v35  ;;  %v5338_v6 = vsel %vm2975_vm0, %v13772_v10, -inf }
 0xe61   : > { %v5305_v22 = vsel %vm2975_vm0, %v13776_v38, -inf  ;;  %5339 = vmax.xlane.f32.xlu1 %v5338_v6  ;;  %v5326_v23 = vsel %vm2975_vm0, %v13779_v37, -inf }
 0xe62   : > { %5306 = vmax.xlane.f32.xlu2 %v5305_v22  ;;  %5327 = vmax.xlane.f32.xlu0 %v5326_v23 }
 0xe66   : > { %v5254_v32 = vpop.xlane.xlu1 %5253  ;;  %v5251_v48 = vpop.xlane.xlu2 %5250 }
 0xe67   : > { %vm5276_vm4 = vcmp.eq.f32.partialorder %v13694_v33, %v5254_v32  ;;  %vm5275_vm5 = vcmp.eq.f32.partialorder %v13697_v18, %v5251_v48 }
 0xe68   : > { %v13790_v57 = vsel %vm5276_vm4, -inf, %v13694_v33  ;;  %v13793_v35 = vsel %vm5275_vm5, -inf, %v13697_v18 }
 0xe69   : > { %v5332_v62 = vsel %vm2975_vm0, %v13790_v57, -inf  ;;  %v5329_v6 = vsel %vm2975_vm0, %v13793_v35, -inf }
 0xe6a   : > { %5333 = vmax.xlane.f32.xlu2 %v5332_v62  ;;  %5330 = vmax.xlane.f32.xlu0 %v5329_v6 }
 0xe6e   : > { %v5245_v22 = vpop.xlane.xlu1 %5244  ;;  %v5257_v23 = vpop.xlane.xlu2 %5256 }
 0xe6f   : > { %vm5273_vm6 = vcmp.eq.f32.partialorder %v13706_v41, %v5245_v22  ;;  %vm5277_vm7 = vcmp.eq.f32.partialorder %v13709_v20, %v5257_v23 }
 0xe70   : > { %v13802_v33 = vsel %vm5273_vm6, -inf, %v13706_v41  ;;  %v13805_v18 = vsel %vm5277_vm7, -inf, %v13709_v20 }
 0xe71   : > { %v5323_v32 = vsel %vm2975_vm0, %v13802_v33, -inf  ;;  %v5335_v48 = vsel %vm2975_vm0, %v13805_v18, -inf }
 0xe72   : > { %5324 = vmax.xlane.f32.xlu2 %v5323_v32  ;;  %5336 = vmax.xlane.f32.xlu0 %v5335_v48 }
 0xe76   : > { %v5263_v62 = vpop.xlane.xlu1 %5262 }
 0xe77   : > { %vm5279_vm8 = vcmp.eq.f32.partialorder %v13717_v49, %v5263_v62 }
 0xe78   : > { %v13813_v6 = vsel %vm5279_vm8, -inf, %v13717_v49 }
 0xe79   : > { %v5341_v41 = vsel %vm2975_vm0, %v13813_v6, -inf }
 0xe7a   : > { %5342 = vmax.xlane.f32.xlu2 %v5341_v41 }
 0xea4   : > { %v5304_v20 = vpop.xlane.xlu1 %5303 }
 0xea5   : > { %vm5346_vm9 = vcmp.eq.f32.partialorder %v13723_v12, %v5304_v20 }
 0xea6   : > { %v13819_v22 = vsel %vm5346_vm9, -inf, %v13723_v12 }
 0xea7   : > { %v5382_v23 = vsel %vm2975_vm0, %v13819_v22, -inf }
 0xea8   : > { %5383 = vmax.xlane.f32.xlu2 %v5382_v23 }
 0xeac   : > { %v5310_v32 = vpop.xlane.xlu1 %5309 }
 0xead   : > { %vm5348_vm10 = vcmp.eq.f32.partialorder %v13729_v21, %v5310_v32 }
 0xeae   : > { %v13825_v49 = vsel %vm5348_vm10, -inf, %v13729_v21 }
 0xeaf   : > { %v5388_v48 = vsel %vm2975_vm0, %v13825_v49, -inf }
 0xeb0   : > { %5389 = vmax.xlane.f32.xlu2 %v5388_v48 }
 0xebc   : > { %v5313_v62 = vpop.xlane.xlu1 %5312 }
 0xebd   : > { %vm5349_vm11 = vcmp.eq.f32.partialorder %v13735_v3, %v5313_v62 }
 0xebe   : > { %v13831_v12 = vsel %vm5349_vm11, -inf, %v13735_v3 }
 0xebf   : > { %v5391_v41 = vsel %vm2975_vm0, %v13831_v12, -inf }
 0xec0   : > { %5392 = vmax.xlane.f32.xlu2 %v5391_v41 }
 0xec5   : > { %v5298_v20 = vpop.xlane.xlu2 %5297  ;;  %v5301_v23 = vpop.xlane.xlu0 %5300 }
 0xec6   : > { %vm5344_vm12 = vcmp.eq.f32.partialorder %v13745_v46, %v5298_v20  ;;  %vm5345_vm13 = vcmp.eq.f32.partialorder %v13742_v0, %v5301_v23 }
 0xec7   : > { %v13838_v21 = vsel %vm5344_vm12, -inf, %v13745_v46  ;;  %v13841_v32 = vsel %vm5345_vm13, -inf, %v13742_v0 }
 0xec8   : > { %v5376_v3 = vsel %vm2975_vm0, %v13838_v21, -inf  ;;  %v5379_v48 = vsel %vm2975_vm0, %v13841_v32, -inf }
 0xec9   : > { %5377 = vmax.xlane.f32.xlu0 %v5376_v3  ;;  %5380 = vmax.xlane.f32.xlu1 %v5379_v48 }
 0xecc   : > { %v5322_v62 = vpop.xlane.xlu1 %5321 }
 0xecd   : > { %v5316_v41 = vpop.xlane.xlu2 %5315  ;;  %vm5352_vm14 = vcmp.eq.f32.partialorder %v13754_v63, %v5322_v62  ;;  %v5319_v20 = vpop.xlane.xlu0 %5318 }
 0xece   : > { %vm5350_vm15 = vcmp.eq.f32.partialorder %v13758_v1, %v5316_v41  ;;  %v13850_v46 = vsel %vm5352_vm14, -inf, %v13754_v63  ;;  %vm5351_vm1 = vcmp.eq.f32.partialorder %v13761_v4, %v5319_v20 }
 0xecf   : > { %v13853_v0 = vsel %vm5350_vm15, -inf, %v13758_v1  ;;  %v13857_v23 = vsel %vm5351_vm1, -inf, %v13761_v4  ;;  %v5400_v3 = vsel %vm2975_vm0, %v13850_v46, -inf }
 0xed0   : > { %v5394_v48 = vsel %vm2975_vm0, %v13853_v0, -inf  ;;  %5401 = vmax.xlane.f32.xlu2 %v5400_v3  ;;  %v5397_v63 = vsel %vm2975_vm0, %v13857_v23, -inf }
 0xed1   : > { %5395 = vmax.xlane.f32.xlu0 %v5394_v48  ;;  %5398 = vmax.xlane.f32.xlu1 %v5397_v63 }
 0xed4   : > { %v5340_v62 = vpop.xlane.xlu1 %5339 }
 0xed5   : > { %v5307_v1 = vpop.xlane.xlu2 %5306  ;;  %vm5358_vm2 = vcmp.eq.f32.partialorder %v13772_v10, %v5340_v62  ;;  %v5328_v4 = vpop.xlane.xlu0 %5327 }
 0xed6   : > { %vm5347_vm3 = vcmp.eq.f32.partialorder %v13776_v38, %v5307_v1  ;;  %v13868_v41 = vsel %vm5358_vm2, -inf, %v13772_v10  ;;  %vm5354_vm4 = vcmp.eq.f32.partialorder %v13779_v37, %v5328_v4 }
 0xed7   : > { %v13871_v20 = vsel %vm5347_vm3, -inf, %v13776_v38  ;;  %v13875_v3 = vsel %vm5354_vm4, -inf, %v13779_v37  ;;  %v5418_v48 = vsel %vm2975_vm0, %v13868_v41, -inf }
 0xed8   : > { %v5385_v63 = vsel %vm2975_vm0, %v13871_v20, -inf  ;;  %5419 = vmax.xlane.f32.xlu2 %v5418_v48  ;;  %v5406_v10 = vsel %vm2975_vm0, %v13875_v3, -inf }
 0xed9   : > { %5386 = vmax.xlane.f32.xlu0 %v5385_v63  ;;  %5407 = vmax.xlane.f32.xlu1 %v5406_v10 }
 0xedd   : > { %v5334_v62 = vpop.xlane.xlu2 %5333  ;;  %v5331_v38 = vpop.xlane.xlu0 %5330 }
 0xede   : > { %vm5356_vm5 = vcmp.eq.f32.partialorder %v13790_v57, %v5334_v62  ;;  %vm5355_vm6 = vcmp.eq.f32.partialorder %v13793_v35, %v5331_v38 }
 0xedf   : > { %v13885_v1 = vsel %vm5356_vm5, -inf, %v13790_v57  ;;  %v13889_v37 = vsel %vm5355_vm6, -inf, %v13793_v35 }
 0xee0   : > { %v5412_v4 = vsel %vm2975_vm0, %v13885_v1, -inf  ;;  %v5409_v48 = vsel %vm2975_vm0, %v13889_v37, -inf }
 0xee1   : > { %5413 = vmax.xlane.f32.xlu0 %v5412_v4  ;;  %5410 = vmax.xlane.f32.xlu1 %v5409_v48 }
 0xee5   : > { %v5325_v63 = vpop.xlane.xlu2 %5324  ;;  %v5337_v10 = vpop.xlane.xlu0 %5336 }
 0xee6   : > { %vm5353_vm7 = vcmp.eq.f32.partialorder %v13802_v33, %v5325_v63  ;;  %vm5357_vm8 = vcmp.eq.f32.partialorder %v13805_v18, %v5337_v10 }
 0xee7   : > { %v13897_v57 = vsel %vm5353_vm7, -inf, %v13802_v33  ;;  %v13901_v35 = vsel %vm5357_vm8, -inf, %v13805_v18 }
 0xee8   : > { %v5403_v62 = vsel %vm2975_vm0, %v13897_v57, -inf  ;;  %v5415_v38 = vsel %vm2975_vm0, %v13901_v35, -inf }
 0xee9   : > { %5404 = vmax.xlane.f32.xlu0 %v5403_v62  ;;  %5416 = vmax.xlane.f32.xlu1 %v5415_v38 }
 0xeed   : > { %v5343_v4 = vpop.xlane.xlu2 %5342 }
 0xeee   : > { %vm5359_vm9 = vcmp.eq.f32.partialorder %v13813_v6, %v5343_v4 }
 0xeef   : > { %v13909_v48 = vsel %vm5359_vm9, -inf, %v13813_v6 }
 0xef0   : > { %v5421_v33 = vsel %vm2975_vm0, %v13909_v48, -inf }
 0xef1   : > { %5422 = vmax.xlane.f32.xlu0 %v5421_v33 }
 0xf1b   : > { %v5384_v18 = vpop.xlane.xlu2 %5383 }
 0xf1c   : > { %vm5426_vm10 = vcmp.eq.f32.partialorder %v13819_v22, %v5384_v18 }
 0xf1d   : > { %v13915_v63 = vsel %vm5426_vm10, -inf, %v13819_v22 }
 0xf1e   : > { %v5462_v10 = vsel %vm2975_vm0, %v13915_v63, -inf }
 0xf1f   : > { %5463 = vmax.xlane.f32.xlu0 %v5462_v10 }
 0xf23   : > { %v5390_v62 = vpop.xlane.xlu2 %5389 }
 0xf24   : > { %vm5428_vm11 = vcmp.eq.f32.partialorder %v13825_v49, %v5390_v62 }
 0xf25   : > { %v13921_v6 = vsel %vm5428_vm11, -inf, %v13825_v49 }
 0xf26   : > { %v5468_v38 = vsel %vm2975_vm0, %v13921_v6, -inf }
 0xf27   : > { %5469 = vmax.xlane.f32.xlu0 %v5468_v38 }
 0xf33   : > { %v5393_v4 = vpop.xlane.xlu2 %5392 }
 0xf34   : > { %vm5429_vm12 = vcmp.eq.f32.partialorder %v13831_v12, %v5393_v4 }
 0xf35   : > { %v13927_v22 = vsel %vm5429_vm12, -inf, %v13831_v12 }
 0xf36   : > { %v5471_v33 = vsel %vm2975_vm0, %v13927_v22, -inf }
 0xf37   : > { %5472 = vmax.xlane.f32.xlu0 %v5471_v33 }
 0xf3c   : > { %v5381_v18 = vpop.xlane.xlu1 %5380  ;;  %v5378_v10 = vpop.xlane.xlu0 %5377 }
 0xf3d   : > { %vm5425_vm13 = vcmp.eq.f32.partialorder %v13841_v32, %v5381_v18  ;;  %vm5424_vm14 = vcmp.eq.f32.partialorder %v13838_v21, %v5378_v10 }
 0xf3e   : > { %v13934_v49 = vsel %vm5425_vm13, -inf, %v13841_v32  ;;  %v13937_v62 = vsel %vm5424_vm14, -inf, %v13838_v21 }
 0xf3f   : > { %v5459_v12 = vsel %vm2975_vm0, %v13934_v49, -inf  ;;  %v5456_v38 = vsel %vm2975_vm0, %v13937_v62, -inf }
 0xf40   : > { %5460 = vmax.xlane.f32.xlu2 %v5459_v12  ;;  %5457 = vmax.xlane.f32.xlu1 %v5456_v38 }
 0xf43   : > { %v5402_v4 = vpop.xlane.xlu2 %5401 }
 0xf44   : > { %v5396_v33 = vpop.xlane.xlu0 %5395  ;;  %vm5432_vm15 = vcmp.eq.f32.partialorder %v13850_v46, %v5402_v4  ;;  %v5399_v18 = vpop.xlane.xlu1 %5398 }
 0xf45   : > { %vm5430_vm1 = vcmp.eq.f32.partialorder %v13853_v0, %v5396_v33  ;;  %v13946_v32 = vsel %vm5432_vm15, -inf, %v13850_v46  ;;  %vm5431_vm2 = vcmp.eq.f32.partialorder %v13857_v23, %v5399_v18 }
 0xf46   : > { %v13950_v21 = vsel %vm5430_vm1, -inf, %v13853_v0  ;;  %v13953_v10 = vsel %vm5431_vm2, -inf, %v13857_v23  ;;  %v5480_v12 = vsel %vm2975_vm0, %v13946_v32, -inf }
 0xf47   : > { %v5474_v38 = vsel %vm2975_vm0, %v13950_v21, -inf  ;;  %5481 = vmax.xlane.f32.xlu0 %v5480_v12  ;;  %v5477_v4 = vsel %vm2975_vm0, %v13953_v10, -inf }
 0xf48   : > { %5475 = vmax.xlane.f32.xlu1 %v5474_v38  ;;  %5478 = vmax.xlane.f32.xlu2 %v5477_v4 }
 0xf4b   : > { %v5420_v46 = vpop.xlane.xlu2 %5419 }
 0xf4c   : > { %v5387_v33 = vpop.xlane.xlu0 %5386  ;;  %vm5438_vm3 = vcmp.eq.f32.partialorder %v13868_v41, %v5420_v46  ;;  %v5408_v0 = vpop.xlane.xlu1 %5407 }
 0xf4d   : > { %vm5427_vm4 = vcmp.eq.f32.partialorder %v13871_v20, %v5387_v33  ;;  %v13964_v23 = vsel %vm5438_vm3, -inf, %v13868_v41  ;;  %vm5434_vm5 = vcmp.eq.f32.partialorder %v13875_v3, %v5408_v0 }
 0xf4e   : > { %v13968_v18 = vsel %vm5427_vm4, -inf, %v13871_v20  ;;  %v13971_v12 = vsel %vm5434_vm5, -inf, %v13875_v3  ;;  %v5498_v38 = vsel %vm2975_vm0, %v13964_v23, -inf }
 0xf4f   : > { %v5465_v4 = vsel %vm2975_vm0, %v13968_v18, -inf  ;;  %5499 = vmax.xlane.f32.xlu0 %v5498_v38  ;;  %v5486_v46 = vsel %vm2975_vm0, %v13971_v12, -inf }
 0xf50   : > { %5466 = vmax.xlane.f32.xlu1 %v5465_v4  ;;  %5487 = vmax.xlane.f32.xlu2 %v5486_v46 }
 0xf54   : > { %v5414_v41 = vpop.xlane.xlu0 %5413  ;;  %v5411_v33 = vpop.xlane.xlu1 %5410 }
 0xf55   : > { %vm5436_vm6 = vcmp.eq.f32.partialorder %v13885_v1, %v5414_v41  ;;  %vm5435_vm7 = vcmp.eq.f32.partialorder %v13889_v37, %v5411_v33 }
 0xf56   : > { %v13982_v20 = vsel %vm5436_vm6, -inf, %v13885_v1  ;;  %v13985_v3 = vsel %vm5435_vm7, -inf, %v13889_v37 }
 0xf57   : > { %v5492_v0 = vsel %vm2975_vm0, %v13982_v20, -inf  ;;  %v5489_v38 = vsel %vm2975_vm0, %v13985_v3, -inf }
 0xf58   : > { %5493 = vmax.xlane.f32.xlu1 %v5492_v0  ;;  %5490 = vmax.xlane.f32.xlu2 %v5489_v38 }
 0xf5c   : > { %v5405_v4 = vpop.xlane.xlu0 %5404  ;;  %v5417_v46 = vpop.xlane.xlu1 %5416 }
 0xf5d   : > { %vm5433_vm8 = vcmp.eq.f32.partialorder %v13897_v57, %v5405_v4  ;;  %vm5437_vm9 = vcmp.eq.f32.partialorder %v13901_v35, %v5417_v46 }
 0xf5e   : > { %v13994_v1 = vsel %vm5433_vm8, -inf, %v13897_v57  ;;  %v13997_v37 = vsel %vm5437_vm9, -inf, %v13901_v35 }
 0xf5f   : > { %v5483_v41 = vsel %vm2975_vm0, %v13994_v1, -inf  ;;  %v5495_v33 = vsel %vm2975_vm0, %v13997_v37, -inf }
 0xf60   : > { %5484 = vmax.xlane.f32.xlu1 %v5483_v41  ;;  %5496 = vmax.xlane.f32.xlu2 %v5495_v33 }
 0xf64   : > { %v5423_v0 = vpop.xlane.xlu0 %5422 }
 0xf65   : > { %vm5439_vm10 = vcmp.eq.f32.partialorder %v13909_v48, %v5423_v0 }
 0xf66   : > { %v14005_v38 = vsel %vm5439_vm10, -inf, %v13909_v48 }
 0xf67   : > { %v5501_v57 = vsel %vm2975_vm0, %v14005_v38, -inf }
 0xf68   : > { %5502 = vmax.xlane.f32.xlu1 %v5501_v57 }
 0xf92   : > { %v5464_v35 = vpop.xlane.xlu0 %5463 }
 0xf93   : > { %vm5506_vm11 = vcmp.eq.f32.partialorder %v13915_v63, %v5464_v35 }
 0xf94   : > { %v14011_v4 = vsel %vm5506_vm11, -inf, %v13915_v63 }
 0xf95   : > { %v5542_v46 = vsel %vm2975_vm0, %v14011_v4, -inf }
 0xf96   : > { %5543 = vmax.xlane.f32.xlu1 %v5542_v46 }
 0xf9a   : > { %v5470_v41 = vpop.xlane.xlu0 %5469 }
 0xf9b   : > { %vm5508_vm12 = vcmp.eq.f32.partialorder %v13921_v6, %v5470_v41 }
 0xf9c   : > { %v14017_v48 = vsel %vm5508_vm12, -inf, %v13921_v6 }
 0xf9d   : > { %v5548_v33 = vsel %vm2975_vm0, %v14017_v48, -inf }
 0xf9e   : > { %5549 = vmax.xlane.f32.xlu1 %v5548_v33 }
 0xfaa   : > { %v5473_v0 = vpop.xlane.xlu0 %5472 }
 0xfab   : > { %vm5509_vm13 = vcmp.eq.f32.partialorder %v13927_v22, %v5473_v0 }
 0xfac   : > { %v14023_v63 = vsel %vm5509_vm13, -inf, %v13927_v22 }
 0xfad   : > { %v5551_v57 = vsel %vm2975_vm0, %v14023_v63, -inf }
 0xfae   : > { %5552 = vmax.xlane.f32.xlu1 %v5551_v57 }
 0xfb3   : > { %v5461_v35 = vpop.xlane.xlu2 %5460  ;;  %v5458_v46 = vpop.xlane.xlu1 %5457 }
 0xfb4   : > { %vm5505_vm14 = vcmp.eq.f32.partialorder %v13934_v49, %v5461_v35  ;;  %vm5504_vm15 = vcmp.eq.f32.partialorder %v13937_v62, %v5458_v46 }
 0xfb5   : > { %v14030_v6 = vsel %vm5505_vm14, -inf, %v13934_v49  ;;  %v14033_v41 = vsel %vm5504_vm15, -inf, %v13937_v62 }
 0xfb6   : > { %v5539_v22 = vsel %vm2975_vm0, %v14030_v6, -inf  ;;  %v5536_v33 = vsel %vm2975_vm0, %v14033_v41, -inf }
 0xfb7   : > { %5540 = vmax.xlane.f32.xlu0 %v5539_v22  ;;  %5537 = vmax.xlane.f32.xlu2 %v5536_v33 }
 0xfba   : > { %v5482_v0 = vpop.xlane.xlu0 %5481 }
 0xfbb   : > { %v5476_v57 = vpop.xlane.xlu1 %5475  ;;  %vm5512_vm1 = vcmp.eq.f32.partialorder %v13946_v32, %v5482_v0  ;;  %v5479_v35 = vpop.xlane.xlu2 %5478 }
 0xfbc   : > { %vm5510_vm2 = vcmp.eq.f32.partialorder %v13950_v21, %v5476_v57  ;;  %v14042_v49 = vsel %vm5512_vm1, -inf, %v13946_v32  ;;  %vm5511_vm3 = vcmp.eq.f32.partialorder %v13953_v10, %v5479_v35 }
 0xfbd   : > { %v14046_v62 = vsel %vm5510_vm2, -inf, %v13950_v21  ;;  %v14049_v46 = vsel %vm5511_vm3, -inf, %v13953_v10  ;;  %v5560_v22 = vsel %vm2975_vm0, %v14042_v49, -inf }
 0xfbe   : > { %v5554_v33 = vsel %vm2975_vm0, %v14046_v62, -inf  ;;  %5561 = vmax.xlane.f32.xlu1 %v5560_v22  ;;  %v5557_v0 = vsel %vm2975_vm0, %v14049_v46, -inf }
 0xfbf   : > { %5555 = vmax.xlane.f32.xlu2 %v5554_v33  ;;  %5558 = vmax.xlane.f32.xlu0 %v5557_v0 }
 0xfc2   : > { %v5500_v32 = vpop.xlane.xlu0 %5499 }
 0xfc3   : > { %v5467_v57 = vpop.xlane.xlu1 %5466  ;;  %vm5518_vm4 = vcmp.eq.f32.partialorder %v13964_v23, %v5500_v32  ;;  %v5488_v21 = vpop.xlane.xlu2 %5487 }
 0xfc4   : > { %vm5507_vm5 = vcmp.eq.f32.partialorder %v13968_v18, %v5467_v57  ;;  %v14060_v10 = vsel %vm5518_vm4, -inf, %v13964_v23  ;;  %vm5514_vm6 = vcmp.eq.f32.partialorder %v13971_v12, %v5488_v21 }
 0xfc5   : > { %v14064_v35 = vsel %vm5507_vm5, -inf, %v13968_v18  ;;  %v14067_v22 = vsel %vm5514_vm6, -inf, %v13971_v12  ;;  %v5578_v33 = vsel %vm2975_vm0, %v14060_v10, -inf }
 0xfc6   : > { %v5545_v0 = vsel %vm2975_vm0, %v14064_v35, -inf  ;;  %5579 = vmax.xlane.f32.xlu1 %v5578_v33  ;;  %v5566_v32 = vsel %vm2975_vm0, %v14067_v22, -inf }
 0xfc7   : > { %5546 = vmax.xlane.f32.xlu2 %v5545_v0  ;;  %5567 = vmax.xlane.f32.xlu0 %v5566_v32 }
 0xfcb   : > { %v5494_v23 = vpop.xlane.xlu1 %5493  ;;  %v5491_v57 = vpop.xlane.xlu2 %5490 }
 0xfcc   : > { %vm5516_vm7 = vcmp.eq.f32.partialorder %v13982_v20, %v5494_v23  ;;  %vm5515_vm8 = vcmp.eq.f32.partialorder %v13985_v3, %v5491_v57 }
 0xfcd   : > { %v14078_v18 = vsel %vm5516_vm7, -inf, %v13982_v20  ;;  %v14081_v12 = vsel %vm5515_vm8, -inf, %v13985_v3 }
 0xfce   : > { %v5572_v21 = vsel %vm2975_vm0, %v14078_v18, -inf  ;;  %v5569_v33 = vsel %vm2975_vm0, %v14081_v12, -inf }
 0xfcf   : > { %5573 = vmax.xlane.f32.xlu2 %v5572_v21  ;;  %5570 = vmax.xlane.f32.xlu0 %v5569_v33 }
 0xfd3   : > { %v5485_v0 = vpop.xlane.xlu1 %5484  ;;  %v5497_v32 = vpop.xlane.xlu2 %5496 }
 0xfd4   : > { %vm5513_vm9 = vcmp.eq.f32.partialorder %v13994_v1, %v5485_v0  ;;  %vm5517_vm10 = vcmp.eq.f32.partialorder %v13997_v37, %v5497_v32 }
 0xfd5   : > { %v14090_v20 = vsel %vm5513_vm9, -inf, %v13994_v1  ;;  %v14093_v3 = vsel %vm5517_vm10, -inf, %v13997_v37 }
 0xfd6   : > { %v5563_v23 = vsel %vm2975_vm0, %v14090_v20, -inf  ;;  %v5575_v57 = vsel %vm2975_vm0, %v14093_v3, -inf }
 0xfd7   : > { %5564 = vmax.xlane.f32.xlu2 %v5563_v23  ;;  %5576 = vmax.xlane.f32.xlu0 %v5575_v57 }
 0xfdb   : > { %v5503_v21 = vpop.xlane.xlu1 %5502 }
 0xfdc   : > { %vm5519_vm11 = vcmp.eq.f32.partialorder %v14005_v38, %v5503_v21 }
 0xfdd   : > { %v14101_v33 = vsel %vm5519_vm11, -inf, %v14005_v38 }
 0xfde   : > { %v5581_v1 = vsel %vm2975_vm0, %v14101_v33, -inf }
 0xfdf   : > { %5582 = vmax.xlane.f32.xlu2 %v5581_v1 }
0x1009   : > { %v5544_v37 = vpop.xlane.xlu1 %5543 }
0x100a   : > { %vm5586_vm12 = vcmp.eq.f32.partialorder %v14011_v4, %v5544_v37 }
0x100b   : > { %v14107_v0 = vsel %vm5586_vm12, -inf, %v14011_v4 }
0x100c   : > { %v5622_v32 = vsel %vm2975_vm0, %v14107_v0, -inf }
0x100d   : > { %5623 = vmax.xlane.f32.xlu2 %v5622_v32 }
0x1011   : > { %v5550_v23 = vpop.xlane.xlu1 %5549 }
0x1012   : > { %vm5588_vm13 = vcmp.eq.f32.partialorder %v14017_v48, %v5550_v23 }
0x1013   : > { %v14113_v38 = vsel %vm5588_vm13, -inf, %v14017_v48 }
0x1014   : > { %v5628_v57 = vsel %vm2975_vm0, %v14113_v38, -inf }
0x1015   : > { %5629 = vmax.xlane.f32.xlu2 %v5628_v57 }
0x1021   : > { %v5553_v21 = vpop.xlane.xlu1 %5552 }
0x1022   : > { %vm5589_vm14 = vcmp.eq.f32.partialorder %v14023_v63, %v5553_v21 }
0x1023   : > { %v14119_v4 = vsel %vm5589_vm14, -inf, %v14023_v63 }
0x1024   : > { %v5631_v1 = vsel %vm2975_vm0, %v14119_v4, -inf }
0x1025   : > { %5632 = vmax.xlane.f32.xlu2 %v5631_v1 }
0x102a   : > { %v5538_v37 = vpop.xlane.xlu2 %5537  ;;  %v5541_v32 = vpop.xlane.xlu0 %5540 }
0x102b   : > { %vm5584_vm15 = vcmp.eq.f32.partialorder %v14033_v41, %v5538_v37  ;;  %vm5585_vm1 = vcmp.eq.f32.partialorder %v14030_v6, %v5541_v32 }
0x102c   : > { %v14126_v48 = vsel %vm5584_vm15, -inf, %v14033_v41  ;;  %v14129_v23 = vsel %vm5585_vm1, -inf, %v14030_v6 }
0x102d   : > { %v5616_v63 = vsel %vm2975_vm0, %v14126_v48, -inf  ;;  %v5619_v57 = vsel %vm2975_vm0, %v14129_v23, -inf }
0x102e   : > { %5617 = vmax.xlane.f32.xlu0 %v5616_v63  ;;  %5620 = vmax.xlane.f32.xlu1 %v5619_v57 }
0x1031   : > { %v5562_v21 = vpop.xlane.xlu1 %5561 }
0x1032   : > { %v5556_v1 = vpop.xlane.xlu2 %5555  ;;  %vm5592_vm2 = vcmp.eq.f32.partialorder %v14042_v49, %v5562_v21  ;;  %v5559_v37 = vpop.xlane.xlu0 %5558 }
0x1033   : > { %vm5590_vm3 = vcmp.eq.f32.partialorder %v14046_v62, %v5556_v1  ;;  %v14138_v41 = vsel %vm5592_vm2, -inf, %v14042_v49  ;;  %vm5591_vm4 = vcmp.eq.f32.partialorder %v14049_v46, %v5559_v37 }
0x1034   : > { %v14141_v6 = vsel %vm5590_vm3, -inf, %v14046_v62  ;;  %v14145_v32 = vsel %vm5591_vm4, -inf, %v14049_v46  ;;  %v5640_v63 = vsel %vm2975_vm0, %v14138_v41, -inf }
0x1035   : > { %v5634_v57 = vsel %vm2975_vm0, %v14141_v6, -inf  ;;  %5641 = vmax.xlane.f32.xlu2 %v5640_v63  ;;  %v5637_v49 = vsel %vm2975_vm0, %v14145_v32, -inf }
0x1036   : > { %5635 = vmax.xlane.f32.xlu0 %v5634_v57  ;;  %5638 = vmax.xlane.f32.xlu1 %v5637_v49 }
0x1039   : > { %v5580_v21 = vpop.xlane.xlu1 %5579 }
0x103a   : > { %v5547_v62 = vpop.xlane.xlu2 %5546  ;;  %vm5598_vm5 = vcmp.eq.f32.partialorder %v14060_v10, %v5580_v21  ;;  %v5568_v46 = vpop.xlane.xlu0 %5567 }
0x103b   : > { %vm5587_vm6 = vcmp.eq.f32.partialorder %v14064_v35, %v5547_v62  ;;  %v14156_v1 = vsel %vm5598_vm5, -inf, %v14060_v10  ;;  %vm5594_vm7 = vcmp.eq.f32.partialorder %v14067_v22, %v5568_v46 }
0x103c   : > { %v14159_v37 = vsel %vm5587_vm6, -inf, %v14064_v35  ;;  %v14163_v63 = vsel %vm5594_vm7, -inf, %v14067_v22  ;;  %v5658_v57 = vsel %vm2975_vm0, %v14156_v1, -inf }
0x103d   : > { %v5625_v49 = vsel %vm2975_vm0, %v14159_v37, -inf  ;;  %5659 = vmax.xlane.f32.xlu2 %v5658_v57  ;;  %v5646_v10 = vsel %vm2975_vm0, %v14163_v63, -inf }
0x103e   : > { %5626 = vmax.xlane.f32.xlu0 %v5625_v49  ;;  %5647 = vmax.xlane.f32.xlu1 %v5646_v10 }
0x1042   : > { %v5574_v21 = vpop.xlane.xlu2 %5573  ;;  %v5571_v35 = vpop.xlane.xlu0 %5570 }
0x1043   : > { %vm5596_vm8 = vcmp.eq.f32.partialorder %v14078_v18, %v5574_v21  ;;  %vm5595_vm9 = vcmp.eq.f32.partialorder %v14081_v12, %v5571_v35 }
0x1044   : > { %v14173_v62 = vsel %vm5596_vm8, -inf, %v14078_v18  ;;  %v14177_v22 = vsel %vm5595_vm9, -inf, %v14081_v12 }
0x1045   : > { %v5652_v46 = vsel %vm2975_vm0, %v14173_v62, -inf  ;;  %v5649_v57 = vsel %vm2975_vm0, %v14177_v22, -inf }
0x1046   : > { %5653 = vmax.xlane.f32.xlu0 %v5652_v46  ;;  %5650 = vmax.xlane.f32.xlu1 %v5649_v57 }
0x104a   : > { %v5565_v49 = vpop.xlane.xlu2 %5564  ;;  %v5577_v10 = vpop.xlane.xlu0 %5576 }
0x104b   : > { %vm5593_vm10 = vcmp.eq.f32.partialorder %v14090_v20, %v5565_v49  ;;  %vm5597_vm11 = vcmp.eq.f32.partialorder %v14093_v3, %v5577_v10 }
0x104c   : > { %v14185_v18 = vsel %vm5593_vm10, -inf, %v14090_v20  ;;  %v14189_v12 = vsel %vm5597_vm11, -inf, %v14093_v3 }
0x104d   : > { %v5643_v21 = vsel %vm2975_vm0, %v14185_v18, -inf  ;;  %v5655_v35 = vsel %vm2975_vm0, %v14189_v12, -inf }
0x104e   : > { %5644 = vmax.xlane.f32.xlu0 %v5643_v21  ;;  %5656 = vmax.xlane.f32.xlu1 %v5655_v35 }
0x1052   : > { %v5583_v46 = vpop.xlane.xlu2 %5582 }
0x1053   : > { %vm5599_vm12 = vcmp.eq.f32.partialorder %v14101_v33, %v5583_v46 }
0x1054   : > { %v14197_v57 = vsel %vm5599_vm12, -inf, %v14101_v33 }
0x1055   : > { %v5661_v20 = vsel %vm2975_vm0, %v14197_v57, -inf }
0x1056   : > { %5662 = vmax.xlane.f32.xlu0 %v5661_v20 }
0x1080   : > { %v5624_v3 = vpop.xlane.xlu2 %5623 }
0x1081   : > { %vm5666_vm13 = vcmp.eq.f32.partialorder %v14107_v0, %v5624_v3 }
0x1082   : > { %v14203_v49 = vsel %vm5666_vm13, -inf, %v14107_v0 }
0x1083   : > { %v5702_v10 = vsel %vm2975_vm0, %v14203_v49, -inf }
0x1084   : > { %5703 = vmax.xlane.f32.xlu0 %v5702_v10 }
0x1088   : > { %v5630_v21 = vpop.xlane.xlu2 %5629 }
0x1089   : > { %vm5668_vm14 = vcmp.eq.f32.partialorder %v14113_v38, %v5630_v21 }
0x108a   : > { %v14209_v33 = vsel %vm5668_vm14, -inf, %v14113_v38 }
0x108b   : > { %v5708_v35 = vsel %vm2975_vm0, %v14209_v33, -inf }
0x108c   : > { %5709 = vmax.xlane.f32.xlu0 %v5708_v35 }
0x1098   : > { %v5633_v46 = vpop.xlane.xlu2 %5632 }
0x1099   : > { %vm5669_vm15 = vcmp.eq.f32.partialorder %v14119_v4, %v5633_v46 }
0x109a   : > { %v14215_v0 = vsel %vm5669_vm15, -inf, %v14119_v4 }
0x109b   : > { %v5711_v20 = vsel %vm2975_vm0, %v14215_v0, -inf }
0x109c   : > { %5712 = vmax.xlane.f32.xlu0 %v5711_v20 }
0x10a1   : > { %v5621_v3 = vpop.xlane.xlu1 %5620  ;;  %v5618_v10 = vpop.xlane.xlu0 %5617 }
0x10a2   : > { %vm5665_vm1 = vcmp.eq.f32.partialorder %v14129_v23, %v5621_v3  ;;  %vm5664_vm2 = vcmp.eq.f32.partialorder %v14126_v48, %v5618_v10 }
0x10a3   : > { %v14222_v38 = vsel %vm5665_vm1, -inf, %v14129_v23  ;;  %v14225_v21 = vsel %vm5664_vm2, -inf, %v14126_v48 }
0x10a4   : > { %v5699_v4 = vsel %vm2975_vm0, %v14222_v38, -inf  ;;  %v5696_v35 = vsel %vm2975_vm0, %v14225_v21, -inf }
0x10a5   : > { %5700 = vmax.xlane.f32.xlu2 %v5699_v4  ;;  %5697 = vmax.xlane.f32.xlu1 %v5696_v35 }
0x10a8   : > { %v5642_v46 = vpop.xlane.xlu2 %5641 }
0x10a9   : > { %v5636_v20 = vpop.xlane.xlu0 %5635  ;;  %vm5672_vm3 = vcmp.eq.f32.partialorder %v14138_v41, %v5642_v46  ;;  %v5639_v3 = vpop.xlane.xlu1 %5638 }
0x10aa   : > { %vm5670_vm4 = vcmp.eq.f32.partialorder %v14141_v6, %v5636_v20  ;;  %v14234_v23 = vsel %vm5672_vm3, -inf, %v14138_v41  ;;  %vm5671_vm5 = vcmp.eq.f32.partialorder %v14145_v32, %v5639_v3 }
0x10ab   : > { %v14238_v48 = vsel %vm5670_vm4, -inf, %v14141_v6  ;;  %v14241_v10 = vsel %vm5671_vm5, -inf, %v14145_v32  ;;  %v5720_v4 = vsel %vm2975_vm0, %v14234_v23, -inf }
0x10ac   : > { %v5714_v35 = vsel %vm2975_vm0, %v14238_v48, -inf  ;;  %5721 = vmax.xlane.f32.xlu0 %v5720_v4  ;;  %v5717_v46 = vsel %vm2975_vm0, %v14241_v10, -inf }
0x10ad   : > { %5715 = vmax.xlane.f32.xlu1 %v5714_v35  ;;  %5718 = vmax.xlane.f32.xlu2 %v5717_v46 }
0x10b0   : > { %v5660_v41 = vpop.xlane.xlu2 %5659 }
0x10b1   : > { %v5627_v20 = vpop.xlane.xlu0 %5626  ;;  %vm5678_vm6 = vcmp.eq.f32.partialorder %v14156_v1, %v5660_v41  ;;  %v5648_v6 = vpop.xlane.xlu1 %5647 }
0x10b2   : > { %vm5667_vm7 = vcmp.eq.f32.partialorder %v14159_v37, %v5627_v20  ;;  %v14252_v32 = vsel %vm5678_vm6, -inf, %v14156_v1  ;;  %vm5674_vm8 = vcmp.eq.f32.partialorder %v14163_v63, %v5648_v6 }
0x10b3   : > { %v14256_v3 = vsel %vm5667_vm7, -inf, %v14159_v37  ;;  %v14259_v4 = vsel %vm5674_vm8, -inf, %v14163_v63  ;;  %v5738_v35 = vsel %vm2975_vm0, %v14252_v32, -inf }
0x10b4   : > { %v5705_v46 = vsel %vm2975_vm0, %v14256_v3, -inf  ;;  %5739 = vmax.xlane.f32.xlu0 %v5738_v35  ;;  %v5726_v41 = vsel %vm2975_vm0, %v14259_v4, -inf }
0x10b5   : > { %5706 = vmax.xlane.f32.xlu1 %v5705_v46  ;;  %5727 = vmax.xlane.f32.xlu2 %v5726_v41 }
0x10b9   : > { %v5654_v1 = vpop.xlane.xlu0 %5653  ;;  %v5651_v20 = vpop.xlane.xlu1 %5650 }
0x10ba   : > { %vm5676_vm9 = vcmp.eq.f32.partialorder %v14173_v62, %v5654_v1  ;;  %vm5675_vm10 = vcmp.eq.f32.partialorder %v14177_v22, %v5651_v20 }
0x10bb   : > { %v14270_v37 = vsel %vm5676_vm9, -inf, %v14173_v62  ;;  %v14273_v63 = vsel %vm5675_vm10, -inf, %v14177_v22 }
0x10bc   : > { %v5732_v6 = vsel %vm2975_vm0, %v14270_v37, -inf  ;;  %v5729_v35 = vsel %vm2975_vm0, %v14273_v63, -inf }
0x10bd   : > { %5733 = vmax.xlane.f32.xlu1 %v5732_v6  ;;  %5730 = vmax.xlane.f32.xlu2 %v5729_v35 }
0x10c1   : > { %v5645_v46 = vpop.xlane.xlu0 %5644  ;;  %v5657_v41 = vpop.xlane.xlu1 %5656 }
0x10c2   : > { %vm5673_vm11 = vcmp.eq.f32.partialorder %v14185_v18, %v5645_v46  ;;  %vm5677_vm12 = vcmp.eq.f32.partialorder %v14189_v12, %v5657_v41 }
0x10c3   : > { %v14282_v62 = vsel %vm5673_vm11, -inf, %v14185_v18  ;;  %v14285_v22 = vsel %vm5677_vm12, -inf, %v14189_v12 }
0x10c4   : > { %v5723_v1 = vsel %vm2975_vm0, %v14282_v62, -inf  ;;  %v5735_v20 = vsel %vm2975_vm0, %v14285_v22, -inf }
0x10c5   : > { %5724 = vmax.xlane.f32.xlu1 %v5723_v1  ;;  %5736 = vmax.xlane.f32.xlu2 %v5735_v20 }
0x10c9   : > { %v5663_v6 = vpop.xlane.xlu0 %5662 }
0x10ca   : > { %vm5679_vm13 = vcmp.eq.f32.partialorder %v14197_v57, %v5663_v6 }
0x10cb   : > { %v14293_v35 = vsel %vm5679_vm13, -inf, %v14197_v57 }
0x10cc   : > { %v5741_v18 = vsel %vm2975_vm0, %v14293_v35, -inf }
0x10cd   : > { %5742 = vmax.xlane.f32.xlu1 %v5741_v18 }
0x10f7   : > { %v5704_v12 = vpop.xlane.xlu0 %5703 }
0x10f8   : > { %vm5746_vm14 = vcmp.eq.f32.partialorder %v14203_v49, %v5704_v12 }
0x10f9   : > { %v14299_v46 = vsel %vm5746_vm14, -inf, %v14203_v49 }
0x10fa   : > { %v5782_v41 = vsel %vm2975_vm0, %v14299_v46, -inf }
0x10fb   : > { %5783 = vmax.xlane.f32.xlu1 %v5782_v41 }
0x10ff   : > { %v5710_v1 = vpop.xlane.xlu0 %5709 }
0x1100   : > { %vm5748_vm15 = vcmp.eq.f32.partialorder %v14209_v33, %v5710_v1 }
0x1101   : > { %v14305_v57 = vsel %vm5748_vm15, -inf, %v14209_v33 }
0x1102   : > { %v5788_v20 = vsel %vm2975_vm0, %v14305_v57, -inf }
0x1103   : > { %5789 = vmax.xlane.f32.xlu1 %v5788_v20 }
0x110f   : > { %v5713_v6 = vpop.xlane.xlu0 %5712 }
0x1110   : > { %vm5749_vm1 = vcmp.eq.f32.partialorder %v14215_v0, %v5713_v6 }
0x1111   : > { %v14311_v49 = vsel %vm5749_vm1, -inf, %v14215_v0 }
0x1112   : > { %v5791_v18 = vsel %vm2975_vm0, %v14311_v49, -inf }
0x1113   : > { %5792 = vmax.xlane.f32.xlu1 %v5791_v18 }
0x1118   : > { %v5701_v12 = vpop.xlane.xlu2 %5700  ;;  %v5698_v41 = vpop.xlane.xlu1 %5697 }
0x1119   : > { %vm5745_vm2 = vcmp.eq.f32.partialorder %v14222_v38, %v5701_v12  ;;  %vm5744_vm3 = vcmp.eq.f32.partialorder %v14225_v21, %v5698_v41 }
0x111a   : > { %v14318_v33 = vsel %vm5745_vm2, -inf, %v14222_v38  ;;  %v14321_v1 = vsel %vm5744_vm3, -inf, %v14225_v21 }
0x111b   : > { %v5779_v0 = vsel %vm2975_vm0, %v14318_v33, -inf  ;;  %v5776_v20 = vsel %vm2975_vm0, %v14321_v1, -inf }
0x111c   : > { %5780 = vmax.xlane.f32.xlu0 %v5779_v0  ;;  %5777 = vmax.xlane.f32.xlu2 %v5776_v20 }
0x111f   : > { %v5722_v6 = vpop.xlane.xlu0 %5721 }
0x1120   : > { %v5716_v18 = vpop.xlane.xlu1 %5715  ;;  %vm5752_vm4 = vcmp.eq.f32.partialorder %v14234_v23, %v5722_v6  ;;  %v5719_v12 = vpop.xlane.xlu2 %5718 }
0x1121   : > { %vm5750_vm5 = vcmp.eq.f32.partialorder %v14238_v48, %v5716_v18  ;;  %v14330_v38 = vsel %vm5752_vm4, -inf, %v14234_v23  ;;  %vm5751_vm6 = vcmp.eq.f32.partialorder %v14241_v10, %v5719_v12 }
0x1122   : > { %v14334_v21 = vsel %vm5750_vm5, -inf, %v14238_v48  ;;  %v14337_v41 = vsel %vm5751_vm6, -inf, %v14241_v10  ;;  %v5800_v0 = vsel %vm2975_vm0, %v14330_v38, -inf }
0x1123   : > { %v5794_v20 = vsel %vm2975_vm0, %v14334_v21, -inf  ;;  %5801 = vmax.xlane.f32.xlu1 %v5800_v0  ;;  %v5797_v6 = vsel %vm2975_vm0, %v14337_v41, -inf }
0x1124   : > { %5795 = vmax.xlane.f32.xlu2 %v5794_v20  ;;  %5798 = vmax.xlane.f32.xlu0 %v5797_v6 }
0x1127   : > { %v5740_v23 = vpop.xlane.xlu0 %5739 }
0x1128   : > { %v5707_v18 = vpop.xlane.xlu1 %5706  ;;  %vm5758_vm7 = vcmp.eq.f32.partialorder %v14252_v32, %v5740_v23  ;;  %v5728_v48 = vpop.xlane.xlu2 %5727 }
0x1129   : > { %vm5747_vm8 = vcmp.eq.f32.partialorder %v14256_v3, %v5707_v18  ;;  %v14348_v10 = vsel %vm5758_vm7, -inf, %v14252_v32  ;;  %vm5754_vm9 = vcmp.eq.f32.partialorder %v14259_v4, %v5728_v48 }
0x112a   : > { %v14352_v12 = vsel %vm5747_vm8, -inf, %v14256_v3  ;;  %v14355_v0 = vsel %vm5754_vm9, -inf, %v14259_v4  ;;  %v5818_v20 = vsel %vm2975_vm0, %v14348_v10, -inf }
0x112b   : > { %v5785_v6 = vsel %vm2975_vm0, %v14352_v12, -inf  ;;  %5819 = vmax.xlane.f32.xlu1 %v5818_v20  ;;  %v5806_v23 = vsel %vm2975_vm0, %v14355_v0, -inf }
0x112c   : > { %5786 = vmax.xlane.f32.xlu2 %v5785_v6  ;;  %5807 = vmax.xlane.f32.xlu0 %v5806_v23 }
0x1130   : > { %v5734_v32 = vpop.xlane.xlu1 %5733  ;;  %v5731_v18 = vpop.xlane.xlu2 %5730 }
0x1131   : > { %vm5756_vm10 = vcmp.eq.f32.partialorder %v14270_v37, %v5734_v32  ;;  %vm5755_vm11 = vcmp.eq.f32.partialorder %v14273_v63, %v5731_v18 }
0x1132   : > { %v14366_v3 = vsel %vm5756_vm10, -inf, %v14270_v37  ;;  %v14369_v4 = vsel %vm5755_vm11, -inf, %v14273_v63 }
0x1133   : > { %v5812_v48 = vsel %vm2975_vm0, %v14366_v3, -inf  ;;  %v5809_v20 = vsel %vm2975_vm0, %v14369_v4, -inf }
0x1134   : > { %5813 = vmax.xlane.f32.xlu2 %v5812_v48  ;;  %5810 = vmax.xlane.f32.xlu0 %v5809_v20 }
0x1138   : > { %v5725_v6 = vpop.xlane.xlu1 %5724  ;;  %v5737_v23 = vpop.xlane.xlu2 %5736 }
0x1139   : > { %vm5753_vm12 = vcmp.eq.f32.partialorder %v14282_v62, %v5725_v6  ;;  %vm5757_vm13 = vcmp.eq.f32.partialorder %v14285_v22, %v5737_v23 }
0x113a   : > { %v14378_v37 = vsel %vm5753_vm12, -inf, %v14282_v62  ;;  %v14381_v63 = vsel %vm5757_vm13, -inf, %v14285_v22 }
0x113b   : > { %v5803_v32 = vsel %vm2975_vm0, %v14378_v37, -inf  ;;  %v5815_v18 = vsel %vm2975_vm0, %v14381_v63, -inf }
0x113c   : > { %5804 = vmax.xlane.f32.xlu2 %v5803_v32  ;;  %5816 = vmax.xlane.f32.xlu0 %v5815_v18 }
0x1140   : > { %v5743_v48 = vpop.xlane.xlu1 %5742 }
0x1141   : > { %vm5759_vm14 = vcmp.eq.f32.partialorder %v14293_v35, %v5743_v48 }
0x1142   : > { %v14389_v20 = vsel %vm5759_vm14, -inf, %v14293_v35 }
0x1143   : > { %v5821_v62 = vsel %vm2975_vm0, %v14389_v20, -inf }
0x1144   : > { %5822 = vmax.xlane.f32.xlu2 %v5821_v62 }
0x116e   : > { %v5784_v22 = vpop.xlane.xlu1 %5783 }
0x116f   : > { %vm5826_vm15 = vcmp.eq.f32.partialorder %v14299_v46, %v5784_v22 }
0x1170   : > { %v14395_v6 = vsel %vm5826_vm15, -inf, %v14299_v46 }
0x1171   : > { %v5862_v23 = vsel %vm2975_vm0, %v14395_v6, -inf }
0x1172   : > { %5863 = vmax.xlane.f32.xlu2 %v5862_v23 }
0x1176   : > { %v5790_v32 = vpop.xlane.xlu1 %5789 }
0x1177   : > { %vm5828_vm1 = vcmp.eq.f32.partialorder %v14305_v57, %v5790_v32 }
0x1178   : > { %v14401_v35 = vsel %vm5828_vm1, -inf, %v14305_v57 }
0x1179   : > { %v5868_v18 = vsel %vm2975_vm0, %v14401_v35, -inf }
0x117a   : > { %5869 = vmax.xlane.f32.xlu2 %v5868_v18 }
0x1186   : > { %v5793_v48 = vpop.xlane.xlu1 %5792 }
0x1187   : > { %vm5829_vm2 = vcmp.eq.f32.partialorder %v14311_v49, %v5793_v48 }
0x1188   : > { %v14407_v46 = vsel %vm5829_vm2, -inf, %v14311_v49 }
0x1189   : > { %v5871_v62 = vsel %vm2975_vm0, %v14407_v46, -inf }
0x118a   : > { %5872 = vmax.xlane.f32.xlu2 %v5871_v62 }
0x118f   : > { %v5778_v22 = vpop.xlane.xlu2 %5777  ;;  %v5781_v23 = vpop.xlane.xlu0 %5780 }
0x1190   : > { %vm5824_vm3 = vcmp.eq.f32.partialorder %v14321_v1, %v5778_v22  ;;  %vm5825_vm4 = vcmp.eq.f32.partialorder %v14318_v33, %v5781_v23 }
0x1191   : > { %v14414_v57 = vsel %vm5824_vm3, -inf, %v14321_v1  ;;  %v14417_v32 = vsel %vm5825_vm4, -inf, %v14318_v33 }
0x1192   : > { %v5856_v49 = vsel %vm2975_vm0, %v14414_v57, -inf  ;;  %v5859_v18 = vsel %vm2975_vm0, %v14417_v32, -inf }
0x1193   : > { %5857 = vmax.xlane.f32.xlu0 %v5856_v49  ;;  %5860 = vmax.xlane.f32.xlu1 %v5859_v18 }
0x1196   : > { %v5802_v48 = vpop.xlane.xlu1 %5801 }
0x1197   : > { %v5796_v62 = vpop.xlane.xlu2 %5795  ;;  %vm5832_vm5 = vcmp.eq.f32.partialorder %v14330_v38, %v5802_v48  ;;  %v5799_v22 = vpop.xlane.xlu0 %5798 }
0x1198   : > { %vm5830_vm6 = vcmp.eq.f32.partialorder %v14334_v21, %v5796_v62  ;;  %v14426_v1 = vsel %vm5832_vm5, -inf, %v14330_v38  ;;  %vm5831_vm7 = vcmp.eq.f32.partialorder %v14337_v41, %v5799_v22 }
0x1199   : > { %v14429_v33 = vsel %vm5830_vm6, -inf, %v14334_v21  ;;  %v14433_v23 = vsel %vm5831_vm7, -inf, %v14337_v41  ;;  %v5880_v49 = vsel %vm2975_vm0, %v14426_v1, -inf }
0x119a   : > { %v5874_v18 = vsel %vm2975_vm0, %v14429_v33, -inf  ;;  %5881 = vmax.xlane.f32.xlu2 %v5880_v49  ;;  %v5877_v38 = vsel %vm2975_vm0, %v14433_v23, -inf }
0x119b   : > { %5875 = vmax.xlane.f32.xlu0 %v5874_v18  ;;  %5878 = vmax.xlane.f32.xlu1 %v5877_v38 }
0x119e   : > { %v5820_v48 = vpop.xlane.xlu1 %5819 }
0x119f   : > { %v5787_v21 = vpop.xlane.xlu2 %5786  ;;  %vm5838_vm8 = vcmp.eq.f32.partialorder %v14348_v10, %v5820_v48  ;;  %v5808_v41 = vpop.xlane.xlu0 %5807 }
0x11a0   : > { %vm5827_vm9 = vcmp.eq.f32.partialorder %v14352_v12, %v5787_v21  ;;  %v14444_v62 = vsel %vm5838_vm8, -inf, %v14348_v10  ;;  %vm5834_vm10 = vcmp.eq.f32.partialorder %v14355_v0, %v5808_v41 }
0x11a1   : > { %v14447_v22 = vsel %vm5827_vm9, -inf, %v14352_v12  ;;  %v14451_v49 = vsel %vm5834_vm10, -inf, %v14355_v0  ;;  %v5898_v18 = vsel %vm2975_vm0, %v14444_v62, -inf }
0x11a2   : > { %v5865_v38 = vsel %vm2975_vm0, %v14447_v22, -inf  ;;  %5899 = vmax.xlane.f32.xlu2 %v5898_v18  ;;  %v5886_v10 = vsel %vm2975_vm0, %v14451_v49, -inf }
0x11a3   : > { %5866 = vmax.xlane.f32.xlu0 %v5865_v38  ;;  %5887 = vmax.xlane.f32.xlu1 %v5886_v10 }
0x11a7   : > { %v5814_v48 = vpop.xlane.xlu2 %5813  ;;  %v5811_v12 = vpop.xlane.xlu0 %5810 }
0x11a8   : > { %vm5836_vm11 = vcmp.eq.f32.partialorder %v14366_v3, %v5814_v48  ;;  %vm5835_vm12 = vcmp.eq.f32.partialorder %v14369_v4, %v5811_v12 }
0x11a9   : > { %v14461_v21 = vsel %vm5836_vm11, -inf, %v14366_v3  ;;  %v14465_v0 = vsel %vm5835_vm12, -inf, %v14369_v4 }
0x11aa   : > { %v5892_v41 = vsel %vm2975_vm0, %v14461_v21, -inf  ;;  %v5889_v18 = vsel %vm2975_vm0, %v14465_v0, -inf }
0x11ab   : > { %5893 = vmax.xlane.f32.xlu0 %v5892_v41  ;;  %5890 = vmax.xlane.f32.xlu1 %v5889_v18 }
0x11af   : > { %v5805_v38 = vpop.xlane.xlu2 %5804  ;;  %v5817_v10 = vpop.xlane.xlu0 %5816 }
0x11b0   : > { %vm5833_vm13 = vcmp.eq.f32.partialorder %v14378_v37, %v5805_v38  ;;  %vm5837_vm14 = vcmp.eq.f32.partialorder %v14381_v63, %v5817_v10 }
0x11b1   : > { %v14473_v3 = vsel %vm5833_vm13, -inf, %v14378_v37  ;;  %v14477_v4 = vsel %vm5837_vm14, -inf, %v14381_v63 }
0x11b2   : > { %v5883_v48 = vsel %vm2975_vm0, %v14473_v3, -inf  ;;  %v5895_v12 = vsel %vm2975_vm0, %v14477_v4, -inf }
0x11b3   : > { %5884 = vmax.xlane.f32.xlu0 %v5883_v48  ;;  %5896 = vmax.xlane.f32.xlu1 %v5895_v12 }
0x11b7   : > { %v5823_v41 = vpop.xlane.xlu2 %5822 }
0x11b8   : > { %vm5839_vm15 = vcmp.eq.f32.partialorder %v14389_v20, %v5823_v41 }
0x11b9   : > { %v14485_v18 = vsel %vm5839_vm15, -inf, %v14389_v20 }
0x11ba   : > { %v5901_v37 = vsel %vm2975_vm0, %v14485_v18, -inf }
0x11bb   : > { %5902 = vmax.xlane.f32.xlu0 %v5901_v37 }
0x11e5   : > { %v5864_v63 = vpop.xlane.xlu2 %5863 }
0x11e6   : > { %vm5906_vm1 = vcmp.eq.f32.partialorder %v14395_v6, %v5864_v63 }
0x11e7   : > { %v5922_v38 = vsel %vm5906_vm1, -inf, %v14395_v6 }
0x11e8   : > { %v5942_v10 = vsel %vm2975_vm0, %v5922_v38, -inf }
0x11e9   : > { %5943 = vmax.xlane.f32.xlu0 %v5942_v10 }
0x11ed   : > { %v5870_v48 = vpop.xlane.xlu2 %5869 }
0x11ee   : > { %vm5908_vm6 = vcmp.eq.f32.partialorder %v14401_v35, %v5870_v48 }
0x11fd   : > { %v5873_v12 = vpop.xlane.xlu2 %5872 }
0x11fe   : > { %vm5909_vm2 = vcmp.eq.f32.partialorder %v14407_v46, %v5873_v12 }
0x11ff   : > { %v5925_v41 = vsel %vm5909_vm2, -inf, %v14407_v46 }
0x1200   : > { %v5951_v20 = vsel %vm2975_vm0, %v5925_v41, -inf }
0x1201   : > { %5952 = vmax.xlane.f32.xlu0 %v5951_v20 }
0x1206   : > { %v5861_v7 = vpop.xlane.xlu1 %5860  ;;  %v5858_v2 = vpop.xlane.xlu0 %5857 }
0x1207   : > { %vm5904_vm3 = vcmp.eq.f32.partialorder %v14414_v57, %v5858_v2  ;;  %vm5905_vm11 = vcmp.eq.f32.partialorder %v14417_v32, %v5861_v7  ;;  %v15774_v7 = vpack.i.bf16 %v11457_v11, %v11430_v50 }
0x1208   : > { %v5920_v37 = vsel %vm5904_vm3, -inf, %v14414_v57  ;;  %v5924_v57 = vsel %vm5908_vm6, -inf, %v14401_v35 }
0x1209   : > { %v5936_v6 = vsel %vm2975_vm0, %v5920_v37, -inf }
0x120a   : > { %5937 = vmax.xlane.f32.xlu1 %v5936_v6 }
0x120d   : > { %v5882_v63 = vpop.xlane.xlu2 %5881 }
0x120e   : > { %v5876_v38 = vpop.xlane.xlu0 %5875  ;;  %v5879_v10 = vpop.xlane.xlu1 %5878  ;;  %vm5912_vm10 = vcmp.eq.f32.partialorder %v14426_v1, %v5882_v63 }
0x120f   : > { %vm5910_vm4 = vcmp.eq.f32.partialorder %v14429_v33, %v5876_v38  ;;  %vm5911_vm5 = vcmp.eq.f32.partialorder %v14433_v23, %v5879_v10  ;;  %v5948_v10 = vsel %vm2975_vm0, %v5924_v57, -inf }
0x1210   : > { %v5926_v46 = vsel %vm5910_vm4, -inf, %v14429_v33  ;;  %v5927_v12 = vsel %vm5911_vm5, -inf, %v14433_v23 }
0x1211   : > { %v5954_v41 = vsel %vm2975_vm0, %v5926_v46, -inf  ;;  %v5957_v2 = vsel %vm2975_vm0, %v5927_v12, -inf  ;;  %v5928_v46 = vsel %vm5912_vm10, -inf, %v14426_v1 }
0x1212   : > { %5955 = vmax.xlane.f32.xlu1 %v5954_v41  ;;  %5958 = vmax.xlane.f32.xlu2 %v5957_v2  ;;  %v5960_v12 = vsel %vm2975_vm0, %v5928_v46, -inf  ;;  %v5921_v41 = vsel %vm5905_vm11, -inf, %v14417_v32 }
0x1213   : > { %v5939_v57 = vsel %vm2975_vm0, %v5921_v41, -inf }
0x1215   : > { %v5900_v20 = vpop.xlane.xlu2 %5899 }
0x1216   : > { %v5867_v37 = vpop.xlane.xlu0 %5866  ;;  %vm5918_vm7 = vcmp.eq.f32.partialorder %v14444_v62, %v5900_v20  ;;  %v5888_v6 = vpop.xlane.xlu1 %5887 }
0x1217   : > { %v5934_v38 = vsel %vm5918_vm7, -inf, %v14444_v62  ;;  %vm5914_vm8 = vcmp.eq.f32.partialorder %v14451_v49, %v5888_v6  ;;  %vm5907_vm9 = vcmp.eq.f32.partialorder %v14447_v22, %v5867_v37 }
0x1218   : > { %v5930_v33 = vsel %vm5914_vm8, -inf, %v14451_v49  ;;  %v5978_v23 = vsel %vm2975_vm0, %v5934_v38, -inf  ;;  %v5923_v35 = vsel %vm5907_vm9, -inf, %v14447_v22 }
0x1219   : > { %5979 = vmax.xlane.f32.xlu0 %v5978_v23  ;;  %v5966_v48 = vsel %vm2975_vm0, %v5930_v33, -inf  ;;  %v5945_v49 = vsel %vm2975_vm0, %v5923_v35, -inf  ;;  %v6002_v33 = vsub.f32 %v11493_v52, %v11561_v47  ;;  %v6006_v47 = vsub.f32 %v11511_v58, %v11585_v26 }
0x121a   : > { %5949 = vmax.xlane.f32.xlu1 %v5948_v10  ;;  %5967 = vmax.xlane.f32.xlu2 %v5966_v48  ;;  %v6003_v26 = vsub.f32 %v11505_v14, %v11579_v17 }
0x121b   : > { %v6020_v50 = vmul.f32 1.442695, %v6002_v33  ;;  %v6028_v35 = vmul.f32 1.442695, %v6006_v47 }
0x121d   : > { %7546 = vpow2.f32 %v6020_v50 }
0x121e   : > { %v5894_v62 = vpop.xlane.xlu0 %5893  ;;  %v5891_v22 = vpop.xlane.xlu1 %5890  ;;  %7548 = vpow2.f32 %v6028_v35  ;;  %v6001_v35 = vsub.f32 %v11521_v28, %v11596_v15  ;;  %v7516_v15 = vpack.i.bf16 %v11434_v36, %v11441_v25  ;;  %v6008_v25 = vsub.f32 %v11529_v19, %v11614_v27 }
0x121f   : > { %vm5916_vm12 = vcmp.eq.f32.partialorder %v14461_v21, %v5894_v62  ;;  %vm5915_vm13 = vcmp.eq.f32.partialorder %v14465_v0, %v5891_v22  ;;  %v15776_v27 = vpack.i.bf16 %v11375_v55, %v11377_v44 }
0x1220   : > { %v5932_v63 = vsel %vm5916_vm12, -inf, %v14461_v21  ;;  %v5931_v32 = vsel %vm5915_vm13, -inf, %v14465_v0 }
0x1221   : > { %v5972_v1 = vsel %vm2975_vm0, %v5932_v63, -inf  ;;  %v5969_v6 = vsel %vm2975_vm0, %v5931_v32, -inf }
0x1222   : > { %5946 = vmax.xlane.f32.xlu1 %v5945_v49  ;;  %5961 = vmax.xlane.f32.xlu2 %v5960_v12 }
0x1223   : > { %v7547_v23 = vpop.eup %7546 }
0x1224   : > { %v7549_v12 = vpop.eup %7548 }
0x1226   : > { %v14522_v2 = vpop.xlane.xlu0 %5884  ;;  %v5897_v38 = vpop.xlane.xlu1 %5896 }
0x1227   : > { %vm5917_vm15 = vcmp.eq.f32.partialorder %v14477_v4, %v5897_v38  ;;  %vm5913_vm8 = vcmp.eq.f32.partialorder %v14473_v3, %v14522_v2 }
0x1228   : > { %v5933_v11 = vsel %vm5917_vm15, -inf, %v14477_v4  ;;  %v15775_v4 = vpack.i.bf16 %v11449_v8, %v11432_v51  ;;  %v6022_v8 = vmul.f32 1.442695, %v6003_v26 }
0x1229   : > { %v5975_v0 = vsel %vm2975_vm0, %v5933_v11, -inf }
0x122a   : > { %5940 = vmax.xlane.f32.xlu1 %v5939_v57  ;;  %5973 = vmax.xlane.f32.xlu2 %v5972_v1 }
0x122d   : > { %7507 = vrot.lane.b32.xlu0 %v15774_v7, %s7740_s19 }
0x122e   : > { %v5903_v20 = vpop.xlane.xlu0 %5902 }
0x122f   : > { %vm5919_vm14 = vcmp.eq.f32.partialorder %v14485_v18, %v5903_v20 }
0x1230   : > { %v5935_v21 = vsel %vm5919_vm14, -inf, %v14485_v18 }
0x1231   : > { %v5981_v37 = vsel %vm2975_vm0, %v5935_v21, -inf }
0x1232   : > { %5982 = vmax.xlane.f32.xlu1 %v5981_v37  ;;  %5970 = vmax.xlane.f32.xlu2 %v5969_v6 }
0x1257   : > { %5976 = vmax.xlane.f32.xlu0 %v5975_v0 }
0x125c   : > { %v5944_v18 = vpop.xlane.xlu0 %5943 }
0x125d   : > { %vm5986_vm1 = vcmp.ge.f32.partialorder %v11493_v52, %v5944_v18  ;;  %v6010_v52 = vsub.f32 %v11517_v42, %v11592_v45  ;;  %v6007_v45 = vsub.f32 %v11531_v34, %v11618_v30  ;;  %v6014_v30 = vsub.f32 %v11533_v40, %v11620_v31 }
0x125e   : > { %v14543_v10 = vsel %vm5986_vm1, %v7547_v23, 0.0  ;;  %v6004_v18 = vsub.f32 %v11500_v13, %v11570_v60 }
0x125f   : > { %v6070_v48 = vsel %vm2975_vm0, %v14543_v10, 0.0  ;;  %v6036_v46 = vmul.f32 1.442695, %v6010_v52  ;;  %v6030_v20 = vmul.f32 1.442695, %v6007_v45  ;;  %v5929_v45 = vsel %vm5913_vm8, -inf, %v14473_v3 }
0x1260   : > { %6071 = vadd.xlane.f32.xlu2 %v6070_v48  ;;  %v6044_v33 = vmul.f32 1.442695, %v6014_v30 }
0x1261   : > { %7550 = vpow2.f32 %v6036_v46 }
0x1262   : > { %7552 = vpow2.f32 %v6022_v8 }
0x1263   : > { %7554 = vpow2.f32 %v6030_v20 }
0x1264   : > { %7556 = vpow2.f32 %v6044_v33 }
0x1267   : > { %v7551_v1 = vpop.eup %7550 }
0x1268   : > { %v7553_v21 = vpop.eup %7552 }
0x1269   : > { %v7555_v11 = vpop.eup %7554 }
0x1278   : > { %7512 = vrot.lane.b32.xlu2 %v15775_v4, %s7740_s19  ;;  %v7557_v4 = vpop.eup %7556 }
0x127d   : > { %v14553_v62 = vpop.xlane.xlu1 %5937 }
0x127e   : > { %vm5984_vm1 = vcmp.ge.f32.partialorder %v11519_v9, %v14553_v62 }
0x1285   : > { %v5956_v49 = vpop.xlane.xlu1 %5955  ;;  %v5959_v41 = vpop.xlane.xlu2 %5958 }
0x1286   : > { %vm5990_vm2 = vcmp.ge.f32.partialorder %v11511_v58, %v5956_v49  ;;  %v14569_v58 = vpop.xlane.xlu0 %5952  ;;  %vm5991_vm5 = vcmp.ge.f32.partialorder %v11531_v34, %v5959_v41  ;;  %v6024_v34 = vmul.f32 1.442695, %v6004_v18 }
0x1287   : > { %v14558_v63 = vsel %vm5990_vm2, %v7549_v12, 0.0  ;;  %v14587_v31 = vsel %vm5991_vm5, %v7555_v11, 0.0  ;;  %v6011_v12 = vsub.f32 %v11543_v16, %v11653_v54  ;;  %v6005_v54 = vsub.f32 %v11509_v61, %v11581_v59 }
0x1288   : > { %v6082_v51 = vsel %vm2975_vm0, %v14558_v63, 0.0  ;;  %v6085_v23 = vsel %vm2975_vm0, %v14587_v31, 0.0  ;;  %vm5989_vm12 = vcmp.ge.f32.partialorder %v11509_v61, %v14569_v58 }
0x1289   : > { %6083 = vadd.xlane.f32.xlu1 %v6082_v51  ;;  %v6018_v51 = vmul.f32 1.442695, %v6001_v35  ;;  %v6038_v8 = vmul.f32 1.442695, %v6011_v12 }
0x128d   : > { %v14564_v22 = vpop.xlane.xlu1 %5949  ;;  %v5968_v57 = vpop.xlane.xlu2 %5967 }
0x128e   : > { %vm5994_vm3 = vcmp.ge.f32.partialorder %v11517_v42, %v5968_v57  ;;  %v6015_v42 = vsub.f32 %v11557_v43, %v11692_v29  ;;  %v5980_v6 = vpop.xlane.xlu0 %5979  ;;  %vm5988_vm9 = vcmp.ge.f32.partialorder %v11500_v13, %v14564_v22  ;;  %v5963_v13 = vsel %vm2975_vm0, %v5929_v45, -inf }
0x128f   : > { %v14571_v7 = vsel %vm5994_vm3, %v7551_v1, 0.0  ;;  %vm5998_vm6 = vcmp.ge.f32.partialorder %v11533_v40, %v5980_v6  ;;  %v6026_v22 = vmul.f32 1.442695, %v6005_v54  ;;  %v6032_v1 = vmul.f32 1.442695, %v6008_v25 }
0x1290   : > { %v6094_v17 = vsel %vm2975_vm0, %v14571_v7, 0.0  ;;  %v6046_v0 = vmul.f32 1.442695, %v6015_v42  ;;  %v14596_v52 = vsel %vm5998_vm6, %v7557_v4, 0.0  ;;  %v6013_v42 = vsub.f32 %v11551_v5, %v11676_v24 }
0x1291   : > { %6095 = vadd.xlane.f32.xlu1 %v6094_v17  ;;  %v6106_v26 = vsel %vm2975_vm0, %v14596_v52, 0.0  ;;  %v6000_v24 = vsub.f32 %v11519_v9, %v11594_v53 }
0x1292   : > { %7558 = vpow2.f32 %v6046_v0  ;;  %v6042_v61 = vmul.f32 1.442695, %v6013_v42 }
0x1293   : > { %7560 = vpow2.f32 %v6024_v34 }
0x1294   : > { %7562 = vpow2.f32 %v6018_v51 }
0x1295   : > { %v5947_v32 = vpop.xlane.xlu1 %5946  ;;  %v14585_v50 = vpop.xlane.xlu2 %5961  ;;  %7564 = vpow2.f32 %v6038_v8 }
0x1296   : > { %vm5987_vm4 = vcmp.ge.f32.partialorder %v11505_v14, %v5947_v32  ;;  %7566 = vpow2.f32 %v6026_v22  ;;  %v6012_v32 = vsub.f32 %v11541_v56, %v11645_v39  ;;  %vm5992_vm13 = vcmp.ge.f32.partialorder %v11529_v19, %v14585_v50 }
0x1297   : > { %v14578_v37 = vsel %vm5987_vm4, %v7553_v21, 0.0  ;;  %7568 = vpow2.f32 %v6032_v1 }
0x1298   : > { %v6073_v38 = vsel %vm2975_vm0, %v14578_v37, 0.0  ;;  %v7559_v49 = vpop.eup %7558  ;;  %v6040_v55 = vmul.f32 1.442695, %v6012_v32 }
0x1299   : > { %6074 = vadd.xlane.f32.xlu0 %v6073_v38 }
0x129a   : > { %7570 = vpow2.f32 %v6040_v55 }
0x129b   : > { %7572 = vpow2.f32 %v6042_v61 }
0x129d   : > { %v5941_v14 = vpop.xlane.xlu1 %5940  ;;  %v5974_v60 = vpop.xlane.xlu2 %5973 }
0x129e   : > { %vm5985_vm10 = vcmp.ge.f32.partialorder %v11521_v28, %v5941_v14  ;;  %vm5996_vm14 = vcmp.ge.f32.partialorder %v11541_v56, %v5974_v60  ;;  %v6016_v14 = vmul.f32 1.442695, %v6000_v24 }
0x129f   : > { %v7508_v29 = vpop.permute.xlu0 %7507 }
0x12a0   : > { %v7510_v48 = vunpack.i.h.bf16 %v7508_v29  ;;  %v7509_v47 = vunpack.i.l.bf16 %v7508_v29  ;;  %7574 = vpow2.f32 %v6016_v14 }
0x12a1   : > { %6086 = vadd.xlane.f32.xlu0 %v6085_v23 }
0x12a2   : > { %6402 = vmatpush.msrb.mxu1 %v7509_v47  ;;  %6494 = vmatpush.msrb.mxu3 %v7510_v48 }
0x12a5   : > { %v5983_v46 = vpop.xlane.xlu1 %5982  ;;  %v5971_v57 = vpop.xlane.xlu2 %5970 }
0x12a6   : > { %vm5999_vm7 = vcmp.ge.f32.partialorder %v11557_v43, %v5983_v46  ;;  %v7561_v43 = vpop.eup %7560  ;;  %vm5995_vm11 = vcmp.ge.f32.partialorder %v11543_v16, %v5971_v57 }
0x12a7   : > { %v14601_v41 = vsel %vm5999_vm7, %v7559_v49, 0.0  ;;  %v14617_v36 = vsel %vm5988_vm9, %v7561_v43, 0.0  ;;  %v7563_v59 = vpop.eup %7562 }
0x12a8   : > { %v6109_v40 = vsel %vm2975_vm0, %v14601_v41, 0.0  ;;  %v6076_v2 = vsel %vm2975_vm0, %v14617_v36, 0.0  ;;  %v7565_v3 = vpop.eup %7564  ;;  %v14630_v17 = vsel %vm5985_vm10, %v7563_v59, 0.0 }
0x12a9   : > { %6110 = vadd.xlane.f32.xlu2 %v6109_v40  ;;  %6107 = vadd.xlane.f32.xlu0 %v6106_v26  ;;  %v14632_v20 = vsel %vm5995_vm11, %v7565_v3, 0.0  ;;  %v6067_v28 = vsel %vm2975_vm0, %v14630_v17, 0.0  ;;  %v7567_v44 = vpop.eup %7566  ;;  %v15777_v40 = vld [vmem:[#allocation8_spill] sm:$0xff]  ;;  %v15778_v26 = vld [vmem:[#allocation31_spill] sm:$0xff] }
0x12aa   : > { %7517 = vrot.lane.b32.xlu1 %v7516_v15, %s7740_s19  ;;  %v6097_v16 = vsel %vm2975_vm0, %v14632_v20, 0.0  ;;  %v7569_v21 = vpop.eup %7568  ;;  %v14644_v30 = vsel %vm5989_vm12, %v7567_v44, 0.0  ;;  %v6009_v15 = vsub.f32 %v15778_v26, %v15777_v40  ;;  %v6796_v40 = vld [vmem:[%s15606_s9 + $0x7e0] sm:$0xff] }
0x12ab   : > { %v14646_v39 = vsel %vm5992_vm13, %v7569_v21, 0.0  ;;  %v6079_v38 = vsel %vm2975_vm0, %v14644_v30, 0.0  ;;  %v7571_v19 = vpop.eup %7570 }
0x12ac   : > { %v6088_v6 = vsel %vm2975_vm0, %v14646_v39, 0.0  ;;  %v14655_v58 = vsel %vm5996_vm14, %v7571_v19, 0.0  ;;  %v7573_v11 = vpop.eup %7572  ;;  %v6034_v8 = vmul.f32 1.442695, %v6009_v15  ;;  %v6792_v15 = vld [vmem:[%s15606_s9 + $0x7c0] sm:$0xff] }
0x12ad   : > { %v6100_v33 = vsel %vm2975_vm0, %v14655_v58, 0.0  ;;  %v7575_v29 = vpop.eup %7574 }
0x12ae   : > { %v14668_v23 = vsel %vm5984_vm1, %v7575_v29, 0.0 }
0x12af   : > { %v6064_v4 = vsel %vm2975_vm0, %v14668_v23, 0.0 }
0x12b1   : > { %6077 = vadd.xlane.f32.xlu2 %v6076_v2  ;;  %5964 = vmax.xlane.f32.xlu0 %v5963_v13 }
0x12b2   : > { %7522 = vrot.lane.b32.xlu1 %v15776_v27, %s7740_s19 }
0x12b9   : > { %6068 = vadd.xlane.f32.xlu2 %v6067_v28  ;;  %6098 = vadd.xlane.f32.xlu0 %v6097_v16 }
0x12c1   : > { %6089 = vadd.xlane.f32.xlu2 %v6088_v6  ;;  %6080 = vadd.xlane.f32.xlu0 %v6079_v38 }
0x12c9   : > { %6101 = vadd.xlane.f32.xlu0 %v6100_v33 }
0x12ca   : > { %v5977_v50 = vpop.xlane.xlu0 %5976 }
0x12cb   : > { %vm5997_vm15 = vcmp.ge.f32.partialorder %v11551_v5, %v5977_v50 }
0x12cc   : > { %v14662_v0 = vsel %vm5997_vm15, %v7573_v11, 0.0 }
0x12cd   : > { %v6103_v56 = vsel %vm2975_vm0, %v14662_v0, 0.0 }
0x12d1   : > { %6104 = vadd.xlane.f32.xlu0 %v6103_v56 }
0x12d3   : > { %v6072_v18 = vpop.xlane.xlu2 %6071 }
0x12d4   : > { %7576 = vrcp.f32 %v6072_v18 }
0x12da   : > { %v7577_v53 = vpop.eup %7576 }
0x12db   : > { %v6130_v48 = vmul.f32 %v7577_v53, %v14543_v10  ;;  %v7513_v5 = vpop.permute.xlu2 %7512 }
0x12dc   : > { %v7515_v47 = vunpack.i.h.bf16 %v7513_v5  ;;  %v7514_v34 = vunpack.i.l.bf16 %v7513_v5  ;;  %6065 = vadd.xlane.f32.xlu1 %v6064_v4 }
0x12dd   : > { %7381 = vmatmul.msk.f32.vlgmr.msra.gmra.mxu1 %vm2975_vm0, %v6130_v48 }
0x12de   : > { %6403 = vmatpush.msrb.mxu1 %v7514_v34  ;;  %6495 = vmatpush.msrb.mxu3 %v7515_v47 }
0x12fc   : > { %v6084_v35 = vpop.xlane.xlu1 %6083 }
0x12fd   : > { %7578 = vrcp.f32 %v6084_v35 }
0x1303   : > { %v7579_v9 = vpop.eup %7578 }
0x1304   : > { %v6134_v62 = vmul.f32 %v7579_v9, %v14558_v63  ;;  %v6096_v12 = vpop.xlane.xlu1 %6095 }
0x1306   : > { %7385 = vmatmul.msk.f32.vlgmr.msra.gmra.mxu3 %vm2975_vm0, %v6134_v62 }
0x130c   : > { %v6075_v60 = vpop.xlane.xlu0 %6074 }
0x130d   : > { %7580 = vrcp.f32 %v6075_v60 }
0x1313   : > { %v7581_v10 = vpop.eup %7580 }
0x1314   : > { %v6087_v46 = vpop.xlane.xlu0 %6086  ;;  %v6131_v49 = vmul.f32 %v7581_v10, %v14578_v37 }
0x1315   : > { %7582 = vrcp.f32 %v6087_v46 }
0x1316   : > { %7382 = vmatmul.msk.f32.gmra.mxu1 %vm2975_vm0, %v6131_v49 }
0x131b   : > { %v7583_v51 = vpop.eup %7582 }
0x131c   : > { %v6111_v43 = vpop.xlane.xlu2 %6110  ;;  %v6108_v54 = vpop.xlane.xlu0 %6107  ;;  %v6135_v63 = vmul.f32 %v7583_v51, %v14587_v31  ;;  %v6660_v51 = vld [vmem:[%s15606_s9 + $0x3a0] sm:$0xff] }
0x131d   : > { %v7518_v45 = vpop.permute.xlu1 %7517  ;;  %7584 = vrcp.f32 %v6108_v54  ;;  %v6784_v54 = vld [vmem:[%s15606_s9 + $0x780] sm:$0xff] }
0x131e   : > { %v7520_v25 = vunpack.i.h.bf16 %v7518_v45  ;;  %v7519_v57 = vunpack.i.l.bf16 %v7518_v45  ;;  %7386 = vmatmul.msk.f32.gmra.mxu3 %vm2975_vm0, %v6135_v63  ;;  %7586 = vpow2.f32 %v6034_v8  ;;  %v6788_v8 = vld [vmem:[%s15606_s9 + $0x7a0] sm:$0xff] }
0x131f   : > { %7588 = vrcp.f32 %v6096_v12  ;;  %v6668_v12 = vld [vmem:[%s15606_s9 + $0x3e0] sm:$0xff] }
0x1320   : > { %6404 = vmatpush.msrb.mxu1 %v7519_v57  ;;  %6496 = vmatpush.msrb.mxu3 %v7520_v25  ;;  %7590 = vrcp.f32 %v6111_v43  ;;  %v6656_v43 = vld [vmem:[%s15606_s9 + $0x380] sm:$0xff] }
0x1321   : > { %v6652_v63 = vld [vmem:[%s15606_s9 + $0x360] sm:$0xff] }
0x1322   : > { %6879 = vmatpush.msra.mxu3 %v6796_v40  ;;  %v6780_v45 = vld [vmem:[%s15606_s9 + $0x760] sm:$0xff]  ;;  %v6785_v40 = vld [vmem:[%s15606_s9 + $0x788] sm:$0xff] }
0x1323   : > { %v7585_v37 = vpop.eup %7584  ;;  %v6648_v25 = vld [vmem:[%s15606_s9 + $0x340] sm:$0xff] }
0x1324   : > { %v6078_v2 = vpop.xlane.xlu2 %6077  ;;  %v5965_v13 = vpop.xlane.xlu0 %5964  ;;  %v6142_v1 = vmul.f32 %v7585_v37, %v14596_v52  ;;  %6880 = vmatpush.msra.mxu3 %v6792_v15  ;;  %v6776_v57 = vld [vmem:[%s15606_s9 + $0x740] sm:$0xff] }
0x1325   : > { %v7587_v22 = vpop.eup %7586  ;;  %v7523_v59 = vpop.permute.xlu1 %7522  ;;  %7592 = vrcp.f32 %v6078_v2  ;;  %vm5993_vm2 = vcmp.ge.f32.partialorder %v15778_v26, %v5965_v13  ;;  %v6664_v26 = vld [vmem:[%s15606_s9 + $0x3c0] sm:$0xff] }
0x1326   : > { %v7589_v31 = vpop.eup %7588  ;;  %v7524_v27 = vunpack.i.l.bf16 %v7523_v59  ;;  %v6057_v3 = vsel %vm5993_vm2, %v7587_v22, 0.0  ;;  %7393 = vmatmul.msk.f32.vlgmr.msrb.gmra.mxu3 %vm2975_vm0, %v6142_v1  ;;  %v7525_v28 = vunpack.i.h.bf16 %v7523_v59  ;;  %v6604_v37 = vld [vmem:[%s15606_s9 + $0x1e0] sm:$0xff] }
0x1327   : > { %v6091_v32 = vsel %vm2975_vm0, %v6057_v3, 0.0  ;;  %v6138_v16 = vmul.f32 %v7589_v31, %v14571_v7  ;;  %v7591_v55 = vpop.eup %7590  ;;  %6881 = vmatpush.msra.mxu3 %v6788_v8  ;;  %v6644_v2 = vld [vmem:[%s15606_s9 + $0x320] sm:$0xff]  ;;  %v6781_v8 = vld [vmem:[%s15606_s9 + $0x768] sm:$0xff] }
0x1328   : > { %6405 = vmatpush.msrb.mxu1 %v7524_v27  ;;  %6092 = vadd.xlane.f32.xlu2 %v6091_v32  ;;  %v6143_v42 = vmul.f32 %v7591_v55, %v14601_v41  ;;  %v6732_v13 = vld [vmem:[%s15606_s9 + $0x5e0] sm:$0xff] }
0x1329   : > { %6882 = vmatpush.msra.mxu3 %v6784_v54  ;;  %v6772_v22 = vld [vmem:[%s15606_s9 + $0x720] sm:$0xff] }
0x132a   : > { %6406 = vmatpush.msrb.mxu1 %v7525_v28  ;;  %v6600_v1 = vld [vmem:[%s15606_s9 + $0x1c0] sm:$0xff] }
0x132b   : > { %v7593_v44 = vpop.eup %7592  ;;  %7389 = vmatmul.msk.f32.vlgmr.msrb.gmra.mxu1 %vm2975_vm0, %v6138_v16  ;;  %6883 = vmatpush.msra.mxu3 %v6780_v45  ;;  %v6728_v59 = vld [vmem:[%s15606_s9 + $0x5c0] sm:$0xff]  ;;  %v6777_v45 = vld [vmem:[%s15606_s9 + $0x748] sm:$0xff] }
0x132c   : > { %v6132_v52 = vmul.f32 %v7593_v44, %v14617_v36  ;;  %v6099_v21 = vpop.xlane.xlu0 %6098  ;;  %v6069_v14 = vpop.xlane.xlu2 %6068  ;;  %6833 = vmatpush.msra.mxu1 %v6668_v12  ;;  %v6640_v31 = vld [vmem:[%s15606_s9 + $0x300] sm:$0xff]  ;;  %v6657_v12 = vld [vmem:[%s15606_s9 + $0x388] sm:$0xff] }
0x132d   : > { %7594 = vrcp.f32 %v6099_v21  ;;  %6884 = vmatpush.msra.mxu3 %v6776_v57  ;;  %v6768_v27 = vld [vmem:[%s15606_s9 + $0x700] sm:$0xff] }
0x132e   : > { %7383 = vmatmul.msk.f32.vlgmr.msra.gmra.mxu2 %vm2975_vm0, %v6132_v52  ;;  %7394 = vmatmul.msk.f32.gmra.mxu3 %vm2975_vm0, %v6143_v42  ;;  %v6636_v32 = vld [vmem:[%s15606_s9 + $0x2e0] sm:$0xff] }
0x132f   : > { %6834 = vmatpush.msra.mxu1 %v6664_v26  ;;  %6856 = vmatpush.msra.mxu2 %v6732_v13  ;;  %v6724_v28 = vld [vmem:[%s15606_s9 + $0x5a0] sm:$0xff]  ;;  %v6733_v13 = vld [vmem:[%s15606_s9 + $0x5e8] sm:$0xff] }
0x1330   : > { %6885 = vmatpush.msra.mxu3 %v6772_v22  ;;  %v6764_v16 = vld [vmem:[%s15606_s9 + $0x6e0] sm:$0xff]  ;;  %v6773_v22 = vld [vmem:[%s15606_s9 + $0x728] sm:$0xff] }
0x1331   : > { %6835 = vmatpush.msra.mxu1 %v6660_v51  ;;  %6857 = vmatpush.msra.mxu2 %v6728_v59  ;;  %v6592_v55 = vld [vmem:[%s15606_s9 + $0x180] sm:$0xff]  ;;  %v6653_v51 = vld [vmem:[%s15606_s9 + $0x368] sm:$0xff] }
0x1332   : > { %6886 = vmatpush.msra.mxu3 %v6768_v27  ;;  %v6632_v44 = vld [vmem:[%s15606_s9 + $0x2c0] sm:$0xff]  ;;  %v6641_v59 = vld [vmem:[%s15606_s9 + $0x308] sm:$0xff] }
0x1333   : > { %v7595_v6 = vpop.eup %7594  ;;  %6836 = vmatpush.msra.mxu1 %v6656_v43  ;;  %6858 = vmatpush.msra.mxu2 %v6724_v28  ;;  %v6720_v52 = vld [vmem:[%s15606_s9 + $0x580] sm:$0xff]  ;;  %v6769_v27 = vld [vmem:[%s15606_s9 + $0x708] sm:$0xff] }
0x1334   : > { %v6081_v38 = vpop.xlane.xlu0 %6080  ;;  %v6139_v61 = vmul.f32 %v7595_v6, %v14632_v20  ;;  %v6090_v18 = vpop.xlane.xlu2 %6089  ;;  %6887 = vmatpush.msra.mxu3 %v6764_v16  ;;  %v6760_v21 = vld [vmem:[%s15606_s9 + $0x6c0] sm:$0xff]  ;;  %v6725_v28 = vld [vmem:[%s15606_s9 + $0x5a8] sm:$0xff] }
0x1335   : > { %7596 = vrcp.f32 %v6081_v38  ;;  %6837 = vmatpush.msra.mxu1 %v6652_v63  ;;  %v6588_v42 = vld [vmem:[%s15606_s9 + $0x160] sm:$0xff]  ;;  %6859 = vmatpush.msra.mxu2 %v6720_v52  ;;  %v6649_v63 = vld [vmem:[%s15606_s9 + $0x348] sm:$0xff] }
0x1336   : > { %7390 = vmatmul.msk.f32.gmra.mxu1 %vm2975_vm0, %v6139_v61  ;;  %v6628_v6 = vld [vmem:[%s15606_s9 + $0x2a0] sm:$0xff]  ;;  %6888 = vmatpush.msra.mxu3 %v6760_v21  ;;  %v6765_v16 = vld [vmem:[%s15606_s9 + $0x6e8] sm:$0xff] }
0x1337   : > { %6838 = vmatpush.msra.mxu1 %v6648_v25  ;;  %v6716_v38 = vld [vmem:[%s15606_s9 + $0x560] sm:$0xff]  ;;  %v6721_v52 = vld [vmem:[%s15606_s9 + $0x588] sm:$0xff] }
0x1338   : > { %v6756_v61 = vld [vmem:[%s15606_s9 + $0x6a0] sm:$0xff]  ;;  %6860 = vmatpush.msra.mxu2 %v6716_v38  ;;  %v6761_v21 = vld [vmem:[%s15606_s9 + $0x6c8] sm:$0xff] }
0x1339   : > { %6839 = vmatpush.msra.mxu1 %v6644_v2  ;;  %6889 = vmatpush.msra.mxu3 %v6756_v61  ;;  %v6552_v26 = vld [vmem:[%s15606_s9 + $0x40] sm:$0xff]  ;;  %v6645_v2 = vld [vmem:[%s15606_s9 + $0x328] sm:$0xff] }
0x133a   : > { %v6680_v15 = vld [vmem:[%s15606_s9 + $0x440] sm:$0xff]  ;;  %v6717_v38 = vld [vmem:[%s15606_s9 + $0x568] sm:$0xff] }
0x133b   : > { %v7597_v7 = vpop.eup %7596  ;;  %6840 = vmatpush.msra.mxu1 %v6640_v31  ;;  %v6548_v43 = vld [vmem:[%s15606_s9 + $0x20] sm:$0xff]  ;;  %v6729_v31 = vld [vmem:[%s15606_s9 + $0x5c8] sm:$0xff] }
0x133c   : > { %v6102_v19 = vpop.xlane.xlu0 %6101  ;;  %v6133_v36 = vmul.f32 %v7597_v7, %v14644_v30  ;;  %v6584_v7 = vld [vmem:[%s15606_s9 + $0x140] sm:$0xff]  ;;  %v6757_v61 = vld [vmem:[%s15606_s9 + $0x6a8] sm:$0xff] }
0x133d   : > { %7598 = vrcp.f32 %v6102_v19  ;;  %6841 = vmatpush.msra.mxu1 %v6636_v32  ;;  %v6624_v19 = vld [vmem:[%s15606_s9 + $0x280] sm:$0xff]  ;;  %v6637_v32 = vld [vmem:[%s15606_s9 + $0x2e8] sm:$0xff] }
0x133e   : > { %7384 = vmatmul.msk.f32.gmra.mxu2 %vm2975_vm0, %v6133_v36  ;;  %v6712_v36 = vld [vmem:[%s15606_s9 + $0x540] sm:$0xff] }
0x133f   : > { %6842 = vmatpush.msra.mxu1 %v6632_v44  ;;  %6861 = vmatpush.msra.mxu2 %v6712_v36  ;;  %v6676_v54 = vld [vmem:[%s15606_s9 + $0x420] sm:$0xff]  ;;  %v6633_v44 = vld [vmem:[%s15606_s9 + $0x2c8] sm:$0xff] }
0x1340   : > { %v6544_v25 = vld [vmem:[%s15606_s9] sm:$0xff]  ;;  %v6713_v36 = vld [vmem:[%s15606_s9 + $0x548] sm:$0xff] }
0x1341   : > { %6843 = vmatpush.msra.mxu1 %v6628_v6  ;;  %v6672_v57 = vld [vmem:[%s15606_s9 + $0x400] sm:$0xff]  ;;  %v6629_v6 = vld [vmem:[%s15606_s9 + $0x2a8] sm:$0xff] }
0x1343   : > { %v7599_v41 = vpop.eup %7598  ;;  %6844 = vmatpush.msra.mxu1 %v6624_v19  ;;  %v6625_v19 = vld [vmem:[%s15606_s9 + $0x288] sm:$0xff] }
0x1344   : > { %v6140_v33 = vmul.f32 %v7599_v41, %v14655_v58  ;;  %v6105_v24 = vpop.xlane.xlu0 %6104  ;;  %v6752_v41 = vld [vmem:[%s15606_s9 + $0x680] sm:$0xff] }
0x1345   : > { %7600 = vrcp.f32 %v6105_v24  ;;  %v6620_v24 = vld [vmem:[%s15606_s9 + $0x260] sm:$0xff]  ;;  %6890 = vmatpush.msra.mxu3 %v6752_v41  ;;  %v6753_v41 = vld [vmem:[%s15606_s9 + $0x688] sm:$0xff] }
0x1346   : > { %7391 = vmatmul.msk.f32.vlgmr.msrb.gmra.mxu2 %vm2975_vm0, %v6140_v33  ;;  %v6580_v33 = vld [vmem:[%s15606_s9 + $0x120] sm:$0xff]  ;;  %6845 = vmatpush.msra.mxu1 %v6620_v24  ;;  %v6621_v24 = vld [vmem:[%s15606_s9 + $0x268] sm:$0xff] }
0x134b   : > { %v7601_v50 = vpop.eup %7600 }
0x134c   : > { %v6141_v20 = vmul.f32 %v7601_v50, %v14662_v0  ;;  %v6708_v50 = vld [vmem:[%s15606_s9 + $0x520] sm:$0xff] }
0x134d   : > { %6862 = vmatpush.msra.mxu2 %v6708_v50  ;;  %v6709_v50 = vld [vmem:[%s15606_s9 + $0x528] sm:$0xff] }
0x134e   : > { %7392 = vmatmul.msk.f32.gmra.mxu2 %vm2975_vm0, %v6141_v20  ;;  %v6748_v20 = vld [vmem:[%s15606_s9 + $0x660] sm:$0xff] }
0x134f   : > { %v6066_v11 = vpop.xlane.xlu1 %6065  ;;  %6891 = vmatpush.msra.mxu3 %v6748_v20  ;;  %v6749_v20 = vld [vmem:[%s15606_s9 + $0x668] sm:$0xff] }
0x1350   : > { %7602 = vrcp.f32 %v6066_v11  ;;  %v6576_v11 = vld [vmem:[%s15606_s9 + $0x100] sm:$0xff] }
0x1351   : > { %7604 = vrcp.f32 %v6069_v14  ;;  %v6616_v14 = vld [vmem:[%s15606_s9 + $0x240] sm:$0xff] }
0x1352   : > { %7606 = vrcp.f32 %v6090_v18  ;;  %v6572_v18 = vld [vmem:[%s15606_s9 + $0xe0] sm:$0xff]  ;;  %6846 = vmatpush.msra.mxu1 %v6616_v14  ;;  %v6617_v14 = vld [vmem:[%s15606_s9 + $0x248] sm:$0xff] }
0x1356   : > { %v7603_v56 = vpop.eup %7602 }
0x1357   : > { %v6128_v30 = vmul.f32 %v7603_v56, %v14668_v23  ;;  %v7605_v58 = vpop.eup %7604  ;;  %v6704_v56 = vld [vmem:[%s15606_s9 + $0x500] sm:$0xff] }
0x1358   : > { %v6129_v29 = vmul.f32 %v7605_v58, %v14630_v17  ;;  %v7607_v53 = vpop.eup %7606  ;;  %v6612_v58 = vld [vmem:[%s15606_s9 + $0x220] sm:$0xff]  ;;  %6863 = vmatpush.msra.mxu2 %v6704_v56  ;;  %v6705_v56 = vld [vmem:[%s15606_s9 + $0x508] sm:$0xff] }
0x1359   : > { %7379 = vmatmul.msk.f32.vlgmr.msra.gmra.mxu0 %vm2975_vm0, %v6128_v30  ;;  %v6136_v0 = vmul.f32 %v7607_v53, %v14646_v39  ;;  %v6744_v30 = vld [vmem:[%s15606_s9 + $0x640] sm:$0xff]  ;;  %6847 = vmatpush.msra.mxu1 %v6612_v58  ;;  %v6613_v58 = vld [vmem:[%s15606_s9 + $0x228] sm:$0xff] }
0x135a   : > { %v6228_v48 = vpop.f32.mrf.mxu1  ;;  %6810 = vmatpush.msra.mxu0 %v6604_v37  ;;  %v6740_v53 = vld [vmem:[%s15606_s9 + $0x620] sm:$0xff]  ;;  %6892 = vmatpush.msra.mxu3 %v6744_v30  ;;  %v6605_v37 = vld [vmem:[%s15606_s9 + $0x1e8] sm:$0xff] }
0x135b   : > { %v6745_v30 = vld [vmem:[%s15606_s9 + $0x648] sm:$0xff] }
0x135c   : > { %6811 = vmatpush.msra.mxu0 %v6600_v1  ;;  %6893 = vmatpush.msra.mxu3 %v6740_v53  ;;  %v6601_v1 = vld [vmem:[%s15606_s9 + $0x1c8] sm:$0xff] }
0x135d   : > { %v6741_v53 = vld [vmem:[%s15606_s9 + $0x628] sm:$0xff] }
0x1361   : > { %7380 = vmatmul.msk.f32.gmra.mxu0 %vm2975_vm0, %v6129_v29  ;;  %v6700_v29 = vld [vmem:[%s15606_s9 + $0x4e0] sm:$0xff] }
0x1362   : > { %6864 = vmatpush.msra.mxu2 %v6700_v29  ;;  %v6701_v29 = vld [vmem:[%s15606_s9 + $0x4e8] sm:$0xff] }
0x1369   : > { %7387 = vmatmul.msk.f32.vlgmr.msrb.gmra.mxu0 %vm2975_vm0, %v6136_v0  ;;  %v6568_v0 = vld [vmem:[%s15606_s9 + $0xc0] sm:$0xff] }
0x1389   : > { %v6318_v5 = vpop.f32.mrf.mxu3 }
0x1393   : > { %v6231_v34 = vpop.f32.mrf.mxu1 }
0x139b   : > { %v6093_v47 = vpop.xlane.xlu2 %6092 }
0x139c   : > { %7608 = vrcp.f32 %v6093_v47  ;;  %v6736_v47 = vld [vmem:[%s15606_s9 + $0x600] sm:$0xff] }
0x139d   : > { %6894 = vmatpush.msra.mxu3 %v6736_v47  ;;  %v6737_v47 = vld [vmem:[%s15606_s9 + $0x608] sm:$0xff] }
0x13a1   : > { %v6321_v23 = vpop.f32.mrf.mxu3 }
0x13a2   : > { %v7609_v4 = vpop.eup %7608 }
0x13a3   : > { %v6137_v35 = vmul.f32 %v7609_v4, %v6057_v3  ;;  %v6596_v3 = vld [vmem:[%s15606_s9 + $0x1a0] sm:$0xff] }
0x13a4   : > { %6812 = vmatpush.msra.mxu0 %v6596_v3  ;;  %v6564_v4 = vld [vmem:[%s15606_s9 + $0xa0] sm:$0xff]  ;;  %v6597_v3 = vld [vmem:[%s15606_s9 + $0x1a8] sm:$0xff] }
0x13a5   : > { %7388 = vmatmul.msk.f32.gmra.mxu0 %vm2975_vm0, %v6137_v35  ;;  %v6692_v35 = vld [vmem:[%s15606_s9 + $0x4a0] sm:$0xff] }
0x13a6   : > { %6813 = vmatpush.msra.mxu0 %v6592_v55  ;;  %v6593_v55 = vld [vmem:[%s15606_s9 + $0x188] sm:$0xff] }
0x13a8   : > { %v6408_v9 = vpop.f32.mrf.mxu1  ;;  %6814 = vmatpush.msra.mxu0 %v6588_v42  ;;  %v6589_v42 = vld [vmem:[%s15606_s9 + $0x168] sm:$0xff] }
0x13a9   : > { %v7526_v62 = vpack.i.bf16 %v6228_v48, %v6408_v9  ;;  %v6498_v17 = vpop.f32.mrf.mxu3  ;;  %v6608_v48 = vld [vmem:[%s15606_s9 + $0x200] sm:$0xff]  ;;  %v6665_v9 = vld [vmem:[%s15606_s9 + $0x3c8] sm:$0xff] }
0x13aa   : > { %v7531_v60 = vpack.i.bf16 %v6318_v5, %v6498_v17  ;;  %6815 = vmatpush.msra.mxu0 %v6584_v7  ;;  %v6696_v5 = vld [vmem:[%s15606_s9 + $0x4c0] sm:$0xff]  ;;  %6848 = vmatpush.msra.mxu1 %v6608_v48  ;;  %v6585_v7 = vld [vmem:[%s15606_s9 + $0x148] sm:$0xff] }
0x13ab   : > { %7527 = vrot.lane.b32.xlu0 %v7526_v62, %s7740_s19  ;;  %6865 = vmatpush.msra.mxu2 %v6696_v5  ;;  %v6793_v62 = vld [vmem:[%s15606_s9 + $0x7c8] sm:$0xff]  ;;  %v6560_v17 = vld [vmem:[%s15606_s9 + $0x80] sm:$0xff] }
0x13ac   : > { %7532 = vrot.lane.b32.xlu2 %v7531_v60, %s7740_s19  ;;  %6816 = vmatpush.msra.mxu0 %v6580_v33  ;;  %v6688_v60 = vld [vmem:[%s15606_s9 + $0x480] sm:$0xff]  ;;  %v6581_v33 = vld [vmem:[%s15606_s9 + $0x128] sm:$0xff] }
0x13ad   : > { %6866 = vmatpush.msra.mxu2 %v6692_v35  ;;  %v6609_v48 = vld [vmem:[%s15606_s9 + $0x208] sm:$0xff] }
0x13ae   : > { %6817 = vmatpush.msra.mxu0 %v6576_v11  ;;  %v6577_v11 = vld [vmem:[%s15606_s9 + $0x108] sm:$0xff] }
0x13af   : > { %6867 = vmatpush.msra.mxu2 %v6688_v60  ;;  %v6697_v5 = vld [vmem:[%s15606_s9 + $0x4c8] sm:$0xff] }
0x13b0   : > { %6818 = vmatpush.msra.mxu0 %v6572_v18  ;;  %v6573_v18 = vld [vmem:[%s15606_s9 + $0xe8] sm:$0xff] }
0x13b1   : > { %v6501_v39 = vpop.f32.mrf.mxu3  ;;  %v6561_v35 = vld [vmem:[%s15606_s9 + $0x88] sm:$0xff] }
0x13b2   : > { %v7541_v10 = vpack.i.bf16 %v6321_v23, %v6501_v39  ;;  %v6797_v23 = vld [vmem:[%s15606_s9 + $0x7e8] sm:$0xff]  ;;  %6819 = vmatpush.msra.mxu0 %v6568_v0 }
0x13b3   : > { %v6411_v46 = vpop.f32.mrf.mxu1  ;;  %6971 = vmatpush.msrb.mxu3 %v6797_v23  ;;  %v6661_v39 = vld [vmem:[%s15606_s9 + $0x3a8] sm:$0xff]  ;;  %v6257_v23 = vpop.f32.mrf.mxu2 }
0x13b4   : > { %v7536_v49 = vpack.i.bf16 %v6231_v34, %v6411_v46  ;;  %7542 = vrot.lane.b32.xlu0 %v7541_v10, %s7740_s19  ;;  %v6669_v34 = vld [vmem:[%s15606_s9 + $0x3e8] sm:$0xff]  ;;  %6820 = vmatpush.msra.mxu0 %v6564_v4  ;;  %v6556_v46 = vld [vmem:[%s15606_s9 + $0x60] sm:$0xff] }
0x13b5   : > { %6925 = vmatpush.msrb.mxu1 %v6669_v34  ;;  %v6789_v10 = vld [vmem:[%s15606_s9 + $0x7a8] sm:$0xff]  ;;  %6972 = vmatpush.msrb.mxu3 %v6793_v62 }
0x13b6   : > { %7537 = vrot.lane.b32.xlu1 %v7536_v49, %s7740_s19  ;;  %v6684_v49 = vld [vmem:[%s15606_s9 + $0x460] sm:$0xff]  ;;  %6821 = vmatpush.msra.mxu0 %v6560_v17  ;;  %v6569_v0 = vld [vmem:[%s15606_s9 + $0xc8] sm:$0xff]  ;;  %s15550_s19 = scalar_lea.vmem [#allocation2], %s7292_s14  ;;  %s7696_s14 = scalar_lea.hbm %s15608_s11, 128 }
0x13b7   : > { %6926 = vmatpush.msrb.mxu1 %v6665_v9  ;;  %6973 = vmatpush.msrb.mxu3 %v6789_v10  ;;  %v6565_v34 = vld [vmem:[%s15606_s9 + $0xa8] sm:$0xff]  ;;  %s7199_s26 = sshll.u32 %s15550_s19, 4  ;;  %p7698_p1 = scmp.lt.s32.totalorder %s7696_s14, %s7692_s16  ;;  %s7200_s26 = int_to_ptr.vmem [resolvable:$true] %s7199_s26 }
0x13b8   : > { %6822 = vmatpush.msra.mxu0 %v6556_v46  ;;  %6868 = vmatpush.msra.mxu2 %v6684_v49  ;;  %v6693_v4 = vld [vmem:[%s15606_s9 + $0x4a8] sm:$0xff] }
0x13b9   : > { %6927 = vmatpush.msrb.mxu1 %v6661_v39  ;;  %6974 = vmatpush.msrb.mxu3 %v6785_v40  ;;  %v6689_v9 = vld [vmem:[%s15606_s9 + $0x488] sm:$0xff]  ;;  %p7699_p2 = por %p7698_p1, %p7697_p0 }
0x13ba   : > { %6823 = vmatpush.msra.mxu0 %v6552_v26  ;;  %6869 = vmatpush.msra.mxu2 %v6680_v15  ;;  %v6557_v62 = vld [vmem:[%s15606_s9 + $0x68] sm:$0xff] }
0x13bb   : > { %6928 = vmatpush.msrb.mxu1 %v6657_v12  ;;  %6975 = vmatpush.msrb.mxu3 %v6781_v8  ;;  %v6685_v17 = vld [vmem:[%s15606_s9 + $0x468] sm:$0xff]  ;;  %p7700_p3 = pnand %p7699_p2, %p7695_p13 }
0x13bc   : > { %6824 = vmatpush.msra.mxu0 %v6548_v43  ;;  %6870 = vmatpush.msra.mxu2 %v6676_v54  ;;  %v6553_v60 = vld [vmem:[%s15606_s9 + $0x48] sm:$0xff]  ;;  %v6670_v43 = vld [vmem:[%s15606_s9 + $0x3f0] sm:$0xff] }
0x13bd   : > { %6929 = vmatpush.msrb.mxu1 %v6653_v51  ;;  %6976 = vmatpush.msrb.mxu3 %v6777_v45  ;;  %v6681_v39 = vld [vmem:[%s15606_s9 + $0x448] sm:$0xff]  ;;  %v6798_v54 = vld [vmem:[%s15606_s9 + $0x7f0] sm:$0xff] }
0x13be   : > { %6825 = vmatpush.msra.mxu0 %v6544_v25  ;;  %6871 = vmatpush.msra.mxu2 %v6672_v57  ;;  %v6549_v10 = vld [vmem:[%s15606_s9 + $0x28] sm:$0xff]  ;;  %v6666_v57 = vld [vmem:[%s15606_s9 + $0x3d0] sm:$0xff] }
0x13bf   : > { %6930 = vmatpush.msrb.mxu1 %v6649_v63  ;;  %6977 = vmatpush.msrb.mxu3 %v6773_v22  ;;  %v6677_v49 = vld [vmem:[%s15606_s9 + $0x428] sm:$0xff]  ;;  %v6658_v22 = vld [vmem:[%s15606_s9 + $0x390] sm:$0xff] }
0x13c0   : > { %6902 = vmatpush.msrb.mxu0 %v6605_v37  ;;  %6948 = vmatpush.msrb.mxu2 %v6733_v13  ;;  %v6545_v12 = vld [vmem:[%s15606_s9 + $0x8] sm:$0xff]  ;;  %v6794_v37 = vld [vmem:[%s15606_s9 + $0x7d0] sm:$0xff] }
0x13c1   : > { %6931 = vmatpush.msrb.mxu1 %v6645_v2  ;;  %6978 = vmatpush.msrb.mxu3 %v6769_v27  ;;  %v15086_v46 = vpop.f32.mrf.mxu2  ;;  %v6673_v40 = vld [vmem:[%s15606_s9 + $0x408] sm:$0xff]  ;;  %v6662_v2 = vld [vmem:[%s15606_s9 + $0x3b0] sm:$0xff] }
0x13c2   : > { %6903 = vmatpush.msrb.mxu0 %v6601_v1  ;;  %6949 = vmatpush.msrb.mxu2 %v6729_v31  ;;  %v6790_v13 = vld [vmem:[%s15606_s9 + $0x7b0] sm:$0xff] }
0x13c3   : > { %6932 = vmatpush.msrb.mxu1 %v6641_v59  ;;  %6979 = vmatpush.msrb.mxu3 %v6765_v16  ;;  %v6786_v1 = vld [vmem:[%s15606_s9 + $0x790] sm:$0xff] }
0x13c4   : > { %6904 = vmatpush.msrb.mxu0 %v6597_v3  ;;  %6950 = vmatpush.msrb.mxu2 %v6725_v28  ;;  %v6654_v59 = vld [vmem:[%s15606_s9 + $0x370] sm:$0xff] }
0x13c5   : > { %6933 = vmatpush.msrb.mxu1 %v6637_v32  ;;  %6980 = vmatpush.msrb.mxu3 %v6761_v21  ;;  %v6782_v31 = vld [vmem:[%s15606_s9 + $0x770] sm:$0xff] }
0x13c6   : > { %6905 = vmatpush.msrb.mxu0 %v6593_v55  ;;  %6951 = vmatpush.msrb.mxu2 %v6721_v52  ;;  %v6650_v27 = vld [vmem:[%s15606_s9 + $0x350] sm:$0xff] }
0x13c7   : > { %6934 = vmatpush.msrb.mxu1 %v6633_v44  ;;  %6981 = vmatpush.msrb.mxu3 %v6757_v61  ;;  %v6778_v3 = vld [vmem:[%s15606_s9 + $0x750] sm:$0xff] }
0x13c8   : > { %6906 = vmatpush.msrb.mxu0 %v6589_v42  ;;  %6952 = vmatpush.msrb.mxu2 %v6717_v38  ;;  %v6646_v28 = vld [vmem:[%s15606_s9 + $0x330] sm:$0xff] }
0x13c9   : > { %6935 = vmatpush.msrb.mxu1 %v6629_v6  ;;  %6982 = vmatpush.msrb.mxu3 %v6753_v41  ;;  %v6437_v8 = vpop.f32.mrf.mxu2  ;;  %v6774_v16 = vld [vmem:[%s15606_s9 + $0x730] sm:$0xff] }
0x13ca   : > { %6907 = vmatpush.msrb.mxu0 %v6585_v7  ;;  %6953 = vmatpush.msrb.mxu2 %v6713_v36  ;;  %v6642_v55 = vld [vmem:[%s15606_s9 + $0x310] sm:$0xff] }
0x13cb   : > { %6936 = vmatpush.msrb.mxu1 %v6625_v19  ;;  %6983 = vmatpush.msrb.mxu3 %v6749_v20  ;;  %v6770_v44 = vld [vmem:[%s15606_s9 + $0x710] sm:$0xff] }
0x13cc   : > { %6908 = vmatpush.msrb.mxu0 %v6581_v33  ;;  %6954 = vmatpush.msrb.mxu2 %v6709_v50  ;;  %v6638_v52 = vld [vmem:[%s15606_s9 + $0x2f0] sm:$0xff] }
0x13cd   : > { %6937 = vmatpush.msrb.mxu1 %v6621_v24  ;;  %6984 = vmatpush.msrb.mxu3 %v6745_v30  ;;  %v6766_v21 = vld [vmem:[%s15606_s9 + $0x6f0] sm:$0xff] }
0x13ce   : > { %6909 = vmatpush.msrb.mxu0 %v6577_v11  ;;  %6955 = vmatpush.msrb.mxu2 %v6705_v56  ;;  %v6634_v42 = vld [vmem:[%s15606_s9 + $0x2d0] sm:$0xff] }
0x13cf   : > { %6938 = vmatpush.msrb.mxu1 %v6617_v14  ;;  %6985 = vmatpush.msrb.mxu3 %v6741_v53  ;;  %v6762_v6 = vld [vmem:[%s15606_s9 + $0x6d0] sm:$0xff] }
0x13d0   : > { %6910 = vmatpush.msrb.mxu0 %v6573_v18  ;;  %6956 = vmatpush.msrb.mxu2 %v6701_v29  ;;  %v6630_v61 = vld [vmem:[%s15606_s9 + $0x2b0] sm:$0xff] }
0x13d1   : > { %6939 = vmatpush.msrb.mxu1 %v6613_v58  ;;  %6986 = vmatpush.msrb.mxu3 %v6737_v47  ;;  %v6758_v7 = vld [vmem:[%s15606_s9 + $0x6b0] sm:$0xff] }
0x13d2   : > { %6911 = vmatpush.msrb.mxu0 %v6569_v0  ;;  %6957 = vmatpush.msrb.mxu2 %v6697_v5  ;;  %v6606_v33 = vld [vmem:[%s15606_s9 + $0x1f0] sm:$0xff] }
0x13d3   : > { %6940 = vmatpush.msrb.mxu1 %v6609_v48  ;;  %v6734_v24 = vld [vmem:[%s15606_s9 + $0x5f0] sm:$0xff] }
0x13d4   : > { %6912 = vmatpush.msrb.mxu0 %v6565_v34  ;;  %6958 = vmatpush.msrb.mxu2 %v6693_v4  ;;  %v6626_v11 = vld [vmem:[%s15606_s9 + $0x290] sm:$0xff] }
0x13d5   : > { %v6754_v14 = vld [vmem:[%s15606_s9 + $0x690] sm:$0xff] }
0x13d6   : > { %6913 = vmatpush.msrb.mxu0 %v6561_v35  ;;  %6959 = vmatpush.msrb.mxu2 %v6689_v9  ;;  %v6167_v25 = vpop.f32.mrf.mxu0  ;;  %v6602_v56 = vld [vmem:[%s15606_s9 + $0x1d0] sm:$0xff] }
0x13d7   : > { %v6730_v30 = vld [vmem:[%s15606_s9 + $0x5d0] sm:$0xff] }
0x13d8   : > { %6914 = vmatpush.msrb.mxu0 %v6557_v62  ;;  %6960 = vmatpush.msrb.mxu2 %v6685_v17  ;;  %v6622_v18 = vld [vmem:[%s15606_s9 + $0x270] sm:$0xff] }
0x13d9   : > { %v6750_v58 = vld [vmem:[%s15606_s9 + $0x670] sm:$0xff] }
0x13da   : > { %6915 = vmatpush.msrb.mxu0 %v6553_v60  ;;  %6961 = vmatpush.msrb.mxu2 %v6681_v39  ;;  %v6598_v29 = vld [vmem:[%s15606_s9 + $0x1b0] sm:$0xff]  ;;  %v6440_v60 = vpop.f32.mrf.mxu2 }
0x13db   : > { %v6726_v53 = vld [vmem:[%s15606_s9 + $0x5b0] sm:$0xff] }
0x13dc   : > { %6916 = vmatpush.msrb.mxu0 %v6549_v10  ;;  %6962 = vmatpush.msrb.mxu2 %v6677_v49  ;;  %v6618_v0 = vld [vmem:[%s15606_s9 + $0x250] sm:$0xff] }
0x13dd   : > { %v6746_v48 = vld [vmem:[%s15606_s9 + $0x650] sm:$0xff] }
0x13de   : > { %6917 = vmatpush.msrb.mxu0 %v6545_v12  ;;  %6963 = vmatpush.msrb.mxu2 %v6673_v40  ;;  %v15141_v32 = vpop.f32.mrf.mxu0  ;;  %v6594_v5 = vld [vmem:[%s15606_s9 + $0x190] sm:$0xff] }
0x13df   : > { %v6722_v47 = vld [vmem:[%s15606_s9 + $0x590] sm:$0xff] }
0x13e0   : > { %v6614_v34 = vld [vmem:[%s15606_s9 + $0x230] sm:$0xff] }
0x13e1   : > { %v6590_v35 = vld [vmem:[%s15606_s9 + $0x170] sm:$0xff] }
0x13e2   : > { %v6718_v9 = vld [vmem:[%s15606_s9 + $0x570] sm:$0xff] }
0x13e3   : > { %v6586_v10 = vld [vmem:[%s15606_s9 + $0x150] sm:$0xff] }
0x13e4   : > { %v6714_v49 = vld [vmem:[%s15606_s9 + $0x550] sm:$0xff] }
0x13e6   : > { %v6347_v41 = vpop.f32.mrf.mxu0 }
0x1406   : > { %v7533_v26 = vpop.permute.xlu2 %7532 }
0x1407   : > { %v7535_v15 = vunpack.i.h.bf16 %v7533_v26  ;;  %v7534_v51 = vunpack.i.l.bf16 %v7533_v26 }
0x1409   : > { %v15104_v63 = vsel %vm2975_vm0, %v6257_v23, %v7535_v15  ;;  %v15107_v45 = vsel %vm2975_vm0, %v6437_v8, %v7534_v51  ;;  %v6742_v23 = vld [vmem:[%s15606_s9 + $0x630] sm:$0xff] }
0x140a   : > { %6849 = vmatmul.f32.vlgmr.msra.gmra.mxu1 %v15104_v63  ;;  %6895 = vmatmul.f32.vlgmr.msra.gmra.mxu3 %v15107_v45  ;;  %v6582_v8 = vld [vmem:[%s15606_s9 + $0x130] sm:$0xff] }
0x140b   : > { %7017 = vmatpush.msra.mxu1 %v6670_v43  ;;  %7063 = vmatpush.msra.mxu3 %v6798_v54  ;;  %v6710_v43 = vld [vmem:[%s15606_s9 + $0x530] sm:$0xff] }
0x140d   : > { %7018 = vmatpush.msra.mxu1 %v6666_v57  ;;  %7064 = vmatpush.msra.mxu3 %v6794_v37  ;;  %v6738_v57 = vld [vmem:[%s15606_s9 + $0x610] sm:$0xff] }
0x140e   : > { %v6578_v37 = vld [vmem:[%s15606_s9 + $0x110] sm:$0xff] }
0x140f   : > { %7019 = vmatpush.msra.mxu1 %v6662_v2  ;;  %7065 = vmatpush.msra.mxu3 %v6790_v13  ;;  %v6706_v2 = vld [vmem:[%s15606_s9 + $0x510] sm:$0xff] }
0x1410   : > { %v6574_v13 = vld [vmem:[%s15606_s9 + $0xf0] sm:$0xff] }
0x1411   : > { %7020 = vmatpush.msra.mxu1 %v6658_v22  ;;  %7066 = vmatpush.msra.mxu3 %v6786_v1  ;;  %v6702_v22 = vld [vmem:[%s15606_s9 + $0x4f0] sm:$0xff] }
0x1412   : > { %v6570_v1 = vld [vmem:[%s15606_s9 + $0xd0] sm:$0xff] }
0x1413   : > { %7021 = vmatpush.msra.mxu1 %v6654_v59  ;;  %7067 = vmatpush.msra.mxu3 %v6782_v31  ;;  %v6698_v59 = vld [vmem:[%s15606_s9 + $0x4d0] sm:$0xff]  ;;  %v6671_v31 = vld [vmem:[%s15606_s9 + $0x3f8] sm:$0xff] }
0x1415   : > { %7022 = vmatpush.msra.mxu1 %v6650_v27  ;;  %7068 = vmatpush.msra.mxu3 %v6778_v3  ;;  %v6799_v27 = vld [vmem:[%s15606_s9 + $0x7f8] sm:$0xff]  ;;  %v6566_v3 = vld [vmem:[%s15606_s9 + $0xb0] sm:$0xff] }
0x1417   : > { %7023 = vmatpush.msra.mxu1 %v6646_v28  ;;  %7069 = vmatpush.msra.mxu3 %v6774_v16  ;;  %v6667_v28 = vld [vmem:[%s15606_s9 + $0x3d8] sm:$0xff] }
0x1418   : > { %v6795_v16 = vld [vmem:[%s15606_s9 + $0x7d8] sm:$0xff] }
0x1419   : > { %7024 = vmatpush.msra.mxu1 %v6642_v55  ;;  %7070 = vmatpush.msra.mxu3 %v6770_v44  ;;  %v6562_v55 = vld [vmem:[%s15606_s9 + $0x90] sm:$0xff] }
0x141a   : > { %v6690_v44 = vld [vmem:[%s15606_s9 + $0x490] sm:$0xff] }
0x141b   : > { %7025 = vmatpush.msra.mxu1 %v6638_v52  ;;  %7071 = vmatpush.msra.mxu3 %v6766_v21  ;;  %v6663_v52 = vld [vmem:[%s15606_s9 + $0x3b8] sm:$0xff] }
0x141c   : > { %v6791_v21 = vld [vmem:[%s15606_s9 + $0x7b8] sm:$0xff] }
0x141d   : > { %v7528_v38 = vpop.permute.xlu0 %7527  ;;  %7026 = vmatpush.msra.mxu1 %v6634_v42  ;;  %7072 = vmatpush.msra.mxu3 %v6762_v6  ;;  %v6558_v42 = vld [vmem:[%s15606_s9 + $0x70] sm:$0xff] }
0x141e   : > { %v7530_v19 = vunpack.i.h.bf16 %v7528_v38  ;;  %v7529_v36 = vunpack.i.l.bf16 %v7528_v38  ;;  %v6686_v6 = vld [vmem:[%s15606_s9 + $0x470] sm:$0xff]  ;;  %v6659_v38 = vld [vmem:[%s15606_s9 + $0x398] sm:$0xff] }
0x141f   : > { %7027 = vmatpush.msra.mxu1 %v6630_v61  ;;  %7073 = vmatpush.msra.mxu3 %v6758_v7  ;;  %v6787_v61 = vld [vmem:[%s15606_s9 + $0x798] sm:$0xff]  ;;  %v6554_v7 = vld [vmem:[%s15606_s9 + $0x50] sm:$0xff] }
0x1420   : > { %v15180_v50 = vsel %vm2975_vm0, %v6167_v25, %v7530_v19  ;;  %v15183_v20 = vsel %vm2975_vm0, %v6347_v41, %v7529_v36  ;;  %v6610_v25 = vld [vmem:[%s15606_s9 + $0x210] sm:$0xff]  ;;  %v6655_v36 = vld [vmem:[%s15606_s9 + $0x378] sm:$0xff] }
0x1421   : > { %6826 = vmatmul.f32.vlgmr.msra.gmra.mxu0 %v15180_v50  ;;  %6872 = vmatmul.f32.vlgmr.msra.gmra.mxu2 %v15183_v20  ;;  %v6682_v19 = vld [vmem:[%s15606_s9 + $0x450] sm:$0xff]  ;;  %v6783_v41 = vld [vmem:[%s15606_s9 + $0x778] sm:$0xff] }
0x1422   : > { %6994 = vmatpush.msra.mxu0 %v6606_v33  ;;  %7040 = vmatpush.msra.mxu2 %v6734_v24  ;;  %v6350_v51 = vpop.f32.mrf.mxu0  ;;  %v6550_v33 = vld [vmem:[%s15606_s9 + $0x30] sm:$0xff] }
0x1423   : > { %7028 = vmatpush.msra.mxu1 %v6626_v11  ;;  %7074 = vmatpush.msra.mxu3 %v6754_v14  ;;  %v6678_v24 = vld [vmem:[%s15606_s9 + $0x430] sm:$0xff]  ;;  %v6651_v11 = vld [vmem:[%s15606_s9 + $0x358] sm:$0xff] }
0x1424   : > { %6995 = vmatpush.msra.mxu0 %v6602_v56  ;;  %7041 = vmatpush.msra.mxu2 %v6730_v30  ;;  %v6779_v14 = vld [vmem:[%s15606_s9 + $0x758] sm:$0xff]  ;;  %v6546_v56 = vld [vmem:[%s15606_s9 + $0x10] sm:$0xff] }
0x1425   : > { %7029 = vmatpush.msra.mxu1 %v6622_v18  ;;  %7075 = vmatpush.msra.mxu3 %v6750_v58  ;;  %v6674_v30 = vld [vmem:[%s15606_s9 + $0x410] sm:$0xff]  ;;  %v6607_v18 = vld [vmem:[%s15606_s9 + $0x1f8] sm:$0xff] }
0x1426   : > { %6996 = vmatpush.msra.mxu0 %v6598_v29  ;;  %7042 = vmatpush.msra.mxu2 %v6726_v53  ;;  %v7543_v4 = vpop.permute.xlu0 %7542  ;;  %v6647_v58 = vld [vmem:[%s15606_s9 + $0x338] sm:$0xff] }
0x1427   : > { %7030 = vmatpush.msra.mxu1 %v6618_v0  ;;  %7076 = vmatpush.msra.mxu3 %v6746_v48  ;;  %v7545_v62 = vunpack.i.h.bf16 %v7543_v4  ;;  %v7544_v17 = vunpack.i.l.bf16 %v7543_v4  ;;  %v6735_v29 = vld [vmem:[%s15606_s9 + $0x5f8] sm:$0xff] }
0x1428   : > { %6997 = vmatpush.msra.mxu0 %v6594_v5  ;;  %7043 = vmatpush.msra.mxu2 %v6722_v47  ;;  %v7538_v39 = vpop.permute.xlu1 %7537  ;;  %v6775_v53 = vld [vmem:[%s15606_s9 + $0x738] sm:$0xff] }
0x1429   : > { %7031 = vmatpush.msra.mxu1 %v6614_v34  ;;  %7077 = vmatpush.msra.mxu3 %v6742_v23  ;;  %v7540_v12 = vunpack.i.h.bf16 %v7538_v39  ;;  %v7539_v40 = vunpack.i.l.bf16 %v7538_v39  ;;  %v15243_v26 = vsel %vm2975_vm0, %v15086_v46, %v7545_v62  ;;  %v15246_v15 = vsel %vm2975_vm0, %v6440_v60, %v7544_v17  ;;  %v6603_v0 = vld [vmem:[%s15606_s9 + $0x1d8] sm:$0xff] }
0x142a   : > { %6998 = vmatpush.msra.mxu0 %v6590_v35  ;;  %7044 = vmatpush.msra.mxu2 %v6718_v9  ;;  %v6643_v48 = vld [vmem:[%s15606_s9 + $0x318] sm:$0xff] }
0x142b   : > { %6852 = vmatmul.f32.gmra.mxu1 %v15243_v26  ;;  %6898 = vmatmul.f32.gmra.mxu3 %v15246_v15  ;;  %v15258_v46 = vsel %vm2975_vm0, %v15141_v32, %v7540_v12  ;;  %v15261_v54 = vsel %vm2975_vm0, %v6350_v51, %v7539_v40  ;;  %v6694_v32 = vld [vmem:[%s15606_s9 + $0x4b0] sm:$0xff]  ;;  %v6731_v5 = vld [vmem:[%s15606_s9 + $0x5d8] sm:$0xff] }
0x142c   : > { %6999 = vmatpush.msra.mxu0 %v6586_v10  ;;  %7045 = vmatpush.msra.mxu2 %v6714_v49  ;;  %v6771_v47 = vld [vmem:[%s15606_s9 + $0x718] sm:$0xff] }
0x142d   : > { %6829 = vmatmul.f32.gmra.mxu0 %v15258_v46  ;;  %6875 = vmatmul.f32.gmra.mxu2 %v15261_v54  ;;  %v6599_v34 = vld [vmem:[%s15606_s9 + $0x1b8] sm:$0xff] }
0x142e   : > { %7000 = vmatpush.msra.mxu0 %v6582_v8  ;;  %7046 = vmatpush.msra.mxu2 %v6710_v43  ;;  %v6639_v23 = vld [vmem:[%s15606_s9 + $0x2f8] sm:$0xff] }
0x142f   : > { %7032 = vmatpush.msra.mxu1 %v6610_v25  ;;  %7078 = vmatpush.msra.mxu3 %v6738_v57  ;;  %v6727_v4 = vld [vmem:[%s15606_s9 + $0x5b8] sm:$0xff] }
0x1430   : > { %7001 = vmatpush.msra.mxu0 %v6578_v37  ;;  %7047 = vmatpush.msra.mxu2 %v6706_v2  ;;  %v6767_v35 = vld [vmem:[%s15606_s9 + $0x6f8] sm:$0xff] }
0x1431   : > { %v6595_v9 = vld [vmem:[%s15606_s9 + $0x198] sm:$0xff] }
0x1432   : > { %7002 = vmatpush.msra.mxu0 %v6574_v13  ;;  %7048 = vmatpush.msra.mxu2 %v6702_v22  ;;  %v6635_v62 = vld [vmem:[%s15606_s9 + $0x2d8] sm:$0xff] }
0x1433   : > { %6941 = vmatmul.f32.vlgmr.msrb.gmra.mxu1 %v15104_v63  ;;  %6987 = vmatmul.f32.vlgmr.msrb.gmra.mxu3 %v15107_v45  ;;  %v6723_v17 = vld [vmem:[%s15606_s9 + $0x598] sm:$0xff] }
0x1434   : > { %7003 = vmatpush.msra.mxu0 %v6570_v1  ;;  %7049 = vmatpush.msra.mxu2 %v6698_v59  ;;  %v6763_v60 = vld [vmem:[%s15606_s9 + $0x6d8] sm:$0xff] }
0x1435   : > { %7109 = vmatpush.msrb.mxu1 %v6671_v31  ;;  %7155 = vmatpush.msrb.mxu3 %v6799_v27  ;;  %v6591_v39 = vld [vmem:[%s15606_s9 + $0x178] sm:$0xff] }
0x1436   : > { %6918 = vmatmul.f32.vlgmr.msrb.gmra.mxu0 %v15180_v50  ;;  %6964 = vmatmul.f32.vlgmr.msrb.gmra.mxu2 %v15183_v20  ;;  %v6631_v10 = vld [vmem:[%s15606_s9 + $0x2b8] sm:$0xff] }
0x1437   : > { %7004 = vmatpush.msra.mxu0 %v6566_v3  ;;  %7050 = vmatpush.msra.mxu2 %v6694_v32  ;;  %v6719_v49 = vld [vmem:[%s15606_s9 + $0x578] sm:$0xff] }
0x1438   : > { %7110 = vmatpush.msrb.mxu1 %v6667_v28  ;;  %7156 = vmatpush.msrb.mxu3 %v6795_v16  ;;  %v6759_v12 = vld [vmem:[%s15606_s9 + $0x6b8] sm:$0xff] }
0x1439   : > { %7005 = vmatpush.msra.mxu0 %v6562_v55  ;;  %7051 = vmatpush.msra.mxu2 %v6690_v44  ;;  %v6587_v40 = vld [vmem:[%s15606_s9 + $0x158] sm:$0xff] }
0x143a   : > { %7111 = vmatpush.msrb.mxu1 %v6663_v52  ;;  %7157 = vmatpush.msrb.mxu3 %v6791_v21  ;;  %v6627_v51 = vld [vmem:[%s15606_s9 + $0x298] sm:$0xff] }
0x143b   : > { %7006 = vmatpush.msra.mxu0 %v6558_v42  ;;  %7052 = vmatpush.msra.mxu2 %v6686_v6  ;;  %v6715_v8 = vld [vmem:[%s15606_s9 + $0x558] sm:$0xff] }
0x143c   : > { %7112 = vmatpush.msrb.mxu1 %v6659_v38  ;;  %7158 = vmatpush.msrb.mxu3 %v6787_v61  ;;  %v6755_v43 = vld [vmem:[%s15606_s9 + $0x698] sm:$0xff] }
0x143d   : > { %6944 = vmatmul.f32.gmra.mxu1 %v15243_v26  ;;  %6990 = vmatmul.f32.gmra.mxu3 %v15246_v15  ;;  %v6583_v25 = vld [vmem:[%s15606_s9 + $0x138] sm:$0xff] }
0x143e   : > { %7007 = vmatpush.msra.mxu0 %v6554_v7  ;;  %7053 = vmatpush.msra.mxu2 %v6682_v19  ;;  %v6623_v57 = vld [vmem:[%s15606_s9 + $0x278] sm:$0xff] }
0x143f   : > { %7113 = vmatpush.msrb.mxu1 %v6655_v36  ;;  %7159 = vmatpush.msrb.mxu3 %v6783_v41  ;;  %v6711_v37 = vld [vmem:[%s15606_s9 + $0x538] sm:$0xff] }
0x1440   : > { %6921 = vmatmul.f32.gmra.mxu0 %v15258_v46  ;;  %6967 = vmatmul.f32.gmra.mxu2 %v15261_v54  ;;  %v6751_v2 = vld [vmem:[%s15606_s9 + $0x678] sm:$0xff] }
0x1441   : > { %7008 = vmatpush.msra.mxu0 %v6550_v33  ;;  %7054 = vmatpush.msra.mxu2 %v6678_v24  ;;  %v6579_v13 = vld [vmem:[%s15606_s9 + $0x118] sm:$0xff] }
0x1442   : > { %7114 = vmatpush.msrb.mxu1 %v6651_v11  ;;  %7160 = vmatpush.msrb.mxu3 %v6779_v14  ;;  %v6619_v22 = vld [vmem:[%s15606_s9 + $0x258] sm:$0xff] }
0x1443   : > { %7009 = vmatpush.msra.mxu0 %v6546_v56  ;;  %7055 = vmatpush.msra.mxu2 %v6674_v30  ;;  %v6707_v1 = vld [vmem:[%s15606_s9 + $0x518] sm:$0xff] }
0x1444   : > { %7115 = vmatpush.msrb.mxu1 %v6647_v58  ;;  %7161 = vmatpush.msrb.mxu3 %v6775_v53  ;;  %v6747_v59 = vld [vmem:[%s15606_s9 + $0x658] sm:$0xff] }
0x1445   : > { %7086 = vmatpush.msrb.mxu0 %v6607_v18  ;;  %7132 = vmatpush.msrb.mxu2 %v6735_v29  ;;  %v6575_v31 = vld [vmem:[%s15606_s9 + $0xf8] sm:$0xff] }
0x1446   : > { %7116 = vmatpush.msrb.mxu1 %v6643_v48  ;;  %7162 = vmatpush.msrb.mxu3 %v6771_v47  ;;  %v6615_v27 = vld [vmem:[%s15606_s9 + $0x238] sm:$0xff] }
0x1447   : > { %7087 = vmatpush.msrb.mxu0 %v6603_v0  ;;  %7133 = vmatpush.msrb.mxu2 %v6731_v5  ;;  %v6703_v3 = vld [vmem:[%s15606_s9 + $0x4f8] sm:$0xff] }
0x1448   : > { %7033 = vmatmul.f32.vlgmr.msra.gmra.mxu1 %v15104_v63  ;;  %7079 = vmatmul.f32.vlgmr.msra.gmra.mxu3 %v15107_v45  ;;  %v6743_v32 = vld [vmem:[%s15606_s9 + $0x638] sm:$0xff] }
0x1449   : > { %7088 = vmatpush.msrb.mxu0 %v6599_v34  ;;  %7117 = vmatpush.msrb.mxu1 %v6639_v23  ;;  %v6571_v28 = vld [vmem:[%s15606_s9 + $0xd8] sm:$0xff] }
0x144a   : > { %7134 = vmatpush.msrb.mxu2 %v6727_v4  ;;  %7163 = vmatpush.msrb.mxu3 %v6767_v35  ;;  %v6611_v16 = vld [vmem:[%s15606_s9 + $0x218] sm:$0xff] }
0x144b   : > { %7010 = vmatmul.f32.vlgmr.msra.gmra.mxu0 %v15180_v50  ;;  %7056 = vmatmul.f32.vlgmr.msra.gmra.mxu2 %v15183_v20  ;;  %v6699_v55 = vld [vmem:[%s15606_s9 + $0x4d8] sm:$0xff] }
0x144c   : > { %7089 = vmatpush.msrb.mxu0 %v6595_v9  ;;  %7118 = vmatpush.msrb.mxu1 %v6635_v62  ;;  %v6739_v44 = vld [vmem:[%s15606_s9 + $0x618] sm:$0xff] }
0x144d   : > { %7135 = vmatpush.msrb.mxu2 %v6723_v17  ;;  %7164 = vmatpush.msrb.mxu3 %v6763_v60  ;;  %v6567_v52 = vld [vmem:[%s15606_s9 + $0xb8] sm:$0xff] }
0x144e   : > { %7090 = vmatpush.msrb.mxu0 %v6591_v39  ;;  %7119 = vmatpush.msrb.mxu1 %v6631_v10  ;;  %v6695_v21 = vld [vmem:[%s15606_s9 + $0x4b8] sm:$0xff] }
0x144f   : > { %7136 = vmatpush.msrb.mxu2 %v6719_v49  ;;  %7165 = vmatpush.msrb.mxu3 %v6759_v12  ;;  %v6563_v42 = vld [vmem:[%s15606_s9 + $0x98] sm:$0xff] }
0x1450   : > { %7091 = vmatpush.msrb.mxu0 %v6587_v40  ;;  %7120 = vmatpush.msrb.mxu1 %v6627_v51  ;;  %v6691_v6 = vld [vmem:[%s15606_s9 + $0x498] sm:$0xff] }
0x1451   : > { %7137 = vmatpush.msrb.mxu2 %v6715_v8  ;;  %7166 = vmatpush.msrb.mxu3 %v6755_v43  ;;  %v6559_v38 = vld [vmem:[%s15606_s9 + $0x78] sm:$0xff] }
0x1452   : > { %7036 = vmatmul.f32.gmra.mxu1 %v15243_v26  ;;  %7082 = vmatmul.f32.gmra.mxu3 %v15246_v15  ;;  %v6683_v61 = vld [vmem:[%s15606_s9 + $0x458] sm:$0xff] }
0x1453   : > { %7092 = vmatpush.msrb.mxu0 %v6583_v25  ;;  %7121 = vmatpush.msrb.mxu1 %v6623_v57  ;;  %v6551_v7 = vld [vmem:[%s15606_s9 + $0x38] sm:$0xff] }
0x1454   : > { %7138 = vmatpush.msrb.mxu2 %v6711_v37  ;;  %7167 = vmatpush.msrb.mxu3 %v6751_v2  ;;  %v6679_v19 = vld [vmem:[%s15606_s9 + $0x438] sm:$0xff] }
0x1455   : > { %7013 = vmatmul.f32.gmra.mxu0 %v15258_v46  ;;  %7059 = vmatmul.f32.gmra.mxu2 %v15261_v54  ;;  %v6547_v36 = vld [vmem:[%s15606_s9 + $0x18] sm:$0xff] }
0x1456   : > { %7093 = vmatpush.msrb.mxu0 %v6579_v13  ;;  %7122 = vmatpush.msrb.mxu1 %v6619_v22  ;;  %v6675_v41 = vld [vmem:[%s15606_s9 + $0x418] sm:$0xff] }
0x1457   : > { %7139 = vmatpush.msrb.mxu2 %v6707_v1  ;;  %7168 = vmatpush.msrb.mxu3 %v6747_v59 }
0x1458   : > { %7094 = vmatpush.msrb.mxu0 %v6575_v31  ;;  %7123 = vmatpush.msrb.mxu1 %v6615_v27 }
0x1459   : > { %7140 = vmatpush.msrb.mxu2 %v6703_v3  ;;  %7169 = vmatpush.msrb.mxu3 %v6743_v32 }
0x145a   : > { %7095 = vmatpush.msrb.mxu0 %v6571_v28  ;;  %7124 = vmatpush.msrb.mxu1 %v6611_v16 }
0x145b   : > { %7141 = vmatpush.msrb.mxu2 %v6699_v55  ;;  %7170 = vmatpush.msrb.mxu3 %v6739_v44 }
0x145c   : > { %7125 = vmatmul.f32.vlgmr.msrb.gmra.mxu1 %v15104_v63  ;;  %7171 = vmatmul.f32.vlgmr.msrb.gmra.mxu3 %v15107_v45  ;;  %v6687_v63 = vld [vmem:[%s15606_s9 + $0x478] sm:$0xff] }
0x145d   : > { %7096 = vmatpush.msrb.mxu0 %v6567_v52  ;;  %7142 = vmatpush.msrb.mxu2 %v6695_v21  ;;  %v6555_v45 = vld [vmem:[%s15606_s9 + $0x58] sm:$0xff] }
0x145f   : > { %7097 = vmatpush.msrb.mxu0 %v6563_v42  ;;  %7143 = vmatpush.msrb.mxu2 %v6691_v6 }
0x1461   : > { %7098 = vmatpush.msrb.mxu0 %v6559_v38  ;;  %7144 = vmatpush.msrb.mxu2 %v6687_v63 }
0x1463   : > { %7099 = vmatpush.msrb.mxu0 %v6555_v45  ;;  %7145 = vmatpush.msrb.mxu2 %v6683_v61 }
0x1464   : > { %7128 = vmatmul.f32.gmra.mxu1 %v15243_v26  ;;  %7174 = vmatmul.f32.gmra.mxu3 %v15246_v15  ;;  %v15544_v26 = vld [vmem:[%s15607_s10] sm:$0xf] }
0x1465   : > { %7100 = vmatpush.msrb.mxu0 %v6551_v7  ;;  %7146 = vmatpush.msrb.mxu2 %v6679_v19  ;;  %v6802_v15 = vperm.slane %v15544_v26, 0  ;;  %v6803_v53 = vperm.slane %v15544_v26, 1  ;;  %v6804_v8 = vperm.slane %v15544_v26, 2  ;;  %v6805_v52 = vperm.slane %v15544_v26, 3 }
0x1467   : > { %7101 = vmatpush.msrb.mxu0 %v6547_v36  ;;  %7147 = vmatpush.msrb.mxu2 %v6675_v41 }
0x1468   : > { %7102 = vmatmul.f32.vlgmr.msrb.gmra.mxu0 %v15180_v50  ;;  %7148 = vmatmul.f32.vlgmr.msrb.gmra.mxu2 %v15183_v20 }
0x1470   : > { %7105 = vmatmul.f32.gmra.mxu0 %v15258_v46  ;;  %7151 = vmatmul.f32.gmra.mxu2 %v15261_v54 }
0x1487   : > { %v6850_v11 = vpop.f32.mrf.mxu1 }
0x148d   : > { %v6896_v56 = vpop.f32.mrf.mxu3 }
0x149e   : > { %v6827_v33 = vpop.f32.mrf.mxu0 }
0x149f   : > { %v6828_v24 = vadd.f32 %v6827_v33, %v6802_v15 }
0x14a1   : > { %v6851_v50 = vadd.f32 %v6850_v11, %v6828_v24 }
0x14a4   : > { %v6873_v14 = vpop.f32.mrf.mxu2 }
0x14a5   : > { %v6874_v20 = vadd.f32 %v6873_v14, %v6851_v50 }
0x14a7   : > { %v6897_v46 = vadd.f32 %v6896_v56, %v6874_v20 }
0x14a8   : > { %v6853_v18 = vpop.f32.mrf.mxu1 }
0x14a9   : > { %7178 = vst [vmem:[%s15550_s19] sm:$0xff] %v6897_v46 }
0x14aa   : > { %v6830_v54 = vpop.f32.mrf.mxu0 }
0x14ab   : > { %v6831_v30 = vadd.f32 %v6830_v54, %v6802_v15 }
0x14ad   : > { %v6854_v58 = vadd.f32 %v6853_v18, %v6831_v30 }
0x14ae   : > { %v6899_v0 = vpop.f32.mrf.mxu3 }
0x14b0   : > { %v6876_v29 = vpop.f32.mrf.mxu2  ;;  %v6942_v23 = vpop.f32.mrf.mxu1 }
0x14b1   : > { %v6877_v48 = vadd.f32 %v6876_v29, %v6854_v58 }
0x14b3   : > { %v6900_v5 = vadd.f32 %v6899_v0, %v6877_v48  ;;  %v6919_v47 = vpop.f32.mrf.mxu0 }
0x14b4   : > { %v6920_v34 = vadd.f32 %v6919_v47, %v6803_v53 }
0x14b5   : > { %7182 = vst [vmem:[%s15550_s19 + $0x20] sm:$0xff] %v6900_v5 }
0x14b6   : > { %v6943_v4 = vadd.f32 %v6942_v23, %v6920_v34  ;;  %v6988_v62 = vpop.f32.mrf.mxu3 }
0x14b9   : > { %v6965_v35 = vpop.f32.mrf.mxu2 }
0x14ba   : > { %v6966_v9 = vadd.f32 %v6965_v35, %v6943_v4  ;;  %v6945_v10 = vpop.f32.mrf.mxu1 }
0x14bc   : > { %v6989_v17 = vadd.f32 %v6988_v62, %v6966_v9 }
0x14bd   : > { %v6922_v60 = vpop.f32.mrf.mxu0 }
0x14be   : > { %7179 = vst [vmem:[%s15550_s19 + $0x8] sm:$0xff] %v6989_v17  ;;  %v6923_v39 = vadd.f32 %v6922_v60, %v6803_v53 }
0x14c0   : > { %v6946_v49 = vadd.f32 %v6945_v10, %v6923_v39  ;;  %v6991_v51 = vpop.f32.mrf.mxu3 }
0x14c3   : > { %v6968_v12 = vpop.f32.mrf.mxu2 }
0x14c4   : > { %v6969_v40 = vadd.f32 %v6968_v12, %v6946_v49 }
0x14c5   : > { %v7034_v37 = vpop.f32.mrf.mxu1 }
0x14c6   : > { %v6992_v43 = vadd.f32 %v6991_v51, %v6969_v40 }
0x14c8   : > { %7183 = vst [vmem:[%s15550_s19 + $0x28] sm:$0xff] %v6992_v43  ;;  %v7011_v25 = vpop.f32.mrf.mxu0 }
0x14c9   : > { %v7012_v57 = vadd.f32 %v7011_v25, %v6804_v8 }
0x14cb   : > { %v7035_v2 = vadd.f32 %v7034_v37, %v7012_v57  ;;  %v7080_v1 = vpop.f32.mrf.mxu3 }
0x14ce   : > { %v7057_v13 = vpop.f32.mrf.mxu2 }
0x14cf   : > { %v7058_v22 = vadd.f32 %v7057_v13, %v7035_v2  ;;  %v7037_v3 = vpop.f32.mrf.mxu1 }
0x14d1   : > { %v7081_v59 = vadd.f32 %v7080_v1, %v7058_v22 }
0x14d2   : > { %v7014_v31 = vpop.f32.mrf.mxu0 }
0x14d3   : > { %7180 = vst [vmem:[%s15550_s19 + $0x10] sm:$0xff] %v7081_v59  ;;  %v7015_v27 = vadd.f32 %v7014_v31, %v6804_v8 }
0x14d5   : > { %v7038_v32 = vadd.f32 %v7037_v3, %v7015_v27  ;;  %v7083_v55 = vpop.f32.mrf.mxu3 }
0x14d8   : > { %v7060_v28 = vpop.f32.mrf.mxu2 }
0x14d9   : > { %v7061_v16 = vadd.f32 %v7060_v28, %v7038_v32  ;;  %v7126_v6 = vpop.f32.mrf.mxu1 }
0x14db   : > { %v7084_v44 = vadd.f32 %v7083_v55, %v7061_v16 }
0x14dd   : > { %7184 = vst [vmem:[%s15550_s19 + $0x30] sm:$0xff] %v7084_v44 }
0x14df   : > { %v7172_v63 = vpop.f32.mrf.mxu3 }
0x14e1   : > { %v7129_v41 = vpop.f32.mrf.mxu1 }
0x14e5   : > { %v7103_v21 = vpop.f32.mrf.mxu0 }
0x14e6   : > { %v7104_v42 = vadd.f32 %v7103_v21, %v6805_v52 }
0x14e7   : > { %v7175_v24 = vpop.f32.mrf.mxu3 }
0x14e8   : > { %v7127_v38 = vadd.f32 %v7126_v6, %v7104_v42 }
0x14eb   : > { %v7149_v45 = vpop.f32.mrf.mxu2 }
0x14ec   : > { %v7150_v61 = vadd.f32 %v7149_v45, %v7127_v38 }
0x14ed   : > { %v7106_v7 = vpop.f32.mrf.mxu0 }
0x14ee   : > { %v7173_v19 = vadd.f32 %v7172_v63, %v7150_v61  ;;  %v7107_v36 = vadd.f32 %v7106_v7, %v6805_v52 }
0x14f0   : > { %7181 = vst [vmem:[%s15550_s19 + $0x18] sm:$0xff] %v7173_v19  ;;  %v7130_v26 = vadd.f32 %v7129_v41, %v7107_v36 }
0x14f3   : > { %v7152_v15 = vpop.f32.mrf.mxu2 }
0x14f4   : > { %v7153_v33 = vadd.f32 %v7152_v15, %v7130_v26 }
0x14f6   : > { %v7176_v11 = vadd.f32 %v7175_v24, %v7153_v33 }
0x14f8   : > { %7185 = vst [vmem:[%s15550_s19 + $0x38] sm:$0xff] %v7176_v11 }
0x14f9   : > { %7703 = shalt.err (!%p7700_p3)
}
0x14fa   : > { %s7741_s13 = smov 512   ;;  %s7742_s19 = smov 32  }
0x14fb   : > { %7404 = dma.vmem_to_hbm [thread:$0]  (%p7841_p5), %s7200_s26, 1024, %s7202_s29, %s7187_s21, %s7741_s13, %s7741_s13, %s7742_s19  }
0x14fc PF: > { %p7410_p4 = scmp.ge.s32.totalorder %s7738_s20, 2  ;;  %s7216_s25 = sand.u32 1, %s7726_s17  }
0x14fd   : > { %s7217_s24 = scalar_lea.sflag [#allocation3], %s7216_s25 }
0x14fe   : > { %p7407_p7 = pnand %p7410_p4, %p7845_p6 }
0x1500   : > { %p7408_p8 = pneg %p7407_p7 }
0x1502   : > { %7721 = dma.done.wait (%p7408_p8), %s7217_s24, 1024  }
0x1503   : > { %7723 = vsyncadd (%p7408_p8), %s7217_s24, 4294966272  ;;  %s15779_s20 = sld [smem:[#allocation6_spill]]  ;;  %s15782_s17 = smov %s7730_s18 }
0x1504   : > { %s15780_s30 = sld [smem:[#allocation5_spill]] }
0x1505   : > { %s15781_s19 = sld [smem:[#allocation7_spill]] }
0x1509   : > { %p21_p9 = scmp.ge.s32.totalorder %s15779_s20, 4  }
0x150a   : > { %s15783_s18 = smov %s15780_s30 }
0x150b   :  { %23 = sbr.rel (!%p21_p9) target bundleno = 3 (0x3), region = 105 }
0x1510   :  { %7223 = vsyncpa [#allocation3], 1 }
0x1511   :  { %7225 = vsyncpa [#allocation3 + $0x1], 1 }

</bundles_post_ra>
